<compile_context>
chip_gen: v7x
topology: tpu7x:2x2x1
jax: 0.10.0
libtpu: 0.0.40
codegen_flags: <defaults>
</compile_context>

<pallas_src>
import jax
import jax.numpy as jnp
from jax.experimental import pallas as pl
from jax.experimental.pallas import tpu as pltpu


# -----------------------------------------------------------------------------
# Kernel 1: embedding gather + single-layer LSTM recurrence (one shot).
# -----------------------------------------------------------------------------
def _recurrence_kernel(tok_ref,      # SMEM (B, T) int32   [scalar prefetch]
                       emb_hbm,      # HBM  (V, E) f32     [pl.ANY]
                       wih_ref,      # VMEM (E, 4H) bf16
                       whh_ref,      # VMEM (H, 4H) bf16
                       b_ref,        # VMEM (1, 4H) f32    (b_ih + b_hh)
                       h0_ref,       # VMEM (B, H) f32
                       c0_ref,       # VMEM (B, H) f32
                       hid_ref,      # VMEM (B*T, H) bf16  out  (row = b*T + t)
                       h_out_ref,    # VMEM (B, H) f32     out
                       c_out_ref,    # VMEM (B, H) f32     out
                       x_emb_ref,    # VMEM (B*T, E) f32   scratch (t-major rows)
                       xg_ref,       # VMEM (B*T, 4H) f32  scratch (t-major rows)
                       gsem):        # DMA sems (B*T,)
    B, T = tok_ref.shape
    H = h0_ref.shape[1]
    V = emb_hbm.shape[0]

    # --- Embedding lookup: one small (1, E) row-DMA per token from HBM.       ---
    # Destination rows are t-major (row = t*B + b) so the precomputed input gates
    # can be read per timestep as one contiguous (B, 4H) slice.
    copies = []
    for r in range(B * T):
        t, b = r // B, r % B
        idx = jnp.clip(tok_ref[b, t], 0, V - 1)      # guard: OOB token -> OOB DMA
        copies.append(pltpu.make_async_copy(
            emb_hbm.at[pl.ds(idx, 1)], x_emb_ref.at[pl.ds(r, 1)], gsem.at[r]))
    for cp in copies:
        cp.start()
    for cp in copies:
        cp.wait()

    # --- Input projection for all timesteps at once (bf16 MXU, f32 acc). ---
    xg_ref[...] = (jnp.dot(x_emb_ref[...].astype(jnp.bfloat16), wih_ref[...],
                           preferred_element_type=jnp.float32)
                   + b_ref[...])

    # --- LSTM recurrence (PyTorch gate order i, f, g, o), fully unrolled. ---
    whh = whh_ref[...]                                   # (H, 4H) bf16
    h = h0_ref[...]                                      # (B, H) f32
    c = c0_ref[...]
    hs = []
    for t in range(T):
        xg_t = xg_ref[pl.ds(t * B, B), :]                # (B, 4H) f32, static slice
        g = xg_t + jnp.dot(h.astype(jnp.bfloat16), whh,
                           preferred_element_type=jnp.float32)
        # Transcendentals only where needed (i/f/o sigmoid, g tanh); every slice
        # is lane-tile aligned because H is a multiple of 128.
        i_g = jax.nn.sigmoid(g[:, 0 * H:1 * H])
        f_g = jax.nn.sigmoid(g[:, 1 * H:2 * H])
        g_g = jnp.tanh(g[:, 2 * H:3 * H])
        o_g = jax.nn.sigmoid(g[:, 3 * H:4 * H])
        c = f_g * c + i_g * g_g
        h = o_g * jnp.tanh(c)
        hs.append(h)                                     # keep as values; reorder once

    # One-time reorder into PyTorch's b*T + t row order + single bf16 cast/store
    # (off the serial per-timestep critical path).
    rows = jnp.concatenate(
        [hs[t][b:b + 1, :] for b in range(B) for t in range(T)], axis=0)
    hid_ref[...] = rows.astype(jnp.bfloat16)
    h_out_ref[...] = h
    c_out_ref[...] = c


# -----------------------------------------------------------------------------
# Kernel 2: vocab-tiled output projection (bandwidth-bound w_out stream).
# -----------------------------------------------------------------------------
def _projection_kernel(hid_ref,      # VMEM (B*T, H) bf16      (resident)
                       wout_ref,     # VMEM (H, TILE_V) bf16   (pipelined)
                       bout_ref,     # VMEM (1, TILE_V) f32    (pipelined)
                       logits_ref):  # VMEM (B*T, TILE_V) f32  out (lane-dense)
    logits_ref[...] = (jnp.dot(hid_ref[...], wout_ref[...],
                               preferred_element_type=jnp.float32)
                       + bout_ref[...])


def rnnlm_forward(x, h, params, *, tile_v=1024):
    """Pallas forward. x: (B, T) int32 tokens, h = (h0, c0) each (1, B, H)."""
    h0, c0 = h
    B, T = x.shape
    V, E = params["embed"].shape
    H = h0.shape[-1]
    tile_v = min(tile_v, V)
    assert V % tile_v == 0, "tile_v must divide the vocab size"
    assert tile_v % 128 == 0 and H % 128 == 0
    n_v = V // tile_v

    # ---------------------------- call 1: recurrence ----------------------------
    rec_grid = pltpu.PrefetchScalarGridSpec(
        num_scalar_prefetch=1,                 # tokens -> SMEM
        grid=(1,),
        in_specs=[
            pl.BlockSpec(memory_space=pl.ANY),                    # embed table (HBM)
            pl.BlockSpec((E, 4 * H), lambda i, tok: (0, 0)),      # w_ih
            pl.BlockSpec((H, 4 * H), lambda i, tok: (0, 0)),      # w_hh
            pl.BlockSpec((1, 4 * H), lambda i, tok: (0, 0)),      # b
            pl.BlockSpec((B, H), lambda i, tok: (0, 0)),          # h0
            pl.BlockSpec((B, H), lambda i, tok: (0, 0)),          # c0
        ],
        out_specs=(
            pl.BlockSpec((B * T, H), lambda i, tok: (0, 0)),      # hidden slab (bf16)
            pl.BlockSpec((B, H), lambda i, tok: (0, 0)),          # h_out
            pl.BlockSpec((B, H), lambda i, tok: (0, 0)),          # c_out
        ),
        scratch_shapes=[
            pltpu.VMEM((B * T, E), jnp.float32),      # gathered embedding rows (t-major)
            pltpu.VMEM((B * T, 4 * H), jnp.float32),  # precomputed input gates (t-major)
            pltpu.SemaphoreType.DMA((B * T,)),        # gather DMA semaphores
        ],
    )
    hid, h_out, c_out = pl.pallas_call(
        _recurrence_kernel,
        out_shape=(jax.ShapeDtypeStruct((B * T, H), jnp.bfloat16),
                   jax.ShapeDtypeStruct((B, H), jnp.float32),
                   jax.ShapeDtypeStruct((B, H), jnp.float32)),
        grid_spec=rec_grid,
        compiler_params=pltpu.CompilerParams(
            dimension_semantics=("arbitrary",),
            vmem_limit_bytes=32 * 1024 * 1024),
    )(x, params["embed"], params["w_ih"], params["w_hh"], params["b"],
      h0[0], c0[0])

    # --------------------- call 2: vocab-tiled projection -----------------------
    # Independent vocab tiles -> "parallel" grid (v7x megacore shards it); w_out /
    # b_out / logits tiles are double-buffered from/to HBM by BlockSpec pipelining.
    proj_grid = pltpu.PrefetchScalarGridSpec(
        num_scalar_prefetch=0,
        grid=(n_v,),
        in_specs=[
            pl.BlockSpec((B * T, H), lambda v: (0, 0)),           # resident hidden slab
            pl.BlockSpec((H, tile_v), lambda v: (0, v)),          # w_out tile (streamed)
            pl.BlockSpec((1, tile_v), lambda v: (0, v)),          # b_out tile
        ],
        out_specs=pl.BlockSpec((B * T, tile_v), lambda v: (0, v)),  # lane-dense logits
    )
    logits = pl.pallas_call(
        _projection_kernel,
        out_shape=jax.ShapeDtypeStruct((B * T, V), jnp.float32),
        grid_spec=proj_grid,
        compiler_params=pltpu.CompilerParams(
            dimension_semantics=("parallel",),
            vmem_limit_bytes=32 * 1024 * 1024),
    )(hid, params["w_out"], params["b_out"])

    return logits, (h_out[None], c_out[None])


def rnnlm_ref(x, h, params):
    """Pure-JAX reference mirroring the kernel's dtype casts."""
    h0, c0 = h
    f32, bf16 = jnp.float32, jnp.bfloat16
    emb = params["embed"][x].astype(bf16).astype(f32)            # (B, T, E)
    w_ih = params["w_ih"].astype(f32)
    w_hh = params["w_hh"].astype(f32)
    w_out = params["w_out"].astype(f32)
    B, T, _ = emb.shape
    H = h0.shape[-1]

    xg = jnp.einsum("bte,eg->btg", emb, w_ih) + params["b"][0]   # (B, T, 4H)
    hcur, ccur = h0[0], c0[0]
    outs = []
    for t in range(T):
        g = xg[:, t] + hcur.astype(bf16).astype(f32) @ w_hh
        i_g = jax.nn.sigmoid(g[:, 0 * H:1 * H])
        f_g = jax.nn.sigmoid(g[:, 1 * H:2 * H])
        g_g = jnp.tanh(g[:, 2 * H:3 * H])
        o_g = jax.nn.sigmoid(g[:, 3 * H:4 * H])
        ccur = f_g * ccur + i_g * g_g
        hcur = o_g * jnp.tanh(ccur)
        outs.append(hcur)
    out = jnp.stack(outs, axis=1).reshape(B * T, H)              # row = b*T + t
    logits = out.astype(bf16).astype(f32) @ w_out + params["b_out"][0]
    return logits, (hcur[None], ccur[None])


def init_params(key, vocab_size, embed_size, hidden_size):
    """Deterministic parameter init (PyTorch-like scales), num_layers = 1.

    Weights are stored pre-transposed so kernels do (rows, in) @ (in, out).
    MXU operands (w_ih, w_hh, w_out) are bf16; biases, the embedding table
    (gathered via DMA) and all elementwise state stay f32.
    """
    ks = jax.random.split(key, 6)
    bound = 1.0 / (hidden_size ** 0.5)
    return {
        "embed": jax.random.normal(ks[0], (vocab_size, embed_size), jnp.float32),
        "w_ih": jax.random.uniform(ks[1], (embed_size, 4 * hidden_size),
                                   jnp.float32, -bound, bound).astype(jnp.bfloat16),
        "w_hh": jax.random.uniform(ks[2], (hidden_size, 4 * hidden_size),
                                   jnp.float32, -bound, bound).astype(jnp.bfloat16),
        "b": jax.random.uniform(ks[3], (1, 4 * hidden_size),
                                jnp.float32, -bound, bound),      # b_ih + b_hh combined
        "w_out": jax.random.uniform(ks[4], (hidden_size, vocab_size),
                                    jnp.float32, -bound, bound).astype(jnp.bfloat16),
        "b_out": jax.random.uniform(ks[5], (1, vocab_size),
                                    jnp.float32, -bound, bound),
    }


if __name__ == "__main__":
    # Small but tile-aligned shapes consistent with the module (num_layers = 1,
    # embed_size = 128; hidden/vocab kept small for the demo, lane-aligned so gate
    # slices and vocab tiles are unmasked).
    VOCAB, EMBED, HIDDEN = 2048, 128, 256
    TILE_V = 1024
    B, T = 2, 8

    key = jax.random.PRNGKey(0)
    k_par, k_tok = jax.random.split(key)
    params = init_params(k_par, VOCAB, EMBED, HIDDEN)

    x = jax.random.randint(k_tok, (B, T), 0, VOCAB, dtype=jnp.int32)
    h0 = jnp.zeros((1, B, HIDDEN), jnp.float32)
    c0 = jnp.zeros((1, B, HIDDEN), jnp.float32)

    logits, (h_out, c_out) = rnnlm_forward(x, (h0, c0), params, tile_v=TILE_V)
    jax.block_until_ready((logits, h_out, c_out))

    ref_logits, (ref_h, ref_c) = rnnlm_ref(x, (h0, c0), params)
    assert logits.shape == (B * T, VOCAB)
    assert h_out.shape == (1, B, HIDDEN) and c_out.shape == (1, B, HIDDEN)
    assert jnp.allclose(logits, ref_logits, rtol=1e-2, atol=1e-2)
    assert jnp.allclose(h_out, ref_h, rtol=1e-2, atol=1e-2)
    assert jnp.allclose(c_out, ref_c, rtol=1e-2, atol=1e-2)

    print("KERNEL_OK")
</pallas_src>

<mosaic_0001>
module attributes {stable_mosaic.version = 11 : i64} {
  func.func @_recurrence_kernel(%arg0: i32, %arg1: memref<2x8xi32, #tpu.memory_space<smem>>, %arg2: memref<2048x128xf32, #tpu.memory_space<any>>, %arg3: memref<128x1024xbf16, #tpu.memory_space<vmem>>, %arg4: memref<256x1024xbf16, #tpu.memory_space<vmem>>, %arg5: memref<1x1024xf32, #tpu.memory_space<vmem>>, %arg6: memref<2x256xf32, #tpu.memory_space<vmem>>, %arg7: memref<2x256xf32, #tpu.memory_space<vmem>>, %arg8: memref<16x256xbf16, #tpu.memory_space<vmem>>, %arg9: memref<2x256xf32, #tpu.memory_space<vmem>>, %arg10: memref<2x256xf32, #tpu.memory_space<vmem>>, %arg11: memref<16x128xf32, #tpu.memory_space<vmem>>, %arg12: memref<16x1024xf32, #tpu.memory_space<vmem>>, %arg13: memref<16x!tpu.dma_semaphore, #tpu.memory_space<semaphore_mem>>) attributes {dimension_semantics = [#tpu.dimension_semantics<arbitrary>], iteration_bounds = array<i64: 1>, scalar_prefetch = 1 : i64, scratch_operands = 3 : i64, tpu.core_type = #tpu.core_type<tc>, window_params = [{}, {pipeline_mode = #tpu.pipeline_mode<synchronous>, transform_indices = @transform_1, window_bounds = array<i64: 128, 1024>}, {pipeline_mode = #tpu.pipeline_mode<synchronous>, transform_indices = @transform_2, window_bounds = array<i64: 256, 1024>}, {pipeline_mode = #tpu.pipeline_mode<synchronous>, transform_indices = @transform_3, window_bounds = array<i64: 1, 1024>}, {pipeline_mode = #tpu.pipeline_mode<synchronous>, transform_indices = @transform_4, window_bounds = array<i64: 2, 256>}, {pipeline_mode = #tpu.pipeline_mode<synchronous>, transform_indices = @transform_5, window_bounds = array<i64: 2, 256>}, {pipeline_mode = #tpu.pipeline_mode<synchronous>, transform_indices = @transform_6, window_bounds = array<i64: 16, 256>}, {pipeline_mode = #tpu.pipeline_mode<synchronous>, transform_indices = @transform_7, window_bounds = array<i64: 2, 256>}, {pipeline_mode = #tpu.pipeline_mode<synchronous>, transform_indices = @transform_8, window_bounds = array<i64: 2, 256>}]} {
    %c0 = arith.constant 0 : index
    %c0_0 = arith.constant 0 : index
    %0 = memref.load %arg1[%c0, %c0_0] : memref<2x8xi32, #tpu.memory_space<smem>>
    %c0_i32 = arith.constant 0 : i32
    %c2047_i32 = arith.constant 2047 : i32
    %1 = arith.maxsi %c0_i32, %0 : i32
    %2 = arith.minsi %c2047_i32, %1 : i32
    %c1 = arith.constant 1 : index
    %c0_1 = arith.constant 0 : index
    %3 = memref.load %arg1[%c1, %c0_1] : memref<2x8xi32, #tpu.memory_space<smem>>
    %c0_i32_2 = arith.constant 0 : i32
    %c2047_i32_3 = arith.constant 2047 : i32
    %4 = arith.maxsi %c0_i32_2, %3 : i32
    %5 = arith.minsi %c2047_i32_3, %4 : i32
    %c0_4 = arith.constant 0 : index
    %c1_5 = arith.constant 1 : index
    %6 = memref.load %arg1[%c0_4, %c1_5] : memref<2x8xi32, #tpu.memory_space<smem>>
    %c0_i32_6 = arith.constant 0 : i32
    %c2047_i32_7 = arith.constant 2047 : i32
    %7 = arith.maxsi %c0_i32_6, %6 : i32
    %8 = arith.minsi %c2047_i32_7, %7 : i32
    %c1_8 = arith.constant 1 : index
    %c1_9 = arith.constant 1 : index
    %9 = memref.load %arg1[%c1_8, %c1_9] : memref<2x8xi32, #tpu.memory_space<smem>>
    %c0_i32_10 = arith.constant 0 : i32
    %c2047_i32_11 = arith.constant 2047 : i32
    %10 = arith.maxsi %c0_i32_10, %9 : i32
    %11 = arith.minsi %c2047_i32_11, %10 : i32
    %c0_12 = arith.constant 0 : index
    %c2 = arith.constant 2 : index
    %12 = memref.load %arg1[%c0_12, %c2] : memref<2x8xi32, #tpu.memory_space<smem>>
    %c0_i32_13 = arith.constant 0 : i32
    %c2047_i32_14 = arith.constant 2047 : i32
    %13 = arith.maxsi %c0_i32_13, %12 : i32
    %14 = arith.minsi %c2047_i32_14, %13 : i32
    %c1_15 = arith.constant 1 : index
    %c2_16 = arith.constant 2 : index
    %15 = memref.load %arg1[%c1_15, %c2_16] : memref<2x8xi32, #tpu.memory_space<smem>>
    %c0_i32_17 = arith.constant 0 : i32
    %c2047_i32_18 = arith.constant 2047 : i32
    %16 = arith.maxsi %c0_i32_17, %15 : i32
    %17 = arith.minsi %c2047_i32_18, %16 : i32
    %c0_19 = arith.constant 0 : index
    %c3 = arith.constant 3 : index
    %18 = memref.load %arg1[%c0_19, %c3] : memref<2x8xi32, #tpu.memory_space<smem>>
    %c0_i32_20 = arith.constant 0 : i32
    %c2047_i32_21 = arith.constant 2047 : i32
    %19 = arith.maxsi %c0_i32_20, %18 : i32
    %20 = arith.minsi %c2047_i32_21, %19 : i32
    %c1_22 = arith.constant 1 : index
    %c3_23 = arith.constant 3 : index
    %21 = memref.load %arg1[%c1_22, %c3_23] : memref<2x8xi32, #tpu.memory_space<smem>>
    %c0_i32_24 = arith.constant 0 : i32
    %c2047_i32_25 = arith.constant 2047 : i32
    %22 = arith.maxsi %c0_i32_24, %21 : i32
    %23 = arith.minsi %c2047_i32_25, %22 : i32
    %c0_26 = arith.constant 0 : index
    %c4 = arith.constant 4 : index
    %24 = memref.load %arg1[%c0_26, %c4] : memref<2x8xi32, #tpu.memory_space<smem>>
    %c0_i32_27 = arith.constant 0 : i32
    %c2047_i32_28 = arith.constant 2047 : i32
    %25 = arith.maxsi %c0_i32_27, %24 : i32
    %26 = arith.minsi %c2047_i32_28, %25 : i32
    %c1_29 = arith.constant 1 : index
    %c4_30 = arith.constant 4 : index
    %27 = memref.load %arg1[%c1_29, %c4_30] : memref<2x8xi32, #tpu.memory_space<smem>>
    %c0_i32_31 = arith.constant 0 : i32
    %c2047_i32_32 = arith.constant 2047 : i32
    %28 = arith.maxsi %c0_i32_31, %27 : i32
    %29 = arith.minsi %c2047_i32_32, %28 : i32
    %c0_33 = arith.constant 0 : index
    %c5 = arith.constant 5 : index
    %30 = memref.load %arg1[%c0_33, %c5] : memref<2x8xi32, #tpu.memory_space<smem>>
    %c0_i32_34 = arith.constant 0 : i32
    %c2047_i32_35 = arith.constant 2047 : i32
    %31 = arith.maxsi %c0_i32_34, %30 : i32
    %32 = arith.minsi %c2047_i32_35, %31 : i32
    %c1_36 = arith.constant 1 : index
    %c5_37 = arith.constant 5 : index
    %33 = memref.load %arg1[%c1_36, %c5_37] : memref<2x8xi32, #tpu.memory_space<smem>>
    %c0_i32_38 = arith.constant 0 : i32
    %c2047_i32_39 = arith.constant 2047 : i32
    %34 = arith.maxsi %c0_i32_38, %33 : i32
    %35 = arith.minsi %c2047_i32_39, %34 : i32
    %c0_40 = arith.constant 0 : index
    %c6 = arith.constant 6 : index
    %36 = memref.load %arg1[%c0_40, %c6] : memref<2x8xi32, #tpu.memory_space<smem>>
    %c0_i32_41 = arith.constant 0 : i32
    %c2047_i32_42 = arith.constant 2047 : i32
    %37 = arith.maxsi %c0_i32_41, %36 : i32
    %38 = arith.minsi %c2047_i32_42, %37 : i32
    %c1_43 = arith.constant 1 : index
    %c6_44 = arith.constant 6 : index
    %39 = memref.load %arg1[%c1_43, %c6_44] : memref<2x8xi32, #tpu.memory_space<smem>>
    %c0_i32_45 = arith.constant 0 : i32
    %c2047_i32_46 = arith.constant 2047 : i32
    %40 = arith.maxsi %c0_i32_45, %39 : i32
    %41 = arith.minsi %c2047_i32_46, %40 : i32
    %c0_47 = arith.constant 0 : index
    %c7 = arith.constant 7 : index
    %42 = memref.load %arg1[%c0_47, %c7] : memref<2x8xi32, #tpu.memory_space<smem>>
    %c0_i32_48 = arith.constant 0 : i32
    %c2047_i32_49 = arith.constant 2047 : i32
    %43 = arith.maxsi %c0_i32_48, %42 : i32
    %44 = arith.minsi %c2047_i32_49, %43 : i32
    %c1_50 = arith.constant 1 : index
    %c7_51 = arith.constant 7 : index
    %45 = memref.load %arg1[%c1_50, %c7_51] : memref<2x8xi32, #tpu.memory_space<smem>>
    %c0_i32_52 = arith.constant 0 : i32
    %c2047_i32_53 = arith.constant 2047 : i32
    %46 = arith.maxsi %c0_i32_52, %45 : i32
    %47 = arith.minsi %c2047_i32_53, %46 : i32
    %c0_i32_54 = arith.constant 0 : i32
    %c0_i32_55 = arith.constant 0 : i32
    %48 = tpu.memref_slice %arg2[%2, %c0_i32_55] : memref<2048x128xf32, #tpu.memory_space<any>> -> memref<1x128xf32, #tpu.memory_space<any>>
    %c0_i32_56 = arith.constant 0 : i32
    %c0_i32_57 = arith.constant 0 : i32
    %49 = tpu.memref_slice %arg11[%c0_i32_56, %c0_i32_57] : memref<16x128xf32, #tpu.memory_space<vmem>> -> memref<1x128xf32, #tpu.memory_space<vmem>>
    %50 = tpu.memref_slice %arg13[%c0_i32_54] : memref<16x!tpu.dma_semaphore, #tpu.memory_space<semaphore_mem>> -> memref<1x!tpu.dma_semaphore, #tpu.memory_space<semaphore_mem>>
    %51 = tpu.memref_squeeze %50 : memref<1x!tpu.dma_semaphore, #tpu.memory_space<semaphore_mem>> -> memref<!tpu.dma_semaphore, #tpu.memory_space<semaphore_mem>>
    tpu.enqueue_dma source(%48 : memref<1x128xf32, #tpu.memory_space<any>>) target(%49 : memref<1x128xf32, #tpu.memory_space<vmem>>) target_semaphore(%51 : memref<!tpu.dma_semaphore, #tpu.memory_space<semaphore_mem>>)
    %c1_i32 = arith.constant 1 : i32
    %c0_i32_58 = arith.constant 0 : i32
    %52 = tpu.memref_slice %arg2[%5, %c0_i32_58] : memref<2048x128xf32, #tpu.memory_space<any>> -> memref<1x128xf32, #tpu.memory_space<any>>
    %c1_i32_59 = arith.constant 1 : i32
    %c0_i32_60 = arith.constant 0 : i32
    %53 = tpu.memref_slice %arg11[%c1_i32_59, %c0_i32_60] : memref<16x128xf32, #tpu.memory_space<vmem>> -> memref<1x128xf32, #tpu.memory_space<vmem>>
    %54 = tpu.memref_slice %arg13[%c1_i32] : memref<16x!tpu.dma_semaphore, #tpu.memory_space<semaphore_mem>> -> memref<1x!tpu.dma_semaphore, #tpu.memory_space<semaphore_mem>>
    %55 = tpu.memref_squeeze %54 : memref<1x!tpu.dma_semaphore, #tpu.memory_space<semaphore_mem>> -> memref<!tpu.dma_semaphore, #tpu.memory_space<semaphore_mem>>
    tpu.enqueue_dma source(%52 : memref<1x128xf32, #tpu.memory_space<any>>) target(%53 : memref<1x128xf32, #tpu.memory_space<vmem>>) target_semaphore(%55 : memref<!tpu.dma_semaphore, #tpu.memory_space<semaphore_mem>>)
    %c2_i32 = arith.constant 2 : i32
    %c0_i32_61 = arith.constant 0 : i32
    %56 = tpu.memref_slice %arg2[%8, %c0_i32_61] : memref<2048x128xf32, #tpu.memory_space<any>> -> memref<1x128xf32, #tpu.memory_space<any>>
    %c2_i32_62 = arith.constant 2 : i32
    %c0_i32_63 = arith.constant 0 : i32
    %57 = tpu.memref_slice %arg11[%c2_i32_62, %c0_i32_63] : memref<16x128xf32, #tpu.memory_space<vmem>> -> memref<1x128xf32, #tpu.memory_space<vmem>>
    %58 = tpu.memref_slice %arg13[%c2_i32] : memref<16x!tpu.dma_semaphore, #tpu.memory_space<semaphore_mem>> -> memref<1x!tpu.dma_semaphore, #tpu.memory_space<semaphore_mem>>
    %59 = tpu.memref_squeeze %58 : memref<1x!tpu.dma_semaphore, #tpu.memory_space<semaphore_mem>> -> memref<!tpu.dma_semaphore, #tpu.memory_space<semaphore_mem>>
    tpu.enqueue_dma source(%56 : memref<1x128xf32, #tpu.memory_space<any>>) target(%57 : memref<1x128xf32, #tpu.memory_space<vmem>>) target_semaphore(%59 : memref<!tpu.dma_semaphore, #tpu.memory_space<semaphore_mem>>)
    %c3_i32 = arith.constant 3 : i32
    %c0_i32_64 = arith.constant 0 : i32
    %60 = tpu.memref_slice %arg2[%11, %c0_i32_64] : memref<2048x128xf32, #tpu.memory_space<any>> -> memref<1x128xf32, #tpu.memory_space<any>>
    %c3_i32_65 = arith.constant 3 : i32
    %c0_i32_66 = arith.constant 0 : i32
    %61 = tpu.memref_slice %arg11[%c3_i32_65, %c0_i32_66] : memref<16x128xf32, #tpu.memory_space<vmem>> -> memref<1x128xf32, #tpu.memory_space<vmem>>
    %62 = tpu.memref_slice %arg13[%c3_i32] : memref<16x!tpu.dma_semaphore, #tpu.memory_space<semaphore_mem>> -> memref<1x!tpu.dma_semaphore, #tpu.memory_space<semaphore_mem>>
    %63 = tpu.memref_squeeze %62 : memref<1x!tpu.dma_semaphore, #tpu.memory_space<semaphore_mem>> -> memref<!tpu.dma_semaphore, #tpu.memory_space<semaphore_mem>>
    tpu.enqueue_dma source(%60 : memref<1x128xf32, #tpu.memory_space<any>>) target(%61 : memref<1x128xf32, #tpu.memory_space<vmem>>) target_semaphore(%63 : memref<!tpu.dma_semaphore, #tpu.memory_space<semaphore_mem>>)
    %c4_i32 = arith.constant 4 : i32
    %c0_i32_67 = arith.constant 0 : i32
    %64 = tpu.memref_slice %arg2[%14, %c0_i32_67] : memref<2048x128xf32, #tpu.memory_space<any>> -> memref<1x128xf32, #tpu.memory_space<any>>
    %c4_i32_68 = arith.constant 4 : i32
    %c0_i32_69 = arith.constant 0 : i32
    %65 = tpu.memref_slice %arg11[%c4_i32_68, %c0_i32_69] : memref<16x128xf32, #tpu.memory_space<vmem>> -> memref<1x128xf32, #tpu.memory_space<vmem>>
    %66 = tpu.memref_slice %arg13[%c4_i32] : memref<16x!tpu.dma_semaphore, #tpu.memory_space<semaphore_mem>> -> memref<1x!tpu.dma_semaphore, #tpu.memory_space<semaphore_mem>>
    %67 = tpu.memref_squeeze %66 : memref<1x!tpu.dma_semaphore, #tpu.memory_space<semaphore_mem>> -> memref<!tpu.dma_semaphore, #tpu.memory_space<semaphore_mem>>
    tpu.enqueue_dma source(%64 : memref<1x128xf32, #tpu.memory_space<any>>) target(%65 : memref<1x128xf32, #tpu.memory_space<vmem>>) target_semaphore(%67 : memref<!tpu.dma_semaphore, #tpu.memory_space<semaphore_mem>>)
    %c5_i32 = arith.constant 5 : i32
    %c0_i32_70 = arith.constant 0 : i32
    %68 = tpu.memref_slice %arg2[%17, %c0_i32_70] : memref<2048x128xf32, #tpu.memory_space<any>> -> memref<1x128xf32, #tpu.memory_space<any>>
    %c5_i32_71 = arith.constant 5 : i32
    %c0_i32_72 = arith.constant 0 : i32
    %69 = tpu.memref_slice %arg11[%c5_i32_71, %c0_i32_72] : memref<16x128xf32, #tpu.memory_space<vmem>> -> memref<1x128xf32, #tpu.memory_space<vmem>>
    %70 = tpu.memref_slice %arg13[%c5_i32] : memref<16x!tpu.dma_semaphore, #tpu.memory_space<semaphore_mem>> -> memref<1x!tpu.dma_semaphore, #tpu.memory_space<semaphore_mem>>
    %71 = tpu.memref_squeeze %70 : memref<1x!tpu.dma_semaphore, #tpu.memory_space<semaphore_mem>> -> memref<!tpu.dma_semaphore, #tpu.memory_space<semaphore_mem>>
    tpu.enqueue_dma source(%68 : memref<1x128xf32, #tpu.memory_space<any>>) target(%69 : memref<1x128xf32, #tpu.memory_space<vmem>>) target_semaphore(%71 : memref<!tpu.dma_semaphore, #tpu.memory_space<semaphore_mem>>)
    %c6_i32 = arith.constant 6 : i32
    %c0_i32_73 = arith.constant 0 : i32
    %72 = tpu.memref_slice %arg2[%20, %c0_i32_73] : memref<2048x128xf32, #tpu.memory_space<any>> -> memref<1x128xf32, #tpu.memory_space<any>>
    %c6_i32_74 = arith.constant 6 : i32
    %c0_i32_75 = arith.constant 0 : i32
    %73 = tpu.memref_slice %arg11[%c6_i32_74, %c0_i32_75] : memref<16x128xf32, #tpu.memory_space<vmem>> -> memref<1x128xf32, #tpu.memory_space<vmem>>
    %74 = tpu.memref_slice %arg13[%c6_i32] : memref<16x!tpu.dma_semaphore, #tpu.memory_space<semaphore_mem>> -> memref<1x!tpu.dma_semaphore, #tpu.memory_space<semaphore_mem>>
    %75 = tpu.memref_squeeze %74 : memref<1x!tpu.dma_semaphore, #tpu.memory_space<semaphore_mem>> -> memref<!tpu.dma_semaphore, #tpu.memory_space<semaphore_mem>>
    tpu.enqueue_dma source(%72 : memref<1x128xf32, #tpu.memory_space<any>>) target(%73 : memref<1x128xf32, #tpu.memory_space<vmem>>) target_semaphore(%75 : memref<!tpu.dma_semaphore, #tpu.memory_space<semaphore_mem>>)
    %c7_i32 = arith.constant 7 : i32
    %c0_i32_76 = arith.constant 0 : i32
    %76 = tpu.memref_slice %arg2[%23, %c0_i32_76] : memref<2048x128xf32, #tpu.memory_space<any>> -> memref<1x128xf32, #tpu.memory_space<any>>
    %c7_i32_77 = arith.constant 7 : i32
    %c0_i32_78 = arith.constant 0 : i32
    %77 = tpu.memref_slice %arg11[%c7_i32_77, %c0_i32_78] : memref<16x128xf32, #tpu.memory_space<vmem>> -> memref<1x128xf32, #tpu.memory_space<vmem>>
    %78 = tpu.memref_slice %arg13[%c7_i32] : memref<16x!tpu.dma_semaphore, #tpu.memory_space<semaphore_mem>> -> memref<1x!tpu.dma_semaphore, #tpu.memory_space<semaphore_mem>>
    %79 = tpu.memref_squeeze %78 : memref<1x!tpu.dma_semaphore, #tpu.memory_space<semaphore_mem>> -> memref<!tpu.dma_semaphore, #tpu.memory_space<semaphore_mem>>
    tpu.enqueue_dma source(%76 : memref<1x128xf32, #tpu.memory_space<any>>) target(%77 : memref<1x128xf32, #tpu.memory_space<vmem>>) target_semaphore(%79 : memref<!tpu.dma_semaphore, #tpu.memory_space<semaphore_mem>>)
    %c8_i32 = arith.constant 8 : i32
    %c0_i32_79 = arith.constant 0 : i32
    %80 = tpu.memref_slice %arg2[%26, %c0_i32_79] : memref<2048x128xf32, #tpu.memory_space<any>> -> memref<1x128xf32, #tpu.memory_space<any>>
    %c8_i32_80 = arith.constant 8 : i32
    %c0_i32_81 = arith.constant 0 : i32
    %81 = tpu.memref_slice %arg11[%c8_i32_80, %c0_i32_81] : memref<16x128xf32, #tpu.memory_space<vmem>> -> memref<1x128xf32, #tpu.memory_space<vmem>>
    %82 = tpu.memref_slice %arg13[%c8_i32] : memref<16x!tpu.dma_semaphore, #tpu.memory_space<semaphore_mem>> -> memref<1x!tpu.dma_semaphore, #tpu.memory_space<semaphore_mem>>
    %83 = tpu.memref_squeeze %82 : memref<1x!tpu.dma_semaphore, #tpu.memory_space<semaphore_mem>> -> memref<!tpu.dma_semaphore, #tpu.memory_space<semaphore_mem>>
    tpu.enqueue_dma source(%80 : memref<1x128xf32, #tpu.memory_space<any>>) target(%81 : memref<1x128xf32, #tpu.memory_space<vmem>>) target_semaphore(%83 : memref<!tpu.dma_semaphore, #tpu.memory_space<semaphore_mem>>)
    %c9_i32 = arith.constant 9 : i32
    %c0_i32_82 = arith.constant 0 : i32
    %84 = tpu.memref_slice %arg2[%29, %c0_i32_82] : memref<2048x128xf32, #tpu.memory_space<any>> -> memref<1x128xf32, #tpu.memory_space<any>>
    %c9_i32_83 = arith.constant 9 : i32
    %c0_i32_84 = arith.constant 0 : i32
    %85 = tpu.memref_slice %arg11[%c9_i32_83, %c0_i32_84] : memref<16x128xf32, #tpu.memory_space<vmem>> -> memref<1x128xf32, #tpu.memory_space<vmem>>
    %86 = tpu.memref_slice %arg13[%c9_i32] : memref<16x!tpu.dma_semaphore, #tpu.memory_space<semaphore_mem>> -> memref<1x!tpu.dma_semaphore, #tpu.memory_space<semaphore_mem>>
    %87 = tpu.memref_squeeze %86 : memref<1x!tpu.dma_semaphore, #tpu.memory_space<semaphore_mem>> -> memref<!tpu.dma_semaphore, #tpu.memory_space<semaphore_mem>>
    tpu.enqueue_dma source(%84 : memref<1x128xf32, #tpu.memory_space<any>>) target(%85 : memref<1x128xf32, #tpu.memory_space<vmem>>) target_semaphore(%87 : memref<!tpu.dma_semaphore, #tpu.memory_space<semaphore_mem>>)
    %c10_i32 = arith.constant 10 : i32
    %c0_i32_85 = arith.constant 0 : i32
    %88 = tpu.memref_slice %arg2[%32, %c0_i32_85] : memref<2048x128xf32, #tpu.memory_space<any>> -> memref<1x128xf32, #tpu.memory_space<any>>
    %c10_i32_86 = arith.constant 10 : i32
    %c0_i32_87 = arith.constant 0 : i32
    %89 = tpu.memref_slice %arg11[%c10_i32_86, %c0_i32_87] : memref<16x128xf32, #tpu.memory_space<vmem>> -> memref<1x128xf32, #tpu.memory_space<vmem>>
    %90 = tpu.memref_slice %arg13[%c10_i32] : memref<16x!tpu.dma_semaphore, #tpu.memory_space<semaphore_mem>> -> memref<1x!tpu.dma_semaphore, #tpu.memory_space<semaphore_mem>>
    %91 = tpu.memref_squeeze %90 : memref<1x!tpu.dma_semaphore, #tpu.memory_space<semaphore_mem>> -> memref<!tpu.dma_semaphore, #tpu.memory_space<semaphore_mem>>
    tpu.enqueue_dma source(%88 : memref<1x128xf32, #tpu.memory_space<any>>) target(%89 : memref<1x128xf32, #tpu.memory_space<vmem>>) target_semaphore(%91 : memref<!tpu.dma_semaphore, #tpu.memory_space<semaphore_mem>>)
    %c11_i32 = arith.constant 11 : i32
    %c0_i32_88 = arith.constant 0 : i32
    %92 = tpu.memref_slice %arg2[%35, %c0_i32_88] : memref<2048x128xf32, #tpu.memory_space<any>> -> memref<1x128xf32, #tpu.memory_space<any>>
    %c11_i32_89 = arith.constant 11 : i32
    %c0_i32_90 = arith.constant 0 : i32
    %93 = tpu.memref_slice %arg11[%c11_i32_89, %c0_i32_90] : memref<16x128xf32, #tpu.memory_space<vmem>> -> memref<1x128xf32, #tpu.memory_space<vmem>>
    %94 = tpu.memref_slice %arg13[%c11_i32] : memref<16x!tpu.dma_semaphore, #tpu.memory_space<semaphore_mem>> -> memref<1x!tpu.dma_semaphore, #tpu.memory_space<semaphore_mem>>
    %95 = tpu.memref_squeeze %94 : memref<1x!tpu.dma_semaphore, #tpu.memory_space<semaphore_mem>> -> memref<!tpu.dma_semaphore, #tpu.memory_space<semaphore_mem>>
    tpu.enqueue_dma source(%92 : memref<1x128xf32, #tpu.memory_space<any>>) target(%93 : memref<1x128xf32, #tpu.memory_space<vmem>>) target_semaphore(%95 : memref<!tpu.dma_semaphore, #tpu.memory_space<semaphore_mem>>)
    %c12_i32 = arith.constant 12 : i32
    %c0_i32_91 = arith.constant 0 : i32
    %96 = tpu.memref_slice %arg2[%38, %c0_i32_91] : memref<2048x128xf32, #tpu.memory_space<any>> -> memref<1x128xf32, #tpu.memory_space<any>>
    %c12_i32_92 = arith.constant 12 : i32
    %c0_i32_93 = arith.constant 0 : i32
    %97 = tpu.memref_slice %arg11[%c12_i32_92, %c0_i32_93] : memref<16x128xf32, #tpu.memory_space<vmem>> -> memref<1x128xf32, #tpu.memory_space<vmem>>
    %98 = tpu.memref_slice %arg13[%c12_i32] : memref<16x!tpu.dma_semaphore, #tpu.memory_space<semaphore_mem>> -> memref<1x!tpu.dma_semaphore, #tpu.memory_space<semaphore_mem>>
    %99 = tpu.memref_squeeze %98 : memref<1x!tpu.dma_semaphore, #tpu.memory_space<semaphore_mem>> -> memref<!tpu.dma_semaphore, #tpu.memory_space<semaphore_mem>>
    tpu.enqueue_dma source(%96 : memref<1x128xf32, #tpu.memory_space<any>>) target(%97 : memref<1x128xf32, #tpu.memory_space<vmem>>) target_semaphore(%99 : memref<!tpu.dma_semaphore, #tpu.memory_space<semaphore_mem>>)
    %c13_i32 = arith.constant 13 : i32
    %c0_i32_94 = arith.constant 0 : i32
    %100 = tpu.memref_slice %arg2[%41, %c0_i32_94] : memref<2048x128xf32, #tpu.memory_space<any>> -> memref<1x128xf32, #tpu.memory_space<any>>
    %c13_i32_95 = arith.constant 13 : i32
    %c0_i32_96 = arith.constant 0 : i32
    %101 = tpu.memref_slice %arg11[%c13_i32_95, %c0_i32_96] : memref<16x128xf32, #tpu.memory_space<vmem>> -> memref<1x128xf32, #tpu.memory_space<vmem>>
    %102 = tpu.memref_slice %arg13[%c13_i32] : memref<16x!tpu.dma_semaphore, #tpu.memory_space<semaphore_mem>> -> memref<1x!tpu.dma_semaphore, #tpu.memory_space<semaphore_mem>>
    %103 = tpu.memref_squeeze %102 : memref<1x!tpu.dma_semaphore, #tpu.memory_space<semaphore_mem>> -> memref<!tpu.dma_semaphore, #tpu.memory_space<semaphore_mem>>
    tpu.enqueue_dma source(%100 : memref<1x128xf32, #tpu.memory_space<any>>) target(%101 : memref<1x128xf32, #tpu.memory_space<vmem>>) target_semaphore(%103 : memref<!tpu.dma_semaphore, #tpu.memory_space<semaphore_mem>>)
    %c14_i32 = arith.constant 14 : i32
    %c0_i32_97 = arith.constant 0 : i32
    %104 = tpu.memref_slice %arg2[%44, %c0_i32_97] : memref<2048x128xf32, #tpu.memory_space<any>> -> memref<1x128xf32, #tpu.memory_space<any>>
    %c14_i32_98 = arith.constant 14 : i32
    %c0_i32_99 = arith.constant 0 : i32
    %105 = tpu.memref_slice %arg11[%c14_i32_98, %c0_i32_99] : memref<16x128xf32, #tpu.memory_space<vmem>> -> memref<1x128xf32, #tpu.memory_space<vmem>>
    %106 = tpu.memref_slice %arg13[%c14_i32] : memref<16x!tpu.dma_semaphore, #tpu.memory_space<semaphore_mem>> -> memref<1x!tpu.dma_semaphore, #tpu.memory_space<semaphore_mem>>
    %107 = tpu.memref_squeeze %106 : memref<1x!tpu.dma_semaphore, #tpu.memory_space<semaphore_mem>> -> memref<!tpu.dma_semaphore, #tpu.memory_space<semaphore_mem>>
    tpu.enqueue_dma source(%104 : memref<1x128xf32, #tpu.memory_space<any>>) target(%105 : memref<1x128xf32, #tpu.memory_space<vmem>>) target_semaphore(%107 : memref<!tpu.dma_semaphore, #tpu.memory_space<semaphore_mem>>)
    %c15_i32 = arith.constant 15 : i32
    %c0_i32_100 = arith.constant 0 : i32
    %108 = tpu.memref_slice %arg2[%47, %c0_i32_100] : memref<2048x128xf32, #tpu.memory_space<any>> -> memref<1x128xf32, #tpu.memory_space<any>>
    %c15_i32_101 = arith.constant 15 : i32
    %c0_i32_102 = arith.constant 0 : i32
    %109 = tpu.memref_slice %arg11[%c15_i32_101, %c0_i32_102] : memref<16x128xf32, #tpu.memory_space<vmem>> -> memref<1x128xf32, #tpu.memory_space<vmem>>
    %110 = tpu.memref_slice %arg13[%c15_i32] : memref<16x!tpu.dma_semaphore, #tpu.memory_space<semaphore_mem>> -> memref<1x!tpu.dma_semaphore, #tpu.memory_space<semaphore_mem>>
    %111 = tpu.memref_squeeze %110 : memref<1x!tpu.dma_semaphore, #tpu.memory_space<semaphore_mem>> -> memref<!tpu.dma_semaphore, #tpu.memory_space<semaphore_mem>>
    tpu.enqueue_dma source(%108 : memref<1x128xf32, #tpu.memory_space<any>>) target(%109 : memref<1x128xf32, #tpu.memory_space<vmem>>) target_semaphore(%111 : memref<!tpu.dma_semaphore, #tpu.memory_space<semaphore_mem>>)
    %c0_i32_103 = arith.constant 0 : i32
    %c0_i32_104 = arith.constant 0 : i32
    %112 = tpu.memref_slice %arg2[%2, %c0_i32_104] : memref<2048x128xf32, #tpu.memory_space<any>> -> memref<1x128xf32, #tpu.memory_space<any>>
    %c0_i32_105 = arith.constant 0 : i32
    %c0_i32_106 = arith.constant 0 : i32
    %113 = tpu.memref_slice %arg11[%c0_i32_105, %c0_i32_106] : memref<16x128xf32, #tpu.memory_space<vmem>> -> memref<1x128xf32, #tpu.memory_space<vmem>>
    %114 = tpu.memref_slice %arg13[%c0_i32_103] : memref<16x!tpu.dma_semaphore, #tpu.memory_space<semaphore_mem>> -> memref<1x!tpu.dma_semaphore, #tpu.memory_space<semaphore_mem>>
    %115 = tpu.memref_squeeze %114 : memref<1x!tpu.dma_semaphore, #tpu.memory_space<semaphore_mem>> -> memref<!tpu.dma_semaphore, #tpu.memory_space<semaphore_mem>>
    tpu.wait_dma2 semaphore(%115 : memref<!tpu.dma_semaphore, #tpu.memory_space<semaphore_mem>>) src(%112 : memref<1x128xf32, #tpu.memory_space<any>>) dst(%113 : memref<1x128xf32, #tpu.memory_space<vmem>>)
    %c1_i32_107 = arith.constant 1 : i32
    %c0_i32_108 = arith.constant 0 : i32
    %116 = tpu.memref_slice %arg2[%5, %c0_i32_108] : memref<2048x128xf32, #tpu.memory_space<any>> -> memref<1x128xf32, #tpu.memory_space<any>>
    %c1_i32_109 = arith.constant 1 : i32
    %c0_i32_110 = arith.constant 0 : i32
    %117 = tpu.memref_slice %arg11[%c1_i32_109, %c0_i32_110] : memref<16x128xf32, #tpu.memory_space<vmem>> -> memref<1x128xf32, #tpu.memory_space<vmem>>
    %118 = tpu.memref_slice %arg13[%c1_i32_107] : memref<16x!tpu.dma_semaphore, #tpu.memory_space<semaphore_mem>> -> memref<1x!tpu.dma_semaphore, #tpu.memory_space<semaphore_mem>>
    %119 = tpu.memref_squeeze %118 : memref<1x!tpu.dma_semaphore, #tpu.memory_space<semaphore_mem>> -> memref<!tpu.dma_semaphore, #tpu.memory_space<semaphore_mem>>
    tpu.wait_dma2 semaphore(%119 : memref<!tpu.dma_semaphore, #tpu.memory_space<semaphore_mem>>) src(%116 : memref<1x128xf32, #tpu.memory_space<any>>) dst(%117 : memref<1x128xf32, #tpu.memory_space<vmem>>)
    %c2_i32_111 = arith.constant 2 : i32
    %c0_i32_112 = arith.constant 0 : i32
    %120 = tpu.memref_slice %arg2[%8, %c0_i32_112] : memref<2048x128xf32, #tpu.memory_space<any>> -> memref<1x128xf32, #tpu.memory_space<any>>
    %c2_i32_113 = arith.constant 2 : i32
    %c0_i32_114 = arith.constant 0 : i32
    %121 = tpu.memref_slice %arg11[%c2_i32_113, %c0_i32_114] : memref<16x128xf32, #tpu.memory_space<vmem>> -> memref<1x128xf32, #tpu.memory_space<vmem>>
    %122 = tpu.memref_slice %arg13[%c2_i32_111] : memref<16x!tpu.dma_semaphore, #tpu.memory_space<semaphore_mem>> -> memref<1x!tpu.dma_semaphore, #tpu.memory_space<semaphore_mem>>
    %123 = tpu.memref_squeeze %122 : memref<1x!tpu.dma_semaphore, #tpu.memory_space<semaphore_mem>> -> memref<!tpu.dma_semaphore, #tpu.memory_space<semaphore_mem>>
    tpu.wait_dma2 semaphore(%123 : memref<!tpu.dma_semaphore, #tpu.memory_space<semaphore_mem>>) src(%120 : memref<1x128xf32, #tpu.memory_space<any>>) dst(%121 : memref<1x128xf32, #tpu.memory_space<vmem>>)
    %c3_i32_115 = arith.constant 3 : i32
    %c0_i32_116 = arith.constant 0 : i32
    %124 = tpu.memref_slice %arg2[%11, %c0_i32_116] : memref<2048x128xf32, #tpu.memory_space<any>> -> memref<1x128xf32, #tpu.memory_space<any>>
    %c3_i32_117 = arith.constant 3 : i32
    %c0_i32_118 = arith.constant 0 : i32
    %125 = tpu.memref_slice %arg11[%c3_i32_117, %c0_i32_118] : memref<16x128xf32, #tpu.memory_space<vmem>> -> memref<1x128xf32, #tpu.memory_space<vmem>>
    %126 = tpu.memref_slice %arg13[%c3_i32_115] : memref<16x!tpu.dma_semaphore, #tpu.memory_space<semaphore_mem>> -> memref<1x!tpu.dma_semaphore, #tpu.memory_space<semaphore_mem>>
    %127 = tpu.memref_squeeze %126 : memref<1x!tpu.dma_semaphore, #tpu.memory_space<semaphore_mem>> -> memref<!tpu.dma_semaphore, #tpu.memory_space<semaphore_mem>>
    tpu.wait_dma2 semaphore(%127 : memref<!tpu.dma_semaphore, #tpu.memory_space<semaphore_mem>>) src(%124 : memref<1x128xf32, #tpu.memory_space<any>>) dst(%125 : memref<1x128xf32, #tpu.memory_space<vmem>>)
    %c4_i32_119 = arith.constant 4 : i32
    %c0_i32_120 = arith.constant 0 : i32
    %128 = tpu.memref_slice %arg2[%14, %c0_i32_120] : memref<2048x128xf32, #tpu.memory_space<any>> -> memref<1x128xf32, #tpu.memory_space<any>>
    %c4_i32_121 = arith.constant 4 : i32
    %c0_i32_122 = arith.constant 0 : i32
    %129 = tpu.memref_slice %arg11[%c4_i32_121, %c0_i32_122] : memref<16x128xf32, #tpu.memory_space<vmem>> -> memref<1x128xf32, #tpu.memory_space<vmem>>
    %130 = tpu.memref_slice %arg13[%c4_i32_119] : memref<16x!tpu.dma_semaphore, #tpu.memory_space<semaphore_mem>> -> memref<1x!tpu.dma_semaphore, #tpu.memory_space<semaphore_mem>>
    %131 = tpu.memref_squeeze %130 : memref<1x!tpu.dma_semaphore, #tpu.memory_space<semaphore_mem>> -> memref<!tpu.dma_semaphore, #tpu.memory_space<semaphore_mem>>
    tpu.wait_dma2 semaphore(%131 : memref<!tpu.dma_semaphore, #tpu.memory_space<semaphore_mem>>) src(%128 : memref<1x128xf32, #tpu.memory_space<any>>) dst(%129 : memref<1x128xf32, #tpu.memory_space<vmem>>)
    %c5_i32_123 = arith.constant 5 : i32
    %c0_i32_124 = arith.constant 0 : i32
    %132 = tpu.memref_slice %arg2[%17, %c0_i32_124] : memref<2048x128xf32, #tpu.memory_space<any>> -> memref<1x128xf32, #tpu.memory_space<any>>
    %c5_i32_125 = arith.constant 5 : i32
    %c0_i32_126 = arith.constant 0 : i32
    %133 = tpu.memref_slice %arg11[%c5_i32_125, %c0_i32_126] : memref<16x128xf32, #tpu.memory_space<vmem>> -> memref<1x128xf32, #tpu.memory_space<vmem>>
    %134 = tpu.memref_slice %arg13[%c5_i32_123] : memref<16x!tpu.dma_semaphore, #tpu.memory_space<semaphore_mem>> -> memref<1x!tpu.dma_semaphore, #tpu.memory_space<semaphore_mem>>
    %135 = tpu.memref_squeeze %134 : memref<1x!tpu.dma_semaphore, #tpu.memory_space<semaphore_mem>> -> memref<!tpu.dma_semaphore, #tpu.memory_space<semaphore_mem>>
    tpu.wait_dma2 semaphore(%135 : memref<!tpu.dma_semaphore, #tpu.memory_space<semaphore_mem>>) src(%132 : memref<1x128xf32, #tpu.memory_space<any>>) dst(%133 : memref<1x128xf32, #tpu.memory_space<vmem>>)
    %c6_i32_127 = arith.constant 6 : i32
    %c0_i32_128 = arith.constant 0 : i32
    %136 = tpu.memref_slice %arg2[%20, %c0_i32_128] : memref<2048x128xf32, #tpu.memory_space<any>> -> memref<1x128xf32, #tpu.memory_space<any>>
    %c6_i32_129 = arith.constant 6 : i32
    %c0_i32_130 = arith.constant 0 : i32
    %137 = tpu.memref_slice %arg11[%c6_i32_129, %c0_i32_130] : memref<16x128xf32, #tpu.memory_space<vmem>> -> memref<1x128xf32, #tpu.memory_space<vmem>>
    %138 = tpu.memref_slice %arg13[%c6_i32_127] : memref<16x!tpu.dma_semaphore, #tpu.memory_space<semaphore_mem>> -> memref<1x!tpu.dma_semaphore, #tpu.memory_space<semaphore_mem>>
    %139 = tpu.memref_squeeze %138 : memref<1x!tpu.dma_semaphore, #tpu.memory_space<semaphore_mem>> -> memref<!tpu.dma_semaphore, #tpu.memory_space<semaphore_mem>>
    tpu.wait_dma2 semaphore(%139 : memref<!tpu.dma_semaphore, #tpu.memory_space<semaphore_mem>>) src(%136 : memref<1x128xf32, #tpu.memory_space<any>>) dst(%137 : memref<1x128xf32, #tpu.memory_space<vmem>>)
    %c7_i32_131 = arith.constant 7 : i32
    %c0_i32_132 = arith.constant 0 : i32
    %140 = tpu.memref_slice %arg2[%23, %c0_i32_132] : memref<2048x128xf32, #tpu.memory_space<any>> -> memref<1x128xf32, #tpu.memory_space<any>>
    %c7_i32_133 = arith.constant 7 : i32
    %c0_i32_134 = arith.constant 0 : i32
    %141 = tpu.memref_slice %arg11[%c7_i32_133, %c0_i32_134] : memref<16x128xf32, #tpu.memory_space<vmem>> -> memref<1x128xf32, #tpu.memory_space<vmem>>
    %142 = tpu.memref_slice %arg13[%c7_i32_131] : memref<16x!tpu.dma_semaphore, #tpu.memory_space<semaphore_mem>> -> memref<1x!tpu.dma_semaphore, #tpu.memory_space<semaphore_mem>>
    %143 = tpu.memref_squeeze %142 : memref<1x!tpu.dma_semaphore, #tpu.memory_space<semaphore_mem>> -> memref<!tpu.dma_semaphore, #tpu.memory_space<semaphore_mem>>
    tpu.wait_dma2 semaphore(%143 : memref<!tpu.dma_semaphore, #tpu.memory_space<semaphore_mem>>) src(%140 : memref<1x128xf32, #tpu.memory_space<any>>) dst(%141 : memref<1x128xf32, #tpu.memory_space<vmem>>)
    %c8_i32_135 = arith.constant 8 : i32
    %c0_i32_136 = arith.constant 0 : i32
    %144 = tpu.memref_slice %arg2[%26, %c0_i32_136] : memref<2048x128xf32, #tpu.memory_space<any>> -> memref<1x128xf32, #tpu.memory_space<any>>
    %c8_i32_137 = arith.constant 8 : i32
    %c0_i32_138 = arith.constant 0 : i32
    %145 = tpu.memref_slice %arg11[%c8_i32_137, %c0_i32_138] : memref<16x128xf32, #tpu.memory_space<vmem>> -> memref<1x128xf32, #tpu.memory_space<vmem>>
    %146 = tpu.memref_slice %arg13[%c8_i32_135] : memref<16x!tpu.dma_semaphore, #tpu.memory_space<semaphore_mem>> -> memref<1x!tpu.dma_semaphore, #tpu.memory_space<semaphore_mem>>
    %147 = tpu.memref_squeeze %146 : memref<1x!tpu.dma_semaphore, #tpu.memory_space<semaphore_mem>> -> memref<!tpu.dma_semaphore, #tpu.memory_space<semaphore_mem>>
    tpu.wait_dma2 semaphore(%147 : memref<!tpu.dma_semaphore, #tpu.memory_space<semaphore_mem>>) src(%144 : memref<1x128xf32, #tpu.memory_space<any>>) dst(%145 : memref<1x128xf32, #tpu.memory_space<vmem>>)
    %c9_i32_139 = arith.constant 9 : i32
    %c0_i32_140 = arith.constant 0 : i32
    %148 = tpu.memref_slice %arg2[%29, %c0_i32_140] : memref<2048x128xf32, #tpu.memory_space<any>> -> memref<1x128xf32, #tpu.memory_space<any>>
    %c9_i32_141 = arith.constant 9 : i32
    %c0_i32_142 = arith.constant 0 : i32
    %149 = tpu.memref_slice %arg11[%c9_i32_141, %c0_i32_142] : memref<16x128xf32, #tpu.memory_space<vmem>> -> memref<1x128xf32, #tpu.memory_space<vmem>>
    %150 = tpu.memref_slice %arg13[%c9_i32_139] : memref<16x!tpu.dma_semaphore, #tpu.memory_space<semaphore_mem>> -> memref<1x!tpu.dma_semaphore, #tpu.memory_space<semaphore_mem>>
    %151 = tpu.memref_squeeze %150 : memref<1x!tpu.dma_semaphore, #tpu.memory_space<semaphore_mem>> -> memref<!tpu.dma_semaphore, #tpu.memory_space<semaphore_mem>>
    tpu.wait_dma2 semaphore(%151 : memref<!tpu.dma_semaphore, #tpu.memory_space<semaphore_mem>>) src(%148 : memref<1x128xf32, #tpu.memory_space<any>>) dst(%149 : memref<1x128xf32, #tpu.memory_space<vmem>>)
    %c10_i32_143 = arith.constant 10 : i32
    %c0_i32_144 = arith.constant 0 : i32
    %152 = tpu.memref_slice %arg2[%32, %c0_i32_144] : memref<2048x128xf32, #tpu.memory_space<any>> -> memref<1x128xf32, #tpu.memory_space<any>>
    %c10_i32_145 = arith.constant 10 : i32
    %c0_i32_146 = arith.constant 0 : i32
    %153 = tpu.memref_slice %arg11[%c10_i32_145, %c0_i32_146] : memref<16x128xf32, #tpu.memory_space<vmem>> -> memref<1x128xf32, #tpu.memory_space<vmem>>
    %154 = tpu.memref_slice %arg13[%c10_i32_143] : memref<16x!tpu.dma_semaphore, #tpu.memory_space<semaphore_mem>> -> memref<1x!tpu.dma_semaphore, #tpu.memory_space<semaphore_mem>>
    %155 = tpu.memref_squeeze %154 : memref<1x!tpu.dma_semaphore, #tpu.memory_space<semaphore_mem>> -> memref<!tpu.dma_semaphore, #tpu.memory_space<semaphore_mem>>
    tpu.wait_dma2 semaphore(%155 : memref<!tpu.dma_semaphore, #tpu.memory_space<semaphore_mem>>) src(%152 : memref<1x128xf32, #tpu.memory_space<any>>) dst(%153 : memref<1x128xf32, #tpu.memory_space<vmem>>)
    %c11_i32_147 = arith.constant 11 : i32
    %c0_i32_148 = arith.constant 0 : i32
    %156 = tpu.memref_slice %arg2[%35, %c0_i32_148] : memref<2048x128xf32, #tpu.memory_space<any>> -> memref<1x128xf32, #tpu.memory_space<any>>
    %c11_i32_149 = arith.constant 11 : i32
    %c0_i32_150 = arith.constant 0 : i32
    %157 = tpu.memref_slice %arg11[%c11_i32_149, %c0_i32_150] : memref<16x128xf32, #tpu.memory_space<vmem>> -> memref<1x128xf32, #tpu.memory_space<vmem>>
    %158 = tpu.memref_slice %arg13[%c11_i32_147] : memref<16x!tpu.dma_semaphore, #tpu.memory_space<semaphore_mem>> -> memref<1x!tpu.dma_semaphore, #tpu.memory_space<semaphore_mem>>
    %159 = tpu.memref_squeeze %158 : memref<1x!tpu.dma_semaphore, #tpu.memory_space<semaphore_mem>> -> memref<!tpu.dma_semaphore, #tpu.memory_space<semaphore_mem>>
    tpu.wait_dma2 semaphore(%159 : memref<!tpu.dma_semaphore, #tpu.memory_space<semaphore_mem>>) src(%156 : memref<1x128xf32, #tpu.memory_space<any>>) dst(%157 : memref<1x128xf32, #tpu.memory_space<vmem>>)
    %c12_i32_151 = arith.constant 12 : i32
    %c0_i32_152 = arith.constant 0 : i32
    %160 = tpu.memref_slice %arg2[%38, %c0_i32_152] : memref<2048x128xf32, #tpu.memory_space<any>> -> memref<1x128xf32, #tpu.memory_space<any>>
    %c12_i32_153 = arith.constant 12 : i32
    %c0_i32_154 = arith.constant 0 : i32
    %161 = tpu.memref_slice %arg11[%c12_i32_153, %c0_i32_154] : memref<16x128xf32, #tpu.memory_space<vmem>> -> memref<1x128xf32, #tpu.memory_space<vmem>>
    %162 = tpu.memref_slice %arg13[%c12_i32_151] : memref<16x!tpu.dma_semaphore, #tpu.memory_space<semaphore_mem>> -> memref<1x!tpu.dma_semaphore, #tpu.memory_space<semaphore_mem>>
    %163 = tpu.memref_squeeze %162 : memref<1x!tpu.dma_semaphore, #tpu.memory_space<semaphore_mem>> -> memref<!tpu.dma_semaphore, #tpu.memory_space<semaphore_mem>>
    tpu.wait_dma2 semaphore(%163 : memref<!tpu.dma_semaphore, #tpu.memory_space<semaphore_mem>>) src(%160 : memref<1x128xf32, #tpu.memory_space<any>>) dst(%161 : memref<1x128xf32, #tpu.memory_space<vmem>>)
    %c13_i32_155 = arith.constant 13 : i32
    %c0_i32_156 = arith.constant 0 : i32
    %164 = tpu.memref_slice %arg2[%41, %c0_i32_156] : memref<2048x128xf32, #tpu.memory_space<any>> -> memref<1x128xf32, #tpu.memory_space<any>>
    %c13_i32_157 = arith.constant 13 : i32
    %c0_i32_158 = arith.constant 0 : i32
    %165 = tpu.memref_slice %arg11[%c13_i32_157, %c0_i32_158] : memref<16x128xf32, #tpu.memory_space<vmem>> -> memref<1x128xf32, #tpu.memory_space<vmem>>
    %166 = tpu.memref_slice %arg13[%c13_i32_155] : memref<16x!tpu.dma_semaphore, #tpu.memory_space<semaphore_mem>> -> memref<1x!tpu.dma_semaphore, #tpu.memory_space<semaphore_mem>>
    %167 = tpu.memref_squeeze %166 : memref<1x!tpu.dma_semaphore, #tpu.memory_space<semaphore_mem>> -> memref<!tpu.dma_semaphore, #tpu.memory_space<semaphore_mem>>
    tpu.wait_dma2 semaphore(%167 : memref<!tpu.dma_semaphore, #tpu.memory_space<semaphore_mem>>) src(%164 : memref<1x128xf32, #tpu.memory_space<any>>) dst(%165 : memref<1x128xf32, #tpu.memory_space<vmem>>)
    %c14_i32_159 = arith.constant 14 : i32
    %c0_i32_160 = arith.constant 0 : i32
    %168 = tpu.memref_slice %arg2[%44, %c0_i32_160] : memref<2048x128xf32, #tpu.memory_space<any>> -> memref<1x128xf32, #tpu.memory_space<any>>
    %c14_i32_161 = arith.constant 14 : i32
    %c0_i32_162 = arith.constant 0 : i32
    %169 = tpu.memref_slice %arg11[%c14_i32_161, %c0_i32_162] : memref<16x128xf32, #tpu.memory_space<vmem>> -> memref<1x128xf32, #tpu.memory_space<vmem>>
    %170 = tpu.memref_slice %arg13[%c14_i32_159] : memref<16x!tpu.dma_semaphore, #tpu.memory_space<semaphore_mem>> -> memref<1x!tpu.dma_semaphore, #tpu.memory_space<semaphore_mem>>
    %171 = tpu.memref_squeeze %170 : memref<1x!tpu.dma_semaphore, #tpu.memory_space<semaphore_mem>> -> memref<!tpu.dma_semaphore, #tpu.memory_space<semaphore_mem>>
    tpu.wait_dma2 semaphore(%171 : memref<!tpu.dma_semaphore, #tpu.memory_space<semaphore_mem>>) src(%168 : memref<1x128xf32, #tpu.memory_space<any>>) dst(%169 : memref<1x128xf32, #tpu.memory_space<vmem>>)
    %c15_i32_163 = arith.constant 15 : i32
    %c0_i32_164 = arith.constant 0 : i32
    %172 = tpu.memref_slice %arg2[%47, %c0_i32_164] : memref<2048x128xf32, #tpu.memory_space<any>> -> memref<1x128xf32, #tpu.memory_space<any>>
    %c15_i32_165 = arith.constant 15 : i32
    %c0_i32_166 = arith.constant 0 : i32
    %173 = tpu.memref_slice %arg11[%c15_i32_165, %c0_i32_166] : memref<16x128xf32, #tpu.memory_space<vmem>> -> memref<1x128xf32, #tpu.memory_space<vmem>>
    %174 = tpu.memref_slice %arg13[%c15_i32_163] : memref<16x!tpu.dma_semaphore, #tpu.memory_space<semaphore_mem>> -> memref<1x!tpu.dma_semaphore, #tpu.memory_space<semaphore_mem>>
    %175 = tpu.memref_squeeze %174 : memref<1x!tpu.dma_semaphore, #tpu.memory_space<semaphore_mem>> -> memref<!tpu.dma_semaphore, #tpu.memory_space<semaphore_mem>>
    tpu.wait_dma2 semaphore(%175 : memref<!tpu.dma_semaphore, #tpu.memory_space<semaphore_mem>>) src(%172 : memref<1x128xf32, #tpu.memory_space<any>>) dst(%173 : memref<1x128xf32, #tpu.memory_space<vmem>>)
    %c0_167 = arith.constant 0 : index
    %c0_168 = arith.constant 0 : index
    %176 = vector.load %arg11[%c0_167, %c0_168] : memref<16x128xf32, #tpu.memory_space<vmem>>, vector<16x128xf32>
    %177 = arith.truncf %176 : vector<16x128xf32> to vector<16x128xbf16>
    %c0_169 = arith.constant 0 : index
    %c0_170 = arith.constant 0 : index
    %178 = vector.load %arg3[%c0_169, %c0_170] : memref<128x1024xbf16, #tpu.memory_space<vmem>>, vector<128x1024xbf16>
    %cst = arith.constant dense<0.000000e+00> : vector<16x1024xf32>
    %179 = tpu.matmul %177, %178, %cst {dimension_numbers = #tpu.dot_dimension_numbers<[1], [0], [0], [1], [0, 0, 1, 1], [], []>} : vector<16x128xbf16>, vector<128x1024xbf16>, vector<16x1024xf32> -> vector<16x1024xf32>
    %c0_171 = arith.constant 0 : index
    %c0_172 = arith.constant 0 : index
    %180 = vector.load %arg5[%c0_171, %c0_172] : memref<1x1024xf32, #tpu.memory_space<vmem>>, vector<1x1024xf32>
    %181 = vector.broadcast %180 : vector<1x1024xf32> to vector<16x1024xf32>
    %182 = arith.addf %179, %181 : vector<16x1024xf32>
    %c0_173 = arith.constant 0 : index
    %c0_174 = arith.constant 0 : index
    %183 = vector.load %arg12[%c0_173, %c0_174] : memref<16x1024xf32, #tpu.memory_space<vmem>>, vector<16x1024xf32>
    tpu.vector_store %arg12[%c0_173, %c0_174], %182 {strides = array<i32>} : memref<16x1024xf32, #tpu.memory_space<vmem>>, vector<16x1024xf32>,
    %c0_175 = arith.constant 0 : index
    %c0_176 = arith.constant 0 : index
    %184 = vector.load %arg4[%c0_175, %c0_176] : memref<256x1024xbf16, #tpu.memory_space<vmem>>, vector<256x1024xbf16>
    %c0_177 = arith.constant 0 : index
    %c0_178 = arith.constant 0 : index
    %185 = vector.load %arg6[%c0_177, %c0_178] : memref<2x256xf32, #tpu.memory_space<vmem>>, vector<2x256xf32>
    %c0_179 = arith.constant 0 : index
    %c0_180 = arith.constant 0 : index
    %186 = vector.load %arg7[%c0_179, %c0_180] : memref<2x256xf32, #tpu.memory_space<vmem>>, vector<2x256xf32>
    %c0_181 = arith.constant 0 : index
    %c0_182 = arith.constant 0 : index
    %187 = vector.load %arg12[%c0_181, %c0_182] : memref<16x1024xf32, #tpu.memory_space<vmem>>, vector<2x1024xf32>
    %188 = arith.truncf %185 : vector<2x256xf32> to vector<2x256xbf16>
    %cst_183 = arith.constant dense<0.000000e+00> : vector<2x1024xf32>
    %189 = tpu.matmul %188, %184, %cst_183 {dimension_numbers = #tpu.dot_dimension_numbers<[1], [0], [0], [1], [0, 0, 1, 1], [], []>} : vector<2x256xbf16>, vector<256x1024xbf16>, vector<2x1024xf32> -> vector<2x1024xf32>
    %190 = arith.addf %187, %189 : vector<2x1024xf32>
    %191 = vector.extract_strided_slice %190 {offsets = [0, 0], sizes = [2, 256], strides = [1, 1]} : vector<2x1024xf32> to vector<2x256xf32>
    %192 = arith.negf %191 : vector<2x256xf32>
    %193 = math.exp %192 : vector<2x256xf32>
    %cst_184 = arith.constant 1.000000e+00 : f32
    %194 = vector.broadcast %cst_184 : f32 to vector<2x256xf32>
    %195 = arith.addf %194, %193 : vector<2x256xf32>
    %196 = arith.divf %194, %195 : vector<2x256xf32>
    %197 = vector.extract_strided_slice %190 {offsets = [0, 256], sizes = [2, 256], strides = [1, 1]} : vector<2x1024xf32> to vector<2x256xf32>
    %198 = arith.negf %197 : vector<2x256xf32>
    %199 = math.exp %198 : vector<2x256xf32>
    %cst_185 = arith.constant 1.000000e+00 : f32
    %200 = vector.broadcast %cst_185 : f32 to vector<2x256xf32>
    %201 = arith.addf %200, %199 : vector<2x256xf32>
    %202 = arith.divf %200, %201 : vector<2x256xf32>
    %203 = vector.extract_strided_slice %190 {offsets = [0, 512], sizes = [2, 256], strides = [1, 1]} : vector<2x1024xf32> to vector<2x256xf32>
    %204 = math.tanh %203 : vector<2x256xf32>
    %205 = vector.extract_strided_slice %190 {offsets = [0, 768], sizes = [2, 256], strides = [1, 1]} : vector<2x1024xf32> to vector<2x256xf32>
    %206 = arith.negf %205 : vector<2x256xf32>
    %207 = math.exp %206 : vector<2x256xf32>
    %cst_186 = arith.constant 1.000000e+00 : f32
    %208 = vector.broadcast %cst_186 : f32 to vector<2x256xf32>
    %209 = arith.addf %208, %207 : vector<2x256xf32>
    %210 = arith.divf %208, %209 : vector<2x256xf32>
    %211 = arith.mulf %202, %186 : vector<2x256xf32>
    %212 = arith.mulf %196, %204 : vector<2x256xf32>
    %213 = arith.addf %211, %212 : vector<2x256xf32>
    %214 = math.tanh %213 : vector<2x256xf32>
    %215 = arith.mulf %210, %214 : vector<2x256xf32>
    %c2_187 = arith.constant 2 : index
    %c0_188 = arith.constant 0 : index
    %216 = vector.load %arg12[%c2_187, %c0_188] : memref<16x1024xf32, #tpu.memory_space<vmem>>, vector<2x1024xf32>
    %217 = arith.truncf %215 : vector<2x256xf32> to vector<2x256xbf16>
    %cst_189 = arith.constant dense<0.000000e+00> : vector<2x1024xf32>
    %218 = tpu.matmul %217, %184, %cst_189 {dimension_numbers = #tpu.dot_dimension_numbers<[1], [0], [0], [1], [0, 0, 1, 1], [], []>} : vector<2x256xbf16>, vector<256x1024xbf16>, vector<2x1024xf32> -> vector<2x1024xf32>
    %219 = arith.addf %216, %218 : vector<2x1024xf32>
    %220 = vector.extract_strided_slice %219 {offsets = [0, 0], sizes = [2, 256], strides = [1, 1]} : vector<2x1024xf32> to vector<2x256xf32>
    %221 = arith.negf %220 : vector<2x256xf32>
    %222 = math.exp %221 : vector<2x256xf32>
    %cst_190 = arith.constant 1.000000e+00 : f32
    %223 = vector.broadcast %cst_190 : f32 to vector<2x256xf32>
    %224 = arith.addf %223, %222 : vector<2x256xf32>
    %225 = arith.divf %223, %224 : vector<2x256xf32>
    %226 = vector.extract_strided_slice %219 {offsets = [0, 256], sizes = [2, 256], strides = [1, 1]} : vector<2x1024xf32> to vector<2x256xf32>
    %227 = arith.negf %226 : vector<2x256xf32>
    %228 = math.exp %227 : vector<2x256xf32>
    %cst_191 = arith.constant 1.000000e+00 : f32
    %229 = vector.broadcast %cst_191 : f32 to vector<2x256xf32>
    %230 = arith.addf %229, %228 : vector<2x256xf32>
    %231 = arith.divf %229, %230 : vector<2x256xf32>
    %232 = vector.extract_strided_slice %219 {offsets = [0, 512], sizes = [2, 256], strides = [1, 1]} : vector<2x1024xf32> to vector<2x256xf32>
    %233 = math.tanh %232 : vector<2x256xf32>
    %234 = vector.extract_strided_slice %219 {offsets = [0, 768], sizes = [2, 256], strides = [1, 1]} : vector<2x1024xf32> to vector<2x256xf32>
    %235 = arith.negf %234 : vector<2x256xf32>
    %236 = math.exp %235 : vector<2x256xf32>
    %cst_192 = arith.constant 1.000000e+00 : f32
    %237 = vector.broadcast %cst_192 : f32 to vector<2x256xf32>
    %238 = arith.addf %237, %236 : vector<2x256xf32>
    %239 = arith.divf %237, %238 : vector<2x256xf32>
    %240 = arith.mulf %231, %213 : vector<2x256xf32>
    %241 = arith.mulf %225, %233 : vector<2x256xf32>
    %242 = arith.addf %240, %241 : vector<2x256xf32>
    %243 = math.tanh %242 : vector<2x256xf32>
    %244 = arith.mulf %239, %243 : vector<2x256xf32>
    %c4_193 = arith.constant 4 : index
    %c0_194 = arith.constant 0 : index
    %245 = vector.load %arg12[%c4_193, %c0_194] : memref<16x1024xf32, #tpu.memory_space<vmem>>, vector<2x1024xf32>
    %246 = arith.truncf %244 : vector<2x256xf32> to vector<2x256xbf16>
    %cst_195 = arith.constant dense<0.000000e+00> : vector<2x1024xf32>
    %247 = tpu.matmul %246, %184, %cst_195 {dimension_numbers = #tpu.dot_dimension_numbers<[1], [0], [0], [1], [0, 0, 1, 1], [], []>} : vector<2x256xbf16>, vector<256x1024xbf16>, vector<2x1024xf32> -> vector<2x1024xf32>
    %248 = arith.addf %245, %247 : vector<2x1024xf32>
    %249 = vector.extract_strided_slice %248 {offsets = [0, 0], sizes = [2, 256], strides = [1, 1]} : vector<2x1024xf32> to vector<2x256xf32>
    %250 = arith.negf %249 : vector<2x256xf32>
    %251 = math.exp %250 : vector<2x256xf32>
    %cst_196 = arith.constant 1.000000e+00 : f32
    %252 = vector.broadcast %cst_196 : f32 to vector<2x256xf32>
    %253 = arith.addf %252, %251 : vector<2x256xf32>
    %254 = arith.divf %252, %253 : vector<2x256xf32>
    %255 = vector.extract_strided_slice %248 {offsets = [0, 256], sizes = [2, 256], strides = [1, 1]} : vector<2x1024xf32> to vector<2x256xf32>
    %256 = arith.negf %255 : vector<2x256xf32>
    %257 = math.exp %256 : vector<2x256xf32>
    %cst_197 = arith.constant 1.000000e+00 : f32
    %258 = vector.broadcast %cst_197 : f32 to vector<2x256xf32>
    %259 = arith.addf %258, %257 : vector<2x256xf32>
    %260 = arith.divf %258, %259 : vector<2x256xf32>
    %261 = vector.extract_strided_slice %248 {offsets = [0, 512], sizes = [2, 256], strides = [1, 1]} : vector<2x1024xf32> to vector<2x256xf32>
    %262 = math.tanh %261 : vector<2x256xf32>
    %263 = vector.extract_strided_slice %248 {offsets = [0, 768], sizes = [2, 256], strides = [1, 1]} : vector<2x1024xf32> to vector<2x256xf32>
    %264 = arith.negf %263 : vector<2x256xf32>
    %265 = math.exp %264 : vector<2x256xf32>
    %cst_198 = arith.constant 1.000000e+00 : f32
    %266 = vector.broadcast %cst_198 : f32 to vector<2x256xf32>
    %267 = arith.addf %266, %265 : vector<2x256xf32>
    %268 = arith.divf %266, %267 : vector<2x256xf32>
    %269 = arith.mulf %260, %242 : vector<2x256xf32>
    %270 = arith.mulf %254, %262 : vector<2x256xf32>
    %271 = arith.addf %269, %270 : vector<2x256xf32>
    %272 = math.tanh %271 : vector<2x256xf32>
    %273 = arith.mulf %268, %272 : vector<2x256xf32>
    %c6_199 = arith.constant 6 : index
    %c0_200 = arith.constant 0 : index
    %274 = vector.load %arg12[%c6_199, %c0_200] : memref<16x1024xf32, #tpu.memory_space<vmem>>, vector<2x1024xf32>
    %275 = arith.truncf %273 : vector<2x256xf32> to vector<2x256xbf16>
    %cst_201 = arith.constant dense<0.000000e+00> : vector<2x1024xf32>
    %276 = tpu.matmul %275, %184, %cst_201 {dimension_numbers = #tpu.dot_dimension_numbers<[1], [0], [0], [1], [0, 0, 1, 1], [], []>} : vector<2x256xbf16>, vector<256x1024xbf16>, vector<2x1024xf32> -> vector<2x1024xf32>
    %277 = arith.addf %274, %276 : vector<2x1024xf32>
    %278 = vector.extract_strided_slice %277 {offsets = [0, 0], sizes = [2, 256], strides = [1, 1]} : vector<2x1024xf32> to vector<2x256xf32>
    %279 = arith.negf %278 : vector<2x256xf32>
    %280 = math.exp %279 : vector<2x256xf32>
    %cst_202 = arith.constant 1.000000e+00 : f32
    %281 = vector.broadcast %cst_202 : f32 to vector<2x256xf32>
    %282 = arith.addf %281, %280 : vector<2x256xf32>
    %283 = arith.divf %281, %282 : vector<2x256xf32>
    %284 = vector.extract_strided_slice %277 {offsets = [0, 256], sizes = [2, 256], strides = [1, 1]} : vector<2x1024xf32> to vector<2x256xf32>
    %285 = arith.negf %284 : vector<2x256xf32>
    %286 = math.exp %285 : vector<2x256xf32>
    %cst_203 = arith.constant 1.000000e+00 : f32
    %287 = vector.broadcast %cst_203 : f32 to vector<2x256xf32>
    %288 = arith.addf %287, %286 : vector<2x256xf32>
    %289 = arith.divf %287, %288 : vector<2x256xf32>
    %290 = vector.extract_strided_slice %277 {offsets = [0, 512], sizes = [2, 256], strides = [1, 1]} : vector<2x1024xf32> to vector<2x256xf32>
    %291 = math.tanh %290 : vector<2x256xf32>
    %292 = vector.extract_strided_slice %277 {offsets = [0, 768], sizes = [2, 256], strides = [1, 1]} : vector<2x1024xf32> to vector<2x256xf32>
    %293 = arith.negf %292 : vector<2x256xf32>
    %294 = math.exp %293 : vector<2x256xf32>
    %cst_204 = arith.constant 1.000000e+00 : f32
    %295 = vector.broadcast %cst_204 : f32 to vector<2x256xf32>
    %296 = arith.addf %295, %294 : vector<2x256xf32>
    %297 = arith.divf %295, %296 : vector<2x256xf32>
    %298 = arith.mulf %289, %271 : vector<2x256xf32>
    %299 = arith.mulf %283, %291 : vector<2x256xf32>
    %300 = arith.addf %298, %299 : vector<2x256xf32>
    %301 = math.tanh %300 : vector<2x256xf32>
    %302 = arith.mulf %297, %301 : vector<2x256xf32>
    %c8 = arith.constant 8 : index
    %c0_205 = arith.constant 0 : index
    %303 = vector.load %arg12[%c8, %c0_205] : memref<16x1024xf32, #tpu.memory_space<vmem>>, vector<2x1024xf32>
    %304 = arith.truncf %302 : vector<2x256xf32> to vector<2x256xbf16>
    %cst_206 = arith.constant dense<0.000000e+00> : vector<2x1024xf32>
    %305 = tpu.matmul %304, %184, %cst_206 {dimension_numbers = #tpu.dot_dimension_numbers<[1], [0], [0], [1], [0, 0, 1, 1], [], []>} : vector<2x256xbf16>, vector<256x1024xbf16>, vector<2x1024xf32> -> vector<2x1024xf32>
    %306 = arith.addf %303, %305 : vector<2x1024xf32>
    %307 = vector.extract_strided_slice %306 {offsets = [0, 0], sizes = [2, 256], strides = [1, 1]} : vector<2x1024xf32> to vector<2x256xf32>
    %308 = arith.negf %307 : vector<2x256xf32>
    %309 = math.exp %308 : vector<2x256xf32>
    %cst_207 = arith.constant 1.000000e+00 : f32
    %310 = vector.broadcast %cst_207 : f32 to vector<2x256xf32>
    %311 = arith.addf %310, %309 : vector<2x256xf32>
    %312 = arith.divf %310, %311 : vector<2x256xf32>
    %313 = vector.extract_strided_slice %306 {offsets = [0, 256], sizes = [2, 256], strides = [1, 1]} : vector<2x1024xf32> to vector<2x256xf32>
    %314 = arith.negf %313 : vector<2x256xf32>
    %315 = math.exp %314 : vector<2x256xf32>
    %cst_208 = arith.constant 1.000000e+00 : f32
    %316 = vector.broadcast %cst_208 : f32 to vector<2x256xf32>
    %317 = arith.addf %316, %315 : vector<2x256xf32>
    %318 = arith.divf %316, %317 : vector<2x256xf32>
    %319 = vector.extract_strided_slice %306 {offsets = [0, 512], sizes = [2, 256], strides = [1, 1]} : vector<2x1024xf32> to vector<2x256xf32>
    %320 = math.tanh %319 : vector<2x256xf32>
    %321 = vector.extract_strided_slice %306 {offsets = [0, 768], sizes = [2, 256], strides = [1, 1]} : vector<2x1024xf32> to vector<2x256xf32>
    %322 = arith.negf %321 : vector<2x256xf32>
    %323 = math.exp %322 : vector<2x256xf32>
    %cst_209 = arith.constant 1.000000e+00 : f32
    %324 = vector.broadcast %cst_209 : f32 to vector<2x256xf32>
    %325 = arith.addf %324, %323 : vector<2x256xf32>
    %326 = arith.divf %324, %325 : vector<2x256xf32>
    %327 = arith.mulf %318, %300 : vector<2x256xf32>
    %328 = arith.mulf %312, %320 : vector<2x256xf32>
    %329 = arith.addf %327, %328 : vector<2x256xf32>
    %330 = math.tanh %329 : vector<2x256xf32>
    %331 = arith.mulf %326, %330 : vector<2x256xf32>
    %c10 = arith.constant 10 : index
    %c0_210 = arith.constant 0 : index
    %332 = vector.load %arg12[%c10, %c0_210] : memref<16x1024xf32, #tpu.memory_space<vmem>>, vector<2x1024xf32>
    %333 = arith.truncf %331 : vector<2x256xf32> to vector<2x256xbf16>
    %cst_211 = arith.constant dense<0.000000e+00> : vector<2x1024xf32>
    %334 = tpu.matmul %333, %184, %cst_211 {dimension_numbers = #tpu.dot_dimension_numbers<[1], [0], [0], [1], [0, 0, 1, 1], [], []>} : vector<2x256xbf16>, vector<256x1024xbf16>, vector<2x1024xf32> -> vector<2x1024xf32>
    %335 = arith.addf %332, %334 : vector<2x1024xf32>
    %336 = vector.extract_strided_slice %335 {offsets = [0, 0], sizes = [2, 256], strides = [1, 1]} : vector<2x1024xf32> to vector<2x256xf32>
    %337 = arith.negf %336 : vector<2x256xf32>
    %338 = math.exp %337 : vector<2x256xf32>
    %cst_212 = arith.constant 1.000000e+00 : f32
    %339 = vector.broadcast %cst_212 : f32 to vector<2x256xf32>
    %340 = arith.addf %339, %338 : vector<2x256xf32>
    %341 = arith.divf %339, %340 : vector<2x256xf32>
    %342 = vector.extract_strided_slice %335 {offsets = [0, 256], sizes = [2, 256], strides = [1, 1]} : vector<2x1024xf32> to vector<2x256xf32>
    %343 = arith.negf %342 : vector<2x256xf32>
    %344 = math.exp %343 : vector<2x256xf32>
    %cst_213 = arith.constant 1.000000e+00 : f32
    %345 = vector.broadcast %cst_213 : f32 to vector<2x256xf32>
    %346 = arith.addf %345, %344 : vector<2x256xf32>
    %347 = arith.divf %345, %346 : vector<2x256xf32>
    %348 = vector.extract_strided_slice %335 {offsets = [0, 512], sizes = [2, 256], strides = [1, 1]} : vector<2x1024xf32> to vector<2x256xf32>
    %349 = math.tanh %348 : vector<2x256xf32>
    %350 = vector.extract_strided_slice %335 {offsets = [0, 768], sizes = [2, 256], strides = [1, 1]} : vector<2x1024xf32> to vector<2x256xf32>
    %351 = arith.negf %350 : vector<2x256xf32>
    %352 = math.exp %351 : vector<2x256xf32>
    %cst_214 = arith.constant 1.000000e+00 : f32
    %353 = vector.broadcast %cst_214 : f32 to vector<2x256xf32>
    %354 = arith.addf %353, %352 : vector<2x256xf32>
    %355 = arith.divf %353, %354 : vector<2x256xf32>
    %356 = arith.mulf %347, %329 : vector<2x256xf32>
    %357 = arith.mulf %341, %349 : vector<2x256xf32>
    %358 = arith.addf %356, %357 : vector<2x256xf32>
    %359 = math.tanh %358 : vector<2x256xf32>
    %360 = arith.mulf %355, %359 : vector<2x256xf32>
    %c12 = arith.constant 12 : index
    %c0_215 = arith.constant 0 : index
    %361 = vector.load %arg12[%c12, %c0_215] : memref<16x1024xf32, #tpu.memory_space<vmem>>, vector<2x1024xf32>
    %362 = arith.truncf %360 : vector<2x256xf32> to vector<2x256xbf16>
    %cst_216 = arith.constant dense<0.000000e+00> : vector<2x1024xf32>
    %363 = tpu.matmul %362, %184, %cst_216 {dimension_numbers = #tpu.dot_dimension_numbers<[1], [0], [0], [1], [0, 0, 1, 1], [], []>} : vector<2x256xbf16>, vector<256x1024xbf16>, vector<2x1024xf32> -> vector<2x1024xf32>
    %364 = arith.addf %361, %363 : vector<2x1024xf32>
    %365 = vector.extract_strided_slice %364 {offsets = [0, 0], sizes = [2, 256], strides = [1, 1]} : vector<2x1024xf32> to vector<2x256xf32>
    %366 = arith.negf %365 : vector<2x256xf32>
    %367 = math.exp %366 : vector<2x256xf32>
    %cst_217 = arith.constant 1.000000e+00 : f32
    %368 = vector.broadcast %cst_217 : f32 to vector<2x256xf32>
    %369 = arith.addf %368, %367 : vector<2x256xf32>
    %370 = arith.divf %368, %369 : vector<2x256xf32>
    %371 = vector.extract_strided_slice %364 {offsets = [0, 256], sizes = [2, 256], strides = [1, 1]} : vector<2x1024xf32> to vector<2x256xf32>
    %372 = arith.negf %371 : vector<2x256xf32>
    %373 = math.exp %372 : vector<2x256xf32>
    %cst_218 = arith.constant 1.000000e+00 : f32
    %374 = vector.broadcast %cst_218 : f32 to vector<2x256xf32>
    %375 = arith.addf %374, %373 : vector<2x256xf32>
    %376 = arith.divf %374, %375 : vector<2x256xf32>
    %377 = vector.extract_strided_slice %364 {offsets = [0, 512], sizes = [2, 256], strides = [1, 1]} : vector<2x1024xf32> to vector<2x256xf32>
    %378 = math.tanh %377 : vector<2x256xf32>
    %379 = vector.extract_strided_slice %364 {offsets = [0, 768], sizes = [2, 256], strides = [1, 1]} : vector<2x1024xf32> to vector<2x256xf32>
    %380 = arith.negf %379 : vector<2x256xf32>
    %381 = math.exp %380 : vector<2x256xf32>
    %cst_219 = arith.constant 1.000000e+00 : f32
    %382 = vector.broadcast %cst_219 : f32 to vector<2x256xf32>
    %383 = arith.addf %382, %381 : vector<2x256xf32>
    %384 = arith.divf %382, %383 : vector<2x256xf32>
    %385 = arith.mulf %376, %358 : vector<2x256xf32>
    %386 = arith.mulf %370, %378 : vector<2x256xf32>
    %387 = arith.addf %385, %386 : vector<2x256xf32>
    %388 = math.tanh %387 : vector<2x256xf32>
    %389 = arith.mulf %384, %388 : vector<2x256xf32>
    %c14 = arith.constant 14 : index
    %c0_220 = arith.constant 0 : index
    %390 = vector.load %arg12[%c14, %c0_220] : memref<16x1024xf32, #tpu.memory_space<vmem>>, vector<2x1024xf32>
    %391 = arith.truncf %389 : vector<2x256xf32> to vector<2x256xbf16>
    %cst_221 = arith.constant dense<0.000000e+00> : vector<2x1024xf32>
    %392 = tpu.matmul %391, %184, %cst_221 {dimension_numbers = #tpu.dot_dimension_numbers<[1], [0], [0], [1], [0, 0, 1, 1], [], []>} : vector<2x256xbf16>, vector<256x1024xbf16>, vector<2x1024xf32> -> vector<2x1024xf32>
    %393 = arith.addf %390, %392 : vector<2x1024xf32>
    %394 = vector.extract_strided_slice %393 {offsets = [0, 0], sizes = [2, 256], strides = [1, 1]} : vector<2x1024xf32> to vector<2x256xf32>
    %395 = arith.negf %394 : vector<2x256xf32>
    %396 = math.exp %395 : vector<2x256xf32>
    %cst_222 = arith.constant 1.000000e+00 : f32
    %397 = vector.broadcast %cst_222 : f32 to vector<2x256xf32>
    %398 = arith.addf %397, %396 : vector<2x256xf32>
    %399 = arith.divf %397, %398 : vector<2x256xf32>
    %400 = vector.extract_strided_slice %393 {offsets = [0, 256], sizes = [2, 256], strides = [1, 1]} : vector<2x1024xf32> to vector<2x256xf32>
    %401 = arith.negf %400 : vector<2x256xf32>
    %402 = math.exp %401 : vector<2x256xf32>
    %cst_223 = arith.constant 1.000000e+00 : f32
    %403 = vector.broadcast %cst_223 : f32 to vector<2x256xf32>
    %404 = arith.addf %403, %402 : vector<2x256xf32>
    %405 = arith.divf %403, %404 : vector<2x256xf32>
    %406 = vector.extract_strided_slice %393 {offsets = [0, 512], sizes = [2, 256], strides = [1, 1]} : vector<2x1024xf32> to vector<2x256xf32>
    %407 = math.tanh %406 : vector<2x256xf32>
    %408 = vector.extract_strided_slice %393 {offsets = [0, 768], sizes = [2, 256], strides = [1, 1]} : vector<2x1024xf32> to vector<2x256xf32>
    %409 = arith.negf %408 : vector<2x256xf32>
    %410 = math.exp %409 : vector<2x256xf32>
    %cst_224 = arith.constant 1.000000e+00 : f32
    %411 = vector.broadcast %cst_224 : f32 to vector<2x256xf32>
    %412 = arith.addf %411, %410 : vector<2x256xf32>
    %413 = arith.divf %411, %412 : vector<2x256xf32>
    %414 = arith.mulf %405, %387 : vector<2x256xf32>
    %415 = arith.mulf %399, %407 : vector<2x256xf32>
    %416 = arith.addf %414, %415 : vector<2x256xf32>
    %417 = math.tanh %416 : vector<2x256xf32>
    %418 = arith.mulf %413, %417 : vector<2x256xf32>
    %419 = vector.extract_strided_slice %215 {offsets = [0, 0], sizes = [1, 256], strides = [1, 1]} : vector<2x256xf32> to vector<1x256xf32>
    %420 = vector.extract_strided_slice %244 {offsets = [0, 0], sizes = [1, 256], strides = [1, 1]} : vector<2x256xf32> to vector<1x256xf32>
    %421 = vector.extract_strided_slice %273 {offsets = [0, 0], sizes = [1, 256], strides = [1, 1]} : vector<2x256xf32> to vector<1x256xf32>
    %422 = vector.extract_strided_slice %302 {offsets = [0, 0], sizes = [1, 256], strides = [1, 1]} : vector<2x256xf32> to vector<1x256xf32>
    %423 = vector.extract_strided_slice %331 {offsets = [0, 0], sizes = [1, 256], strides = [1, 1]} : vector<2x256xf32> to vector<1x256xf32>
    %424 = vector.extract_strided_slice %360 {offsets = [0, 0], sizes = [1, 256], strides = [1, 1]} : vector<2x256xf32> to vector<1x256xf32>
    %425 = vector.extract_strided_slice %389 {offsets = [0, 0], sizes = [1, 256], strides = [1, 1]} : vector<2x256xf32> to vector<1x256xf32>
    %426 = vector.extract_strided_slice %418 {offsets = [0, 0], sizes = [1, 256], strides = [1, 1]} : vector<2x256xf32> to vector<1x256xf32>
    %427 = vector.extract_strided_slice %215 {offsets = [1, 0], sizes = [1, 256], strides = [1, 1]} : vector<2x256xf32> to vector<1x256xf32>
    %428 = vector.extract_strided_slice %244 {offsets = [1, 0], sizes = [1, 256], strides = [1, 1]} : vector<2x256xf32> to vector<1x256xf32>
    %429 = vector.extract_strided_slice %273 {offsets = [1, 0], sizes = [1, 256], strides = [1, 1]} : vector<2x256xf32> to vector<1x256xf32>
    %430 = vector.extract_strided_slice %302 {offsets = [1, 0], sizes = [1, 256], strides = [1, 1]} : vector<2x256xf32> to vector<1x256xf32>
    %431 = vector.extract_strided_slice %331 {offsets = [1, 0], sizes = [1, 256], strides = [1, 1]} : vector<2x256xf32> to vector<1x256xf32>
    %432 = vector.extract_strided_slice %360 {offsets = [1, 0], sizes = [1, 256], strides = [1, 1]} : vector<2x256xf32> to vector<1x256xf32>
    %433 = vector.extract_strided_slice %389 {offsets = [1, 0], sizes = [1, 256], strides = [1, 1]} : vector<2x256xf32> to vector<1x256xf32>
    %434 = vector.extract_strided_slice %418 {offsets = [1, 0], sizes = [1, 256], strides = [1, 1]} : vector<2x256xf32> to vector<1x256xf32>
    %435 = tpu.concatenate %419, %420, %421, %422, %423, %424, %425, %426, %427, %428, %429, %430, %431, %432, %433, %434 in 0 : vector<1x256xf32>, vector<1x256xf32>, vector<1x256xf32>, vector<1x256xf32>, vector<1x256xf32>, vector<1x256xf32>, vector<1x256xf32>, vector<1x256xf32>, vector<1x256xf32>, vector<1x256xf32>, vector<1x256xf32>, vector<1x256xf32>, vector<1x256xf32>, vector<1x256xf32>, vector<1x256xf32>, vector<1x256xf32> -> vector<16x256xf32>
    %436 = arith.truncf %435 : vector<16x256xf32> to vector<16x256xbf16>
    %c0_225 = arith.constant 0 : index
    %c0_226 = arith.constant 0 : index
    %437 = vector.load %arg8[%c0_225, %c0_226] : memref<16x256xbf16, #tpu.memory_space<vmem>>, vector<16x256xbf16>
    tpu.vector_store %arg8[%c0_225, %c0_226], %436 {strides = array<i32>} : memref<16x256xbf16, #tpu.memory_space<vmem>>, vector<16x256xbf16>,
    %c0_227 = arith.constant 0 : index
    %c0_228 = arith.constant 0 : index
    %438 = vector.load %arg9[%c0_227, %c0_228] : memref<2x256xf32, #tpu.memory_space<vmem>>, vector<2x256xf32>
    tpu.vector_store %arg9[%c0_227, %c0_228], %418 {strides = array<i32>} : memref<2x256xf32, #tpu.memory_space<vmem>>, vector<2x256xf32>,
    %c0_229 = arith.constant 0 : index
    %c0_230 = arith.constant 0 : index
    %439 = vector.load %arg10[%c0_229, %c0_230] : memref<2x256xf32, #tpu.memory_space<vmem>>, vector<2x256xf32>
    tpu.vector_store %arg10[%c0_229, %c0_230], %416 {strides = array<i32>} : memref<2x256xf32, #tpu.memory_space<vmem>>, vector<2x256xf32>,
    return
  }
  func.func @transform_1(%arg0: i32, %arg1: memref<2x8xi32, #tpu.memory_space<smem>>) -> (i32, i32) {
    %c0_i32 = arith.constant 0 : i32
    %c0_i32_0 = arith.constant 0 : i32
    %c0_i32_1 = arith.constant 0 : i32
    return %c0_i32, %c0_i32_0 : i32, i32
  }
  func.func @transform_2(%arg0: i32, %arg1: memref<2x8xi32, #tpu.memory_space<smem>>) -> (i32, i32) {
    %c0_i32 = arith.constant 0 : i32
    %c0_i32_0 = arith.constant 0 : i32
    %c0_i32_1 = arith.constant 0 : i32
    return %c0_i32, %c0_i32_0 : i32, i32
  }
  func.func @transform_3(%arg0: i32, %arg1: memref<2x8xi32, #tpu.memory_space<smem>>) -> (i32, i32) {
    %c0_i32 = arith.constant 0 : i32
    %c0_i32_0 = arith.constant 0 : i32
    %c0_i32_1 = arith.constant 0 : i32
    return %c0_i32, %c0_i32_0 : i32, i32
  }
  func.func @transform_4(%arg0: i32, %arg1: memref<2x8xi32, #tpu.memory_space<smem>>) -> (i32, i32) {
    %c0_i32 = arith.constant 0 : i32
    %c0_i32_0 = arith.constant 0 : i32
    %c0_i32_1 = arith.constant 0 : i32
    return %c0_i32, %c0_i32_0 : i32, i32
  }
  func.func @transform_5(%arg0: i32, %arg1: memref<2x8xi32, #tpu.memory_space<smem>>) -> (i32, i32) {
    %c0_i32 = arith.constant 0 : i32
    %c0_i32_0 = arith.constant 0 : i32
    %c0_i32_1 = arith.constant 0 : i32
    return %c0_i32, %c0_i32_0 : i32, i32
  }
  func.func @transform_6(%arg0: i32, %arg1: memref<2x8xi32, #tpu.memory_space<smem>>) -> (i32, i32) {
    %c0_i32 = arith.constant 0 : i32
    %c0_i32_0 = arith.constant 0 : i32
    %c0_i32_1 = arith.constant 0 : i32
    return %c0_i32, %c0_i32_0 : i32, i32
  }
  func.func @transform_7(%arg0: i32, %arg1: memref<2x8xi32, #tpu.memory_space<smem>>) -> (i32, i32) {
    %c0_i32 = arith.constant 0 : i32
    %c0_i32_0 = arith.constant 0 : i32
    %c0_i32_1 = arith.constant 0 : i32
    return %c0_i32, %c0_i32_0 : i32, i32
  }
  func.func @transform_8(%arg0: i32, %arg1: memref<2x8xi32, #tpu.memory_space<smem>>) -> (i32, i32) {
    %c0_i32 = arith.constant 0 : i32
    %c0_i32_0 = arith.constant 0 : i32
    %c0_i32_1 = arith.constant 0 : i32
    return %c0_i32, %c0_i32_0 : i32, i32
  }
}

</mosaic_0001>

<bundles_post_ra>
// kernel: tpu_custom_call.1
= control target key start
LH: loop header
LB: loop body
LE: loop exit
PB: predicated region body
PF: predicated region fallthrough
CT: control target
= control target key end

     0   :  { %s7474_s0 = inlined_call_operand.hbm [shape: s32[2,8], index: 0, kind: input, shape index: {}]   ;;  %s7475_s1 = inlined_call_operand.hbm [shape: f32[2048,128], index: 1, kind: input, shape index: {}]   ;;  %s7476_s2 = inlined_call_operand.hbm [shape: bf16[128,1024], index: 2, kind: input, shape index: {}]   ;;  %s7477_s3 = inlined_call_operand.hbm [shape: bf16[256,1024], index: 3, kind: input, shape index: {}]   ;;  %s7478_s4 = inlined_call_operand.vmem [shape: f32[1,1024], index: 4, kind: input, shape index: {}]   ;;  %s7479_s5 = inlined_call_operand.vmem [shape: f32[2,256], index: 5, kind: input, shape index: {}]   ;;  %s7480_s6 = inlined_call_operand.vmem [shape: f32[2,256], index: 6, kind: input, shape index: {}]   ;;  %s7481_s7 = inlined_call_operand.hbm [shape: bf16[16,256], index: 7, kind: output, shape index: {0}]   ;;  %s7482_s8 = inlined_call_operand.hbm [shape: f32[2,256], index: 8, kind: output, shape index: {1}]   ;;  %s7483_s9 = inlined_call_operand.hbm [shape: f32[2,256], index: 9, kind: output, shape index: {2}]  }
   0x1   :  { %s4898_s11 = scalar_lea.hbm %s7474_s0, 32 }
   0x2   :  { %p4899_p0 = scmp.ne.s32.totalorder %s7474_s0, %s4898_s11  ;;  %p4902_p1 = scmp.lt.u32.totalorder %s4898_s11, %s7474_s0 }
   0x4   :  { %p4904_p2 = pnand %p4902_p1, %p4899_p0 }
   0x6   :  { %4907 = shalt.err (!%p4904_p2)  }
   0x7   :  { %s5444_s16 = smov [#allocation6]  }
   0x8   :  { %16 = dma.hbm_to_smem %s7474_s0, 32, %s5444_s16, [#allocation5] }
   0x9   :  { %5402 = dma.done.wait [#allocation5], 32 }
   0xa   :  { %5403 = vsyncadd [#allocation5], 4294967264 }
   0xb   :  { %18 = sfence }
   0xc   :  { %19 = vsyncpa [#allocation8], 0 }
   0xd   :  { %20 = vsyncpa [#allocation11], 0 }
   0xe   :  { %21 = vsyncpa [#allocation9], 0 }
   0xf   :  { %22 = vsyncpa [#allocation14], 0  ;;  %s5445_s19 = smov [#allocation7]   ;;  %s4908_s23 = scalar_lea.hbm %s7476_s2, 8192 }
  0x10   :  { %s28_s20 = sshll.u32 %s5445_s19, 4  ;;  %p4909_p3 = scmp.ne.s32.totalorder %s7476_s2, %s4908_s23  ;;  %s29_s20 = int_to_ptr.vmem [resolvable:$true] %s28_s20 }
  0x11   :  { %p4912_p4 = scmp.lt.u32.totalorder %s4908_s23, %s7476_s2 }
  0x13   :  { %p4914_p5 = pnand %p4912_p4, %p4909_p3 }
  0x15   :  { %4917 = shalt.err (!%p4914_p5)
}
  0x16   :  { %s4918_s27 = scalar_lea.vmem %s29_s20, 8192  ;;  %p4923_p7 = scmp.lt.s32.totalorder %s29_s20, %s29_s20 }
  0x17   :  { %p4919_p6 = scmp.ne.s32.totalorder %s29_s20, %s4918_s27  ;;  %p4924_p8 = scmp.lt.s32.totalorder %s4918_s27, %s4918_s27 }
  0x19   :  { %p4925_p9 = por %p4924_p8, %p4923_p7 }
  0x1b   :  { %p4926_p10 = pnand %p4925_p9, %p4919_p6 }
  0x1d   :  { %4929 = shalt.err (!%p4926_p10)
}
  0x1e   :  { %s5446_s28 = smov 512   ;;  %s5447_s29 = smov 32  }
  0x1f   :  { %34 = dma.hbm_to_vmem [thread:$0]  %s7476_s2, 8192, %s29_s20, [#allocation8], %s5446_s28, %s5446_s28, %s5447_s29  }
  0x20   :  { %s5448_s11 = smov [#allocation10]   ;;  %s4930_s15 = scalar_lea.hbm %s7477_s3, 16384 }
  0x21   :  { %s40_s12 = sshll.u32 %s5448_s11, 4  ;;  %p4931_p11 = scmp.ne.s32.totalorder %s7477_s3, %s4930_s15  ;;  %s41_s12 = int_to_ptr.vmem [resolvable:$true] %s40_s12 }
  0x22   :  { %p4934_p12 = scmp.lt.u32.totalorder %s4930_s15, %s7477_s3 }
  0x24   :  { %p4936_p13 = pnand %p4934_p12, %p4931_p11 }
  0x26   :  { %4939 = shalt.err (!%p4936_p13)
}
  0x27   :  { %s4940_s21 = scalar_lea.vmem %s41_s12, 16384  ;;  %p4945_p1 = scmp.lt.s32.totalorder %s41_s12, %s41_s12 }
  0x28   :  { %p4941_p0 = scmp.ne.s32.totalorder %s41_s12, %s4940_s21  ;;  %p4946_p2 = scmp.lt.s32.totalorder %s4940_s21, %s4940_s21 }
  0x2a   :  { %p4947_p3 = por %p4946_p2, %p4945_p1 }
  0x2c   :  { %p4948_p4 = pnand %p4947_p3, %p4941_p0 }
  0x2e   :  { %4951 = shalt.err (!%p4948_p4)
}
  0x2f   :  { %46 = dma.hbm_to_vmem [thread:$0]  %s7477_s3, 16384, %s41_s12, [#allocation11], %s5446_s28, %s5446_s28, %s5447_s29  }
  0x30   :  { %5404 = dma.done.wait [#allocation8], 8192  }
  0x31   :  { %5405 = vsyncadd [#allocation8], 4294959104 }
  0x32   :  { %5406 = dma.done.wait [#allocation11], 16384  }
  0x33   :  { %5407 = vsyncadd [#allocation11], 4294950912  ;;  %s60_s22 = sld [smem:[#allocation6]]  ;;  %s5449_s23 = smov [#allocation2]  }
  0x34   :  { %s149_s24 = sshll.u32 %s5449_s23, 4  ;;  %s4214_s25 = sld [smem:[#allocation6 + $0x80]]  ;;  %s5558_s24 = int_to_ptr.vmem [resolvable:$true] %s149_s24 }
  0x35   :  { %s5450_s26 = smov [#allocation2 + $0x1]   ;;  %s5560_s27 = sld [smem:[#allocation6 + $0x1]] }
  0x36   :  { %s164_s0 = sshll.u32 %s5450_s26, 4  ;;  %s5451_s30 = smov [#allocation2 + $0x2]   ;;  %s5562_s0 = int_to_ptr.vmem [resolvable:$true] %s164_s0 }
  0x37   :  { %s179_s10 = sshll.u32 %s5451_s30, 4  ;;  %s5564_s3 = sld [smem:[#allocation6 + $0x81]]  ;;  %s5566_s10 = int_to_ptr.vmem [resolvable:$true] %s179_s10 }
  0x38   :  { %s5575_s17 = scalar_lea.hbm %s7475_s1, 32768 }
  0x39   :  { %p61_p5 = scmp.gt.s32.totalorder %s60_s22, 0  ;;  %p4209_p6 = scmp.lt.s32.totalorder %s60_s22, 2047 }
  0x3a   :  { %p66_p7 = scmp.gt.s32.totalorder %s4214_s25, 0  ;;  %p4215_p8 = scmp.lt.s32.totalorder %s4214_s25, 2047 }
  0x3b   :  { %s8486_s22 = smov (!%p61_p5, %s60_s22), 0  ;;  %p71_p9 = scmp.gt.s32.totalorder %s5560_s27, 0 }
  0x3c   :  { %s8488_s25 = smov (!%p66_p7, %s4214_s25), 0  ;;  %s8490_s22 = smov (!%p4209_p6, %s8486_s22), 2047 }
  0x3d   :  { %s8492_s25 = smov (!%p4215_p8, %s8488_s25), 2047  ;;  %s4304_s28 = sshll.u32 %s8490_s22, 4 }
  0x3e   :  { %s141_s12 = scalar_lea.hbm %s7475_s1, %s4304_s28  ;;  %s4305_s13 = sshll.u32 %s8492_s25, 4 }
  0x3f   :  { %s4952_s14 = scalar_lea.hbm %s141_s12, 16  ;;  %p4955_p11 = scmp.lt.u32.totalorder %s141_s12, %s7475_s1 }
  0x40   :  { %p4953_p10 = scmp.ne.s32.totalorder %s141_s12, %s4952_s14  ;;  %p4956_p12 = scmp.lt.u32.totalorder %s5575_s17, %s4952_s14 }
  0x41   :  { %p4958_p0 = scmp.lt.u32.totalorder %s4952_s14, %s141_s12 }
  0x42   :  { %p4957_p13 = por %p4956_p12, %p4955_p11 }
  0x44   :  { %p4959_p1 = por %p4958_p0, %p4957_p13 }
  0x46   :  { %p4960_p2 = pnand %p4959_p1, %p4953_p10 }
  0x48   :  { %4963 = shalt.err (!%p4960_p2)  }
  0x49   :  { %s4964_s21 = scalar_lea.vmem %s5558_s24, 16  ;;  %s5584_s2 = scalar_lea.vmem %s5558_s24, 256 }
  0x4a   :  { %p4965_p3 = scmp.ne.s32.totalorder %s5558_s24, %s4964_s21  ;;  %p4969_p4 = scmp.lt.s32.totalorder %s5558_s24, %s5558_s24 }
  0x4b   :  { %p4970_p5 = scmp.lt.s32.totalorder %s5584_s2, %s4964_s21 }
  0x4d   :  { %p4971_p6 = por %p4970_p5, %p4969_p4 }
  0x4f   :  { %p4972_p7 = pnand %p4971_p6, %p4965_p3 }
  0x51   :  { %4975 = shalt.err (!%p4972_p7)  }
  0x52   :  { %152 = dma.hbm_to_vmem [thread:$0]  %s141_s12, 16, %s5558_s24, [#allocation4] }
  0x53   :  { %s154_s23 = scalar_lea.hbm %s7475_s1, %s4305_s13  ;;  %p4221_p8 = scmp.lt.s32.totalorder %s5560_s27, 2047 }
  0x54   :  { %s4976_s25 = scalar_lea.hbm %s154_s23, 16  ;;  %p4979_p11 = scmp.lt.u32.totalorder %s154_s23, %s7475_s1 }
  0x55   :  { %p4977_p10 = scmp.ne.s32.totalorder %s154_s23, %s4976_s25  ;;  %p4980_p12 = scmp.lt.u32.totalorder %s5575_s17, %s4976_s25 }
  0x56   :  { %p4982_p0 = scmp.lt.u32.totalorder %s4976_s25, %s154_s23 }
  0x57   :  { %p4981_p13 = por %p4980_p12, %p4979_p11 }
  0x59   :  { %p4983_p1 = por %p4982_p0, %p4981_p13 }
  0x5b   :  { %p4984_p2 = pnand %p4983_p1, %p4977_p10 }
  0x5d   :  { %4987 = shalt.err (!%p4984_p2)  }
  0x5e   :  { %s4988_s28 = scalar_lea.vmem %s5562_s0, 16  ;;  %p4993_p4 = scmp.lt.s32.totalorder %s5562_s0, %s5558_s24 }
  0x5f   :  { %p4989_p3 = scmp.ne.s32.totalorder %s5562_s0, %s4988_s28  ;;  %p4994_p5 = scmp.lt.s32.totalorder %s5584_s2, %s4988_s28 }
  0x61   :  { %p4995_p6 = por %p4994_p5, %p4993_p4 }
  0x63   :  { %p4996_p7 = pnand %p4995_p6, %p4989_p3 }
  0x65   :  { %4999 = shalt.err (!%p4996_p7)  }
  0x66   :  { %167 = dma.hbm_to_vmem [thread:$0]  %s154_s23, 16, %s5562_s0, [#allocation4 + $0x1] }
  0x67   :  { %s72_s29 = scalar_select %p71_p9, %s5560_s27, 0 }
  0x68   :  { %p76_p10 = scmp.gt.s32.totalorder %s5564_s3, 0  ;;  %p4227_p11 = scmp.lt.s32.totalorder %s5564_s3, 2047 }
  0x69   :  { %s8494_s29 = smov (!%p4221_p8, %s72_s29), 2047  ;;  %s5452_s13 = smov [#allocation2 + $0x3]  }
  0x6a   :  { %s77_s11 = scalar_select %p76_p10, %s5564_s3, 0 }
  0x6b   :  { %s4306_s12 = sshll.u32 %s8494_s29, 4  ;;  %s194_s14 = sshll.u32 %s5452_s13, 4  ;;  %s5615_s14 = int_to_ptr.vmem [resolvable:$true] %s194_s14 }
  0x6c   :  { %s169_s18 = scalar_lea.hbm %s7475_s1, %s4306_s12 }
  0x6d   :  { %s5000_s19 = scalar_lea.hbm %s169_s18, 16  ;;  %p5003_p9 = scmp.lt.u32.totalorder %s169_s18, %s7475_s1 }
  0x6e   :  { %p5001_p12 = scmp.ne.s32.totalorder %s169_s18, %s5000_s19  ;;  %p5004_p13 = scmp.lt.u32.totalorder %s5575_s17, %s5000_s19 }
  0x6f   :  { %p5006_p1 = scmp.lt.u32.totalorder %s5000_s19, %s169_s18 }
  0x70   :  { %p5005_p0 = por %p5004_p13, %p5003_p9 }
  0x72   :  { %p5007_p8 = por %p5006_p1, %p5005_p0 }
  0x74   :  { %p5008_p2 = pnand %p5007_p8, %p5001_p12 }
  0x76   :  { %5011 = shalt.err (!%p5008_p2)  }
  0x77   :  { %s5012_s27 = scalar_lea.vmem %s5566_s10, 16  ;;  %p5017_p4 = scmp.lt.s32.totalorder %s5566_s10, %s5558_s24 }
  0x78   :  { %p5013_p3 = scmp.ne.s32.totalorder %s5566_s10, %s5012_s27  ;;  %p5018_p5 = scmp.lt.s32.totalorder %s5584_s2, %s5012_s27 }
  0x7a   :  { %p5019_p6 = por %p5018_p5, %p5017_p4 }
  0x7c   :  { %p5020_p7 = pnand %p5019_p6, %p5013_p3 }
  0x7e   :  { %5023 = shalt.err (!%p5020_p7)  }
  0x7f   :  { %182 = dma.hbm_to_vmem [thread:$0]  %s169_s18, 16, %s5566_s10, [#allocation4 + $0x2] }
  0x80   :  { %s8496_s11 = smov (!%p4227_p11, %s77_s11), 2047  ;;  %s5629_s20 = sld [smem:[#allocation6 + $0x2]] }
  0x81   :  { %s4307_s22 = sshll.u32 %s8496_s11, 4  ;;  %s5453_s23 = smov [#allocation2 + $0x4]  }
  0x82   :  { %s209_s25 = sshll.u32 %s5453_s23, 4  ;;  %s184_s28 = scalar_lea.hbm %s7475_s1, %s4307_s22  ;;  %s5634_s25 = int_to_ptr.vmem [resolvable:$true] %s209_s25 }
  0x83   :  { %s5024_s29 = scalar_lea.hbm %s184_s28, 16  ;;  %p5027_p12 = scmp.lt.u32.totalorder %s184_s28, %s7475_s1 }
  0x84   :  { %p5025_p10 = scmp.ne.s32.totalorder %s184_s28, %s5024_s29  ;;  %p5028_p9 = scmp.lt.u32.totalorder %s5575_s17, %s5024_s29 }
  0x85   :  { %p5030_p11 = scmp.lt.u32.totalorder %s5024_s29, %s184_s28 }
  0x86   :  { %p5029_p13 = por %p5028_p9, %p5027_p12 }
  0x88   :  { %p5031_p0 = por %p5030_p11, %p5029_p13 }
  0x8a   :  { %p5032_p1 = pnand %p5031_p0, %p5025_p10 }
  0x8c   :  { %5035 = shalt.err (!%p5032_p1)  }
  0x8d   :  { %s5036_s10 = scalar_lea.vmem %s5615_s14, 16  ;;  %p5041_p2 = scmp.lt.s32.totalorder %s5615_s14, %s5558_s24 }
  0x8e   :  { %p5037_p8 = scmp.ne.s32.totalorder %s5615_s14, %s5036_s10  ;;  %p5042_p3 = scmp.lt.s32.totalorder %s5584_s2, %s5036_s10 }
  0x90   :  { %p5043_p4 = por %p5042_p3, %p5041_p2 }
  0x92   :  { %p5044_p5 = pnand %p5043_p4, %p5037_p8 }
  0x94   :  { %5047 = shalt.err (!%p5044_p5)  }
  0x95   :  { %197 = dma.hbm_to_vmem [thread:$0]  %s184_s28, 16, %s5615_s14, [#allocation4 + $0x3] }
  0x96   :  { %s5646_s3 = sld [smem:[#allocation6 + $0x82]]  ;;  %s5454_s11 = smov [#allocation2 + $0x5]  }
  0x97   :  { %s224_s15 = sshll.u32 %s5454_s11, 4  ;;  %s5648_s16 = sld [smem:[#allocation6 + $0x3]]  ;;  %s5652_s15 = int_to_ptr.vmem [resolvable:$true] %s224_s15 }
  0x98   :  { %p81_p6 = scmp.gt.s32.totalorder %s5629_s20, 0  ;;  %p4233_p7 = scmp.lt.s32.totalorder %s5629_s20, 2047 }
  0x99   :  { %s5455_s18 = smov [#allocation2 + $0x6]   ;;  %s5657_s14 = sld [smem:[#allocation6 + $0x83]] }
  0x9a   :  { %s8498_s20 = smov (!%p81_p6, %s5629_s20), 0  ;;  %s5655_s19 = sshll.u32 %s5455_s18, 4  ;;  %s5687_s19 = int_to_ptr.vmem [resolvable:$true] %s5655_s19 }
  0x9b   :  { %s8500_s20 = smov (!%p4233_p7, %s8498_s20), 2047 }
  0x9c   :  { %p86_p10 = scmp.gt.s32.totalorder %s5646_s3, 0  ;;  %s4308_s21 = sshll.u32 %s8500_s20, 4 }
  0x9d   :  { %p91_p9 = scmp.gt.s32.totalorder %s5648_s16, 0  ;;  %s199_s22 = scalar_lea.hbm %s7475_s1, %s4308_s21 }
  0x9e   :  { %s5048_s23 = scalar_lea.hbm %s199_s22, 16  ;;  %p5051_p0 = scmp.lt.u32.totalorder %s199_s22, %s7475_s1 }
  0x9f   :  { %p5049_p11 = scmp.ne.s32.totalorder %s199_s22, %s5048_s23  ;;  %p5052_p1 = scmp.lt.u32.totalorder %s5575_s17, %s5048_s23 }
  0xa0   :  { %p5054_p2 = scmp.lt.u32.totalorder %s5048_s23, %s199_s22 }
  0xa1   :  { %p5053_p8 = por %p5052_p1, %p5051_p0 }
  0xa3   :  { %p5055_p3 = por %p5054_p2, %p5053_p8 }
  0xa5   :  { %p5056_p4 = pnand %p5055_p3, %p5049_p11 }
  0xa7   :  { %5059 = shalt.err (!%p5056_p4)  }
  0xa8   :  { %s5060_s20 = scalar_lea.vmem %s5634_s25, 16  ;;  %p5065_p6 = scmp.lt.s32.totalorder %s5634_s25, %s5558_s24 }
  0xa9   :  { %p5061_p5 = scmp.ne.s32.totalorder %s5634_s25, %s5060_s20  ;;  %p5066_p7 = scmp.lt.s32.totalorder %s5584_s2, %s5060_s20 }
  0xab   :  { %p5067_p13 = por %p5066_p7, %p5065_p6 }
  0xad   :  { %p5068_p12 = pnand %p5067_p13, %p5061_p5 }
  0xaf   :  { %5071 = shalt.err (!%p5068_p12)  }
  0xb0   :  { %212 = dma.hbm_to_vmem [thread:$0]  %s199_s22, 16, %s5634_s25, [#allocation4 + $0x4] }
  0xb1   :  { %s87_s28 = scalar_select %p86_p10, %s5646_s3, 0 }
  0xb2   :  { %s92_s29 = scalar_select %p91_p9, %s5648_s16, 0 }
  0xb3   :  { %p7758_p11 = scmp.lt.s32.totalorder %s5646_s3, 2047  ;;  %p7759_p0 = scmp.lt.s32.totalorder %s5648_s16, 2047 }
  0xb5   :  { %s8502_s28 = smov (!%p7758_p11, %s87_s28), 2047  ;;  %s8504_s29 = smov (!%p7759_p0, %s92_s29), 2047 }
  0xb6   :  { %s4309_s12 = sshll.u32 %s8502_s28, 4  ;;  %s4310_s18 = sshll.u32 %s8504_s29, 4 }
  0xb7   :  { %s214_s11 = scalar_lea.hbm %s7475_s1, %s4309_s12 }
  0xb8   :  { %s5072_s21 = scalar_lea.hbm %s214_s11, 16  ;;  %p5075_p10 = scmp.lt.u32.totalorder %s214_s11, %s7475_s1 }
  0xb9   :  { %p5073_p12 = scmp.ne.s32.totalorder %s214_s11, %s5072_s21  ;;  %p5076_p13 = scmp.lt.u32.totalorder %s5575_s17, %s5072_s21 }
  0xba   :  { %p5078_p1 = scmp.lt.u32.totalorder %s5072_s21, %s214_s11 }
  0xbb   :  { %p5077_p9 = por %p5076_p13, %p5075_p10 }
  0xbd   :  { %p5079_p8 = por %p5078_p1, %p5077_p9 }
  0xbf   :  { %p5080_p2 = pnand %p5079_p8, %p5073_p12 }
  0xc1   :  { %5083 = shalt.err (!%p5080_p2)  }
  0xc2   :  { %s5084_s3 = scalar_lea.vmem %s5652_s15, 16  ;;  %p5089_p4 = scmp.lt.s32.totalorder %s5652_s15, %s5558_s24 }
  0xc3   :  { %p5085_p3 = scmp.ne.s32.totalorder %s5652_s15, %s5084_s3  ;;  %p5090_p5 = scmp.lt.s32.totalorder %s5584_s2, %s5084_s3 }
  0xc5   :  { %p5091_p6 = por %p5090_p5, %p5089_p4 }
  0xc7   :  { %p5092_p7 = pnand %p5091_p6, %p5085_p3 }
  0xc9   :  { %5095 = shalt.err (!%p5092_p7)  }
  0xca   :  { %227 = dma.hbm_to_vmem [thread:$0]  %s214_s11, 16, %s5652_s15, [#allocation4 + $0x5] }
  0xcb   :  { %s229_s22 = scalar_lea.hbm %s7475_s1, %s4310_s18  ;;  %p96_p11 = scmp.gt.s32.totalorder %s5657_s14, 0 }
  0xcc   :  { %s5096_s23 = scalar_lea.hbm %s229_s22, 16  ;;  %p5099_p12 = scmp.lt.u32.totalorder %s229_s22, %s7475_s1 }
  0xcd   :  { %p5097_p0 = scmp.ne.s32.totalorder %s229_s22, %s5096_s23  ;;  %p5100_p10 = scmp.lt.u32.totalorder %s5575_s17, %s5096_s23 }
  0xce   :  { %p5102_p9 = scmp.lt.u32.totalorder %s5096_s23, %s229_s22 }
  0xcf   :  { %p5101_p13 = por %p5100_p10, %p5099_p12 }
  0xd1   :  { %p5103_p1 = por %p5102_p9, %p5101_p13 }
  0xd3   :  { %p5104_p8 = pnand %p5103_p1, %p5097_p0 }
  0xd5   :  { %5107 = shalt.err (!%p5104_p8)  }
  0xd6   :  { %s5108_s15 = scalar_lea.vmem %s5687_s19, 16  ;;  %p5113_p3 = scmp.lt.s32.totalorder %s5687_s19, %s5558_s24 }
  0xd7   :  { %p5109_p2 = scmp.ne.s32.totalorder %s5687_s19, %s5108_s15  ;;  %p5114_p4 = scmp.lt.s32.totalorder %s5584_s2, %s5108_s15 }
  0xd9   :  { %p5115_p5 = por %p5114_p4, %p5113_p3 }
  0xdb   :  { %p5116_p6 = pnand %p5115_p5, %p5109_p2 }
  0xdd   :  { %5119 = shalt.err (!%p5116_p6)  }
  0xde   :  { %242 = dma.hbm_to_vmem [thread:$0]  %s229_s22, 16, %s5687_s19, [#allocation4 + $0x6] }
  0xdf   :  { %s97_s20 = scalar_select %p96_p11, %s5657_s14, 0 }
  0xe0   :  { %p4251_p7 = scmp.lt.s32.totalorder %s5657_s14, 2047  ;;  %s5456_s28 = smov [#allocation2 + $0x7]  }
  0xe1   :  { %s254_s29 = sshll.u32 %s5456_s28, 4  ;;  %s5720_s12 = sld [smem:[#allocation6 + $0x4]]  ;;  %s255_s29 = int_to_ptr.vmem [resolvable:$true] %s254_s29 }
  0xe2   :  { %s8506_s20 = smov (!%p4251_p7, %s97_s20), 2047  ;;  %s5457_s10 = smov [#allocation2 + $0x8]  }
  0xe3   :  { %s4311_s13 = sshll.u32 %s8506_s20, 4  ;;  %s269_s11 = sshll.u32 %s5457_s10, 4  ;;  %s5725_s11 = int_to_ptr.vmem [resolvable:$true] %s269_s11 }
  0xe4   :  { %s244_s0 = scalar_lea.hbm %s7475_s1, %s4311_s13 }
  0xe5   :  { %s5120_s19 = scalar_lea.hbm %s244_s0, 16  ;;  %p5123_p11 = scmp.lt.u32.totalorder %s244_s0, %s7475_s1 }
  0xe6   :  { %p5121_p0 = scmp.ne.s32.totalorder %s244_s0, %s5120_s19  ;;  %p5124_p12 = scmp.lt.u32.totalorder %s5575_s17, %s5120_s19 }
  0xe7   :  { %p5126_p13 = scmp.lt.u32.totalorder %s5120_s19, %s244_s0 }
  0xe8   :  { %p5125_p10 = por %p5124_p12, %p5123_p11 }
  0xea   :  { %p5127_p9 = por %p5126_p13, %p5125_p10 }
  0xec   :  { %p5128_p1 = pnand %p5127_p9, %p5121_p0 }
  0xee   :  { %5131 = shalt.err (!%p5128_p1)  }
  0xef   :  { %s5132_s14 = scalar_lea.vmem %s255_s29, 16  ;;  %p5137_p2 = scmp.lt.s32.totalorder %s255_s29, %s5558_s24 }
  0xf0   :  { %p5133_p8 = scmp.ne.s32.totalorder %s255_s29, %s5132_s14  ;;  %p5138_p3 = scmp.lt.s32.totalorder %s5584_s2, %s5132_s14 }
  0xf2   :  { %p5139_p4 = por %p5138_p3, %p5137_p2 }
  0xf4   :  { %p5140_p5 = pnand %p5139_p4, %p5133_p8 }
  0xf6   :  { %5143 = shalt.err (!%p5140_p5)  }
  0xf7   :  { %257 = dma.hbm_to_vmem [thread:$0]  %s244_s0, 16, %s255_s29, [#allocation4 + $0x7] }
  0xf8   :  { %p101_p6 = scmp.gt.s32.totalorder %s5720_s12, 0  ;;  %p4257_p7 = scmp.lt.s32.totalorder %s5720_s12, 2047 }
  0xf9   :  { %s5735_s16 = sld [smem:[#allocation6 + $0x84]]  ;;  %s5458_s27 = smov [#allocation2 + $0x9]  }
  0xfa   :  { %s8508_s12 = smov (!%p101_p6, %s5720_s12), 0  ;;  %s284_s22 = sshll.u32 %s5458_s27, 4  ;;  %s5740_s22 = int_to_ptr.vmem [resolvable:$true] %s284_s22 }
  0xfb   :  { %s5738_s23 = sld [smem:[#allocation6 + $0x5]]  ;;  %s8510_s12 = smov (!%p4257_p7, %s8508_s12), 2047 }
  0xfc   :  { %s4312_s26 = sshll.u32 %s8510_s12, 4  ;;  %s5459_s30 = smov [#allocation2 + $0xa]  }
  0xfd   :  { %s299_s15 = sshll.u32 %s5459_s30, 4  ;;  %s259_s29 = scalar_lea.hbm %s7475_s1, %s4312_s26  ;;  %s5762_s15 = int_to_ptr.vmem [resolvable:$true] %s299_s15 }
  0xfe   :  { %s5144_s13 = scalar_lea.hbm %s259_s29, 16  ;;  %p5147_p12 = scmp.lt.u32.totalorder %s259_s29, %s7475_s1 }
  0xff   :  { %p106_p0 = scmp.gt.s32.totalorder %s5735_s16, 0  ;;  %p5145_p11 = scmp.ne.s32.totalorder %s259_s29, %s5144_s13 }
 0x100   :  { %p5148_p10 = scmp.lt.u32.totalorder %s5575_s17, %s5144_s13  ;;  %p5150_p9 = scmp.lt.u32.totalorder %s5144_s13, %s259_s29 }
 0x102   :  { %p5149_p13 = por %p5148_p10, %p5147_p12 }
 0x104   :  { %p5151_p1 = por %p5150_p9, %p5149_p13 }
 0x106   :  { %p5152_p8 = pnand %p5151_p1, %p5145_p11 }
 0x108   :  { %5155 = shalt.err (!%p5152_p8)  }
 0x109   :  { %s5156_s12 = scalar_lea.vmem %s5725_s11, 16  ;;  %p5161_p3 = scmp.lt.s32.totalorder %s5725_s11, %s5558_s24 }
 0x10a   :  { %p5157_p2 = scmp.ne.s32.totalorder %s5725_s11, %s5156_s12  ;;  %p5162_p4 = scmp.lt.s32.totalorder %s5584_s2, %s5156_s12 }
 0x10c   :  { %p5163_p5 = por %p5162_p4, %p5161_p3 }
 0x10e   :  { %p5164_p6 = pnand %p5163_p5, %p5157_p2 }
 0x110   :  { %5167 = shalt.err (!%p5164_p6)  }
 0x111   :  { %272 = dma.hbm_to_vmem [thread:$0]  %s259_s29, 16, %s5725_s11, [#allocation4 + $0x8] }
 0x112   :  { %s107_s21 = scalar_select %p106_p0, %s5735_s16, 0 }
 0x113   :  { %p4263_p7 = scmp.lt.s32.totalorder %s5735_s16, 2047  ;;  %p111_p11 = scmp.gt.s32.totalorder %s5738_s23, 0 }
 0x114   :  { %p4269_p12 = scmp.lt.s32.totalorder %s5738_s23, 2047  ;;  %s5765_s25 = sld [smem:[#allocation6 + $0x85]] }
 0x115   :  { %s8512_s21 = smov (!%p4263_p7, %s107_s21), 2047 }
 0x116   :  { %s112_s0 = scalar_select %p111_p11, %s5738_s23, 0 }
 0x117   :  { %s4313_s19 = sshll.u32 %s8512_s21, 4 }
 0x118   :  { %s274_s27 = scalar_lea.hbm %s7475_s1, %s4313_s19 }
 0x119   :  { %s5168_s26 = scalar_lea.hbm %s274_s27, 16  ;;  %p5171_p0 = scmp.lt.u32.totalorder %s274_s27, %s7475_s1 }
 0x11a   :  { %p5169_p10 = scmp.ne.s32.totalorder %s274_s27, %s5168_s26  ;;  %p5172_p13 = scmp.lt.u32.totalorder %s5575_s17, %s5168_s26 }
 0x11b   :  { %p5174_p1 = scmp.lt.u32.totalorder %s5168_s26, %s274_s27 }
 0x11c   :  { %p5173_p9 = por %p5172_p13, %p5171_p0 }
 0x11e   :  { %p5175_p8 = por %p5174_p1, %p5173_p9 }
 0x120   :  { %p5176_p2 = pnand %p5175_p8, %p5169_p10 }
 0x122   :  { %5179 = shalt.err (!%p5176_p2)  }
 0x123   :  { %s5180_s16 = scalar_lea.vmem %s5740_s22, 16  ;;  %p5185_p4 = scmp.lt.s32.totalorder %s5740_s22, %s5558_s24 }
 0x124   :  { %p5181_p3 = scmp.ne.s32.totalorder %s5740_s22, %s5180_s16  ;;  %p5186_p5 = scmp.lt.s32.totalorder %s5584_s2, %s5180_s16 }
 0x126   :  { %p5187_p6 = por %p5186_p5, %p5185_p4 }
 0x128   :  { %p5188_p7 = pnand %p5187_p6, %p5181_p3 }
 0x12a   :  { %5191 = shalt.err (!%p5188_p7)  }
 0x12b   :  { %287 = dma.hbm_to_vmem [thread:$0]  %s274_s27, 16, %s5740_s22, [#allocation4 + $0x9] }
 0x12c   :  { %s8514_s0 = smov (!%p4269_p12, %s112_s0), 2047  ;;  %s5460_s20 = smov [#allocation2 + $0xb]  }
 0x12d   :  { %s314_s28 = sshll.u32 %s5460_s20, 4  ;;  %s5782_s29 = sld [smem:[#allocation6 + $0x6]]  ;;  %s5784_s28 = int_to_ptr.vmem [resolvable:$true] %s314_s28 }
 0x12e   :  { %s4314_s13 = sshll.u32 %s8514_s0, 4  ;;  %p116_p11 = scmp.gt.s32.totalorder %s5765_s25, 0 }
 0x12f   :  { %s289_s12 = scalar_lea.hbm %s7475_s1, %s4314_s13 }
 0x130   :  { %s5192_s21 = scalar_lea.hbm %s289_s12, 16  ;;  %p5195_p0 = scmp.lt.u32.totalorder %s289_s12, %s7475_s1 }
 0x131   :  { %p5193_p10 = scmp.ne.s32.totalorder %s289_s12, %s5192_s21  ;;  %p5196_p13 = scmp.lt.u32.totalorder %s5575_s17, %s5192_s21 }
 0x132   :  { %p5198_p9 = scmp.lt.u32.totalorder %s5192_s21, %s289_s12 }
 0x133   :  { %p5197_p12 = por %p5196_p13, %p5195_p0 }
 0x135   :  { %p5199_p1 = por %p5198_p9, %p5197_p12 }
 0x137   :  { %p5200_p8 = pnand %p5199_p1, %p5193_p10 }
 0x139   :  { %5203 = shalt.err (!%p5200_p8)  }
 0x13a   :  { %s5204_s22 = scalar_lea.vmem %s5762_s15, 16  ;;  %p5209_p3 = scmp.lt.s32.totalorder %s5762_s15, %s5558_s24 }
 0x13b   :  { %p5205_p2 = scmp.ne.s32.totalorder %s5762_s15, %s5204_s22  ;;  %p5210_p4 = scmp.lt.s32.totalorder %s5584_s2, %s5204_s22 }
 0x13d   :  { %p5211_p5 = por %p5210_p4, %p5209_p3 }
 0x13f   :  { %p5212_p6 = pnand %p5211_p5, %p5205_p2 }
 0x141   :  { %5215 = shalt.err (!%p5212_p6)  }
 0x142   :  { %302 = dma.hbm_to_vmem [thread:$0]  %s289_s12, 16, %s5762_s15, [#allocation4 + $0xa] }
 0x143   :  { %s117_s23 = scalar_select %p116_p11, %s5765_s25, 0 }
 0x144   :  { %p4275_p7 = scmp.lt.s32.totalorder %s5765_s25, 2047  ;;  %p121_p10 = scmp.gt.s32.totalorder %s5782_s29, 0 }
 0x145   :  { %p4281_p0 = scmp.lt.s32.totalorder %s5782_s29, 2047  ;;  %s5461_s27 = smov [#allocation2 + $0xc]  }
 0x146   :  { %s8516_s23 = smov (!%p4275_p7, %s117_s23), 2047  ;;  %s329_s26 = sshll.u32 %s5461_s27, 4  ;;  %s5810_s26 = int_to_ptr.vmem [resolvable:$true] %s329_s26 }
 0x147   :  { %s122_s0 = scalar_select %p121_p10, %s5782_s29, 0 }
 0x148   :  { %s4315_s14 = sshll.u32 %s8516_s23, 4 }
 0x149   :  { %s304_s16 = scalar_lea.hbm %s7475_s1, %s4315_s14 }
 0x14a   :  { %s5216_s20 = scalar_lea.hbm %s304_s16, 16  ;;  %p5219_p11 = scmp.lt.u32.totalorder %s304_s16, %s7475_s1 }
 0x14b   :  { %p5217_p13 = scmp.ne.s32.totalorder %s304_s16, %s5216_s20  ;;  %p5220_p12 = scmp.lt.u32.totalorder %s5575_s17, %s5216_s20 }
 0x14c   :  { %p5222_p1 = scmp.lt.u32.totalorder %s5216_s20, %s304_s16 }
 0x14d   :  { %p5221_p9 = por %p5220_p12, %p5219_p11 }
 0x14f   :  { %p5223_p8 = por %p5222_p1, %p5221_p9 }
 0x151   :  { %p5224_p2 = pnand %p5223_p8, %p5217_p13 }
 0x153   :  { %5227 = shalt.err (!%p5224_p2)  }
 0x154   :  { %s5228_s25 = scalar_lea.vmem %s5784_s28, 16  ;;  %p5233_p4 = scmp.lt.s32.totalorder %s5784_s28, %s5558_s24 }
 0x155   :  { %p5229_p3 = scmp.ne.s32.totalorder %s5784_s28, %s5228_s25  ;;  %p5234_p5 = scmp.lt.s32.totalorder %s5584_s2, %s5228_s25 }
 0x157   :  { %p5235_p6 = por %p5234_p5, %p5233_p4 }
 0x159   :  { %p5236_p7 = pnand %p5235_p6, %p5229_p3 }
 0x15b   :  { %5239 = shalt.err (!%p5236_p7)  }
 0x15c   :  { %317 = dma.hbm_to_vmem [thread:$0]  %s304_s16, 16, %s5784_s28, [#allocation4 + $0xb] }
 0x15d   :  { %s8518_s0 = smov (!%p4281_p0, %s122_s0), 2047  ;;  %s5824_s10 = sld [smem:[#allocation6 + $0x86]] }
 0x15e   :  { %s4316_s18 = sshll.u32 %s8518_s0, 4  ;;  %s5462_s3 = smov [#allocation2 + $0xd]  }
 0x15f   :  { %s319_s19 = scalar_lea.hbm %s7475_s1, %s4316_s18  ;;  %s344_s22 = sshll.u32 %s5462_s3, 4  ;;  %s345_s22 = int_to_ptr.vmem [resolvable:$true] %s344_s22 }
 0x160   :  { %s5240_s23 = scalar_lea.hbm %s319_s19, 16  ;;  %p5243_p13 = scmp.lt.u32.totalorder %s319_s19, %s7475_s1 }
 0x161   :  { %p5241_p10 = scmp.ne.s32.totalorder %s319_s19, %s5240_s23  ;;  %p5244_p11 = scmp.lt.u32.totalorder %s5575_s17, %s5240_s23 }
 0x162   :  { %p5246_p9 = scmp.lt.u32.totalorder %s5240_s23, %s319_s19 }
 0x163   :  { %p5245_p12 = por %p5244_p11, %p5243_p13 }
 0x165   :  { %p5247_p1 = por %p5246_p9, %p5245_p12 }
 0x167   :  { %p5248_p0 = pnand %p5247_p1, %p5241_p10 }
 0x169   :  { %5251 = shalt.err (!%p5248_p0)  }
 0x16a   :  { %s5252_s28 = scalar_lea.vmem %s5810_s26, 16  ;;  %p5257_p2 = scmp.lt.s32.totalorder %s5810_s26, %s5558_s24 }
 0x16b   :  { %p5253_p8 = scmp.ne.s32.totalorder %s5810_s26, %s5252_s28  ;;  %p5258_p3 = scmp.lt.s32.totalorder %s5584_s2, %s5252_s28 }
 0x16d   :  { %p5259_p4 = por %p5258_p3, %p5257_p2 }
 0x16f   :  { %p5260_p5 = pnand %p5259_p4, %p5253_p8 }
 0x171   :  { %5263 = shalt.err (!%p5260_p5)  }
 0x172   :  { %332 = dma.hbm_to_vmem [thread:$0]  %s319_s19, 16, %s5810_s26, [#allocation4 + $0xc] }
 0x173   :  { %s5839_s29 = sld [smem:[#allocation6 + $0x7]]  ;;  %s5463_s0 = smov [#allocation2 + $0xe]  }
 0x174   :  { %s359_s30 = sshll.u32 %s5463_s0, 4  ;;  %s5841_s11 = sld [smem:[#allocation6 + $0x87]]  ;;  %s5846_s30 = int_to_ptr.vmem [resolvable:$true] %s359_s30 }
 0x175   :  { %p126_p6 = scmp.gt.s32.totalorder %s5824_s10, 0  ;;  %p4287_p7 = scmp.lt.s32.totalorder %s5824_s10, 2047 }
 0x176   :  { %s5464_s16 = smov [#allocation2 + $0xf]  }
 0x177   :  { %s8520_s10 = smov (!%p126_p6, %s5824_s10), 0  ;;  %s5848_s20 = sshll.u32 %s5464_s16, 4  ;;  %s5874_s20 = int_to_ptr.vmem [resolvable:$true] %s5848_s20 }
 0x178   :  { %s8522_s10 = smov (!%p4287_p7, %s8520_s10), 2047 }
 0x179   :  { %p131_p10 = scmp.gt.s32.totalorder %s5839_s29, 0  ;;  %s4317_s26 = sshll.u32 %s8522_s10, 4 }
 0x17a   :  { %p136_p11 = scmp.gt.s32.totalorder %s5841_s11, 0  ;;  %s334_s25 = scalar_lea.hbm %s7475_s1, %s4317_s26 }
 0x17b   :  { %s5264_s18 = scalar_lea.hbm %s334_s25, 16  ;;  %p5267_p1 = scmp.lt.u32.totalorder %s334_s25, %s7475_s1 }
 0x17c   :  { %p5265_p9 = scmp.ne.s32.totalorder %s334_s25, %s5264_s18  ;;  %p5268_p0 = scmp.lt.u32.totalorder %s5575_s17, %s5264_s18 }
 0x17d   :  { %p5270_p2 = scmp.lt.u32.totalorder %s5264_s18, %s334_s25 }
 0x17e   :  { %p5269_p8 = por %p5268_p0, %p5267_p1 }
 0x180   :  { %p5271_p3 = por %p5270_p2, %p5269_p8 }
 0x182   :  { %p5272_p4 = pnand %p5271_p3, %p5265_p9 }
 0x184   :  { %5275 = shalt.err (!%p5272_p4)  }
 0x185   :  { %s5276_s19 = scalar_lea.vmem %s345_s22, 16  ;;  %p5281_p6 = scmp.lt.s32.totalorder %s345_s22, %s5558_s24 }
 0x186   :  { %p5277_p5 = scmp.ne.s32.totalorder %s345_s22, %s5276_s19  ;;  %p5282_p7 = scmp.lt.s32.totalorder %s5584_s2, %s5276_s19 }
 0x188   :  { %p5283_p13 = por %p5282_p7, %p5281_p6 }
 0x18a   :  { %p5284_p12 = pnand %p5283_p13, %p5277_p5 }
 0x18c   :  { %5287 = shalt.err (!%p5284_p12)  }
 0x18d   :  { %347 = dma.hbm_to_vmem [thread:$0]  %s334_s25, 16, %s345_s22, [#allocation4 + $0xd] }
 0x18e   :  { %s132_s10 = scalar_select %p131_p10, %s5839_s29, 0 }
 0x18f   :  { %s137_s3 = scalar_select %p136_p11, %s5841_s11, 0 }
 0x190   :  { %p7760_p9 = scmp.lt.s32.totalorder %s5839_s29, 2047  ;;  %p7761_p1 = scmp.lt.s32.totalorder %s5841_s11, 2047 }
 0x192   :  { %s8524_s10 = smov (!%p7760_p9, %s132_s10), 2047  ;;  %s8526_s3 = smov (!%p7761_p1, %s137_s3), 2047 }
 0x193   :  { %s4318_s23 = sshll.u32 %s8524_s10, 4  ;;  %s4319_s28 = sshll.u32 %s8526_s3, 4 }
 0x194   :  { %s349_s27 = scalar_lea.hbm %s7475_s1, %s4318_s23 }
 0x195   :  { %s5288_s0 = scalar_lea.hbm %s349_s27, 16  ;;  %p5291_p10 = scmp.lt.u32.totalorder %s349_s27, %s7475_s1 }
 0x196   :  { %p5289_p13 = scmp.ne.s32.totalorder %s349_s27, %s5288_s0  ;;  %p5292_p12 = scmp.lt.u32.totalorder %s5575_s17, %s5288_s0 }
 0x197   :  { %p5294_p0 = scmp.lt.u32.totalorder %s5288_s0, %s349_s27 }
 0x198   :  { %p5293_p11 = por %p5292_p12, %p5291_p10 }
 0x19a   :  { %p5295_p8 = por %p5294_p0, %p5293_p11 }
 0x19c   :  { %p5296_p2 = pnand %p5295_p8, %p5289_p13 }
 0x19e   :  { %5299 = shalt.err (!%p5296_p2)  }
 0x19f   :  { %s5300_s29 = scalar_lea.vmem %s5846_s30, 16  ;;  %p5305_p4 = scmp.lt.s32.totalorder %s5846_s30, %s5558_s24 }
 0x1a0   :  { %p5301_p3 = scmp.ne.s32.totalorder %s5846_s30, %s5300_s29  ;;  %p5306_p5 = scmp.lt.s32.totalorder %s5584_s2, %s5300_s29 }
 0x1a2   :  { %p5307_p6 = por %p5306_p5, %p5305_p4 }
 0x1a4   :  { %p5308_p7 = pnand %p5307_p6, %p5301_p3 }
 0x1a6   :  { %5311 = shalt.err (!%p5308_p7)  }
 0x1a7   :  { %362 = dma.hbm_to_vmem [thread:$0]  %s349_s27, 16, %s5846_s30, [#allocation4 + $0xe] }
 0x1a8   :  { %s364_s15 = scalar_lea.hbm %s7475_s1, %s4319_s28 }
 0x1a9   :  { %s5312_s25 = scalar_lea.hbm %s364_s15, 16  ;;  %p5315_p1 = scmp.lt.u32.totalorder %s364_s15, %s7475_s1 }
 0x1aa   :  { %p5313_p9 = scmp.ne.s32.totalorder %s364_s15, %s5312_s25  ;;  %p5316_p13 = scmp.lt.u32.totalorder %s5575_s17, %s5312_s25 }
 0x1ab   :  { %p5318_p12 = scmp.lt.u32.totalorder %s5312_s25, %s364_s15 }
 0x1ac   :  { %p5317_p10 = por %p5316_p13, %p5315_p1 }
 0x1ae   :  { %p5319_p11 = por %p5318_p12, %p5317_p10 }
 0x1b0   :  { %p5320_p0 = pnand %p5319_p11, %p5313_p9 }
 0x1b2   :  { %5323 = shalt.err (!%p5320_p0)  }
 0x1b3   :  { %s5324_s30 = scalar_lea.vmem %s5874_s20, 16  ;;  %p5329_p2 = scmp.lt.s32.totalorder %s5874_s20, %s5558_s24 }
 0x1b4   :  { %p5325_p8 = scmp.ne.s32.totalorder %s5874_s20, %s5324_s30  ;;  %p5330_p3 = scmp.lt.s32.totalorder %s5584_s2, %s5324_s30 }
 0x1b6   :  { %p5331_p4 = por %p5330_p3, %p5329_p2 }
 0x1b8   :  { %p5332_p5 = pnand %p5331_p4, %p5325_p8 }
 0x1ba   :  { %5335 = shalt.err (!%p5332_p5)  }
 0x1bb   :  { %377 = dma.hbm_to_vmem [thread:$0]  %s364_s15, 16, %s5874_s20, [#allocation4 + $0xf] }
 0x1bc   :  { %5408 = dma.done.wait [#allocation4], 16 }
 0x1bd   :  { %5409 = vsyncadd [#allocation4], 4294967280 }
 0x1be   :  { %5410 = dma.done.wait [#allocation4 + $0x1], 16 }
 0x1bf   :  { %5411 = vsyncadd [#allocation4 + $0x1], 4294967280 }
 0x1c0   :  { %5412 = dma.done.wait [#allocation4 + $0x2], 16 }
 0x1c1   :  { %5413 = vsyncadd [#allocation4 + $0x2], 4294967280 }
 0x1c2   :  { %5414 = dma.done.wait [#allocation4 + $0x3], 16 }
 0x1c3   :  { %5415 = vsyncadd [#allocation4 + $0x3], 4294967280 }
 0x1c4   :  { %5416 = dma.done.wait [#allocation4 + $0x4], 16 }
 0x1c5   :  { %5417 = vsyncadd [#allocation4 + $0x4], 4294967280 }
 0x1c6   :  { %5418 = dma.done.wait [#allocation4 + $0x5], 16 }
 0x1c7   :  { %5419 = vsyncadd [#allocation4 + $0x5], 4294967280 }
 0x1c8   :  { %5420 = dma.done.wait [#allocation4 + $0x6], 16 }
 0x1c9   :  { %5421 = vsyncadd [#allocation4 + $0x6], 4294967280 }
 0x1ca   :  { %5422 = dma.done.wait [#allocation4 + $0x7], 16 }
 0x1cb   :  { %5423 = vsyncadd [#allocation4 + $0x7], 4294967280 }
 0x1cc   :  { %5424 = dma.done.wait [#allocation4 + $0x8], 16 }
 0x1cd   :  { %5425 = vsyncadd [#allocation4 + $0x8], 4294967280 }
 0x1ce   :  { %5426 = dma.done.wait [#allocation4 + $0x9], 16 }
 0x1cf   :  { %5427 = vsyncadd [#allocation4 + $0x9], 4294967280 }
 0x1d0   :  { %5428 = dma.done.wait [#allocation4 + $0xa], 16 }
 0x1d1   :  { %5429 = vsyncadd [#allocation4 + $0xa], 4294967280 }
 0x1d2   :  { %5430 = dma.done.wait [#allocation4 + $0xb], 16 }
 0x1d3   :  { %5431 = vsyncadd [#allocation4 + $0xb], 4294967280 }
 0x1d4   :  { %5432 = dma.done.wait [#allocation4 + $0xc], 16 }
 0x1d5   :  { %5433 = vsyncadd [#allocation4 + $0xc], 4294967280 }
 0x1d6   :  { %5434 = dma.done.wait [#allocation4 + $0xd], 16 }
 0x1d7   :  { %5435 = vsyncadd [#allocation4 + $0xd], 4294967280 }
 0x1d8   :  { %5436 = dma.done.wait [#allocation4 + $0xe], 16 }
 0x1d9   :  { %5437 = vsyncadd [#allocation4 + $0xe], 4294967280 }
 0x1da   :  { %5438 = dma.done.wait [#allocation4 + $0xf], 16 }
 0x1db   :  { %5439 = vsyncadd [#allocation4 + $0xf], 4294967280  ;;  %v5465_v0 = vmov 0   ;;  %v414_v1 = vld [vmem:[#allocation7] sm:$0xff]  ;;  %v415_v3 = vld [vmem:[#allocation7 + $0x8] sm:$0xff]  ;;  %vm3948_vm0 = vcmask 1040384  }
 0x1dc   :  { %872 = vmatprep.mubr.bf16.mxu0 %v5465_v0  ;;  %915 = vmatprep.mubr.bf16.mxu1 %v5465_v0  ;;  %v418_v2 = vld [vmem:[#allocation7 + $0x20] sm:$0xff]  ;;  %v419_v5 = vld [vmem:[#allocation7 + $0x28] sm:$0xff]  ;;  %v416_v63 = vld [vmem:[#allocation7 + $0x10] sm:$0xff]  ;;  %vm3951_vm1 = vcmask 1041408   ;;  %vm3954_vm2 = vcmask 1042432   ;;  %vm3957_vm3 = vcmask 1043456  }
 0x1dd   :  { %v4321_v4 = vcombine.high %v414_v1, %v418_v2  ;;  %v4320_v6 = vcombine.low %v414_v1, %v418_v2  ;;  %v422_v7 = vld [vmem:[#allocation7 + $0x40] sm:$0xff]  ;;  %v4323_v9 = vcombine.high %v415_v3, %v419_v5  ;;  %v4322_v10 = vcombine.low %v415_v3, %v419_v5  ;;  %v423_v12 = vld [vmem:[#allocation7 + $0x48] sm:$0xff]  ;;  %v420_v1 = vld [vmem:[#allocation7 + $0x30] sm:$0xff]  ;;  %s5468_s21 = smov [#allocation13]   ;;  %s5469_s10 = smov [#allocation15]  }
 0x1de   :  { %v426_v8 = vld [vmem:[#allocation7 + $0x60] sm:$0xff]  ;;  %v427_v13 = vld [vmem:[#allocation7 + $0x68] sm:$0xff]  ;;  %v417_v2 = vld [vmem:[#allocation7 + $0x18] sm:$0xff]  ;;  %vm3960_vm4 = vcmask 1044480   ;;  %vm3963_vm5 = vcmask 1045504   ;;  %vm3966_vm6 = vcmask 1046528  }
 0x1df   :  { %v4329_v11 = vcombine.high %v422_v7, %v426_v8  ;;  %v430_v14 = vld [vmem:[#allocation7 + $0x80] sm:$0xff]  ;;  %840 = vmatprep.subr.bf16.mxu0 %v4321_v4  ;;  %v4331_v15 = vcombine.high %v423_v12, %v427_v13  ;;  %v431_v17 = vld [vmem:[#allocation7 + $0x88] sm:$0xff]  ;;  %883 = vmatprep.subr.bf16.mxu1 %v4323_v9  ;;  %v4328_v19 = vcombine.low %v422_v7, %v426_v8  ;;  %v421_v3 = vld [vmem:[#allocation7 + $0x38] sm:$0xff]  ;;  %s4039_s19 = sshll.u32 %s5468_s21, 4  ;;  %s4049_s3 = sshll.u32 %s5469_s10, 4  ;;  %s7424_s19 = int_to_ptr.vmem [resolvable:$true] %s4039_s19  ;;  %s7426_s3 = int_to_ptr.vmem [resolvable:$true] %s4049_s3 }
 0x1e0   :  { %v434_v16 = vld [vmem:[#allocation7 + $0xa0] sm:$0xff]  ;;  %v435_v18 = vld [vmem:[#allocation7 + $0xa8] sm:$0xff]  ;;  %841 = vmatpush1.bf16.msra.mxu0 %v4320_v6  ;;  %884 = vmatpush1.bf16.msra.mxu1 %v4322_v10  ;;  %v4330_v20 = vcombine.low %v423_v12, %v427_v13  ;;  %v411_v5 = vld [vmem:[#allocation2] sm:$0xff]  ;;  %v4325_v8 = vcombine.high %v416_v63, %v420_v1  ;;  %v4327_v9 = vcombine.high %v417_v2, %v421_v3 }
 0x1e1   :  { %842 = vmatprep.subr.bf16.mxu0 %v4329_v11  ;;  %v4337_v21 = vcombine.high %v430_v14, %v434_v16  ;;  %885 = vmatprep.subr.bf16.mxu1 %v4331_v15  ;;  %v4339_v22 = vcombine.high %v431_v17, %v435_v18  ;;  %v438_v23 = vld [vmem:[#allocation7 + $0xc0] sm:$0xff]  ;;  %v439_v25 = vld [vmem:[#allocation7 + $0xc8] sm:$0xff]  ;;  %v4336_v27 = vcombine.low %v430_v14, %v434_v16  ;;  %v412_v6 = vld [vmem:[#allocation2 + $0x8] sm:$0xff] }
 0x1e2   :  { %v442_v24 = vld [vmem:[#allocation7 + $0xe0] sm:$0xff]  ;;  %v443_v26 = vld [vmem:[#allocation7 + $0xe8] sm:$0xff]  ;;  %v4338_v28 = vcombine.low %v431_v17, %v435_v18  ;;  %v424_v10 = vld [vmem:[#allocation7 + $0x50] sm:$0xff]  ;;  %v5904_v12 = vpack.c.bf16 %v412_v6, %v411_v5  ;;  %v4324_v15 = vcombine.low %v416_v63, %v420_v1  ;;  %v4326_v16 = vcombine.low %v417_v2, %v421_v3 }
 0x1e3   :  { %v4345_v29 = vcombine.high %v438_v23, %v442_v24  ;;  %v4347_v30 = vcombine.high %v439_v25, %v443_v26  ;;  %v446_v31 = vld [vmem:[#allocation7 + $0x100] sm:$0xff]  ;;  %v447_v33 = vld [vmem:[#allocation7 + $0x108] sm:$0xff]  ;;  %v4344_v35 = vcombine.low %v438_v23, %v442_v24  ;;  %v4346_v36 = vcombine.low %v439_v25, %v443_v26  ;;  %v428_v11 = vld [vmem:[#allocation7 + $0x70] sm:$0xff] }
 0x1e4   :  { %843 = vmatpush1.bf16.msra.mxu0 %v4328_v19  ;;  %886 = vmatpush1.bf16.msra.mxu1 %v4330_v20  ;;  %v450_v32 = vld [vmem:[#allocation7 + $0x120] sm:$0xff]  ;;  %v451_v34 = vld [vmem:[#allocation7 + $0x128] sm:$0xff]  ;;  %v425_v13 = vld [vmem:[#allocation7 + $0x58] sm:$0xff]  ;;  %v4333_v17 = vcombine.high %v424_v10, %v428_v11  ;;  %v4332_v23 = vcombine.low %v424_v10, %v428_v11 }
 0x1e5   :  { %844 = vmatprep.subr.bf16.mxu0 %v4337_v21  ;;  %887 = vmatprep.subr.bf16.mxu1 %v4339_v22  ;;  %v4353_v37 = vcombine.high %v446_v31, %v450_v32  ;;  %v4355_v38 = vcombine.high %v447_v33, %v451_v34  ;;  %v454_v39 = vld [vmem:[#allocation7 + $0x140] sm:$0xff]  ;;  %v455_v41 = vld [vmem:[#allocation7 + $0x148] sm:$0xff]  ;;  %v4352_v43 = vcombine.low %v446_v31, %v450_v32  ;;  %v429_v14 = vld [vmem:[#allocation7 + $0x78] sm:$0xff] }
 0x1e6   :  { %v458_v40 = vld [vmem:[#allocation7 + $0x160] sm:$0xff]  ;;  %v459_v42 = vld [vmem:[#allocation7 + $0x168] sm:$0xff]  ;;  %v4354_v44 = vcombine.low %v447_v33, %v451_v34  ;;  %v4335_v18 = vcombine.high %v425_v13, %v429_v14  ;;  %v432_v19 = vld [vmem:[#allocation7 + $0x90] sm:$0xff]  ;;  %v4334_v24 = vcombine.low %v425_v13, %v429_v14 }
 0x1e7   :  { %v4361_v45 = vcombine.high %v454_v39, %v458_v40  ;;  %v4363_v46 = vcombine.high %v455_v41, %v459_v42  ;;  %v462_v47 = vld [vmem:[#allocation7 + $0x180] sm:$0xff]  ;;  %v463_v49 = vld [vmem:[#allocation7 + $0x188] sm:$0xff]  ;;  %v4360_v51 = vcombine.low %v454_v39, %v458_v40  ;;  %v4362_v52 = vcombine.low %v455_v41, %v459_v42  ;;  %v436_v20 = vld [vmem:[#allocation7 + $0xb0] sm:$0xff] }
 0x1e8   :  { %845 = vmatpush1.bf16.msra.mxu0 %v4336_v27  ;;  %888 = vmatpush1.bf16.msra.mxu1 %v4338_v28  ;;  %v466_v48 = vld [vmem:[#allocation7 + $0x1a0] sm:$0xff]  ;;  %v467_v50 = vld [vmem:[#allocation7 + $0x1a8] sm:$0xff]  ;;  %v433_v21 = vld [vmem:[#allocation7 + $0x98] sm:$0xff]  ;;  %v4341_v25 = vcombine.high %v432_v19, %v436_v20  ;;  %v4340_v31 = vcombine.low %v432_v19, %v436_v20 }
 0x1e9   :  { %846 = vmatprep.subr.bf16.mxu0 %v4345_v29  ;;  %889 = vmatprep.subr.bf16.mxu1 %v4347_v30  ;;  %v4369_v53 = vcombine.high %v462_v47, %v466_v48  ;;  %v4371_v54 = vcombine.high %v463_v49, %v467_v50  ;;  %v470_v55 = vld [vmem:[#allocation7 + $0x1c0] sm:$0xff]  ;;  %v471_v57 = vld [vmem:[#allocation7 + $0x1c8] sm:$0xff]  ;;  %v4368_v59 = vcombine.low %v462_v47, %v466_v48  ;;  %v437_v22 = vld [vmem:[#allocation7 + $0xb8] sm:$0xff] }
 0x1ea   :  { %v474_v56 = vld [vmem:[#allocation7 + $0x1e0] sm:$0xff]  ;;  %v475_v58 = vld [vmem:[#allocation7 + $0x1e8] sm:$0xff]  ;;  %v4370_v60 = vcombine.low %v463_v49, %v467_v50  ;;  %v4343_v26 = vcombine.high %v433_v21, %v437_v22  ;;  %v440_v27 = vld [vmem:[#allocation7 + $0xd0] sm:$0xff]  ;;  %v4342_v32 = vcombine.low %v433_v21, %v437_v22 }
 0x1eb   :  { %v4377_v61 = vcombine.high %v470_v55, %v474_v56  ;;  %v4379_v62 = vcombine.high %v471_v57, %v475_v58  ;;  %v4376_v4 = vcombine.low %v470_v55, %v474_v56  ;;  %v4378_v7 = vcombine.low %v471_v57, %v475_v58  ;;  %v444_v28 = vld [vmem:[#allocation7 + $0xf0] sm:$0xff]  ;;  %v441_v29 = vld [vmem:[#allocation7 + $0xd8] sm:$0xff]  ;;  %v1028_v3 = vld [vmem:[#allocation10] sm:$0xff] }
 0x1ec   :  { %847 = vmatpush1.bf16.msra.mxu0 %v4344_v35  ;;  %890 = vmatpush1.bf16.msra.mxu1 %v4346_v36  ;;  %v445_v30 = vld [vmem:[#allocation7 + $0xf8] sm:$0xff]  ;;  %v4349_v33 = vcombine.high %v440_v27, %v444_v28  ;;  %v448_v35 = vld [vmem:[#allocation7 + $0x110] sm:$0xff]  ;;  %v4348_v39 = vcombine.low %v440_v27, %v444_v28  ;;  %v1029_v5 = vld [vmem:[#allocation10 + $0x8] sm:$0xff] }
 0x1ed   :  { %848 = vmatprep.subr.bf16.mxu0 %v4353_v37  ;;  %891 = vmatprep.subr.bf16.mxu1 %v4355_v38  ;;  %v4351_v34 = vcombine.high %v441_v29, %v445_v30  ;;  %v452_v36 = vld [vmem:[#allocation7 + $0x130] sm:$0xff]  ;;  %v449_v37 = vld [vmem:[#allocation7 + $0x118] sm:$0xff]  ;;  %v4350_v40 = vcombine.low %v441_v29, %v445_v30  ;;  %v1033_v6 = vld [vmem:[#allocation10 + $0x28] sm:$0xff] }
 0x1ee   :  { %v453_v38 = vld [vmem:[#allocation7 + $0x138] sm:$0xff]  ;;  %v4357_v41 = vcombine.high %v448_v35, %v452_v36  ;;  %v456_v42 = vld [vmem:[#allocation7 + $0x150] sm:$0xff]  ;;  %v5917_v11 = vcombine.high %v1029_v5, %v1033_v6  ;;  %v1036_v13 = vld [vmem:[#allocation10 + $0x40] sm:$0xff]  ;;  %v5924_v19 = vcombine.low %v1029_v5, %v1033_v6 }
 0x1ef   :  { %v4358_v47 = vcombine.low %v449_v37, %v453_v38  ;;  %v464_v50 = vld [vmem:[#allocation7 + $0x190] sm:$0xff]  ;;  %v1040_v14 = vld [vmem:[#allocation10 + $0x60] sm:$0xff] }
 0x1f0   :  { %849 = vmatpush1.bf16.msra.mxu0 %v4352_v43  ;;  %892 = vmatpush1.bf16.msra.mxu1 %v4354_v44  ;;  %v460_v43 = vld [vmem:[#allocation7 + $0x170] sm:$0xff]  ;;  %v457_v44 = vld [vmem:[#allocation7 + $0x158] sm:$0xff]  ;;  %7763 = vst [vmem:[#allocation72_spill] sm:$0xff] %v5917_v11  ;;  %7765 = vst [vmem:[#allocation74_spill] sm:$0xff] %v5924_v19  ;;  %v5926_v20 = vcombine.high %v1036_v13, %v1040_v14  ;;  %v5936_v27 = vcombine.low %v1036_v13, %v1040_v14 }
 0x1f1   :  { %850 = vmatprep.subr.bf16.mxu0 %v4361_v45  ;;  %893 = vmatprep.subr.bf16.mxu1 %v4363_v46  ;;  %v461_v45 = vld [vmem:[#allocation7 + $0x178] sm:$0xff]  ;;  %v4356_v46 = vcombine.low %v448_v35, %v452_v36  ;;  %v4365_v48 = vcombine.high %v456_v42, %v460_v43  ;;  %v472_v58 = vld [vmem:[#allocation7 + $0x1d0] sm:$0xff]  ;;  %v1044_v22 = vld [vmem:[#allocation10 + $0x80] sm:$0xff] }
 0x1f2   :  { %v4367_v49 = vcombine.high %v457_v44, %v461_v45  ;;  %v4366_v55 = vcombine.low %v457_v44, %v461_v45  ;;  %7766 = vst [vmem:[#allocation75_spill] sm:$0xff] %v5926_v20  ;;  %7768 = vst [vmem:[#allocation77_spill] sm:$0xff] %v5936_v27  ;;  %v1068_v45 = vld [vmem:[#allocation10 + $0x140] sm:$0xff]  ;;  %v1097_v13 = vld [vmem:[#allocation10 + $0x228] sm:$0xff] }
 0x1f3   :  { %v1092_v6 = vld [vmem:[#allocation10 + $0x200] sm:$0xff] }
 0x1f4   :  { %851 = vmatpush1.bf16.msra.mxu0 %v4360_v51  ;;  %894 = vmatpush1.bf16.msra.mxu1 %v4362_v52  ;;  %v468_v51 = vld [vmem:[#allocation7 + $0x1b0] sm:$0xff]  ;;  %v465_v52 = vld [vmem:[#allocation7 + $0x198] sm:$0xff] }
 0x1f5   :  { %852 = vmatprep.subr.bf16.mxu0 %v4369_v53  ;;  %895 = vmatprep.subr.bf16.mxu1 %v4371_v54  ;;  %v469_v53 = vld [vmem:[#allocation7 + $0x1b8] sm:$0xff]  ;;  %v4364_v54 = vcombine.low %v456_v42, %v460_v43  ;;  %v4373_v56 = vcombine.high %v464_v50, %v468_v51 }
 0x1f6   :  { %v4375_v57 = vcombine.high %v465_v52, %v469_v53  ;;  %v4374_v63 = vcombine.low %v465_v52, %v469_v53  ;;  %v1076_v53 = vld [vmem:[#allocation10 + $0x180] sm:$0xff] }
 0x1f8   :  { %853 = vmatpush1.bf16.msra.mxu0 %v4368_v59  ;;  %896 = vmatpush1.bf16.msra.mxu1 %v4370_v60  ;;  %v476_v59 = vld [vmem:[#allocation7 + $0x1f0] sm:$0xff]  ;;  %v473_v60 = vld [vmem:[#allocation7 + $0x1d8] sm:$0xff] }
 0x1f9   :  { %854 = vmatprep.subr.bf16.mxu0 %v4377_v61  ;;  %897 = vmatprep.subr.bf16.mxu1 %v4379_v62  ;;  %v477_v61 = vld [vmem:[#allocation7 + $0x1f8] sm:$0xff]  ;;  %v4372_v62 = vcombine.low %v464_v50, %v468_v51  ;;  %v4381_v1 = vcombine.high %v472_v58, %v476_v59 }
 0x1fa   :  { %v4383_v2 = vcombine.high %v473_v60, %v477_v61 }
 0x1fc   :  { %855 = vmatpush1.bf16.msra.mxu0 %v4376_v4  ;;  %898 = vmatpush1.bf16.msra.mxu1 %v4378_v7  ;;  %v1032_v4 = vld [vmem:[#allocation10 + $0x20] sm:$0xff]  ;;  %v5913_v7 = vld.sshfl [vmem:[%s7479_s5] sm:$0x33 pattern:$0x76325410] }
 0x1fd   :  { %926 = vmatprep.subr.bf16.mxu0 %v4325_v8  ;;  %969 = vmatprep.subr.bf16.mxu1 %v4327_v9  ;;  %v4380_v8 = vcombine.low %v472_v58, %v476_v59  ;;  %v4382_v9 = vcombine.low %v473_v60, %v477_v61  ;;  %v5915_v10 = vcombine.high %v1028_v3, %v1032_v4  ;;  %v1084_v61 = vld [vmem:[#allocation10 + $0x1c0] sm:$0xff] }
 0x1ff   :  { %873 = vmatmul.mubr.bf16.vlgmr.msra.gmra.mrb[0].mxu0 %v5904_v12  ;;  %916 = vmatmul.mubr.bf16.vlgmr.msra.gmra.mrb[0].mxu1 %v5904_v12  ;;  %7762 = vst [vmem:[#allocation71_spill] sm:$0xff] %v5915_v10 }
 0x200   :  { %927 = vmatpush1.bf16.msra.mxu0 %v4324_v15  ;;  %970 = vmatpush1.bf16.msra.mxu1 %v4326_v16  ;;  %v1174_v15 = vcombine.high %v5913_v7, %v5913_v7  ;;  %v1037_v16 = vld [vmem:[#allocation10 + $0x48] sm:$0xff] }
 0x201   :  { %928 = vmatprep.subr.bf16.mxu0 %v4333_v17  ;;  %971 = vmatprep.subr.bf16.mxu1 %v4335_v18  ;;  %v1041_v17 = vld [vmem:[#allocation10 + $0x68] sm:$0xff]  ;;  %v5921_v18 = vcombine.low %v1028_v3, %v1032_v4 }
 0x202   :  { %958 = vmatprep.mubr.bf16.mxu0 %v5465_v0  ;;  %1001 = vmatprep.mubr.bf16.mxu1 %v5465_v0  ;;  %v4359_v0 = vcombine.high %v449_v37, %v453_v38  ;;  %v5929_v21 = vcombine.high %v1037_v16, %v1041_v17  ;;  %v5940_v28 = vcombine.low %v1037_v16, %v1041_v17  ;;  %v1060_v38 = vld [vmem:[#allocation10 + $0x100] sm:$0xff] }
 0x203   :  { %7764 = vst [vmem:[#allocation73_spill] sm:$0xff] %v5921_v18 }
 0x204   :  { %929 = vmatpush1.bf16.msra.mxu0 %v4332_v23  ;;  %972 = vmatpush1.bf16.msra.mxu1 %v4334_v24  ;;  %7767 = vst [vmem:[#allocation76_spill] sm:$0xff] %v5929_v21  ;;  %v1048_v23 = vld [vmem:[#allocation10 + $0xa0] sm:$0xff]  ;;  %v5931_v24 = vpack.c.bf16 %v1174_v15, %v1174_v15  ;;  %7769 = vst [vmem:[#allocation78_spill] sm:$0xff] %v5940_v28 }
 0x205   :  { %930 = vmatprep.subr.bf16.mxu0 %v4341_v25  ;;  %973 = vmatprep.subr.bf16.mxu1 %v4343_v26  ;;  %v1045_v25 = vld [vmem:[#allocation10 + $0x88] sm:$0xff]  ;;  %v5942_v29 = vcombine.high %v1044_v22, %v1048_v23 }
 0x206   :  { %v1049_v26 = vld [vmem:[#allocation10 + $0xa8] sm:$0xff] }
 0x207   :  { %7770 = vst [vmem:[#allocation79_spill] sm:$0xff] %v5942_v29  ;;  %v5945_v30 = vcombine.high %v1045_v25, %v1049_v26  ;;  %v5954_v35 = vcombine.low %v1045_v25, %v1049_v26  ;;  %v1101_v25 = vld [vmem:[#allocation10 + $0x248] sm:$0xff] }
 0x208   :  { %931 = vmatpush1.bf16.msra.mxu0 %v4340_v31  ;;  %974 = vmatpush1.bf16.msra.mxu1 %v4342_v32  ;;  %v1052_v31 = vld [vmem:[#allocation10 + $0xc0] sm:$0xff]  ;;  %v1105_v26 = vld [vmem:[#allocation10 + $0x268] sm:$0xff] }
 0x209   :  { %932 = vmatprep.subr.bf16.mxu0 %v4349_v33  ;;  %975 = vmatprep.subr.bf16.mxu1 %v4351_v34  ;;  %7771 = vst [vmem:[#allocation80_spill] sm:$0xff] %v5945_v30  ;;  %v1056_v32 = vld [vmem:[#allocation10 + $0xe0] sm:$0xff]  ;;  %v1057_v33 = vld [vmem:[#allocation10 + $0xe8] sm:$0xff]  ;;  %v5950_v34 = vcombine.low %v1044_v22, %v1048_v23  ;;  %7773 = vst [vmem:[#allocation82_spill] sm:$0xff] %v5954_v35 }
 0x20a   :  { %v5956_v36 = vcombine.high %v1052_v31, %v1056_v32  ;;  %v1100_v22 = vld [vmem:[#allocation10 + $0x240] sm:$0xff] }
 0x20b   :  { %7772 = vst [vmem:[#allocation81_spill] sm:$0xff] %v5950_v34  ;;  %v1104_v23 = vld [vmem:[#allocation10 + $0x260] sm:$0xff] }
 0x20c   :  { %933 = vmatpush1.bf16.msra.mxu0 %v4348_v39  ;;  %976 = vmatpush1.bf16.msra.mxu1 %v4350_v40  ;;  %7774 = vst [vmem:[#allocation83_spill] sm:$0xff] %v5956_v36  ;;  %v1064_v39 = vld [vmem:[#allocation10 + $0x120] sm:$0xff]  ;;  %v1061_v40 = vld [vmem:[#allocation10 + $0x108] sm:$0xff] }
 0x20d   :  { %934 = vmatprep.subr.bf16.mxu0 %v4357_v41  ;;  %977 = vmatprep.subr.bf16.mxu1 %v4359_v0  ;;  %v1065_v41 = vld [vmem:[#allocation10 + $0x128] sm:$0xff]  ;;  %v5962_v0 = vcombine.low %v1052_v31, %v1056_v32  ;;  %v5968_v43 = vcombine.high %v1060_v38, %v1064_v39 }
 0x20e   :  { %v5971_v44 = vcombine.high %v1061_v40, %v1065_v41  ;;  %v5978_v50 = vcombine.low %v1061_v40, %v1065_v41  ;;  %v1109_v40 = vld [vmem:[#allocation10 + $0x288] sm:$0xff] }
 0x20f   :  { %7776 = vst [vmem:[#allocation85_spill] sm:$0xff] %v5962_v0  ;;  %7778 = vst [vmem:[#allocation87_spill] sm:$0xff] %v5968_v43  ;;  %v1113_v41 = vld [vmem:[#allocation10 + $0x2a8] sm:$0xff] }
 0x210   :  { %935 = vmatpush1.bf16.msra.mxu0 %v4356_v46  ;;  %978 = vmatpush1.bf16.msra.mxu1 %v4358_v47  ;;  %7779 = vst [vmem:[#allocation88_spill] sm:$0xff] %v5971_v44  ;;  %v1072_v46 = vld [vmem:[#allocation10 + $0x160] sm:$0xff]  ;;  %v1069_v47 = vld [vmem:[#allocation10 + $0x148] sm:$0xff]  ;;  %7781 = vst [vmem:[#allocation90_spill] sm:$0xff] %v5978_v50 }
 0x211   :  { %936 = vmatprep.subr.bf16.mxu0 %v4365_v48  ;;  %979 = vmatprep.subr.bf16.mxu1 %v4367_v49  ;;  %v1073_v48 = vld [vmem:[#allocation10 + $0x168] sm:$0xff]  ;;  %v5974_v49 = vcombine.low %v1060_v38, %v1064_v39  ;;  %v5980_v51 = vcombine.high %v1068_v45, %v1072_v46  ;;  %v1108_v38 = vld [vmem:[#allocation10 + $0x280] sm:$0xff] }
 0x212   :  { %v5983_v52 = vcombine.high %v1069_v47, %v1073_v48  ;;  %v5990_v58 = vcombine.low %v1069_v47, %v1073_v48  ;;  %v1112_v39 = vld [vmem:[#allocation10 + $0x2a0] sm:$0xff]  ;;  %v6043_v48 = vcombine.high %v1109_v40, %v1113_v41 }
 0x213   :  { %7780 = vst [vmem:[#allocation89_spill] sm:$0xff] %v5974_v49  ;;  %7782 = vst [vmem:[#allocation91_spill] sm:$0xff] %v5980_v51  ;;  %v6040_v47 = vcombine.high %v1108_v38, %v1112_v39 }
 0x214   :  { %937 = vmatpush1.bf16.msra.mxu0 %v4364_v54  ;;  %980 = vmatpush1.bf16.msra.mxu1 %v4366_v55  ;;  %7783 = vst [vmem:[#allocation92_spill] sm:$0xff] %v5983_v52  ;;  %v1080_v54 = vld [vmem:[#allocation10 + $0x1a0] sm:$0xff]  ;;  %v1077_v55 = vld [vmem:[#allocation10 + $0x188] sm:$0xff]  ;;  %7785 = vst [vmem:[#allocation94_spill] sm:$0xff] %v5990_v58 }
 0x215   :  { %938 = vmatprep.subr.bf16.mxu0 %v4373_v56  ;;  %981 = vmatprep.subr.bf16.mxu1 %v4375_v57  ;;  %v1081_v56 = vld [vmem:[#allocation10 + $0x1a8] sm:$0xff]  ;;  %v5986_v57 = vcombine.low %v1068_v45, %v1072_v46  ;;  %v5992_v59 = vcombine.high %v1076_v53, %v1080_v54  ;;  %v6034_v45 = vcombine.low %v1100_v22, %v1104_v23 }
 0x216   :  { %v5995_v60 = vcombine.high %v1077_v55, %v1081_v56  ;;  %v6002_v3 = vcombine.low %v1077_v55, %v1081_v56  ;;  %v6038_v46 = vcombine.low %v1101_v25, %v1105_v26  ;;  %7802 = vst [vmem:[#allocation111_spill] sm:$0xff] %v6040_v47  ;;  %7803 = vst [vmem:[#allocation112_spill] sm:$0xff] %v6043_v48  ;;  %v1117_v55 = vld [vmem:[#allocation10 + $0x2c8] sm:$0xff] }
 0x217   :  { %7784 = vst [vmem:[#allocation93_spill] sm:$0xff] %v5986_v57  ;;  %7786 = vst [vmem:[#allocation95_spill] sm:$0xff] %v5992_v59  ;;  %v1121_v56 = vld [vmem:[#allocation10 + $0x2e8] sm:$0xff] }
 0x218   :  { %939 = vmatpush1.bf16.msra.mxu0 %v4372_v62  ;;  %982 = vmatpush1.bf16.msra.mxu1 %v4374_v63  ;;  %7787 = vst [vmem:[#allocation96_spill] sm:$0xff] %v5995_v60  ;;  %v1088_v62 = vld [vmem:[#allocation10 + $0x1e0] sm:$0xff]  ;;  %v1085_v63 = vld [vmem:[#allocation10 + $0x1c8] sm:$0xff]  ;;  %7789 = vst [vmem:[#allocation98_spill] sm:$0xff] %v6002_v3 }
 0x219   :  { %940 = vmatprep.subr.bf16.mxu0 %v4381_v1  ;;  %983 = vmatprep.subr.bf16.mxu1 %v4383_v2  ;;  %v1089_v1 = vld [vmem:[#allocation10 + $0x1e8] sm:$0xff]  ;;  %v5998_v2 = vcombine.low %v1076_v53, %v1080_v54  ;;  %v6004_v4 = vcombine.high %v1084_v61, %v1088_v62  ;;  %v6010_v14 = vcombine.low %v1084_v61, %v1088_v62  ;;  %v1116_v53 = vld [vmem:[#allocation10 + $0x2c0] sm:$0xff] }
 0x21a   :  { %v6007_v5 = vcombine.high %v1085_v63, %v1089_v1  ;;  %v6014_v15 = vcombine.low %v1085_v63, %v1089_v1  ;;  %7800 = vst [vmem:[#allocation109_spill] sm:$0xff] %v6034_v45  ;;  %7801 = vst [vmem:[#allocation110_spill] sm:$0xff] %v6038_v46  ;;  %v1120_v54 = vld [vmem:[#allocation10 + $0x2e0] sm:$0xff]  ;;  %v6046_v61 = vcombine.low %v1108_v38, %v1112_v39 }
 0x21b   :  { %7788 = vst [vmem:[#allocation97_spill] sm:$0xff] %v5998_v2  ;;  %7790 = vst [vmem:[#allocation99_spill] sm:$0xff] %v6004_v4  ;;  %v6050_v62 = vcombine.low %v1109_v40, %v1113_v41  ;;  %v6052_v63 = vcombine.high %v1116_v53, %v1120_v54  ;;  %v6055_v1 = vcombine.high %v1117_v55, %v1121_v56  ;;  %v1132_v38 = vld [vmem:[#allocation10 + $0x340] sm:$0xff]  ;;  %v1133_v40 = vld [vmem:[#allocation10 + $0x348] sm:$0xff] }
 0x21c   :  { %941 = vmatpush1.bf16.msra.mxu0 %v4380_v8  ;;  %984 = vmatpush1.bf16.msra.mxu1 %v4382_v9  ;;  %7791 = vst [vmem:[#allocation100_spill] sm:$0xff] %v6007_v5  ;;  %v1096_v8 = vld [vmem:[#allocation10 + $0x220] sm:$0xff]  ;;  %v1093_v9 = vld [vmem:[#allocation10 + $0x208] sm:$0xff]  ;;  %7792 = vst [vmem:[#allocation101_spill] sm:$0xff] %v6010_v14 }
 0x21d   :  { %1819 = vmatprep.subr.bf16.mxu0 %v5915_v10  ;;  %1860 = vmatprep.subr.bf16.mxu1 %v5917_v11  ;;  %7793 = vst [vmem:[#allocation102_spill] sm:$0xff] %v6014_v15  ;;  %v6016_v16 = vcombine.high %v1092_v6, %v1096_v8  ;;  %v6019_v17 = vcombine.high %v1093_v9, %v1097_v13  ;;  %7804 = vst [vmem:[#allocation113_spill] sm:$0xff] %v6046_v61  ;;  %v1136_v39 = vld [vmem:[#allocation10 + $0x360] sm:$0xff]  ;;  %v1137_v41 = vld [vmem:[#allocation10 + $0x368] sm:$0xff] }
 0x21e   :  { %v6022_v31 = vcombine.low %v1092_v6, %v1096_v8  ;;  %v6026_v32 = vcombine.low %v1093_v9, %v1097_v13  ;;  %7805 = vst [vmem:[#allocation114_spill] sm:$0xff] %v6050_v62  ;;  %7806 = vst [vmem:[#allocation115_spill] sm:$0xff] %v6052_v63  ;;  %v1124_v6 = vld [vmem:[#allocation10 + $0x300] sm:$0xff]  ;;  %v1125_v9 = vld [vmem:[#allocation10 + $0x308] sm:$0xff] }
 0x21f   :  { %959 = vmatmul.mubr.bf16.vlgmr.msra.gmra.mrb[4].mxu0 %v5904_v12  ;;  %1002 = vmatmul.mubr.bf16.vlgmr.msra.gmra.mrb[4].mxu1 %v5904_v12  ;;  %v1053_v12 = vld [vmem:[#allocation10 + $0xc8] sm:$0xff]  ;;  %7794 = vst [vmem:[#allocation103_spill] sm:$0xff] %v6016_v16  ;;  %7795 = vst [vmem:[#allocation104_spill] sm:$0xff] %v6019_v17  ;;  %v1128_v8 = vld [vmem:[#allocation10 + $0x320] sm:$0xff] }
 0x220   :  { %1820 = vmatpush1.bf16.msra.mxu0 %v5921_v18  ;;  %1861 = vmatpush1.bf16.msra.mxu1 %v5924_v19  ;;  %v5959_v37 = vcombine.high %v1053_v12, %v1057_v33  ;;  %v5966_v42 = vcombine.low %v1053_v12, %v1057_v33  ;;  %7796 = vst [vmem:[#allocation105_spill] sm:$0xff] %v6022_v31  ;;  %7797 = vst [vmem:[#allocation106_spill] sm:$0xff] %v6026_v32  ;;  %v1129_v13 = vld [vmem:[#allocation10 + $0x328] sm:$0xff] }
 0x221   :  { %1821 = vmatprep.subr.bf16.mxu0 %v5926_v20  ;;  %1862 = vmatprep.subr.bf16.mxu1 %v5929_v21  ;;  %v6028_v12 = vcombine.high %v1100_v22, %v1104_v23  ;;  %v6031_v33 = vcombine.high %v1101_v25, %v1105_v26  ;;  %7807 = vst [vmem:[#allocation116_spill] sm:$0xff] %v6055_v1 }
 0x222   :  { %1851 = vmatprep.mubr.bf16.mxu0 %v5931_v24  ;;  %1892 = vmatprep.mubr.bf16.mxu1 %v5931_v24  ;;  %7775 = vst [vmem:[#allocation84_spill] sm:$0xff] %v5959_v37  ;;  %7777 = vst [vmem:[#allocation86_spill] sm:$0xff] %v5966_v42  ;;  %v6058_v22 = vcombine.low %v1116_v53, %v1120_v54  ;;  %v6062_v23 = vcombine.low %v1117_v55, %v1121_v56 }
 0x223   :  { %7798 = vst [vmem:[#allocation107_spill] sm:$0xff] %v6028_v12  ;;  %7799 = vst [vmem:[#allocation108_spill] sm:$0xff] %v6031_v33  ;;  %v6064_v25 = vcombine.high %v1124_v6, %v1128_v8  ;;  %v6067_v26 = vcombine.high %v1125_v9, %v1129_v13  ;;  %v6070_v53 = vcombine.low %v1124_v6, %v1128_v8 }
 0x224   :  { %1822 = vmatpush1.bf16.msra.mxu0 %v5936_v27  ;;  %1863 = vmatpush1.bf16.msra.mxu1 %v5940_v28  ;;  %7808 = vst [vmem:[#allocation117_spill] sm:$0xff] %v6058_v22  ;;  %7809 = vst [vmem:[#allocation118_spill] sm:$0xff] %v6062_v23  ;;  %v6074_v54 = vcombine.low %v1125_v9, %v1129_v13  ;;  %v6076_v55 = vcombine.high %v1132_v38, %v1136_v39 }
 0x225   :  { %1823 = vmatprep.subr.bf16.mxu0 %v5942_v29  ;;  %1864 = vmatprep.subr.bf16.mxu1 %v5945_v30  ;;  %7810 = vst [vmem:[#allocation119_spill] sm:$0xff] %v6064_v25  ;;  %7811 = vst [vmem:[#allocation120_spill] sm:$0xff] %v6067_v26  ;;  %v6079_v56 = vcombine.high %v1133_v40, %v1137_v41  ;;  %v6082_v6 = vcombine.low %v1132_v38, %v1136_v39 }
 0x226   :  { %7812 = vst [vmem:[#allocation121_spill] sm:$0xff] %v6070_v53  ;;  %7813 = vst [vmem:[#allocation122_spill] sm:$0xff] %v6074_v54  ;;  %v6086_v8 = vcombine.low %v1133_v40, %v1137_v41 }
 0x227   :  { %7814 = vst [vmem:[#allocation123_spill] sm:$0xff] %v6076_v55  ;;  %7815 = vst [vmem:[#allocation124_spill] sm:$0xff] %v6079_v56 }
 0x228   :  { %1824 = vmatpush1.bf16.msra.mxu0 %v5950_v34  ;;  %1865 = vmatpush1.bf16.msra.mxu1 %v5954_v35  ;;  %7816 = vst [vmem:[#allocation125_spill] sm:$0xff] %v6082_v6  ;;  %7817 = vst [vmem:[#allocation126_spill] sm:$0xff] %v6086_v8 }
 0x229   :  { %1825 = vmatprep.subr.bf16.mxu0 %v5956_v36  ;;  %1866 = vmatprep.subr.bf16.mxu1 %v5959_v37 }
 0x22c   :  { %1826 = vmatpush1.bf16.msra.mxu0 %v5962_v0  ;;  %1867 = vmatpush1.bf16.msra.mxu1 %v5966_v42 }
 0x22d   :  { %1827 = vmatprep.subr.bf16.mxu0 %v5968_v43  ;;  %1868 = vmatprep.subr.bf16.mxu1 %v5971_v44 }
 0x230   :  { %1828 = vmatpush1.bf16.msra.mxu0 %v5974_v49  ;;  %1869 = vmatpush1.bf16.msra.mxu1 %v5978_v50 }
 0x231   :  { %1829 = vmatprep.subr.bf16.mxu0 %v5980_v51  ;;  %1870 = vmatprep.subr.bf16.mxu1 %v5983_v52 }
 0x234   :  { %1830 = vmatpush1.bf16.msra.mxu0 %v5986_v57  ;;  %1871 = vmatpush1.bf16.msra.mxu1 %v5990_v58 }
 0x235   :  { %1831 = vmatprep.subr.bf16.mxu0 %v5992_v59  ;;  %1872 = vmatprep.subr.bf16.mxu1 %v5995_v60 }
 0x238   :  { %1832 = vmatpush1.bf16.msra.mxu0 %v5998_v2  ;;  %1873 = vmatpush1.bf16.msra.mxu1 %v6002_v3 }
 0x239   :  { %1833 = vmatprep.subr.bf16.mxu0 %v6004_v4  ;;  %1874 = vmatprep.subr.bf16.mxu1 %v6007_v5 }
 0x23c   :  { %1834 = vmatpush1.bf16.msra.mxu0 %v6010_v14  ;;  %1875 = vmatpush1.bf16.msra.mxu1 %v6014_v15 }
 0x23d   :  { %1835 = vmatprep.subr.bf16.mxu0 %v6016_v16  ;;  %1876 = vmatprep.subr.bf16.mxu1 %v6019_v17 }
 0x240   :  { %1836 = vmatpush1.bf16.msra.mxu0 %v6022_v31  ;;  %1877 = vmatpush1.bf16.msra.mxu1 %v6026_v32 }
 0x241   :  { %1837 = vmatprep.subr.bf16.mxu0 %v6028_v12  ;;  %1878 = vmatprep.subr.bf16.mxu1 %v6031_v33 }
 0x244   :  { %1838 = vmatpush1.bf16.msra.mxu0 %v6034_v45  ;;  %1879 = vmatpush1.bf16.msra.mxu1 %v6038_v46 }
 0x245   :  { %1839 = vmatprep.subr.bf16.mxu0 %v6040_v47  ;;  %1880 = vmatprep.subr.bf16.mxu1 %v6043_v48 }
 0x248   :  { %1840 = vmatpush1.bf16.msra.mxu0 %v6046_v61  ;;  %1881 = vmatpush1.bf16.msra.mxu1 %v6050_v62  ;;  %v1141_v62 = vld [vmem:[#allocation10 + $0x388] sm:$0xff] }
 0x249   :  { %1841 = vmatprep.subr.bf16.mxu0 %v6052_v63  ;;  %1882 = vmatprep.subr.bf16.mxu1 %v6055_v1  ;;  %v1140_v1 = vld [vmem:[#allocation10 + $0x380] sm:$0xff]  ;;  %v1145_v61 = vld [vmem:[#allocation10 + $0x3a8] sm:$0xff] }
 0x24a   :  { %v1144_v63 = vld [vmem:[#allocation10 + $0x3a0] sm:$0xff]  ;;  %v6091_v13 = vcombine.high %v1141_v62, %v1145_v61  ;;  %v6098_v39 = vcombine.low %v1141_v62, %v1145_v61 }
 0x24b   :  { %v6088_v9 = vcombine.high %v1140_v1, %v1144_v63  ;;  %v6094_v38 = vcombine.low %v1140_v1, %v1144_v63 }
 0x24c   :  { %1842 = vmatpush1.bf16.msra.mxu0 %v6058_v22  ;;  %1883 = vmatpush1.bf16.msra.mxu1 %v6062_v23  ;;  %7819 = vst [vmem:[#allocation128_spill] sm:$0xff] %v6091_v13  ;;  %v1149_v23 = vld [vmem:[#allocation10 + $0x3c8] sm:$0xff]  ;;  %7821 = vst [vmem:[#allocation130_spill] sm:$0xff] %v6098_v39 }
 0x24d   :  { %1843 = vmatprep.subr.bf16.mxu0 %v6064_v25  ;;  %1884 = vmatprep.subr.bf16.mxu1 %v6067_v26  ;;  %7818 = vst [vmem:[#allocation127_spill] sm:$0xff] %v6088_v9  ;;  %v1148_v26 = vld [vmem:[#allocation10 + $0x3c0] sm:$0xff]  ;;  %v1153_v22 = vld [vmem:[#allocation10 + $0x3e8] sm:$0xff]  ;;  %7820 = vst [vmem:[#allocation129_spill] sm:$0xff] %v6094_v38 }
 0x24e   :  { %v1152_v25 = vld [vmem:[#allocation10 + $0x3e0] sm:$0xff]  ;;  %v6103_v41 = vcombine.high %v1149_v23, %v1153_v22  ;;  %v6110_v61 = vcombine.low %v1149_v23, %v1153_v22 }
 0x24f   :  { %v6100_v40 = vcombine.high %v1148_v26, %v1152_v25  ;;  %v6106_v63 = vcombine.low %v1148_v26, %v1152_v25  ;;  %v1039_v25 = vld [vmem:[#allocation10 + $0x58] sm:$0xff] }
 0x250   :  { %1844 = vmatpush1.bf16.msra.mxu0 %v6070_v53  ;;  %1885 = vmatpush1.bf16.msra.mxu1 %v6074_v54  ;;  %7823 = vst [vmem:[#allocation132_spill] sm:$0xff] %v6103_v41  ;;  %v1031_v54 = vld [vmem:[#allocation10 + $0x18] sm:$0xff]  ;;  %7825 = vst [vmem:[#allocation134_spill] sm:$0xff] %v6110_v61 }
 0x251   :  { %1845 = vmatprep.subr.bf16.mxu0 %v6076_v55  ;;  %1886 = vmatprep.subr.bf16.mxu1 %v6079_v56  ;;  %7822 = vst [vmem:[#allocation131_spill] sm:$0xff] %v6100_v40  ;;  %v1030_v56 = vld [vmem:[#allocation10 + $0x10] sm:$0xff]  ;;  %v1035_v53 = vld [vmem:[#allocation10 + $0x38] sm:$0xff]  ;;  %7824 = vst [vmem:[#allocation133_spill] sm:$0xff] %v6106_v63 }
 0x252   :  { %v1034_v55 = vld [vmem:[#allocation10 + $0x30] sm:$0xff]  ;;  %v6115_v1 = vcombine.high %v1031_v54, %v1035_v53  ;;  %v1043_v26 = vld [vmem:[#allocation10 + $0x78] sm:$0xff]  ;;  %v6126_v22 = vcombine.low %v1031_v54, %v1035_v53 }
 0x253   :  { %v6112_v62 = vcombine.high %v1030_v56, %v1034_v55  ;;  %v6140_v53 = vcombine.low %v1039_v25, %v1043_v26 }
 0x254   :  { %1846 = vmatpush1.bf16.msra.mxu0 %v6082_v6  ;;  %1887 = vmatpush1.bf16.msra.mxu1 %v6086_v8  ;;  %7827 = vst [vmem:[#allocation136_spill] sm:$0xff] %v6115_v1  ;;  %v6119_v8 = vpack.c.bf16 %v5913_v7, %v5913_v7  ;;  %7829 = vst [vmem:[#allocation138_spill] sm:$0xff] %v6126_v22  ;;  %v1046_v7 = vld [vmem:[#allocation10 + $0x90] sm:$0xff] }
 0x255   :  { %1847 = vmatprep.subr.bf16.mxu0 %v6088_v9  ;;  %1888 = vmatprep.subr.bf16.mxu1 %v6091_v13  ;;  %7826 = vst [vmem:[#allocation135_spill] sm:$0xff] %v6112_v62  ;;  %v1038_v13 = vld [vmem:[#allocation10 + $0x50] sm:$0xff]  ;;  %7833 = vst [vmem:[#allocation142_spill] sm:$0xff] %v6140_v53 }
 0x256   :  { %v1042_v9 = vld [vmem:[#allocation10 + $0x70] sm:$0xff] }
 0x257   :  { %v6128_v23 = vcombine.high %v1038_v13, %v1042_v9 }
 0x258   :  { %1848 = vmatpush1.bf16.msra.mxu0 %v6094_v38  ;;  %1889 = vmatpush1.bf16.msra.mxu1 %v6098_v39  ;;  %v6122_v39 = vcombine.low %v1030_v56, %v1034_v55  ;;  %v1047_v38 = vld [vmem:[#allocation10 + $0x98] sm:$0xff]  ;;  %v6136_v55 = vcombine.low %v1038_v13, %v1042_v9 }
 0x259   :  { %1849 = vmatprep.subr.bf16.mxu0 %v6100_v40  ;;  %1890 = vmatprep.subr.bf16.mxu1 %v6103_v41  ;;  %7830 = vst [vmem:[#allocation139_spill] sm:$0xff] %v6128_v23  ;;  %v6131_v41 = vcombine.high %v1039_v25, %v1043_v26  ;;  %v1050_v40 = vld [vmem:[#allocation10 + $0xb0] sm:$0xff] }
 0x25a   :  { %7828 = vst [vmem:[#allocation137_spill] sm:$0xff] %v6122_v39  ;;  %7832 = vst [vmem:[#allocation141_spill] sm:$0xff] %v6136_v55  ;;  %v6142_v54 = vcombine.high %v1046_v7, %v1050_v40  ;;  %v6150_v9 = vcombine.low %v1046_v7, %v1050_v40 }
 0x25b   :  { %7831 = vst [vmem:[#allocation140_spill] sm:$0xff] %v6131_v41 }
 0x25c   :  { %1850 = vmatpush1.bf16.msra.mxu0 %v6106_v63  ;;  %1891 = vmatpush1.bf16.msra.mxu1 %v6110_v61  ;;  %v1051_v63 = vld [vmem:[#allocation10 + $0xb8] sm:$0xff]  ;;  %7834 = vst [vmem:[#allocation143_spill] sm:$0xff] %v6142_v54  ;;  %7836 = vst [vmem:[#allocation145_spill] sm:$0xff] %v6150_v9 }
 0x25d   :  { %1901 = vmatprep.subr.bf16.mxu0 %v6112_v62  ;;  %1942 = vmatprep.subr.bf16.mxu1 %v6115_v1  ;;  %v6145_v56 = vcombine.high %v1047_v38, %v1051_v63  ;;  %v1054_v1 = vld [vmem:[#allocation10 + $0xd0] sm:$0xff]  ;;  %v1055_v61 = vld [vmem:[#allocation10 + $0xd8] sm:$0xff]  ;;  %v6154_v13 = vcombine.low %v1047_v38, %v1051_v63 }
 0x25e   :  { %v1058_v62 = vld [vmem:[#allocation10 + $0xf0] sm:$0xff] }
 0x25f   :  { %1852 = vmatmul.mubr.bf16.vlgmr.msra.gmra.mrb[8].mxu0 %v6119_v8  ;;  %1893 = vmatmul.mubr.bf16.vlgmr.msra.gmra.mrb[8].mxu1 %v6119_v8  ;;  %7835 = vst [vmem:[#allocation144_spill] sm:$0xff] %v6145_v56  ;;  %7837 = vst [vmem:[#allocation146_spill] sm:$0xff] %v6154_v13  ;;  %v6156_v25 = vcombine.high %v1054_v1, %v1058_v62  ;;  %v6162_v40 = vcombine.low %v1054_v1, %v1058_v62 }
 0x260   :  { %1902 = vmatpush1.bf16.msra.mxu0 %v6122_v39  ;;  %1943 = vmatpush1.bf16.msra.mxu1 %v6126_v22  ;;  %v1059_v39 = vld [vmem:[#allocation10 + $0xf8] sm:$0xff] }
 0x261   :  { %1903 = vmatprep.subr.bf16.mxu0 %v6128_v23  ;;  %1944 = vmatprep.subr.bf16.mxu1 %v6131_v41  ;;  %7838 = vst [vmem:[#allocation147_spill] sm:$0xff] %v6156_v25  ;;  %v6159_v26 = vcombine.high %v1055_v61, %v1059_v39  ;;  %v1062_v41 = vld [vmem:[#allocation10 + $0x110] sm:$0xff]  ;;  %v1063_v22 = vld [vmem:[#allocation10 + $0x118] sm:$0xff]  ;;  %7840 = vst [vmem:[#allocation149_spill] sm:$0xff] %v6162_v40  ;;  %v6166_v38 = vcombine.low %v1055_v61, %v1059_v39 }
 0x262   :  { %1933 = vmatprep.mubr.bf16.mxu0 %v5931_v24  ;;  %1974 = vmatprep.mubr.bf16.mxu1 %v5931_v24  ;;  %v1066_v23 = vld [vmem:[#allocation10 + $0x130] sm:$0xff]  ;;  %v1067_v24 = vld [vmem:[#allocation10 + $0x138] sm:$0xff] }
 0x263   :  { %7839 = vst [vmem:[#allocation148_spill] sm:$0xff] %v6159_v26  ;;  %7841 = vst [vmem:[#allocation150_spill] sm:$0xff] %v6166_v38  ;;  %v6168_v63 = vcombine.high %v1062_v41, %v1066_v23  ;;  %v6171_v7 = vcombine.high %v1063_v22, %v1067_v24  ;;  %v6174_v62 = vcombine.low %v1062_v41, %v1066_v23 }
 0x264   :  { %1904 = vmatpush1.bf16.msra.mxu0 %v6136_v55  ;;  %1945 = vmatpush1.bf16.msra.mxu1 %v6140_v53  ;;  %v1071_v53 = vld [vmem:[#allocation10 + $0x158] sm:$0xff]  ;;  %v6178_v39 = vcombine.low %v1063_v22, %v1067_v24 }
 0x265   :  { %1905 = vmatprep.subr.bf16.mxu0 %v6142_v54  ;;  %1946 = vmatprep.subr.bf16.mxu1 %v6145_v56  ;;  %7842 = vst [vmem:[#allocation151_spill] sm:$0xff] %v6168_v63  ;;  %7843 = vst [vmem:[#allocation152_spill] sm:$0xff] %v6171_v7  ;;  %v1070_v56 = vld [vmem:[#allocation10 + $0x150] sm:$0xff]  ;;  %v1075_v55 = vld [vmem:[#allocation10 + $0x178] sm:$0xff] }
 0x266   :  { %v1074_v54 = vld [vmem:[#allocation10 + $0x170] sm:$0xff]  ;;  %7844 = vst [vmem:[#allocation153_spill] sm:$0xff] %v6174_v62  ;;  %7845 = vst [vmem:[#allocation154_spill] sm:$0xff] %v6178_v39  ;;  %v6183_v1 = vcombine.high %v1071_v53, %v1075_v55  ;;  %v6190_v22 = vcombine.low %v1071_v53, %v1075_v55 }
 0x267   :  { %v6180_v61 = vcombine.high %v1070_v56, %v1074_v54  ;;  %v6186_v41 = vcombine.low %v1070_v56, %v1074_v54 }
 0x268   :  { %1906 = vmatpush1.bf16.msra.mxu0 %v6150_v9  ;;  %1947 = vmatpush1.bf16.msra.mxu1 %v6154_v13  ;;  %7847 = vst [vmem:[#allocation156_spill] sm:$0xff] %v6183_v1  ;;  %v1079_v13 = vld [vmem:[#allocation10 + $0x198] sm:$0xff]  ;;  %7849 = vst [vmem:[#allocation158_spill] sm:$0xff] %v6190_v22 }
 0x269   :  { %1907 = vmatprep.subr.bf16.mxu0 %v6156_v25  ;;  %1948 = vmatprep.subr.bf16.mxu1 %v6159_v26  ;;  %7846 = vst [vmem:[#allocation155_spill] sm:$0xff] %v6180_v61  ;;  %v1078_v26 = vld [vmem:[#allocation10 + $0x190] sm:$0xff]  ;;  %v1083_v9 = vld [vmem:[#allocation10 + $0x1b8] sm:$0xff]  ;;  %7848 = vst [vmem:[#allocation157_spill] sm:$0xff] %v6186_v41 }
 0x26a   :  { %v1082_v25 = vld [vmem:[#allocation10 + $0x1b0] sm:$0xff]  ;;  %v6195_v24 = vcombine.high %v1079_v13, %v1083_v9  ;;  %v6202_v55 = vcombine.low %v1079_v13, %v1083_v9 }
 0x26b   :  { %v6192_v23 = vcombine.high %v1078_v26, %v1082_v25  ;;  %v6198_v54 = vcombine.low %v1078_v26, %v1082_v25 }
 0x26c   :  { %1908 = vmatpush1.bf16.msra.mxu0 %v6162_v40  ;;  %1949 = vmatpush1.bf16.msra.mxu1 %v6166_v38  ;;  %7851 = vst [vmem:[#allocation160_spill] sm:$0xff] %v6195_v24  ;;  %v1087_v38 = vld [vmem:[#allocation10 + $0x1d8] sm:$0xff]  ;;  %7853 = vst [vmem:[#allocation162_spill] sm:$0xff] %v6202_v55 }
 0x26d   :  { %1909 = vmatprep.subr.bf16.mxu0 %v6168_v63  ;;  %1950 = vmatprep.subr.bf16.mxu1 %v6171_v7  ;;  %7850 = vst [vmem:[#allocation159_spill] sm:$0xff] %v6192_v23  ;;  %v1086_v7 = vld [vmem:[#allocation10 + $0x1d0] sm:$0xff]  ;;  %v1091_v40 = vld [vmem:[#allocation10 + $0x1f8] sm:$0xff]  ;;  %7852 = vst [vmem:[#allocation161_spill] sm:$0xff] %v6198_v54 }
 0x26e   :  { %v1090_v63 = vld [vmem:[#allocation10 + $0x1f0] sm:$0xff]  ;;  %v6207_v56 = vcombine.high %v1087_v38, %v1091_v40  ;;  %v6214_v9 = vcombine.low %v1087_v38, %v1091_v40 }
 0x26f   :  { %v6204_v53 = vcombine.high %v1086_v7, %v1090_v63  ;;  %v6210_v25 = vcombine.low %v1086_v7, %v1090_v63 }
 0x270   :  { %1910 = vmatpush1.bf16.msra.mxu0 %v6174_v62  ;;  %1951 = vmatpush1.bf16.msra.mxu1 %v6178_v39  ;;  %7855 = vst [vmem:[#allocation164_spill] sm:$0xff] %v6207_v56  ;;  %v1095_v39 = vld [vmem:[#allocation10 + $0x218] sm:$0xff]  ;;  %7857 = vst [vmem:[#allocation166_spill] sm:$0xff] %v6214_v9 }
 0x271   :  { %1911 = vmatprep.subr.bf16.mxu0 %v6180_v61  ;;  %1952 = vmatprep.subr.bf16.mxu1 %v6183_v1  ;;  %7854 = vst [vmem:[#allocation163_spill] sm:$0xff] %v6204_v53  ;;  %v1094_v1 = vld [vmem:[#allocation10 + $0x210] sm:$0xff]  ;;  %v1099_v62 = vld [vmem:[#allocation10 + $0x238] sm:$0xff]  ;;  %7856 = vst [vmem:[#allocation165_spill] sm:$0xff] %v6210_v25 }
 0x272   :  { %v1098_v61 = vld [vmem:[#allocation10 + $0x230] sm:$0xff]  ;;  %v6219_v26 = vcombine.high %v1095_v39, %v1099_v62  ;;  %v6226_v40 = vcombine.low %v1095_v39, %v1099_v62 }
 0x273   :  { %v6216_v13 = vcombine.high %v1094_v1, %v1098_v61  ;;  %v6222_v63 = vcombine.low %v1094_v1, %v1098_v61 }
 0x274   :  { %1912 = vmatpush1.bf16.msra.mxu0 %v6186_v41  ;;  %1953 = vmatpush1.bf16.msra.mxu1 %v6190_v22  ;;  %7859 = vst [vmem:[#allocation168_spill] sm:$0xff] %v6219_v26  ;;  %v1103_v22 = vld [vmem:[#allocation10 + $0x258] sm:$0xff]  ;;  %7861 = vst [vmem:[#allocation170_spill] sm:$0xff] %v6226_v40 }
 0x275   :  { %1913 = vmatprep.subr.bf16.mxu0 %v6192_v23  ;;  %1954 = vmatprep.subr.bf16.mxu1 %v6195_v24  ;;  %7858 = vst [vmem:[#allocation167_spill] sm:$0xff] %v6216_v13  ;;  %v1102_v24 = vld [vmem:[#allocation10 + $0x250] sm:$0xff]  ;;  %v1107_v41 = vld [vmem:[#allocation10 + $0x278] sm:$0xff]  ;;  %7860 = vst [vmem:[#allocation169_spill] sm:$0xff] %v6222_v63 }
 0x276   :  { %v1106_v23 = vld [vmem:[#allocation10 + $0x270] sm:$0xff]  ;;  %v6231_v7 = vcombine.high %v1103_v22, %v1107_v41  ;;  %v6238_v62 = vcombine.low %v1103_v22, %v1107_v41 }
 0x277   :  { %v6228_v38 = vcombine.high %v1102_v24, %v1106_v23  ;;  %v6234_v61 = vcombine.low %v1102_v24, %v1106_v23 }
 0x278   :  { %1914 = vmatpush1.bf16.msra.mxu0 %v6198_v54  ;;  %1955 = vmatpush1.bf16.msra.mxu1 %v6202_v55  ;;  %7863 = vst [vmem:[#allocation172_spill] sm:$0xff] %v6231_v7  ;;  %v1111_v55 = vld [vmem:[#allocation10 + $0x298] sm:$0xff]  ;;  %7865 = vst [vmem:[#allocation174_spill] sm:$0xff] %v6238_v62 }
 0x279   :  { %1915 = vmatprep.subr.bf16.mxu0 %v6204_v53  ;;  %1956 = vmatprep.subr.bf16.mxu1 %v6207_v56  ;;  %7862 = vst [vmem:[#allocation171_spill] sm:$0xff] %v6228_v38  ;;  %v1110_v56 = vld [vmem:[#allocation10 + $0x290] sm:$0xff]  ;;  %v1115_v54 = vld [vmem:[#allocation10 + $0x2b8] sm:$0xff]  ;;  %7864 = vst [vmem:[#allocation173_spill] sm:$0xff] %v6234_v61 }
 0x27a   :  { %v1114_v53 = vld [vmem:[#allocation10 + $0x2b0] sm:$0xff]  ;;  %v6243_v1 = vcombine.high %v1111_v55, %v1115_v54  ;;  %v6250_v41 = vcombine.low %v1111_v55, %v1115_v54 }
 0x27b   :  { %v6240_v39 = vcombine.high %v1110_v56, %v1114_v53  ;;  %v6246_v23 = vcombine.low %v1110_v56, %v1114_v53 }
 0x27c   :  { %1916 = vmatpush1.bf16.msra.mxu0 %v6210_v25  ;;  %1957 = vmatpush1.bf16.msra.mxu1 %v6214_v9  ;;  %7867 = vst [vmem:[#allocation176_spill] sm:$0xff] %v6243_v1  ;;  %v1119_v9 = vld [vmem:[#allocation10 + $0x2d8] sm:$0xff]  ;;  %7869 = vst [vmem:[#allocation178_spill] sm:$0xff] %v6250_v41 }
 0x27d   :  { %1917 = vmatprep.subr.bf16.mxu0 %v6216_v13  ;;  %1958 = vmatprep.subr.bf16.mxu1 %v6219_v26  ;;  %7866 = vst [vmem:[#allocation175_spill] sm:$0xff] %v6240_v39  ;;  %v1118_v26 = vld [vmem:[#allocation10 + $0x2d0] sm:$0xff]  ;;  %v1123_v25 = vld [vmem:[#allocation10 + $0x2f8] sm:$0xff]  ;;  %7868 = vst [vmem:[#allocation177_spill] sm:$0xff] %v6246_v23 }
 0x27e   :  { %v1122_v13 = vld [vmem:[#allocation10 + $0x2f0] sm:$0xff]  ;;  %v6255_v24 = vcombine.high %v1119_v9, %v1123_v25  ;;  %v6262_v54 = vcombine.low %v1119_v9, %v1123_v25 }
 0x27f   :  { %v6252_v22 = vcombine.high %v1118_v26, %v1122_v13  ;;  %v6258_v53 = vcombine.low %v1118_v26, %v1122_v13 }
 0x280   :  { %1918 = vmatpush1.bf16.msra.mxu0 %v6222_v63  ;;  %1959 = vmatpush1.bf16.msra.mxu1 %v6226_v40  ;;  %7871 = vst [vmem:[#allocation180_spill] sm:$0xff] %v6255_v24  ;;  %v1127_v40 = vld [vmem:[#allocation10 + $0x318] sm:$0xff]  ;;  %7873 = vst [vmem:[#allocation182_spill] sm:$0xff] %v6262_v54 }
 0x281   :  { %1919 = vmatprep.subr.bf16.mxu0 %v6228_v38  ;;  %1960 = vmatprep.subr.bf16.mxu1 %v6231_v7  ;;  %7870 = vst [vmem:[#allocation179_spill] sm:$0xff] %v6252_v22  ;;  %v1126_v7 = vld [vmem:[#allocation10 + $0x310] sm:$0xff]  ;;  %v1131_v63 = vld [vmem:[#allocation10 + $0x338] sm:$0xff]  ;;  %7872 = vst [vmem:[#allocation181_spill] sm:$0xff] %v6258_v53 }
 0x282   :  { %v1130_v38 = vld [vmem:[#allocation10 + $0x330] sm:$0xff]  ;;  %v6267_v56 = vcombine.high %v1127_v40, %v1131_v63  ;;  %v6274_v25 = vcombine.low %v1127_v40, %v1131_v63 }
 0x283   :  { %v6264_v55 = vcombine.high %v1126_v7, %v1130_v38  ;;  %v6270_v13 = vcombine.low %v1126_v7, %v1130_v38 }
 0x284   :  { %1920 = vmatpush1.bf16.msra.mxu0 %v6234_v61  ;;  %1961 = vmatpush1.bf16.msra.mxu1 %v6238_v62  ;;  %7875 = vst [vmem:[#allocation184_spill] sm:$0xff] %v6267_v56  ;;  %v1135_v62 = vld [vmem:[#allocation10 + $0x358] sm:$0xff]  ;;  %7877 = vst [vmem:[#allocation186_spill] sm:$0xff] %v6274_v25 }
 0x285   :  { %1921 = vmatprep.subr.bf16.mxu0 %v6240_v39  ;;  %1962 = vmatprep.subr.bf16.mxu1 %v6243_v1  ;;  %7874 = vst [vmem:[#allocation183_spill] sm:$0xff] %v6264_v55  ;;  %v1134_v1 = vld [vmem:[#allocation10 + $0x350] sm:$0xff]  ;;  %v1139_v61 = vld [vmem:[#allocation10 + $0x378] sm:$0xff]  ;;  %7876 = vst [vmem:[#allocation185_spill] sm:$0xff] %v6270_v13 }
 0x286   :  { %v1138_v39 = vld [vmem:[#allocation10 + $0x370] sm:$0xff]  ;;  %v6279_v26 = vcombine.high %v1135_v62, %v1139_v61  ;;  %v6286_v63 = vcombine.low %v1135_v62, %v1139_v61 }
 0x287   :  { %v6276_v9 = vcombine.high %v1134_v1, %v1138_v39  ;;  %v6282_v38 = vcombine.low %v1134_v1, %v1138_v39 }
 0x288   :  { %1922 = vmatpush1.bf16.msra.mxu0 %v6246_v23  ;;  %1963 = vmatpush1.bf16.msra.mxu1 %v6250_v41  ;;  %7879 = vst [vmem:[#allocation188_spill] sm:$0xff] %v6279_v26  ;;  %v1143_v41 = vld [vmem:[#allocation10 + $0x398] sm:$0xff]  ;;  %7881 = vst [vmem:[#allocation190_spill] sm:$0xff] %v6286_v63 }
 0x289   :  { %1923 = vmatprep.subr.bf16.mxu0 %v6252_v22  ;;  %1964 = vmatprep.subr.bf16.mxu1 %v6255_v24  ;;  %7878 = vst [vmem:[#allocation187_spill] sm:$0xff] %v6276_v9  ;;  %v1142_v24 = vld [vmem:[#allocation10 + $0x390] sm:$0xff]  ;;  %v1147_v23 = vld [vmem:[#allocation10 + $0x3b8] sm:$0xff]  ;;  %7880 = vst [vmem:[#allocation189_spill] sm:$0xff] %v6282_v38 }
 0x28a   :  { %v1146_v22 = vld [vmem:[#allocation10 + $0x3b0] sm:$0xff]  ;;  %v6291_v7 = vcombine.high %v1143_v41, %v1147_v23  ;;  %v6298_v61 = vcombine.low %v1143_v41, %v1147_v23  ;;  %v7891_v41 = vld [vmem:[#allocation113_spill] sm:$0xff] }
 0x28b   :  { %v6288_v40 = vcombine.high %v1142_v24, %v1146_v22  ;;  %v6294_v39 = vcombine.low %v1142_v24, %v1146_v22  ;;  %v7892_v24 = vld [vmem:[#allocation114_spill] sm:$0xff] }
 0x28c   :  { %1924 = vmatpush1.bf16.msra.mxu0 %v6258_v53  ;;  %1965 = vmatpush1.bf16.msra.mxu1 %v6262_v54  ;;  %7883 = vst [vmem:[#allocation192_spill] sm:$0xff] %v6291_v7  ;;  %v1151_v54 = vld [vmem:[#allocation10 + $0x3d8] sm:$0xff]  ;;  %7885 = vst [vmem:[#allocation194_spill] sm:$0xff] %v6298_v61 }
 0x28d   :  { %1925 = vmatprep.subr.bf16.mxu0 %v6264_v55  ;;  %1966 = vmatprep.subr.bf16.mxu1 %v6267_v56  ;;  %7882 = vst [vmem:[#allocation191_spill] sm:$0xff] %v6288_v40  ;;  %v1150_v56 = vld [vmem:[#allocation10 + $0x3d0] sm:$0xff]  ;;  %v1155_v53 = vld [vmem:[#allocation10 + $0x3f8] sm:$0xff]  ;;  %7884 = vst [vmem:[#allocation193_spill] sm:$0xff] %v6294_v39 }
 0x28e   :  { %v1154_v55 = vld [vmem:[#allocation10 + $0x3f0] sm:$0xff]  ;;  %v6303_v1 = vcombine.high %v1151_v54, %v1155_v53  ;;  %v6310_v22 = vcombine.low %v1151_v54, %v1155_v53  ;;  %v7893_v53 = vld [vmem:[#allocation115_spill] sm:$0xff]  ;;  %v7894_v54 = vld [vmem:[#allocation116_spill] sm:$0xff] }
 0x28f   :  { %v6300_v62 = vcombine.high %v1150_v56, %v1154_v55 }
 0x290   :  { %1926 = vmatpush1.bf16.msra.mxu0 %v6270_v13  ;;  %1967 = vmatpush1.bf16.msra.mxu1 %v6274_v25  ;;  %7887 = vst [vmem:[#allocation196_spill] sm:$0xff] %v6303_v1  ;;  %7889 = vst [vmem:[#allocation198_spill] sm:$0xff] %v6310_v22 }
 0x291   :  { %1927 = vmatprep.subr.bf16.mxu0 %v6276_v9  ;;  %1968 = vmatprep.subr.bf16.mxu1 %v6279_v26  ;;  %7886 = vst [vmem:[#allocation195_spill] sm:$0xff] %v6300_v62  ;;  %v6306_v26 = vcombine.low %v1150_v56, %v1154_v55  ;;  %v478_v56 = vld [vmem:[%s7478_s4] sm:$0xff] }
 0x293   :  { %7888 = vst [vmem:[#allocation197_spill] sm:$0xff] %v6306_v26 }
 0x294   :  { %1928 = vmatpush1.bf16.msra.mxu0 %v6282_v38  ;;  %1969 = vmatpush1.bf16.msra.mxu1 %v6286_v63 }
 0x295   :  { %1929 = vmatprep.subr.bf16.mxu0 %v6288_v40  ;;  %1970 = vmatprep.subr.bf16.mxu1 %v6291_v7 }
 0x298   :  { %1930 = vmatpush1.bf16.msra.mxu0 %v6294_v39  ;;  %1971 = vmatpush1.bf16.msra.mxu1 %v6298_v61 }
 0x299   :  { %1931 = vmatprep.subr.bf16.mxu0 %v6300_v62  ;;  %1972 = vmatprep.subr.bf16.mxu1 %v6303_v1 }
 0x29c   :  { %1932 = vmatpush1.bf16.msra.mxu0 %v6306_v26  ;;  %1973 = vmatpush1.bf16.msra.mxu1 %v6310_v22 }
 0x29d   :  { %2060 = vmatprep.subr.bf16.mxu0 %v5915_v10  ;;  %2101 = vmatprep.subr.bf16.mxu1 %v5917_v11 }
 0x29f   :  { %1934 = vmatmul.mubr.bf16.vlgmr.msra.gmra.mrb[12].mxu0 %v6119_v8  ;;  %1975 = vmatmul.mubr.bf16.vlgmr.msra.gmra.mrb[12].mxu1 %v6119_v8  ;;  %v480_v8 = vlaneseq }
 0x2a0   :  { %2061 = vmatpush1.bf16.msra.mxu0 %v5921_v18  ;;  %2102 = vmatpush1.bf16.msra.mxu1 %v5924_v19 }
 0x2a1   :  { %2062 = vmatprep.subr.bf16.mxu0 %v5926_v20  ;;  %2103 = vmatprep.subr.bf16.mxu1 %v5929_v21  ;;  %v6359_v23 = vshrl.u32 %v480_v8, 7  ;;  %v7895_v8 = vld [vmem:[#allocation117_spill] sm:$0xff] }
 0x2a3   :  { %7890 = vst [vmem:[#allocation199_spill] sm:$0xff] %v6359_v23  ;;  %v482_v55 = vsub.s32 0, %v6359_v23 }
 0x2a4   :  { %2063 = vmatpush1.bf16.msra.mxu0 %v5936_v27  ;;  %2104 = vmatpush1.bf16.msra.mxu1 %v5940_v28 }
 0x2a5   :  { %2064 = vmatprep.subr.bf16.mxu0 %v5942_v29  ;;  %2105 = vmatprep.subr.bf16.mxu1 %v5945_v30 }
 0x2a8   :  { %2065 = vmatpush1.bf16.msra.mxu0 %v5950_v34  ;;  %2106 = vmatpush1.bf16.msra.mxu1 %v5954_v35 }
 0x2a9   :  { %2066 = vmatprep.subr.bf16.mxu0 %v5956_v36  ;;  %2107 = vmatprep.subr.bf16.mxu1 %v5959_v37 }
 0x2ac   :  { %2067 = vmatpush1.bf16.msra.mxu0 %v5962_v0  ;;  %2108 = vmatpush1.bf16.msra.mxu1 %v5966_v42 }
 0x2ad   :  { %2068 = vmatprep.subr.bf16.mxu0 %v5968_v43  ;;  %2109 = vmatprep.subr.bf16.mxu1 %v5971_v44 }
 0x2b0   :  { %2069 = vmatpush1.bf16.msra.mxu0 %v5974_v49  ;;  %2110 = vmatpush1.bf16.msra.mxu1 %v5978_v50 }
 0x2b1   :  { %2070 = vmatprep.subr.bf16.mxu0 %v5980_v51  ;;  %2111 = vmatprep.subr.bf16.mxu1 %v5983_v52 }
 0x2b4   :  { %2071 = vmatpush1.bf16.msra.mxu0 %v5986_v57  ;;  %2112 = vmatpush1.bf16.msra.mxu1 %v5990_v58 }
 0x2b5   :  { %2072 = vmatprep.subr.bf16.mxu0 %v5992_v59  ;;  %2113 = vmatprep.subr.bf16.mxu1 %v5995_v60 }
 0x2b8   :  { %2073 = vmatpush1.bf16.msra.mxu0 %v5998_v2  ;;  %2114 = vmatpush1.bf16.msra.mxu1 %v6002_v3 }
 0x2b9   :  { %2074 = vmatprep.subr.bf16.mxu0 %v6004_v4  ;;  %2115 = vmatprep.subr.bf16.mxu1 %v6007_v5 }
 0x2bc   :  { %2075 = vmatpush1.bf16.msra.mxu0 %v6010_v14  ;;  %2116 = vmatpush1.bf16.msra.mxu1 %v6014_v15 }
 0x2bd   :  { %2076 = vmatprep.subr.bf16.mxu0 %v6016_v16  ;;  %2117 = vmatprep.subr.bf16.mxu1 %v6019_v17  ;;  %v7901_v17 = vld [vmem:[#allocation123_spill] sm:$0xff] }
 0x2c0   :  { %2077 = vmatpush1.bf16.msra.mxu0 %v6022_v31  ;;  %2118 = vmatpush1.bf16.msra.mxu1 %v6026_v32  ;;  %v7900_v31 = vld [vmem:[#allocation122_spill] sm:$0xff] }
 0x2c1   :  { %2078 = vmatprep.subr.bf16.mxu0 %v6028_v12  ;;  %2119 = vmatprep.subr.bf16.mxu1 %v6031_v33  ;;  %v7899_v12 = vld [vmem:[#allocation121_spill] sm:$0xff] }
 0x2c4   :  { %2079 = vmatpush1.bf16.msra.mxu0 %v6034_v45  ;;  %2120 = vmatpush1.bf16.msra.mxu1 %v6038_v46  ;;  %v7896_v46 = vld [vmem:[#allocation118_spill] sm:$0xff] }
 0x2c5   :  { %2080 = vmatprep.subr.bf16.mxu0 %v6040_v47  ;;  %2121 = vmatprep.subr.bf16.mxu1 %v6043_v48  ;;  %v490_v47 = vsub.s32 2, %v6359_v23  ;;  %v486_v48 = vsub.s32 1, %v6359_v23 }
 0x2c7   :  { %v491_v45 = vrot.slane %v478_v56, %v490_v47  ;;  %v487_v33 = vrot.slane %v478_v56, %v486_v48 }
 0x2c8   :  { %2081 = vmatpush1.bf16.msra.mxu0 %v7891_v41  ;;  %2122 = vmatpush1.bf16.msra.mxu1 %v7892_v24  ;;  %v494_v41 = vsub.s32 3, %v6359_v23  ;;  %v7897_v24 = vld [vmem:[#allocation119_spill] sm:$0xff] }
 0x2c9   :  { %2082 = vmatprep.subr.bf16.mxu0 %v7893_v53  ;;  %2123 = vmatprep.subr.bf16.mxu1 %v7894_v54  ;;  %v7898_v53 = vld [vmem:[#allocation120_spill] sm:$0xff]  ;;  %v483_v54 = vrot.slane %v478_v56, %v482_v55 }
 0x2ca   :  { %v495_v32 = vrot.slane %v478_v56, %v494_v41 }
 0x2cc   :  { %2083 = vmatpush1.bf16.msra.mxu0 %v7895_v8  ;;  %2124 = vmatpush1.bf16.msra.mxu1 %v7896_v46  ;;  %v7902_v8 = vld [vmem:[#allocation124_spill] sm:$0xff] }
 0x2cd   :  { %2084 = vmatprep.subr.bf16.mxu0 %v7897_v24  ;;  %2125 = vmatprep.subr.bf16.mxu1 %v7898_v53 }
 0x2d0   :  { %2085 = vmatpush1.bf16.msra.mxu0 %v7899_v12  ;;  %2126 = vmatpush1.bf16.msra.mxu1 %v7900_v31  ;;  %v7903_v31 = vld [vmem:[#allocation126_spill] sm:$0xff] }
 0x2d1   :  { %2086 = vmatprep.subr.bf16.mxu0 %v7901_v17  ;;  %2127 = vmatprep.subr.bf16.mxu1 %v7902_v8  ;;  %v7904_v17 = vld [vmem:[#allocation127_spill] sm:$0xff] }
 0x2d2   :  { %v874_v16 = vpop.f32.mrb[0].mxu0  ;;  %v917_v14 = vpop.f32.mrb[0].mxu1 }
 0x2d3   :  { %v875_v15 = vadd.f32 %v874_v16, %v483_v54  ;;  %v876_v46 = vpop.f32.mrb[1].mxu0  ;;  %v918_v5 = vadd.f32 %v917_v14, %v491_v45  ;;  %v919_v4 = vpop.f32.mrb[1].mxu1  ;;  %v7905_v14 = vld [vmem:[#allocation128_spill] sm:$0xff] }
 0x2d4   :  { %v877_v24 = vadd.f32 %v876_v46, %v487_v33  ;;  %v878_v53 = vpop.f32.mrb[2].mxu0  ;;  %2087 = vmatpush1.bf16.msra.mxu0 %v6082_v6  ;;  %v920_v47 = vadd.f32 %v919_v4, %v495_v32  ;;  %v921_v41 = vpop.f32.mrb[2].mxu1  ;;  %2128 = vmatpush1.bf16.msra.mxu1 %v7903_v31  ;;  %v7906_v4 = vld [vmem:[#allocation129_spill] sm:$0xff] }
 0x2d5   :  { %1012 = vst [vmem:[#allocation3] sm:$0xff] %v875_v15  ;;  %v879_v48 = vadd.f32 %v878_v53, %v483_v54  ;;  %v880_v55 = vpop.f32.mrb[3].mxu0  ;;  %2088 = vmatprep.subr.bf16.mxu0 %v7904_v17  ;;  %1014 = vst [vmem:[#allocation3 + $0x10] sm:$0xff] %v918_v5  ;;  %v922_v16 = vadd.f32 %v921_v41, %v491_v45  ;;  %v923_v12 = vpop.f32.mrb[3].mxu1  ;;  %2129 = vmatprep.subr.bf16.mxu1 %v7905_v14  ;;  %v7907_v15 = vld [vmem:[#allocation130_spill] sm:$0xff]  ;;  %v7908_v53 = vld [vmem:[#allocation131_spill] sm:$0xff] }
 0x2d6   :  { %1013 = vst [vmem:[#allocation3 + $0x8] sm:$0xff] %v877_v24  ;;  %v881_v8 = vadd.f32 %v880_v55, %v487_v33  ;;  %1015 = vst [vmem:[#allocation3 + $0x18] sm:$0xff] %v920_v47  ;;  %v924_v46 = vadd.f32 %v923_v12, %v495_v32  ;;  %v7909_v54 = vld [vmem:[#allocation132_spill] sm:$0xff]  ;;  %v7910_v5 = vld [vmem:[#allocation133_spill] sm:$0xff]  ;;  %v498_v32 = vsub.s32 4, %v6359_v23  ;;  %v506_v12 = vsub.s32 6, %v6359_v23 }
 0x2d7   :  { %1020 = vst [vmem:[#allocation3 + $0x40] sm:$0xff] %v879_v48  ;;  %1022 = vst [vmem:[#allocation3 + $0x50] sm:$0xff] %v922_v16  ;;  %v7911_v33 = vld [vmem:[#allocation134_spill] sm:$0xff]  ;;  %v7912_v45 = vld [vmem:[#allocation135_spill] sm:$0xff]  ;;  %v510_v47 = vsub.s32 7, %v6359_v23 }
 0x2d8   :  { %1021 = vst [vmem:[#allocation3 + $0x48] sm:$0xff] %v881_v8  ;;  %2089 = vmatpush1.bf16.msra.mxu0 %v7906_v4  ;;  %1023 = vst [vmem:[#allocation3 + $0x58] sm:$0xff] %v924_v46  ;;  %2130 = vmatpush1.bf16.msra.mxu1 %v7907_v15  ;;  %v7913_v24 = vld [vmem:[#allocation136_spill] sm:$0xff]  ;;  %v502_v8 = vsub.s32 5, %v6359_v23  ;;  %v499_v48 = vrot.slane %v478_v56, %v498_v32  ;;  %v507_v41 = vrot.slane %v478_v56, %v506_v12 }
 0x2d9   :  { %2090 = vmatprep.subr.bf16.mxu0 %v7908_v53  ;;  %2131 = vmatprep.subr.bf16.mxu1 %v7909_v54  ;;  %v511_v16 = vrot.slane %v478_v56, %v510_v47 }
 0x2da   :  { %v503_v55 = vrot.slane %v478_v56, %v502_v8 }
 0x2dc   :  { %2091 = vmatpush1.bf16.msra.mxu0 %v7910_v5  ;;  %2132 = vmatpush1.bf16.msra.mxu1 %v7911_v33 }
 0x2dd   :  { %2142 = vmatprep.subr.bf16.mxu0 %v7912_v45  ;;  %2183 = vmatprep.subr.bf16.mxu1 %v7913_v24 }
 0x2f2   :  { %v960_v46 = vpop.f32.mrb[4].mxu0  ;;  %v1003_v54 = vpop.f32.mrb[4].mxu1 }
 0x2f3   :  { %v961_v5 = vadd.f32 %v960_v46, %v499_v48  ;;  %v962_v33 = vpop.f32.mrb[5].mxu0  ;;  %v1004_v53 = vadd.f32 %v1003_v54, %v507_v41  ;;  %v1005_v15 = vpop.f32.mrb[5].mxu1  ;;  %v1158_v46 = vld [vmem:[#allocation3] sm:$0x3] }
 0x2f4   :  { %v963_v45 = vadd.f32 %v962_v33, %v503_v55  ;;  %v964_v24 = vpop.f32.mrb[6].mxu0  ;;  %v1006_v4 = vadd.f32 %v1005_v15, %v511_v16  ;;  %v1007_v17 = vpop.f32.mrb[6].mxu1 }
 0x2f5   :  { %1016 = vst [vmem:[#allocation3 + $0x20] sm:$0xff] %v961_v5  ;;  %v965_v14 = vadd.f32 %v964_v24, %v499_v48  ;;  %v966_v31 = vpop.f32.mrb[7].mxu0  ;;  %1018 = vst [vmem:[#allocation3 + $0x30] sm:$0xff] %v1004_v53  ;;  %v1008_v23 = vadd.f32 %v1007_v17, %v507_v41  ;;  %v1009_v12 = vpop.f32.mrb[7].mxu1 }
 0x2f6   :  { %1017 = vst [vmem:[#allocation3 + $0x28] sm:$0xff] %v963_v45  ;;  %v967_v32 = vadd.f32 %v966_v31, %v503_v55  ;;  %1019 = vst [vmem:[#allocation3 + $0x38] sm:$0xff] %v1006_v4  ;;  %v1010_v56 = vadd.f32 %v1009_v12, %v511_v16  ;;  %v1160_v45 = vld [vmem:[#allocation3 + $0x10] sm:$0x3]  ;;  %v1159_v31 = vld [vmem:[#allocation3 + $0x8] sm:$0x3] }
 0x2f7   :  { %1024 = vst [vmem:[#allocation3 + $0x60] sm:$0xff] %v965_v14  ;;  %1026 = vst [vmem:[#allocation3 + $0x70] sm:$0xff] %v1008_v23  ;;  %v1161_v4 = vld [vmem:[#allocation3 + $0x18] sm:$0x3] }
 0x2f8   :  { %1025 = vst [vmem:[#allocation3 + $0x68] sm:$0xff] %v967_v32  ;;  %1027 = vst [vmem:[#allocation3 + $0x78] sm:$0xff] %v1010_v56 }
 0x332   :  { %v1853_v54 = vpop.f32.mrb[8].mxu0  ;;  %v1894_v33 = vpop.f32.mrb[8].mxu1 }
 0x333   :  { %v1855_v8 = vpop.f32.mrb[9].mxu0  ;;  %v1896_v47 = vpop.f32.mrb[9].mxu1  ;;  %v1983_v53 = vadd.f32 %v1853_v54, %v1158_v46  ;;  %v1985_v17 = vadd.f32 %v1894_v33, %v1160_v45 }
 0x334   :  { %v1857_v5 = vpop.f32.mrb[10].mxu0  ;;  %v1898_v15 = vpop.f32.mrb[10].mxu1  ;;  %v1984_v41 = vadd.f32 %v1855_v8, %v1159_v31  ;;  %v1986_v14 = vadd.f32 %v1896_v47, %v1161_v4  ;;  %v1162_v8 = vld [vmem:[#allocation3 + $0x20] sm:$0x3] }
 0x335   :  { %v1858_v24 = vpop.f32.mrb[11].mxu0  ;;  %v1899_v48 = vpop.f32.mrb[11].mxu1  ;;  %v4513_v55 = vmul.f32 -1.442695, %v1983_v53  ;;  %v4515_v23 = vmul.f32 -1.442695, %v1985_v17 }
 0x336   :  { %v4514_v16 = vmul.f32 -1.442695, %v1984_v41  ;;  %v4516_v32 = vmul.f32 -1.442695, %v1986_v14  ;;  %v1164_v53 = vld [vmem:[#allocation3 + $0x30] sm:$0x3] }
 0x337   :  { %4642 = vpow2.f32 %v4513_v55  ;;  %v1163_v17 = vld [vmem:[#allocation3 + $0x28] sm:$0x3]  ;;  %v1165_v14 = vld [vmem:[#allocation3 + $0x38] sm:$0x3] }
 0x338   :  { %4644 = vpow2.f32 %v4515_v23 }
 0x339   :  { %4646 = vpow2.f32 %v4514_v16 }
 0x33a   :  { %4648 = vpow2.f32 %v4516_v32 }
 0x341   :  { %v4643_v12 = vpop.eup %4642 }
 0x342   :  { %v4645_v56 = vpop.eup %4644  ;;  %v1997_v24 = vadd.f32 1.0, %v4643_v12 }
 0x343   :  { %v4647_v5 = vpop.eup %4646  ;;  %v2009_v54 = vadd.f32 1.0, %v4645_v56 }
 0x344   :  { %v4649_v15 = vpop.eup %4648  ;;  %v1998_v48 = vadd.f32 1.0, %v4647_v5  ;;  %4650 = vrcp.f32 %v1997_v24  ;;  %v4519_v24 = vld.sshfl [vmem:[%s7480_s6] sm:$0x33 pattern:$0x76325410]  ;;  %s5467_s6 = smov [#allocation12]  }
 0x345   :  { %v2010_v33 = vadd.f32 1.0, %v4649_v15  ;;  %4652 = vrcp.f32 %v2009_v54  ;;  %s4026_s20 = sshll.u32 %s5467_s6, 4  ;;  %s4027_s20 = int_to_ptr.vmem [resolvable:$true] %s4026_s20 }
 0x346   :  { %4654 = vrcp.f32 %v1998_v48  ;;  %s5336_s23 = scalar_lea.vmem %s4027_s20, 256  ;;  %p5341_p7 = scmp.lt.s32.totalorder %s4027_s20, %s4027_s20 }
 0x347   :  { %4656 = vrcp.f32 %v2010_v33  ;;  %p5337_p6 = scmp.ne.s32.totalorder %s4027_s20, %s5336_s23  ;;  %p5342_p9 = scmp.lt.s32.totalorder %s5336_s23, %s5336_s23 }
 0x349   :  { %p5343_p1 = por %p5342_p9, %p5341_p7 }
 0x34b   :  { %p5344_p13 = pnand %p5343_p1, %p5337_p6 }
 0x34e   :  { %v4651_v54 = vpop.eup %4650 }
 0x34f   :  { %v4653_v48 = vpop.eup %4652 }
 0x350   :  { %v4655_v33 = vpop.eup %4654 }
 0x372   :  { %v1935_v47 = vpop.f32.mrb[12].mxu0  ;;  %v1976_v45 = vpop.f32.mrb[12].mxu1 }
 0x373   :  { %v1987_v46 = vadd.f32 %v1935_v47, %v1162_v8  ;;  %v1937_v31 = vpop.f32.mrb[13].mxu0  ;;  %v1989_v41 = vadd.f32 %v1976_v45, %v1164_v53  ;;  %v1978_v55 = vpop.f32.mrb[13].mxu1  ;;  %v2037_v8 = vcombine.high %v4519_v24, %v4519_v24  ;;  %v2040_v45 = vmul.f32 %v4653_v48, %v4519_v24 }
 0x374   :  { %v1988_v4 = vadd.f32 %v1937_v31, %v1163_v17  ;;  %v1939_v23 = vpop.f32.mrb[14].mxu0  ;;  %v1990_v16 = vadd.f32 %v1978_v55, %v1165_v14  ;;  %v1980_v32 = vpop.f32.mrb[14].mxu1 }
 0x375   :  { %4658 = vtanh.f32 %v1987_v46  ;;  %v1940_v12 = vpop.f32.mrb[15].mxu0  ;;  %v4517_v56 = vmul.f32 -1.442695, %v1989_v41  ;;  %v1981_v5 = vpop.f32.mrb[15].mxu1 }
 0x376   :  { %4660 = vtanh.f32 %v1988_v4  ;;  %v4518_v15 = vmul.f32 -1.442695, %v1990_v16  ;;  %v4657_v47 = vpop.eup %4656 }
 0x377   :  { %4662 = vpow2.f32 %v4517_v56  ;;  %v2041_v31 = vmul.f32 %v4657_v47, %v2037_v8  ;;  %v7916_v8 = vld [vmem:[#allocation137_spill] sm:$0xff]  ;;  %v7917_v47 = vld [vmem:[#allocation138_spill] sm:$0xff] }
 0x378   :  { %4664 = vpow2.f32 %v4518_v15 }
 0x37f   :  { %v4659_v53 = vpop.eup %4658 }
 0x380   :  { %v4661_v46 = vpop.eup %4660  ;;  %v2042_v17 = vmul.f32 %v4659_v53, %v4651_v54  ;;  %v7918_v53 = vld [vmem:[#allocation139_spill] sm:$0xff] }
 0x381   :  { %v2043_v41 = vmul.f32 %v4661_v46, %v4655_v33  ;;  %v4663_v4 = vpop.eup %4662  ;;  %v7919_v46 = vld [vmem:[#allocation140_spill] sm:$0xff] }
 0x382   :  { %v6399_v14 = vadd.f32 %v2042_v17, %v2040_v45  ;;  %v4665_v55 = vpop.eup %4664  ;;  %v2023_v23 = vadd.f32 1.0, %v4663_v4  ;;  %v7920_v45 = vld [vmem:[#allocation141_spill] sm:$0xff]  ;;  %v7921_v17 = vld [vmem:[#allocation142_spill] sm:$0xff] }
 0x383   :  { %v6401_v16 = vadd.f32 %v2043_v41, %v2041_v31  ;;  %v2024_v32 = vadd.f32 1.0, %v4665_v55  ;;  %v7922_v31 = vld [vmem:[#allocation143_spill] sm:$0xff]  ;;  %v7923_v41 = vld [vmem:[#allocation144_spill] sm:$0xff]  ;;  %v7924_v4 = vld [vmem:[#allocation145_spill] sm:$0xff] }
 0x384   :  { %4666 = vtanh.f32 %v6399_v14  ;;  %v7925_v55 = vld [vmem:[#allocation146_spill] sm:$0xff] }
 0x385   :  { %4668 = vrcp.f32 %v2023_v23  ;;  %v7926_v23 = vld [vmem:[#allocation147_spill] sm:$0xff] }
 0x386   :  { %4670 = vtanh.f32 %v6401_v16 }
 0x387   :  { %4672 = vrcp.f32 %v2024_v32  ;;  %v7927_v32 = vld [vmem:[#allocation148_spill] sm:$0xff] }
 0x38e   :  { %v4667_v12 = vpop.eup %4666 }
 0x38f   :  { %v4669_v56 = vpop.eup %4668 }
 0x390   :  { %v4671_v5 = vpop.eup %4670  ;;  %v6405_v15 = vmul.f32 %v4669_v56, %v4667_v12  ;;  %v7928_v12 = vld [vmem:[#allocation149_spill] sm:$0xff]  ;;  %v7929_v56 = vld [vmem:[#allocation150_spill] sm:$0xff] }
 0x391   :  { %v4673_v24 = vpop.eup %4672 }
 0x392   :  { %7914 = vst [vmem:[#allocation200_spill] sm:$0xff] %v6405_v15  ;;  %v6407_v54 = vmul.f32 %v4673_v24, %v4671_v5  ;;  %v6413_v33 = vpack.c.bf16 %v6405_v15, %v6405_v15  ;;  %v7930_v5 = vld [vmem:[#allocation151_spill] sm:$0xff]  ;;  %v7931_v24 = vld [vmem:[#allocation152_spill] sm:$0xff] }
 0x393   :  { %v7934_v15 = vld [vmem:[#allocation155_spill] sm:$0xff] }
 0x394   :  { %7915 = vst [vmem:[#allocation201_spill] sm:$0xff] %v6407_v54  ;;  %v2059_v48 = vpack.c.bf16 %v6407_v54, %v6407_v54  ;;  %v7933_v54 = vld [vmem:[#allocation154_spill] sm:$0xff] }
 0x396   :  { %2092 = vmatprep.mubr.bf16.mxu0 %v2059_v48  ;;  %2133 = vmatprep.mubr.bf16.mxu1 %v2059_v48 }
 0x397   :  { %2093 = vmatmul.mubr.bf16.vlgmr.msra.gmra.mrb[16].mxu0 %v6413_v33  ;;  %2134 = vmatmul.mubr.bf16.vlgmr.msra.gmra.mrb[16].mxu1 %v6413_v33 }
 0x398   :  { %2143 = vmatpush1.bf16.msra.mxu0 %v7916_v8  ;;  %2184 = vmatpush1.bf16.msra.mxu1 %v7917_v47 }
 0x399   :  { %2174 = vmatprep.mubr.bf16.mxu0 %v2059_v48  ;;  %2215 = vmatprep.mubr.bf16.mxu1 %v2059_v48  ;;  %v7932_v48 = vld [vmem:[#allocation153_spill] sm:$0xff] }
 0x39a   :  { %2144 = vmatprep.subr.bf16.mxu0 %v7918_v53  ;;  %2185 = vmatprep.subr.bf16.mxu1 %v7919_v46 }
 0x39c   :  { %2145 = vmatpush1.bf16.msra.mxu0 %v7920_v45  ;;  %2186 = vmatpush1.bf16.msra.mxu1 %v7921_v17 }
 0x39d   :  { %2146 = vmatprep.subr.bf16.mxu0 %v7922_v31  ;;  %2187 = vmatprep.subr.bf16.mxu1 %v7923_v41 }
 0x3a0   :  { %2147 = vmatpush1.bf16.msra.mxu0 %v7924_v4  ;;  %2188 = vmatpush1.bf16.msra.mxu1 %v7925_v55  ;;  %v7935_v4 = vld [vmem:[#allocation156_spill] sm:$0xff]  ;;  %v7936_v55 = vld [vmem:[#allocation157_spill] sm:$0xff] }
 0x3a1   :  { %2148 = vmatprep.subr.bf16.mxu0 %v7926_v23  ;;  %2189 = vmatprep.subr.bf16.mxu1 %v7927_v32  ;;  %v7937_v23 = vld [vmem:[#allocation158_spill] sm:$0xff]  ;;  %v7938_v32 = vld [vmem:[#allocation159_spill] sm:$0xff] }
 0x3a4   :  { %2149 = vmatpush1.bf16.msra.mxu0 %v7928_v12  ;;  %2190 = vmatpush1.bf16.msra.mxu1 %v7929_v56  ;;  %v7939_v12 = vld [vmem:[#allocation160_spill] sm:$0xff]  ;;  %v7940_v56 = vld [vmem:[#allocation161_spill] sm:$0xff] }
 0x3a5   :  { %2150 = vmatprep.subr.bf16.mxu0 %v7930_v5  ;;  %2191 = vmatprep.subr.bf16.mxu1 %v7931_v24  ;;  %v7941_v5 = vld [vmem:[#allocation162_spill] sm:$0xff]  ;;  %v7942_v24 = vld [vmem:[#allocation163_spill] sm:$0xff] }
 0x3a8   :  { %2151 = vmatpush1.bf16.msra.mxu0 %v7932_v48  ;;  %2192 = vmatpush1.bf16.msra.mxu1 %v7933_v54  ;;  %v7943_v48 = vld [vmem:[#allocation164_spill] sm:$0xff]  ;;  %v7944_v54 = vld [vmem:[#allocation165_spill] sm:$0xff] }
 0x3a9   :  { %2152 = vmatprep.subr.bf16.mxu0 %v7934_v15  ;;  %2193 = vmatprep.subr.bf16.mxu1 %v7935_v4  ;;  %v7945_v15 = vld [vmem:[#allocation166_spill] sm:$0xff]  ;;  %v7946_v4 = vld [vmem:[#allocation167_spill] sm:$0xff] }
 0x3ac   :  { %2153 = vmatpush1.bf16.msra.mxu0 %v7936_v55  ;;  %2194 = vmatpush1.bf16.msra.mxu1 %v7937_v23  ;;  %v7947_v55 = vld [vmem:[#allocation168_spill] sm:$0xff]  ;;  %v7948_v23 = vld [vmem:[#allocation169_spill] sm:$0xff] }
 0x3ad   :  { %2154 = vmatprep.subr.bf16.mxu0 %v7938_v32  ;;  %2195 = vmatprep.subr.bf16.mxu1 %v7939_v12  ;;  %v7949_v32 = vld [vmem:[#allocation170_spill] sm:$0xff]  ;;  %v7950_v12 = vld [vmem:[#allocation171_spill] sm:$0xff] }
 0x3b0   :  { %2155 = vmatpush1.bf16.msra.mxu0 %v7940_v56  ;;  %2196 = vmatpush1.bf16.msra.mxu1 %v7941_v5  ;;  %v7951_v56 = vld [vmem:[#allocation172_spill] sm:$0xff]  ;;  %v7952_v5 = vld [vmem:[#allocation173_spill] sm:$0xff] }
 0x3b1   :  { %2156 = vmatprep.subr.bf16.mxu0 %v7942_v24  ;;  %2197 = vmatprep.subr.bf16.mxu1 %v7943_v48  ;;  %v7953_v24 = vld [vmem:[#allocation174_spill] sm:$0xff]  ;;  %v7954_v48 = vld [vmem:[#allocation175_spill] sm:$0xff] }
 0x3b4   :  { %2157 = vmatpush1.bf16.msra.mxu0 %v7944_v54  ;;  %2198 = vmatpush1.bf16.msra.mxu1 %v7945_v15  ;;  %v7955_v54 = vld [vmem:[#allocation176_spill] sm:$0xff]  ;;  %v7956_v15 = vld [vmem:[#allocation177_spill] sm:$0xff] }
 0x3b5   :  { %2158 = vmatprep.subr.bf16.mxu0 %v7946_v4  ;;  %2199 = vmatprep.subr.bf16.mxu1 %v7947_v55  ;;  %v7957_v4 = vld [vmem:[#allocation178_spill] sm:$0xff]  ;;  %v7958_v55 = vld [vmem:[#allocation179_spill] sm:$0xff] }
 0x3b8   :  { %2159 = vmatpush1.bf16.msra.mxu0 %v7948_v23  ;;  %2200 = vmatpush1.bf16.msra.mxu1 %v7949_v32  ;;  %v7959_v23 = vld [vmem:[#allocation180_spill] sm:$0xff]  ;;  %v7960_v32 = vld [vmem:[#allocation181_spill] sm:$0xff] }
 0x3b9   :  { %2160 = vmatprep.subr.bf16.mxu0 %v7950_v12  ;;  %2201 = vmatprep.subr.bf16.mxu1 %v7951_v56  ;;  %v7961_v12 = vld [vmem:[#allocation182_spill] sm:$0xff]  ;;  %v7962_v56 = vld [vmem:[#allocation183_spill] sm:$0xff] }
 0x3bc   :  { %2161 = vmatpush1.bf16.msra.mxu0 %v7952_v5  ;;  %2202 = vmatpush1.bf16.msra.mxu1 %v7953_v24  ;;  %v7963_v5 = vld [vmem:[#allocation184_spill] sm:$0xff] }
 0x3bd   :  { %2162 = vmatprep.subr.bf16.mxu0 %v7954_v48  ;;  %2203 = vmatprep.subr.bf16.mxu1 %v7955_v54 }
 0x3c0   :  { %2163 = vmatpush1.bf16.msra.mxu0 %v7956_v15  ;;  %2204 = vmatpush1.bf16.msra.mxu1 %v7957_v4  ;;  %v7964_v15 = vld [vmem:[#allocation188_spill] sm:$0xff] }
 0x3c1   :  { %2164 = vmatprep.subr.bf16.mxu0 %v7958_v55  ;;  %2205 = vmatprep.subr.bf16.mxu1 %v7959_v23 }
 0x3c4   :  { %2165 = vmatpush1.bf16.msra.mxu0 %v7960_v32  ;;  %2206 = vmatpush1.bf16.msra.mxu1 %v7961_v12 }
 0x3c5   :  { %2166 = vmatprep.subr.bf16.mxu0 %v7962_v56  ;;  %2207 = vmatprep.subr.bf16.mxu1 %v7963_v5 }
 0x3c8   :  { %2167 = vmatpush1.bf16.msra.mxu0 %v6270_v13  ;;  %2208 = vmatpush1.bf16.msra.mxu1 %v6274_v25 }
 0x3c9   :  { %2168 = vmatprep.subr.bf16.mxu0 %v6276_v9  ;;  %2209 = vmatprep.subr.bf16.mxu1 %v7964_v15 }
 0x3cc   :  { %2169 = vmatpush1.bf16.msra.mxu0 %v6282_v38  ;;  %2210 = vmatpush1.bf16.msra.mxu1 %v6286_v63 }
 0x3cd   :  { %2170 = vmatprep.subr.bf16.mxu0 %v6288_v40  ;;  %2211 = vmatprep.subr.bf16.mxu1 %v6291_v7 }
 0x3d0   :  { %2171 = vmatpush1.bf16.msra.mxu0 %v6294_v39  ;;  %2212 = vmatpush1.bf16.msra.mxu1 %v6298_v61 }
 0x3d1   :  { %2172 = vmatprep.subr.bf16.mxu0 %v6300_v62  ;;  %2213 = vmatprep.subr.bf16.mxu1 %v6303_v1 }
 0x3d4   :  { %2173 = vmatpush1.bf16.msra.mxu0 %v6306_v26  ;;  %2214 = vmatpush1.bf16.msra.mxu1 %v6310_v22 }
 0x3d5   :  { %2326 = vmatprep.subr.bf16.mxu0 %v5915_v10  ;;  %2367 = vmatprep.subr.bf16.mxu1 %v5917_v11 }
 0x3d7   :  { %2175 = vmatmul.mubr.bf16.vlgmr.msra.gmra.mrb[20].mxu0 %v6413_v33  ;;  %2216 = vmatmul.mubr.bf16.vlgmr.msra.gmra.mrb[20].mxu1 %v6413_v33  ;;  %v7965_v33 = vld [vmem:[#allocation99_spill] sm:$0xff] }
 0x3d8   :  { %2327 = vmatpush1.bf16.msra.mxu0 %v5921_v18  ;;  %2368 = vmatpush1.bf16.msra.mxu1 %v5924_v19 }
 0x3d9   :  { %2328 = vmatprep.subr.bf16.mxu0 %v5926_v20  ;;  %2369 = vmatprep.subr.bf16.mxu1 %v5929_v21 }
 0x3dc   :  { %2329 = vmatpush1.bf16.msra.mxu0 %v5936_v27  ;;  %2370 = vmatpush1.bf16.msra.mxu1 %v5940_v28 }
 0x3dd   :  { %2330 = vmatprep.subr.bf16.mxu0 %v5942_v29  ;;  %2371 = vmatprep.subr.bf16.mxu1 %v5945_v30 }
 0x3e0   :  { %2331 = vmatpush1.bf16.msra.mxu0 %v5950_v34  ;;  %2372 = vmatpush1.bf16.msra.mxu1 %v5954_v35  ;;  %v2296_v34 = vrot.slane %v6399_v14, 6 }
 0x3e1   :  { %2332 = vmatprep.subr.bf16.mxu0 %v5956_v36  ;;  %2373 = vmatprep.subr.bf16.mxu1 %v5959_v37 }
 0x3e4   :  { %2333 = vmatpush1.bf16.msra.mxu0 %v5962_v0  ;;  %2374 = vmatpush1.bf16.msra.mxu1 %v5966_v42  ;;  %v2053_v0 = vld [vmem:[#allocation3 + $0x18] sm:$0xc] }
 0x3e5   :  { %2334 = vmatprep.subr.bf16.mxu0 %v5968_v43  ;;  %2375 = vmatprep.subr.bf16.mxu1 %v5971_v44 }
 0x3e8   :  { %2335 = vmatpush1.bf16.msra.mxu0 %v5974_v49  ;;  %2376 = vmatpush1.bf16.msra.mxu1 %v5978_v50  ;;  %v7966_v49 = vld [vmem:[#allocation100_spill] sm:$0xff]  ;;  %v7967_v50 = vld [vmem:[#allocation101_spill] sm:$0xff] }
 0x3e9   :  { %2336 = vmatprep.subr.bf16.mxu0 %v5980_v51  ;;  %2377 = vmatprep.subr.bf16.mxu1 %v5983_v52  ;;  %v7968_v51 = vld [vmem:[#allocation102_spill] sm:$0xff]  ;;  %v7969_v52 = vld [vmem:[#allocation103_spill] sm:$0xff] }
 0x3ec   :  { %2337 = vmatpush1.bf16.msra.mxu0 %v5986_v57  ;;  %2378 = vmatpush1.bf16.msra.mxu1 %v5990_v58  ;;  %v7970_v57 = vld [vmem:[#allocation104_spill] sm:$0xff]  ;;  %v7971_v58 = vld [vmem:[#allocation105_spill] sm:$0xff] }
 0x3ed   :  { %2338 = vmatprep.subr.bf16.mxu0 %v5992_v59  ;;  %2379 = vmatprep.subr.bf16.mxu1 %v5995_v60  ;;  %v7972_v59 = vld [vmem:[#allocation106_spill] sm:$0xff]  ;;  %v7973_v60 = vld [vmem:[#allocation107_spill] sm:$0xff] }
 0x3f0   :  { %2339 = vmatpush1.bf16.msra.mxu0 %v5998_v2  ;;  %2380 = vmatpush1.bf16.msra.mxu1 %v6002_v3  ;;  %v7974_v2 = vld [vmem:[#allocation108_spill] sm:$0xff]  ;;  %v7975_v3 = vld [vmem:[#allocation109_spill] sm:$0xff] }
 0x3f1   :  { %2340 = vmatprep.subr.bf16.mxu0 %v7965_v33  ;;  %2381 = vmatprep.subr.bf16.mxu1 %v7966_v49  ;;  %v7976_v33 = vld [vmem:[#allocation110_spill] sm:$0xff]  ;;  %v7977_v49 = vld [vmem:[#allocation111_spill] sm:$0xff] }
 0x3f4   :  { %2341 = vmatpush1.bf16.msra.mxu0 %v7967_v50  ;;  %2382 = vmatpush1.bf16.msra.mxu1 %v7968_v51  ;;  %v7978_v50 = vld [vmem:[#allocation112_spill] sm:$0xff]  ;;  %v7979_v51 = vld [vmem:[#allocation113_spill] sm:$0xff] }
 0x3f5   :  { %2342 = vmatprep.subr.bf16.mxu0 %v7969_v52  ;;  %2383 = vmatprep.subr.bf16.mxu1 %v7970_v57  ;;  %v7980_v52 = vld [vmem:[#allocation114_spill] sm:$0xff]  ;;  %v7981_v57 = vld [vmem:[#allocation115_spill] sm:$0xff] }
 0x3f8   :  { %2343 = vmatpush1.bf16.msra.mxu0 %v7971_v58  ;;  %2384 = vmatpush1.bf16.msra.mxu1 %v7972_v59  ;;  %v7982_v58 = vld [vmem:[#allocation116_spill] sm:$0xff]  ;;  %v7983_v59 = vld [vmem:[#allocation117_spill] sm:$0xff] }
 0x3f9   :  { %2344 = vmatprep.subr.bf16.mxu0 %v7973_v60  ;;  %2385 = vmatprep.subr.bf16.mxu1 %v7974_v2  ;;  %v7984_v60 = vld [vmem:[#allocation118_spill] sm:$0xff]  ;;  %v7985_v2 = vld [vmem:[#allocation119_spill] sm:$0xff] }
 0x3fc   :  { %2345 = vmatpush1.bf16.msra.mxu0 %v7975_v3  ;;  %2386 = vmatpush1.bf16.msra.mxu1 %v7976_v33  ;;  %v7986_v3 = vld [vmem:[#allocation120_spill] sm:$0xff]  ;;  %v7987_v33 = vld [vmem:[#allocation121_spill] sm:$0xff] }
 0x3fd   :  { %2346 = vmatprep.subr.bf16.mxu0 %v7977_v49  ;;  %2387 = vmatprep.subr.bf16.mxu1 %v7978_v50  ;;  %v7988_v49 = vld [vmem:[#allocation122_spill] sm:$0xff]  ;;  %v7989_v50 = vld [vmem:[#allocation123_spill] sm:$0xff] }
 0x400   :  { %2347 = vmatpush1.bf16.msra.mxu0 %v7979_v51  ;;  %2388 = vmatpush1.bf16.msra.mxu1 %v7980_v52  ;;  %v7990_v51 = vld [vmem:[#allocation124_spill] sm:$0xff] }
 0x401   :  { %2348 = vmatprep.subr.bf16.mxu0 %v7981_v57  ;;  %2389 = vmatprep.subr.bf16.mxu1 %v7982_v58  ;;  %v7991_v57 = vld [vmem:[#allocation126_spill] sm:$0xff]  ;;  %v7992_v58 = vld [vmem:[#allocation127_spill] sm:$0xff] }
 0x404   :  { %2349 = vmatpush1.bf16.msra.mxu0 %v7983_v59  ;;  %2390 = vmatpush1.bf16.msra.mxu1 %v7984_v60  ;;  %v7993_v59 = vld [vmem:[#allocation128_spill] sm:$0xff]  ;;  %v7994_v60 = vld [vmem:[#allocation129_spill] sm:$0xff] }
 0x405   :  { %2350 = vmatprep.subr.bf16.mxu0 %v7985_v2  ;;  %2391 = vmatprep.subr.bf16.mxu1 %v7986_v3  ;;  %v7995_v2 = vld [vmem:[#allocation130_spill] sm:$0xff]  ;;  %v7996_v3 = vld [vmem:[#allocation131_spill] sm:$0xff] }
 0x408   :  { %2351 = vmatpush1.bf16.msra.mxu0 %v7987_v33  ;;  %2392 = vmatpush1.bf16.msra.mxu1 %v7988_v49  ;;  %v7997_v33 = vld [vmem:[#allocation132_spill] sm:$0xff]  ;;  %v7998_v49 = vld [vmem:[#allocation133_spill] sm:$0xff] }
 0x409   :  { %2352 = vmatprep.subr.bf16.mxu0 %v7989_v50  ;;  %2393 = vmatprep.subr.bf16.mxu1 %v7990_v51  ;;  %v7999_v50 = vld [vmem:[#allocation134_spill] sm:$0xff]  ;;  %v8000_v51 = vld [vmem:[#allocation135_spill] sm:$0xff] }
 0x40c   :  { %2353 = vmatpush1.bf16.msra.mxu0 %v6082_v6  ;;  %2394 = vmatpush1.bf16.msra.mxu1 %v7991_v57  ;;  %v8001_v6 = vld [vmem:[#allocation136_spill] sm:$0xff] }
 0x40d   :  { %2354 = vmatprep.subr.bf16.mxu0 %v7992_v58  ;;  %2395 = vmatprep.subr.bf16.mxu1 %v7993_v59 }
 0x410   :  { %2355 = vmatpush1.bf16.msra.mxu0 %v7994_v60  ;;  %2396 = vmatpush1.bf16.msra.mxu1 %v7995_v2  ;;  %v2052_v60 = vld [vmem:[#allocation3 + $0x10] sm:$0xc] }
 0x411   :  { %2356 = vmatprep.subr.bf16.mxu0 %v7996_v3  ;;  %2397 = vmatprep.subr.bf16.mxu1 %v7997_v33 }
 0x414   :  { %2357 = vmatpush1.bf16.msra.mxu0 %v7998_v49  ;;  %2398 = vmatpush1.bf16.msra.mxu1 %v7999_v50 }
 0x415   :  { %2408 = vmatprep.subr.bf16.mxu0 %v8000_v51  ;;  %2449 = vmatprep.subr.bf16.mxu1 %v8001_v6 }
 0x46a   :  { %v2094_v57 = vpop.f32.mrb[16].mxu0  ;;  %v2135_v58 = vpop.f32.mrb[16].mxu1 }
 0x46b   :  { %v2234_v52 = vrot.slane %v2135_v58, 6  ;;  %v2096_v59 = vpop.f32.mrb[17].mxu0  ;;  %v2137_v44 = vpop.f32.mrb[17].mxu1 }
 0x46c   :  { %v2235_v43 = vrot.slane %v2137_v44, 6  ;;  %v2098_v2 = vpop.f32.mrb[18].mxu0  ;;  %v2139_v42 = vpop.f32.mrb[18].mxu1 }
 0x46d   :  { %v2250_v3 = vadd.f32 %v2234_v52, %v2052_v60  ;;  %v2099_v33 = vpop.f32.mrb[19].mxu0  ;;  %v2140_v37 = vpop.f32.mrb[19].mxu1  ;;  %v2297_v42 = vrot.slane %v6401_v16, 6  ;;  %v2054_v16 = vld [vmem:[#allocation3 + $0x20] sm:$0xc] }
 0x46e   :  { %v2251_v49 = vadd.f32 %v2235_v43, %v2053_v0  ;;  %v2232_v37 = vrot.slane %v2094_v57, 6  ;;  %v2233_v0 = vrot.slane %v2096_v59, 6  ;;  %v2050_v43 = vld [vmem:[#allocation3] sm:$0xc]  ;;  %v2056_v59 = vld [vmem:[#allocation3 + $0x30] sm:$0xc] }
 0x46f   :  { %v4522_v36 = vmul.f32 -1.442695, %v2250_v3 }
 0x470   :  { %v4523_v50 = vmul.f32 -1.442695, %v2251_v49  ;;  %v2248_v49 = vadd.f32 %v2232_v37, %v2050_v43 }
 0x471   :  { %4674 = vpow2.f32 %v4522_v36  ;;  %v2051_v36 = vld [vmem:[#allocation3 + $0x8] sm:$0xc] }
 0x472   :  { %4676 = vpow2.f32 %v4523_v50  ;;  %v2249_v50 = vadd.f32 %v2233_v0, %v2051_v36  ;;  %v4520_v3 = vmul.f32 -1.442695, %v2248_v49 }
 0x47b   :  { %v4675_v51 = vpop.eup %4674 }
 0x47c   :  { %v2274_v6 = vadd.f32 1.0, %v4675_v51  ;;  %v4677_v35 = vpop.eup %4676  ;;  %v4521_v51 = vmul.f32 -1.442695, %v2249_v50  ;;  %v2055_v50 = vld [vmem:[#allocation3 + $0x28] sm:$0xc] }
 0x47d   :  { %v2275_v58 = vadd.f32 1.0, %v4677_v35 }
 0x47e   :  { %4678 = vrcp.f32 %v2274_v6 }
 0x47f   :  { %4680 = vrcp.f32 %v2275_v58 }
 0x480   :  { %4682 = vpow2.f32 %v4520_v3  ;;  %v2057_v3 = vld [vmem:[#allocation3 + $0x38] sm:$0xc] }
 0x481   :  { %4684 = vpow2.f32 %v4521_v51 }
 0x488   :  { %v4679_v44 = vpop.eup %4678 }
 0x489   :  { %v2300_v52 = vmul.f32 %v4679_v44, %v2296_v34  ;;  %v4681_v60 = vpop.eup %4680 }
 0x48a   :  { %v2301_v2 = vmul.f32 %v4681_v60, %v2297_v42  ;;  %v4683_v35 = vpop.eup %4682 }
 0x48b   :  { %v4685_v6 = vpop.eup %4684  ;;  %v2262_v33 = vadd.f32 1.0, %v4683_v35 }
 0x48c   :  { %v2263_v14 = vadd.f32 1.0, %v4685_v6 }
 0x48d   :  { %4686 = vrcp.f32 %v2262_v33 }
 0x48e   :  { %4688 = vrcp.f32 %v2263_v14 }
 0x4aa   :  { %v2176_v58 = vpop.f32.mrb[20].mxu0  ;;  %v2217_v30 = vpop.f32.mrb[20].mxu1 }
 0x4ab   :  { %v2236_v34 = vrot.slane %v2176_v58, 6  ;;  %v2238_v44 = vrot.slane %v2217_v30, 6  ;;  %v2178_v42 = vpop.f32.mrb[21].mxu0  ;;  %v2219_v57 = vpop.f32.mrb[21].mxu1 }
 0x4ac   :  { %v2237_v60 = vrot.slane %v2178_v42, 6  ;;  %v2239_v37 = vrot.slane %v2219_v57, 6  ;;  %v2180_v43 = vpop.f32.mrb[22].mxu0  ;;  %v2221_v0 = vpop.f32.mrb[22].mxu1 }
 0x4ad   :  { %v2252_v49 = vadd.f32 %v2236_v34, %v2054_v16  ;;  %v2254_v36 = vadd.f32 %v2238_v44, %v2056_v59  ;;  %v2181_v51 = vpop.f32.mrb[23].mxu0  ;;  %v2222_v35 = vpop.f32.mrb[23].mxu1 }
 0x4ae   :  { %v2253_v6 = vadd.f32 %v2237_v60, %v2055_v50  ;;  %v2255_v29 = vadd.f32 %v2239_v37, %v2057_v3  ;;  %v4687_v42 = vpop.eup %4686 }
 0x4af   :  { %4690 = vtanh.f32 %v2252_v49  ;;  %v4524_v58 = vmul.f32 -1.442695, %v2254_v36  ;;  %v4689_v57 = vpop.eup %4688 }
 0x4b0   :  { %4692 = vtanh.f32 %v2253_v6  ;;  %v4525_v30 = vmul.f32 -1.442695, %v2255_v29 }
 0x4b1   :  { %4694 = vpow2.f32 %v4524_v58  ;;  %v8002_v58 = vld [vmem:[#allocation145_spill] sm:$0xff] }
 0x4b2   :  { %4696 = vpow2.f32 %v4525_v30  ;;  %v8003_v30 = vld [vmem:[#allocation146_spill] sm:$0xff] }
 0x4b9   :  { %v4691_v43 = vpop.eup %4690 }
 0x4ba   :  { %v4693_v0 = vpop.eup %4692  ;;  %v2302_v33 = vmul.f32 %v4691_v43, %v4687_v42  ;;  %v8004_v42 = vld [vmem:[#allocation147_spill] sm:$0xff]  ;;  %v8006_v43 = vld [vmem:[#allocation149_spill] sm:$0xff] }
 0x4bb   :  { %v4695_v16 = vpop.eup %4694  ;;  %v2303_v34 = vmul.f32 %v4693_v0, %v4689_v57  ;;  %v8005_v57 = vld [vmem:[#allocation148_spill] sm:$0xff]  ;;  %v8007_v0 = vld [vmem:[#allocation150_spill] sm:$0xff] }
 0x4bc   :  { %v4697_v44 = vpop.eup %4696  ;;  %v6549_v59 = vadd.f32 %v2302_v33, %v2300_v52  ;;  %v2288_v51 = vadd.f32 1.0, %v4695_v16  ;;  %v8008_v33 = vld [vmem:[#allocation151_spill] sm:$0xff]  ;;  %v8009_v16 = vld [vmem:[#allocation152_spill] sm:$0xff] }
 0x4bd   :  { %v6551_v14 = vadd.f32 %v2303_v34, %v2301_v2  ;;  %v2289_v60 = vadd.f32 1.0, %v4697_v44  ;;  %v8010_v34 = vld [vmem:[#allocation153_spill] sm:$0xff]  ;;  %v8011_v44 = vld [vmem:[#allocation154_spill] sm:$0xff] }
 0x4be   :  { %4698 = vtanh.f32 %v6549_v59 }
 0x4bf   :  { %4700 = vrcp.f32 %v2288_v51  ;;  %v8012_v51 = vld [vmem:[#allocation155_spill] sm:$0xff] }
 0x4c0   :  { %4702 = vtanh.f32 %v6551_v14 }
 0x4c1   :  { %4704 = vrcp.f32 %v2289_v60  ;;  %v8013_v60 = vld [vmem:[#allocation156_spill] sm:$0xff] }
 0x4c8   :  { %v4699_v29 = vpop.eup %4698 }
 0x4c9   :  { %v4701_v37 = vpop.eup %4700 }
 0x4ca   :  { %v4703_v49 = vpop.eup %4702  ;;  %v6555_v36 = vmul.f32 %v4701_v37, %v4699_v29  ;;  %v8014_v29 = vld [vmem:[#allocation157_spill] sm:$0xff]  ;;  %v8015_v37 = vld [vmem:[#allocation158_spill] sm:$0xff] }
 0x4cb   :  { %v4705_v50 = vpop.eup %4704 }
 0x4cc   :  { %v6557_v3 = vmul.f32 %v4705_v50, %v4703_v49  ;;  %v2318_v52 = vpack.c.bf16 %v6555_v36, %v6555_v36  ;;  %v8016_v49 = vld [vmem:[#allocation159_spill] sm:$0xff]  ;;  %v8017_v50 = vld [vmem:[#allocation160_spill] sm:$0xff] }
 0x4ce   :  { %v2319_v2 = vpack.c.bf16 %v6557_v3, %v6557_v3  ;;  %v6563_v6 = vrot.slane %v2318_v52, 1  ;;  %v8018_v52 = vld [vmem:[#allocation161_spill] sm:$0xff] }
 0x4d0   :  { %v2323_v35 = vrot.slane %v2319_v2, 1  ;;  %v8019_v2 = vld [vmem:[#allocation162_spill] sm:$0xff] }
 0x4d2   :  { %2358 = vmatprep.mubr.bf16.mxu0 %v2323_v35  ;;  %2399 = vmatprep.mubr.bf16.mxu1 %v2323_v35 }
 0x4d3   :  { %2359 = vmatmul.mubr.bf16.vlgmr.msra.gmra.mrb[24].mxu0 %v6563_v6  ;;  %2400 = vmatmul.mubr.bf16.vlgmr.msra.gmra.mrb[24].mxu1 %v6563_v6 }
 0x4d4   :  { %2409 = vmatpush1.bf16.msra.mxu0 %v7916_v8  ;;  %2450 = vmatpush1.bf16.msra.mxu1 %v7917_v47 }
 0x4d5   :  { %2440 = vmatprep.mubr.bf16.mxu0 %v2323_v35  ;;  %2481 = vmatprep.mubr.bf16.mxu1 %v2323_v35  ;;  %v8020_v35 = vld [vmem:[#allocation163_spill] sm:$0xff] }
 0x4d6   :  { %2410 = vmatprep.subr.bf16.mxu0 %v7918_v53  ;;  %2451 = vmatprep.subr.bf16.mxu1 %v7919_v46 }
 0x4d8   :  { %2411 = vmatpush1.bf16.msra.mxu0 %v7920_v45  ;;  %2452 = vmatpush1.bf16.msra.mxu1 %v7921_v17 }
 0x4d9   :  { %2412 = vmatprep.subr.bf16.mxu0 %v7922_v31  ;;  %2453 = vmatprep.subr.bf16.mxu1 %v7923_v41 }
 0x4dc   :  { %2413 = vmatpush1.bf16.msra.mxu0 %v8002_v58  ;;  %2454 = vmatpush1.bf16.msra.mxu1 %v8003_v30 }
 0x4dd   :  { %2414 = vmatprep.subr.bf16.mxu0 %v8004_v42  ;;  %2455 = vmatprep.subr.bf16.mxu1 %v8005_v57 }
 0x4e0   :  { %2415 = vmatpush1.bf16.msra.mxu0 %v8006_v43  ;;  %2456 = vmatpush1.bf16.msra.mxu1 %v8007_v0 }
 0x4e1   :  { %2416 = vmatprep.subr.bf16.mxu0 %v8008_v33  ;;  %2457 = vmatprep.subr.bf16.mxu1 %v8009_v16 }
 0x4e4   :  { %2417 = vmatpush1.bf16.msra.mxu0 %v8010_v34  ;;  %2458 = vmatpush1.bf16.msra.mxu1 %v8011_v44  ;;  %v8021_v34 = vld [vmem:[#allocation164_spill] sm:$0xff]  ;;  %v8022_v44 = vld [vmem:[#allocation165_spill] sm:$0xff] }
 0x4e5   :  { %2418 = vmatprep.subr.bf16.mxu0 %v8012_v51  ;;  %2459 = vmatprep.subr.bf16.mxu1 %v8013_v60  ;;  %v8023_v51 = vld [vmem:[#allocation166_spill] sm:$0xff]  ;;  %v8024_v60 = vld [vmem:[#allocation167_spill] sm:$0xff] }
 0x4e8   :  { %2419 = vmatpush1.bf16.msra.mxu0 %v8014_v29  ;;  %2460 = vmatpush1.bf16.msra.mxu1 %v8015_v37  ;;  %v8025_v29 = vld [vmem:[#allocation168_spill] sm:$0xff]  ;;  %v8026_v37 = vld [vmem:[#allocation169_spill] sm:$0xff] }
 0x4e9   :  { %2420 = vmatprep.subr.bf16.mxu0 %v8016_v49  ;;  %2461 = vmatprep.subr.bf16.mxu1 %v8017_v50  ;;  %v8027_v49 = vld [vmem:[#allocation170_spill] sm:$0xff]  ;;  %v8028_v50 = vld [vmem:[#allocation171_spill] sm:$0xff] }
 0x4ec   :  { %2421 = vmatpush1.bf16.msra.mxu0 %v8018_v52  ;;  %2462 = vmatpush1.bf16.msra.mxu1 %v8019_v2  ;;  %v8029_v52 = vld [vmem:[#allocation172_spill] sm:$0xff]  ;;  %v8030_v2 = vld [vmem:[#allocation173_spill] sm:$0xff] }
 0x4ed   :  { %2422 = vmatprep.subr.bf16.mxu0 %v8020_v35  ;;  %2463 = vmatprep.subr.bf16.mxu1 %v8021_v34 }
 0x4f0   :  { %2423 = vmatpush1.bf16.msra.mxu0 %v8022_v44  ;;  %2464 = vmatpush1.bf16.msra.mxu1 %v8023_v51  ;;  %v8031_v51 = vld [vmem:[#allocation177_spill] sm:$0xff] }
 0x4f1   :  { %2424 = vmatprep.subr.bf16.mxu0 %v8024_v60  ;;  %2465 = vmatprep.subr.bf16.mxu1 %v8025_v29 }
 0x4f4   :  { %2425 = vmatpush1.bf16.msra.mxu0 %v8026_v37  ;;  %2466 = vmatpush1.bf16.msra.mxu1 %v8027_v49 }
 0x4f5   :  { %2426 = vmatprep.subr.bf16.mxu0 %v8028_v50  ;;  %2467 = vmatprep.subr.bf16.mxu1 %v8029_v52 }
 0x4f8   :  { %2427 = vmatpush1.bf16.msra.mxu0 %v8030_v2  ;;  %2468 = vmatpush1.bf16.msra.mxu1 %v7953_v24 }
 0x4f9   :  { %2428 = vmatprep.subr.bf16.mxu0 %v7954_v48  ;;  %2469 = vmatprep.subr.bf16.mxu1 %v7955_v54 }
 0x4fc   :  { %2429 = vmatpush1.bf16.msra.mxu0 %v8031_v51  ;;  %2470 = vmatpush1.bf16.msra.mxu1 %v7957_v4 }
 0x4fd   :  { %2430 = vmatprep.subr.bf16.mxu0 %v7958_v55  ;;  %2471 = vmatprep.subr.bf16.mxu1 %v7959_v23 }
 0x500   :  { %2431 = vmatpush1.bf16.msra.mxu0 %v7960_v32  ;;  %2472 = vmatpush1.bf16.msra.mxu1 %v7961_v12 }
 0x501   :  { %2432 = vmatprep.subr.bf16.mxu0 %v7962_v56  ;;  %2473 = vmatprep.subr.bf16.mxu1 %v7963_v5 }
 0x504   :  { %2433 = vmatpush1.bf16.msra.mxu0 %v6270_v13  ;;  %2474 = vmatpush1.bf16.msra.mxu1 %v6274_v25 }
 0x505   :  { %2434 = vmatprep.subr.bf16.mxu0 %v6276_v9  ;;  %2475 = vmatprep.subr.bf16.mxu1 %v7964_v15  ;;  %v2562_v15 = vrot.slane %v6549_v59, 6 }
 0x508   :  { %2435 = vmatpush1.bf16.msra.mxu0 %v6282_v38  ;;  %2476 = vmatpush1.bf16.msra.mxu1 %v6286_v63 }
 0x509   :  { %2436 = vmatprep.subr.bf16.mxu0 %v6288_v40  ;;  %2477 = vmatprep.subr.bf16.mxu1 %v6291_v7  ;;  %v2313_v7 = vld [vmem:[#allocation3 + $0x18] sm:$0x30] }
 0x50c   :  { %2437 = vmatpush1.bf16.msra.mxu0 %v6294_v39  ;;  %2478 = vmatpush1.bf16.msra.mxu1 %v6298_v61 }
 0x50d   :  { %2438 = vmatprep.subr.bf16.mxu0 %v6300_v62  ;;  %2479 = vmatprep.subr.bf16.mxu1 %v6303_v1 }
 0x510   :  { %2439 = vmatpush1.bf16.msra.mxu0 %v6306_v26  ;;  %2480 = vmatpush1.bf16.msra.mxu1 %v6310_v22  ;;  %v8032_v22 = vld [vmem:[#allocation79_spill] sm:$0xff]  ;;  %v8035_v26 = vld [vmem:[#allocation82_spill] sm:$0xff] }
 0x511   :  { %2592 = vmatprep.subr.bf16.mxu0 %v5915_v10  ;;  %2633 = vmatprep.subr.bf16.mxu1 %v5917_v11  ;;  %v8033_v10 = vld [vmem:[#allocation80_spill] sm:$0xff]  ;;  %v8034_v11 = vld [vmem:[#allocation81_spill] sm:$0xff] }
 0x513   :  { %2441 = vmatmul.mubr.bf16.vlgmr.msra.gmra.mrb[28].mxu0 %v6563_v6  ;;  %2482 = vmatmul.mubr.bf16.vlgmr.msra.gmra.mrb[28].mxu1 %v6563_v6  ;;  %v8036_v6 = vld [vmem:[#allocation83_spill] sm:$0xff] }
 0x514   :  { %2593 = vmatpush1.bf16.msra.mxu0 %v5921_v18  ;;  %2634 = vmatpush1.bf16.msra.mxu1 %v5924_v19  ;;  %v8037_v18 = vld [vmem:[#allocation84_spill] sm:$0xff]  ;;  %v8038_v19 = vld [vmem:[#allocation85_spill] sm:$0xff] }
 0x515   :  { %2594 = vmatprep.subr.bf16.mxu0 %v5926_v20  ;;  %2635 = vmatprep.subr.bf16.mxu1 %v5929_v21  ;;  %v8039_v20 = vld [vmem:[#allocation86_spill] sm:$0xff]  ;;  %v8040_v21 = vld [vmem:[#allocation87_spill] sm:$0xff] }
 0x518   :  { %2595 = vmatpush1.bf16.msra.mxu0 %v5936_v27  ;;  %2636 = vmatpush1.bf16.msra.mxu1 %v5940_v28  ;;  %v8041_v27 = vld [vmem:[#allocation88_spill] sm:$0xff]  ;;  %v8042_v28 = vld [vmem:[#allocation89_spill] sm:$0xff] }
 0x519   :  { %2596 = vmatprep.subr.bf16.mxu0 %v8032_v22  ;;  %2637 = vmatprep.subr.bf16.mxu1 %v8033_v10  ;;  %v8043_v22 = vld [vmem:[#allocation90_spill] sm:$0xff]  ;;  %v8044_v10 = vld [vmem:[#allocation91_spill] sm:$0xff] }
 0x51c   :  { %2597 = vmatpush1.bf16.msra.mxu0 %v8034_v11  ;;  %2638 = vmatpush1.bf16.msra.mxu1 %v8035_v26  ;;  %v8045_v11 = vld [vmem:[#allocation92_spill] sm:$0xff]  ;;  %v8046_v26 = vld [vmem:[#allocation93_spill] sm:$0xff] }
 0x51d   :  { %2598 = vmatprep.subr.bf16.mxu0 %v8036_v6  ;;  %2639 = vmatprep.subr.bf16.mxu1 %v8037_v18  ;;  %v8047_v6 = vld [vmem:[#allocation94_spill] sm:$0xff]  ;;  %v8048_v18 = vld [vmem:[#allocation95_spill] sm:$0xff] }
 0x520   :  { %2599 = vmatpush1.bf16.msra.mxu0 %v8038_v19  ;;  %2640 = vmatpush1.bf16.msra.mxu1 %v8039_v20  ;;  %v8049_v19 = vld [vmem:[#allocation96_spill] sm:$0xff]  ;;  %v8050_v20 = vld [vmem:[#allocation97_spill] sm:$0xff] }
 0x521   :  { %2600 = vmatprep.subr.bf16.mxu0 %v8040_v21  ;;  %2641 = vmatprep.subr.bf16.mxu1 %v8041_v27  ;;  %v8051_v21 = vld [vmem:[#allocation98_spill] sm:$0xff]  ;;  %v8052_v27 = vld [vmem:[#allocation99_spill] sm:$0xff] }
 0x524   :  { %2601 = vmatpush1.bf16.msra.mxu0 %v8042_v28  ;;  %2642 = vmatpush1.bf16.msra.mxu1 %v8043_v22  ;;  %v8053_v28 = vld [vmem:[#allocation100_spill] sm:$0xff]  ;;  %v8054_v22 = vld [vmem:[#allocation101_spill] sm:$0xff] }
 0x525   :  { %2602 = vmatprep.subr.bf16.mxu0 %v8044_v10  ;;  %2643 = vmatprep.subr.bf16.mxu1 %v8045_v11  ;;  %v8055_v10 = vld [vmem:[#allocation102_spill] sm:$0xff]  ;;  %v8056_v11 = vld [vmem:[#allocation103_spill] sm:$0xff] }
 0x528   :  { %2603 = vmatpush1.bf16.msra.mxu0 %v8046_v26  ;;  %2644 = vmatpush1.bf16.msra.mxu1 %v8047_v6  ;;  %v8057_v26 = vld [vmem:[#allocation104_spill] sm:$0xff]  ;;  %v8058_v6 = vld [vmem:[#allocation105_spill] sm:$0xff] }
 0x529   :  { %2604 = vmatprep.subr.bf16.mxu0 %v8048_v18  ;;  %2645 = vmatprep.subr.bf16.mxu1 %v8049_v19  ;;  %v8059_v18 = vld [vmem:[#allocation106_spill] sm:$0xff]  ;;  %v8060_v19 = vld [vmem:[#allocation107_spill] sm:$0xff] }
 0x52c   :  { %2605 = vmatpush1.bf16.msra.mxu0 %v8050_v20  ;;  %2646 = vmatpush1.bf16.msra.mxu1 %v8051_v21  ;;  %v8061_v20 = vld [vmem:[#allocation108_spill] sm:$0xff]  ;;  %v8062_v21 = vld [vmem:[#allocation109_spill] sm:$0xff] }
 0x52d   :  { %2606 = vmatprep.subr.bf16.mxu0 %v8052_v27  ;;  %2647 = vmatprep.subr.bf16.mxu1 %v8053_v28  ;;  %v8063_v27 = vld [vmem:[#allocation110_spill] sm:$0xff]  ;;  %v8064_v28 = vld [vmem:[#allocation111_spill] sm:$0xff] }
 0x530   :  { %2607 = vmatpush1.bf16.msra.mxu0 %v8054_v22  ;;  %2648 = vmatpush1.bf16.msra.mxu1 %v8055_v10  ;;  %v8065_v22 = vld [vmem:[#allocation112_spill] sm:$0xff]  ;;  %v8066_v10 = vld [vmem:[#allocation113_spill] sm:$0xff] }
 0x531   :  { %2608 = vmatprep.subr.bf16.mxu0 %v8056_v11  ;;  %2649 = vmatprep.subr.bf16.mxu1 %v8057_v26  ;;  %v8067_v11 = vld [vmem:[#allocation114_spill] sm:$0xff]  ;;  %v8068_v26 = vld [vmem:[#allocation115_spill] sm:$0xff] }
 0x534   :  { %2609 = vmatpush1.bf16.msra.mxu0 %v8058_v6  ;;  %2650 = vmatpush1.bf16.msra.mxu1 %v8059_v18  ;;  %v8069_v6 = vld [vmem:[#allocation116_spill] sm:$0xff]  ;;  %v8070_v18 = vld [vmem:[#allocation117_spill] sm:$0xff] }
 0x535   :  { %2610 = vmatprep.subr.bf16.mxu0 %v8060_v19  ;;  %2651 = vmatprep.subr.bf16.mxu1 %v8061_v20  ;;  %v8071_v19 = vld [vmem:[#allocation118_spill] sm:$0xff]  ;;  %v8072_v20 = vld [vmem:[#allocation119_spill] sm:$0xff] }
 0x538   :  { %2611 = vmatpush1.bf16.msra.mxu0 %v8062_v21  ;;  %2652 = vmatpush1.bf16.msra.mxu1 %v8063_v27  ;;  %v8073_v21 = vld [vmem:[#allocation120_spill] sm:$0xff]  ;;  %v8074_v27 = vld [vmem:[#allocation121_spill] sm:$0xff] }
 0x539   :  { %2612 = vmatprep.subr.bf16.mxu0 %v8064_v28  ;;  %2653 = vmatprep.subr.bf16.mxu1 %v8065_v22  ;;  %v8075_v28 = vld [vmem:[#allocation122_spill] sm:$0xff]  ;;  %v8076_v22 = vld [vmem:[#allocation123_spill] sm:$0xff] }
 0x53c   :  { %2613 = vmatpush1.bf16.msra.mxu0 %v8066_v10  ;;  %2654 = vmatpush1.bf16.msra.mxu1 %v8067_v11  ;;  %v8077_v10 = vld [vmem:[#allocation124_spill] sm:$0xff]  ;;  %v8078_v11 = vld [vmem:[#allocation125_spill] sm:$0xff] }
 0x53d   :  { %2614 = vmatprep.subr.bf16.mxu0 %v8068_v26  ;;  %2655 = vmatprep.subr.bf16.mxu1 %v8069_v6  ;;  %v8079_v26 = vld [vmem:[#allocation126_spill] sm:$0xff]  ;;  %v8080_v6 = vld [vmem:[#allocation127_spill] sm:$0xff] }
 0x540   :  { %2615 = vmatpush1.bf16.msra.mxu0 %v8070_v18  ;;  %2656 = vmatpush1.bf16.msra.mxu1 %v8071_v19  ;;  %v8081_v18 = vld [vmem:[#allocation128_spill] sm:$0xff]  ;;  %v8082_v19 = vld [vmem:[#allocation129_spill] sm:$0xff] }
 0x541   :  { %2616 = vmatprep.subr.bf16.mxu0 %v8072_v20  ;;  %2657 = vmatprep.subr.bf16.mxu1 %v8073_v21  ;;  %v8083_v20 = vld [vmem:[#allocation130_spill] sm:$0xff]  ;;  %v8084_v21 = vld [vmem:[#allocation131_spill] sm:$0xff] }
 0x544   :  { %2617 = vmatpush1.bf16.msra.mxu0 %v8074_v27  ;;  %2658 = vmatpush1.bf16.msra.mxu1 %v8075_v28  ;;  %v8085_v27 = vld [vmem:[#allocation132_spill] sm:$0xff]  ;;  %v8086_v28 = vld [vmem:[#allocation133_spill] sm:$0xff] }
 0x545   :  { %2618 = vmatprep.subr.bf16.mxu0 %v8076_v22  ;;  %2659 = vmatprep.subr.bf16.mxu1 %v8077_v10  ;;  %v8087_v22 = vld [vmem:[#allocation134_spill] sm:$0xff]  ;;  %v8088_v10 = vld [vmem:[#allocation135_spill] sm:$0xff] }
 0x548   :  { %2619 = vmatpush1.bf16.msra.mxu0 %v8078_v11  ;;  %2660 = vmatpush1.bf16.msra.mxu1 %v8079_v26  ;;  %v8089_v11 = vld [vmem:[#allocation136_spill] sm:$0xff] }
 0x549   :  { %2620 = vmatprep.subr.bf16.mxu0 %v8080_v6  ;;  %2661 = vmatprep.subr.bf16.mxu1 %v8081_v18 }
 0x54c   :  { %2621 = vmatpush1.bf16.msra.mxu0 %v8082_v19  ;;  %2662 = vmatpush1.bf16.msra.mxu1 %v8083_v20  ;;  %v2312_v19 = vld [vmem:[#allocation3 + $0x10] sm:$0x30] }
 0x54d   :  { %2622 = vmatprep.subr.bf16.mxu0 %v8084_v21  ;;  %2663 = vmatprep.subr.bf16.mxu1 %v8085_v27 }
 0x550   :  { %2623 = vmatpush1.bf16.msra.mxu0 %v8086_v28  ;;  %2664 = vmatpush1.bf16.msra.mxu1 %v8087_v22 }
 0x551   :  { %2674 = vmatprep.subr.bf16.mxu0 %v8088_v10  ;;  %2715 = vmatprep.subr.bf16.mxu1 %v8089_v11 }
 0x5a6   :  { %v2360_v26 = vpop.f32.mrb[24].mxu0  ;;  %v2401_v6 = vpop.f32.mrb[24].mxu1 }
 0x5a7   :  { %v2500_v1 = vrot.slane %v2401_v6, 4  ;;  %v2362_v18 = vpop.f32.mrb[25].mxu0  ;;  %v2403_v62 = vpop.f32.mrb[25].mxu1 }
 0x5a8   :  { %v2501_v61 = vrot.slane %v2403_v62, 4  ;;  %v2364_v20 = vpop.f32.mrb[26].mxu0  ;;  %v2405_v39 = vpop.f32.mrb[26].mxu1 }
 0x5a9   :  { %v2516_v21 = vadd.f32 %v2500_v1, %v2312_v19  ;;  %v2365_v27 = vpop.f32.mrb[27].mxu0  ;;  %v2406_v40 = vpop.f32.mrb[27].mxu1  ;;  %v2563_v20 = vrot.slane %v6551_v14, 6  ;;  %v2314_v14 = vld [vmem:[#allocation3 + $0x20] sm:$0x30] }
 0x5aa   :  { %v2517_v28 = vadd.f32 %v2501_v61, %v2313_v7  ;;  %v2498_v40 = vrot.slane %v2360_v26, 4  ;;  %v2499_v7 = vrot.slane %v2362_v18, 4  ;;  %v2316_v18 = vld [vmem:[#allocation3 + $0x30] sm:$0x30] }
 0x5ab   :  { %v4528_v63 = vmul.f32 -1.442695, %v2516_v21  ;;  %v2310_v21 = vld [vmem:[#allocation3] sm:$0x30] }
 0x5ac   :  { %v4529_v22 = vmul.f32 -1.442695, %v2517_v28  ;;  %v2514_v28 = vadd.f32 %v2498_v40, %v2310_v21 }
 0x5ad   :  { %4706 = vpow2.f32 %v4528_v63  ;;  %v2311_v63 = vld [vmem:[#allocation3 + $0x8] sm:$0x30] }
 0x5ae   :  { %4708 = vpow2.f32 %v4529_v22  ;;  %v2515_v61 = vadd.f32 %v2499_v7, %v2311_v63  ;;  %v4526_v1 = vmul.f32 -1.442695, %v2514_v28 }
 0x5b7   :  { %v4707_v10 = vpop.eup %4706 }
 0x5b8   :  { %v2540_v11 = vadd.f32 1.0, %v4707_v10  ;;  %v4709_v38 = vpop.eup %4708  ;;  %v4527_v10 = vmul.f32 -1.442695, %v2515_v61  ;;  %v2315_v61 = vld [vmem:[#allocation3 + $0x28] sm:$0x30] }
 0x5b9   :  { %v2541_v6 = vadd.f32 1.0, %v4709_v38 }
 0x5ba   :  { %4710 = vrcp.f32 %v2540_v11 }
 0x5bb   :  { %4712 = vrcp.f32 %v2541_v6 }
 0x5bc   :  { %4714 = vpow2.f32 %v4526_v1  ;;  %v2317_v1 = vld [vmem:[#allocation3 + $0x38] sm:$0x30] }
 0x5bd   :  { %4716 = vpow2.f32 %v4527_v10 }
 0x5c4   :  { %v4711_v62 = vpop.eup %4710 }
 0x5c5   :  { %v2566_v19 = vmul.f32 %v4711_v62, %v2562_v15  ;;  %v4713_v39 = vpop.eup %4712 }
 0x5c6   :  { %v2567_v27 = vmul.f32 %v4713_v39, %v2563_v20  ;;  %v4715_v11 = vpop.eup %4714 }
 0x5c7   :  { %v4717_v38 = vpop.eup %4716  ;;  %v2528_v22 = vadd.f32 1.0, %v4715_v11 }
 0x5c8   :  { %v2529_v59 = vadd.f32 1.0, %v4717_v38 }
 0x5c9   :  { %4718 = vrcp.f32 %v2528_v22 }
 0x5ca   :  { %4720 = vrcp.f32 %v2529_v59 }
 0x5e6   :  { %v2442_v6 = vpop.f32.mrb[28].mxu0  ;;  %v2483_v9 = vpop.f32.mrb[28].mxu1 }
 0x5e7   :  { %v2502_v15 = vrot.slane %v2442_v6, 4  ;;  %v2504_v62 = vrot.slane %v2483_v9, 4  ;;  %v2444_v20 = vpop.f32.mrb[29].mxu0  ;;  %v2485_v26 = vpop.f32.mrb[29].mxu1 }
 0x5e8   :  { %v2503_v39 = vrot.slane %v2444_v20, 4  ;;  %v2505_v40 = vrot.slane %v2485_v26, 4  ;;  %v2446_v21 = vpop.f32.mrb[30].mxu0  ;;  %v2487_v7 = vpop.f32.mrb[30].mxu1 }
 0x5e9   :  { %v2518_v28 = vadd.f32 %v2502_v15, %v2314_v14  ;;  %v2520_v63 = vadd.f32 %v2504_v62, %v2316_v18  ;;  %v2447_v10 = vpop.f32.mrb[31].mxu0  ;;  %v2488_v11 = vpop.f32.mrb[31].mxu1 }
 0x5ea   :  { %v2519_v38 = vadd.f32 %v2503_v39, %v2315_v61  ;;  %v2521_v25 = vadd.f32 %v2505_v40, %v2317_v1  ;;  %v4719_v20 = vpop.eup %4718  ;;  %v3924_v61 = vrot.slane %v6555_v36, 2  ;;  %v8090_v11 = vld [vmem:[#allocation200_spill] sm:$0xff] }
 0x5eb   :  { %4722 = vtanh.f32 %v2518_v28  ;;  %v4530_v6 = vmul.f32 -1.442695, %v2520_v63  ;;  %v4721_v26 = vpop.eup %4720  ;;  %v3878_v28 = vrot.slane %v6555_v36, 1 }
 0x5ec   :  { %4724 = vtanh.f32 %v2519_v38  ;;  %v4531_v9 = vmul.f32 -1.442695, %v2521_v25  ;;  %v3879_v38 = vrot.slane %v6557_v3, 1 }
 0x5ed   :  { %4726 = vpow2.f32 %v4530_v6  ;;  %v3925_v6 = vrot.slane %v6557_v3, 2 }
 0x5ee   :  { %4728 = vpow2.f32 %v4531_v9 }
 0x5f5   :  { %v4723_v21 = vpop.eup %4722 }
 0x5f6   :  { %v4725_v7 = vpop.eup %4724  ;;  %v2568_v22 = vmul.f32 %v4723_v21, %v4719_v20  ;;  %v8091_v21 = vld [vmem:[#allocation201_spill] sm:$0xff] }
 0x5f7   :  { %v4727_v14 = vpop.eup %4726  ;;  %v2569_v15 = vmul.f32 %v4725_v7, %v4721_v26  ;;  %v3921_v7 = vrot.slane %v8091_v21, 1 }
 0x5f8   :  { %v4729_v62 = vpop.eup %4728  ;;  %v6699_v18 = vadd.f32 %v2568_v22, %v2566_v19  ;;  %v2554_v10 = vadd.f32 1.0, %v4727_v14  ;;  %v3949_v22 = vsel %vm3948_vm0, %v8090_v11, %v3878_v28 }
 0x5f9   :  { %v6701_v59 = vadd.f32 %v2569_v15, %v2567_v27  ;;  %v2555_v39 = vadd.f32 1.0, %v4729_v62  ;;  %v3920_v27 = vrot.slane %v8090_v11, 1  ;;  %v3970_v3 = vsel %vm3948_vm0, %v3921_v7, %v3925_v6  ;;  %v8093_v11 = vld [vmem:[#allocation154_spill] sm:$0xff]  ;;  %v8096_v6 = vld [vmem:[#allocation157_spill] sm:$0xff] }
 0x5fa   :  { %4730 = vtanh.f32 %v6699_v18  ;;  %v8101_v7 = vld [vmem:[#allocation162_spill] sm:$0xff] }
 0x5fb   :  { %4732 = vrcp.f32 %v2554_v10  ;;  %v3969_v36 = vsel %vm3948_vm0, %v3920_v27, %v3924_v61  ;;  %v8094_v27 = vld [vmem:[#allocation155_spill] sm:$0xff] }
 0x5fc   :  { %4734 = vtanh.f32 %v6701_v59 }
 0x5fd   :  { %4736 = vrcp.f32 %v2555_v39  ;;  %v3950_v39 = vsel %vm3948_vm0, %v8091_v21, %v3879_v38  ;;  %v8095_v38 = vld [vmem:[#allocation156_spill] sm:$0xff]  ;;  %v8100_v21 = vld [vmem:[#allocation161_spill] sm:$0xff] }
 0x604   :  { %v4731_v25 = vpop.eup %4730 }
 0x605   :  { %v4733_v40 = vpop.eup %4732 }
 0x606   :  { %v4735_v63 = vpop.eup %4734  ;;  %v2574_v19 = vmul.f32 %v4733_v40, %v4731_v25 }
 0x607   :  { %v4737_v1 = vpop.eup %4736 }
 0x608   :  { %v2575_v9 = vmul.f32 %v4737_v1, %v4735_v63  ;;  %v3884_v20 = vrot.slane %v2574_v19, 2  ;;  %v3928_v26 = vrot.slane %v2574_v19, 3  ;;  %v2584_v14 = vpack.c.bf16 %v2574_v19, %v2574_v19  ;;  %v8092_v1 = vld [vmem:[#allocation153_spill] sm:$0xff] }
 0x60a   :  { %v2585_v15 = vpack.c.bf16 %v2575_v9, %v2575_v9  ;;  %v3885_v62 = vrot.slane %v2575_v9, 2  ;;  %v3929_v10 = vrot.slane %v2575_v9, 3  ;;  %v6718_v25 = vsel %vm3951_vm1, %v3949_v22, %v3884_v20  ;;  %v8097_v9 = vld [vmem:[#allocation158_spill] sm:$0xff]  ;;  %v8098_v20 = vld [vmem:[#allocation159_spill] sm:$0xff] }
 0x60b   :  { %v6721_v40 = vsel %vm3951_vm1, %v3969_v36, %v3928_v26  ;;  %v6729_v19 = vrot.slane %v2584_v14, 2  ;;  %v8099_v26 = vld [vmem:[#allocation160_spill] sm:$0xff]  ;;  %v8102_v22 = vld [vmem:[#allocation166_spill] sm:$0xff]  ;;  %v8104_v36 = vld [vmem:[#allocation187_spill] sm:$0xff] }
 0x60c   :  { %v2589_v63 = vrot.slane %v2585_v15, 2  ;;  %v6724_v28 = vsel %vm3951_vm1, %v3950_v39, %v3885_v62  ;;  %v6727_v61 = vsel %vm3951_vm1, %v3970_v3, %v3929_v10  ;;  %v8103_v14 = vld [vmem:[#allocation186_spill] sm:$0xff]  ;;  %v8105_v15 = vld [vmem:[#allocation188_spill] sm:$0xff]  ;;  %v8106_v62 = vld [vmem:[#allocation189_spill] sm:$0xff] }
 0x60d   :  { %v8107_v10 = vld [vmem:[#allocation190_spill] sm:$0xff]  ;;  %v8108_v39 = vld [vmem:[#allocation191_spill] sm:$0xff]  ;;  %v8109_v3 = vld [vmem:[#allocation192_spill] sm:$0xff] }
 0x60e   :  { %2624 = vmatprep.mubr.bf16.mxu0 %v2589_v63  ;;  %2665 = vmatprep.mubr.bf16.mxu1 %v2589_v63 }
 0x60f   :  { %2625 = vmatmul.mubr.bf16.vlgmr.msra.gmra.mrb[32].mxu0 %v6729_v19  ;;  %2666 = vmatmul.mubr.bf16.vlgmr.msra.gmra.mrb[32].mxu1 %v6729_v19 }
 0x610   :  { %2675 = vmatpush1.bf16.msra.mxu0 %v7916_v8  ;;  %2716 = vmatpush1.bf16.msra.mxu1 %v7917_v47 }
 0x611   :  { %2706 = vmatprep.mubr.bf16.mxu0 %v2589_v63  ;;  %2747 = vmatprep.mubr.bf16.mxu1 %v2589_v63  ;;  %v8110_v63 = vld [vmem:[#allocation193_spill] sm:$0xff] }
 0x612   :  { %2676 = vmatprep.subr.bf16.mxu0 %v7918_v53  ;;  %2717 = vmatprep.subr.bf16.mxu1 %v7919_v46 }
 0x614   :  { %2677 = vmatpush1.bf16.msra.mxu0 %v7920_v45  ;;  %2718 = vmatpush1.bf16.msra.mxu1 %v7921_v17 }
 0x615   :  { %2678 = vmatprep.subr.bf16.mxu0 %v7922_v31  ;;  %2719 = vmatprep.subr.bf16.mxu1 %v7923_v41 }
 0x618   :  { %2679 = vmatpush1.bf16.msra.mxu0 %v8002_v58  ;;  %2720 = vmatpush1.bf16.msra.mxu1 %v8003_v30 }
 0x619   :  { %2680 = vmatprep.subr.bf16.mxu0 %v8004_v42  ;;  %2721 = vmatprep.subr.bf16.mxu1 %v8005_v57 }
 0x61c   :  { %2681 = vmatpush1.bf16.msra.mxu0 %v8006_v43  ;;  %2722 = vmatpush1.bf16.msra.mxu1 %v8007_v0 }
 0x61d   :  { %2682 = vmatprep.subr.bf16.mxu0 %v8008_v33  ;;  %2723 = vmatprep.subr.bf16.mxu1 %v8009_v16 }
 0x620   :  { %2683 = vmatpush1.bf16.msra.mxu0 %v8092_v1  ;;  %2724 = vmatpush1.bf16.msra.mxu1 %v8093_v11 }
 0x621   :  { %2684 = vmatprep.subr.bf16.mxu0 %v8094_v27  ;;  %2725 = vmatprep.subr.bf16.mxu1 %v8095_v38 }
 0x624   :  { %2685 = vmatpush1.bf16.msra.mxu0 %v8096_v6  ;;  %2726 = vmatpush1.bf16.msra.mxu1 %v8097_v9 }
 0x625   :  { %2686 = vmatprep.subr.bf16.mxu0 %v8098_v20  ;;  %2727 = vmatprep.subr.bf16.mxu1 %v8099_v26 }
 0x628   :  { %2687 = vmatpush1.bf16.msra.mxu0 %v8100_v21  ;;  %2728 = vmatpush1.bf16.msra.mxu1 %v8101_v7 }
 0x629   :  { %2688 = vmatprep.subr.bf16.mxu0 %v8020_v35  ;;  %2729 = vmatprep.subr.bf16.mxu1 %v8021_v34 }
 0x62c   :  { %2689 = vmatpush1.bf16.msra.mxu0 %v8022_v44  ;;  %2730 = vmatpush1.bf16.msra.mxu1 %v8102_v22 }
 0x62d   :  { %2690 = vmatprep.subr.bf16.mxu0 %v8024_v60  ;;  %2731 = vmatprep.subr.bf16.mxu1 %v8025_v29 }
 0x630   :  { %2691 = vmatpush1.bf16.msra.mxu0 %v8026_v37  ;;  %2732 = vmatpush1.bf16.msra.mxu1 %v8027_v49 }
 0x631   :  { %2692 = vmatprep.subr.bf16.mxu0 %v8028_v50  ;;  %2733 = vmatprep.subr.bf16.mxu1 %v8029_v52 }
 0x634   :  { %2693 = vmatpush1.bf16.msra.mxu0 %v8030_v2  ;;  %2734 = vmatpush1.bf16.msra.mxu1 %v7953_v24 }
 0x635   :  { %2694 = vmatprep.subr.bf16.mxu0 %v7954_v48  ;;  %2735 = vmatprep.subr.bf16.mxu1 %v7955_v54  ;;  %v2828_v48 = vrot.slane %v6699_v18, 6 }
 0x638   :  { %2695 = vmatpush1.bf16.msra.mxu0 %v8031_v51  ;;  %2736 = vmatpush1.bf16.msra.mxu1 %v7957_v4 }
 0x639   :  { %2696 = vmatprep.subr.bf16.mxu0 %v7958_v55  ;;  %2737 = vmatprep.subr.bf16.mxu1 %v7959_v23  ;;  %v2579_v55 = vld [vmem:[#allocation3 + $0x18] sm:$0xc0] }
 0x63c   :  { %2697 = vmatpush1.bf16.msra.mxu0 %v7960_v32  ;;  %2738 = vmatpush1.bf16.msra.mxu1 %v7961_v12 }
 0x63d   :  { %2698 = vmatprep.subr.bf16.mxu0 %v7962_v56  ;;  %2739 = vmatprep.subr.bf16.mxu1 %v7963_v5  ;;  %v8111_v56 = vld [vmem:[#allocation194_spill] sm:$0xff]  ;;  %v8112_v5 = vld [vmem:[#allocation195_spill] sm:$0xff] }
 0x640   :  { %2699 = vmatpush1.bf16.msra.mxu0 %v6270_v13  ;;  %2740 = vmatpush1.bf16.msra.mxu1 %v8103_v14  ;;  %v8113_v13 = vld [vmem:[#allocation196_spill] sm:$0xff]  ;;  %v8114_v14 = vld [vmem:[#allocation197_spill] sm:$0xff] }
 0x641   :  { %2700 = vmatprep.subr.bf16.mxu0 %v8104_v36  ;;  %2741 = vmatprep.subr.bf16.mxu1 %v8105_v15  ;;  %v8115_v36 = vld [vmem:[#allocation198_spill] sm:$0xff]  ;;  %v8116_v15 = vld [vmem:[#allocation71_spill] sm:$0xff] }
 0x644   :  { %2701 = vmatpush1.bf16.msra.mxu0 %v8106_v62  ;;  %2742 = vmatpush1.bf16.msra.mxu1 %v8107_v10  ;;  %v8117_v62 = vld [vmem:[#allocation72_spill] sm:$0xff] }
 0x645   :  { %2702 = vmatprep.subr.bf16.mxu0 %v8108_v39  ;;  %2743 = vmatprep.subr.bf16.mxu1 %v8109_v3  ;;  %v8118_v3 = vld [vmem:[#allocation73_spill] sm:$0xff]  ;;  %v8127_v39 = vld [vmem:[#allocation82_spill] sm:$0xff] }
 0x648   :  { %2703 = vmatpush1.bf16.msra.mxu0 %v8110_v63  ;;  %2744 = vmatpush1.bf16.msra.mxu1 %v8111_v56  ;;  %v8119_v63 = vld [vmem:[#allocation74_spill] sm:$0xff]  ;;  %v8120_v56 = vld [vmem:[#allocation75_spill] sm:$0xff] }
 0x649   :  { %2704 = vmatprep.subr.bf16.mxu0 %v8112_v5  ;;  %2745 = vmatprep.subr.bf16.mxu1 %v8113_v13  ;;  %v8121_v5 = vld [vmem:[#allocation76_spill] sm:$0xff]  ;;  %v8122_v13 = vld [vmem:[#allocation77_spill] sm:$0xff] }
 0x64c   :  { %2705 = vmatpush1.bf16.msra.mxu0 %v8114_v14  ;;  %2746 = vmatpush1.bf16.msra.mxu1 %v8115_v36  ;;  %v8123_v14 = vld [vmem:[#allocation78_spill] sm:$0xff]  ;;  %v8124_v36 = vld [vmem:[#allocation79_spill] sm:$0xff] }
 0x64d   :  { %2858 = vmatprep.subr.bf16.mxu0 %v8116_v15  ;;  %2899 = vmatprep.subr.bf16.mxu1 %v8117_v62  ;;  %v8125_v15 = vld [vmem:[#allocation80_spill] sm:$0xff]  ;;  %v8126_v62 = vld [vmem:[#allocation81_spill] sm:$0xff] }
 0x64f   :  { %2707 = vmatmul.mubr.bf16.vlgmr.msra.gmra.mrb[36].mxu0 %v6729_v19  ;;  %2748 = vmatmul.mubr.bf16.vlgmr.msra.gmra.mrb[36].mxu1 %v6729_v19  ;;  %v8128_v19 = vld [vmem:[#allocation83_spill] sm:$0xff] }
 0x650   :  { %2859 = vmatpush1.bf16.msra.mxu0 %v8118_v3  ;;  %2900 = vmatpush1.bf16.msra.mxu1 %v8119_v63  ;;  %v8129_v3 = vld [vmem:[#allocation84_spill] sm:$0xff]  ;;  %v8130_v63 = vld [vmem:[#allocation85_spill] sm:$0xff] }
 0x651   :  { %2860 = vmatprep.subr.bf16.mxu0 %v8120_v56  ;;  %2901 = vmatprep.subr.bf16.mxu1 %v8121_v5  ;;  %v8131_v56 = vld [vmem:[#allocation86_spill] sm:$0xff]  ;;  %v8132_v5 = vld [vmem:[#allocation87_spill] sm:$0xff] }
 0x654   :  { %2861 = vmatpush1.bf16.msra.mxu0 %v8122_v13  ;;  %2902 = vmatpush1.bf16.msra.mxu1 %v8123_v14  ;;  %v8133_v13 = vld [vmem:[#allocation88_spill] sm:$0xff]  ;;  %v8134_v14 = vld [vmem:[#allocation89_spill] sm:$0xff] }
 0x655   :  { %2862 = vmatprep.subr.bf16.mxu0 %v8124_v36  ;;  %2903 = vmatprep.subr.bf16.mxu1 %v8125_v15  ;;  %v8135_v36 = vld [vmem:[#allocation90_spill] sm:$0xff]  ;;  %v8136_v15 = vld [vmem:[#allocation91_spill] sm:$0xff] }
 0x658   :  { %2863 = vmatpush1.bf16.msra.mxu0 %v8126_v62  ;;  %2904 = vmatpush1.bf16.msra.mxu1 %v8127_v39  ;;  %v8137_v62 = vld [vmem:[#allocation92_spill] sm:$0xff]  ;;  %v8138_v39 = vld [vmem:[#allocation93_spill] sm:$0xff] }
 0x659   :  { %2864 = vmatprep.subr.bf16.mxu0 %v8128_v19  ;;  %2905 = vmatprep.subr.bf16.mxu1 %v8129_v3  ;;  %v8139_v19 = vld [vmem:[#allocation94_spill] sm:$0xff]  ;;  %v8140_v3 = vld [vmem:[#allocation95_spill] sm:$0xff] }
 0x65c   :  { %2865 = vmatpush1.bf16.msra.mxu0 %v8130_v63  ;;  %2906 = vmatpush1.bf16.msra.mxu1 %v8131_v56  ;;  %v8141_v63 = vld [vmem:[#allocation96_spill] sm:$0xff]  ;;  %v8142_v56 = vld [vmem:[#allocation97_spill] sm:$0xff] }
 0x65d   :  { %2866 = vmatprep.subr.bf16.mxu0 %v8132_v5  ;;  %2907 = vmatprep.subr.bf16.mxu1 %v8133_v13  ;;  %v8143_v5 = vld [vmem:[#allocation98_spill] sm:$0xff]  ;;  %v8144_v13 = vld [vmem:[#allocation99_spill] sm:$0xff] }
 0x660   :  { %2867 = vmatpush1.bf16.msra.mxu0 %v8134_v14  ;;  %2908 = vmatpush1.bf16.msra.mxu1 %v8135_v36  ;;  %v8145_v14 = vld [vmem:[#allocation100_spill] sm:$0xff]  ;;  %v8146_v36 = vld [vmem:[#allocation101_spill] sm:$0xff] }
 0x661   :  { %2868 = vmatprep.subr.bf16.mxu0 %v8136_v15  ;;  %2909 = vmatprep.subr.bf16.mxu1 %v8137_v62  ;;  %v8147_v15 = vld [vmem:[#allocation102_spill] sm:$0xff]  ;;  %v8148_v62 = vld [vmem:[#allocation103_spill] sm:$0xff] }
 0x664   :  { %2869 = vmatpush1.bf16.msra.mxu0 %v8138_v39  ;;  %2910 = vmatpush1.bf16.msra.mxu1 %v8139_v19  ;;  %v8149_v39 = vld [vmem:[#allocation104_spill] sm:$0xff]  ;;  %v8150_v19 = vld [vmem:[#allocation105_spill] sm:$0xff] }
 0x665   :  { %2870 = vmatprep.subr.bf16.mxu0 %v8140_v3  ;;  %2911 = vmatprep.subr.bf16.mxu1 %v8141_v63  ;;  %v8151_v3 = vld [vmem:[#allocation106_spill] sm:$0xff]  ;;  %v8152_v63 = vld [vmem:[#allocation107_spill] sm:$0xff] }
 0x668   :  { %2871 = vmatpush1.bf16.msra.mxu0 %v8142_v56  ;;  %2912 = vmatpush1.bf16.msra.mxu1 %v8143_v5  ;;  %v8153_v56 = vld [vmem:[#allocation108_spill] sm:$0xff]  ;;  %v8154_v5 = vld [vmem:[#allocation109_spill] sm:$0xff] }
 0x669   :  { %2872 = vmatprep.subr.bf16.mxu0 %v8144_v13  ;;  %2913 = vmatprep.subr.bf16.mxu1 %v8145_v14  ;;  %v8155_v13 = vld [vmem:[#allocation110_spill] sm:$0xff]  ;;  %v8156_v14 = vld [vmem:[#allocation111_spill] sm:$0xff] }
 0x66c   :  { %2873 = vmatpush1.bf16.msra.mxu0 %v8146_v36  ;;  %2914 = vmatpush1.bf16.msra.mxu1 %v8147_v15  ;;  %v8157_v36 = vld [vmem:[#allocation112_spill] sm:$0xff]  ;;  %v8158_v15 = vld [vmem:[#allocation113_spill] sm:$0xff] }
 0x66d   :  { %2874 = vmatprep.subr.bf16.mxu0 %v8148_v62  ;;  %2915 = vmatprep.subr.bf16.mxu1 %v8149_v39  ;;  %v8159_v62 = vld [vmem:[#allocation114_spill] sm:$0xff]  ;;  %v8160_v39 = vld [vmem:[#allocation115_spill] sm:$0xff] }
 0x670   :  { %2875 = vmatpush1.bf16.msra.mxu0 %v8150_v19  ;;  %2916 = vmatpush1.bf16.msra.mxu1 %v8151_v3  ;;  %v8161_v19 = vld [vmem:[#allocation116_spill] sm:$0xff]  ;;  %v8162_v3 = vld [vmem:[#allocation117_spill] sm:$0xff] }
 0x671   :  { %2876 = vmatprep.subr.bf16.mxu0 %v8152_v63  ;;  %2917 = vmatprep.subr.bf16.mxu1 %v8153_v56  ;;  %v8163_v63 = vld [vmem:[#allocation118_spill] sm:$0xff]  ;;  %v8164_v56 = vld [vmem:[#allocation119_spill] sm:$0xff] }
 0x674   :  { %2877 = vmatpush1.bf16.msra.mxu0 %v8154_v5  ;;  %2918 = vmatpush1.bf16.msra.mxu1 %v8155_v13  ;;  %v8165_v5 = vld [vmem:[#allocation120_spill] sm:$0xff]  ;;  %v8166_v13 = vld [vmem:[#allocation121_spill] sm:$0xff] }
 0x675   :  { %2878 = vmatprep.subr.bf16.mxu0 %v8156_v14  ;;  %2919 = vmatprep.subr.bf16.mxu1 %v8157_v36  ;;  %v8167_v14 = vld [vmem:[#allocation122_spill] sm:$0xff]  ;;  %v8168_v36 = vld [vmem:[#allocation123_spill] sm:$0xff] }
 0x678   :  { %2879 = vmatpush1.bf16.msra.mxu0 %v8158_v15  ;;  %2920 = vmatpush1.bf16.msra.mxu1 %v8159_v62  ;;  %v8169_v15 = vld [vmem:[#allocation124_spill] sm:$0xff]  ;;  %v8170_v62 = vld [vmem:[#allocation125_spill] sm:$0xff] }
 0x679   :  { %2880 = vmatprep.subr.bf16.mxu0 %v8160_v39  ;;  %2921 = vmatprep.subr.bf16.mxu1 %v8161_v19  ;;  %v8171_v39 = vld [vmem:[#allocation126_spill] sm:$0xff]  ;;  %v8172_v19 = vld [vmem:[#allocation127_spill] sm:$0xff] }
 0x67c   :  { %2881 = vmatpush1.bf16.msra.mxu0 %v8162_v3  ;;  %2922 = vmatpush1.bf16.msra.mxu1 %v8163_v63  ;;  %v8173_v3 = vld [vmem:[#allocation128_spill] sm:$0xff]  ;;  %v8174_v63 = vld [vmem:[#allocation129_spill] sm:$0xff] }
 0x67d   :  { %2882 = vmatprep.subr.bf16.mxu0 %v8164_v56  ;;  %2923 = vmatprep.subr.bf16.mxu1 %v8165_v5  ;;  %v8175_v56 = vld [vmem:[#allocation130_spill] sm:$0xff]  ;;  %v8176_v5 = vld [vmem:[#allocation131_spill] sm:$0xff] }
 0x680   :  { %2883 = vmatpush1.bf16.msra.mxu0 %v8166_v13  ;;  %2924 = vmatpush1.bf16.msra.mxu1 %v8167_v14  ;;  %v8177_v13 = vld [vmem:[#allocation132_spill] sm:$0xff]  ;;  %v8178_v14 = vld [vmem:[#allocation133_spill] sm:$0xff] }
 0x681   :  { %2884 = vmatprep.subr.bf16.mxu0 %v8168_v36  ;;  %2925 = vmatprep.subr.bf16.mxu1 %v8169_v15  ;;  %v8179_v36 = vld [vmem:[#allocation134_spill] sm:$0xff]  ;;  %v8180_v15 = vld [vmem:[#allocation135_spill] sm:$0xff] }
 0x684   :  { %2885 = vmatpush1.bf16.msra.mxu0 %v8170_v62  ;;  %2926 = vmatpush1.bf16.msra.mxu1 %v8171_v39  ;;  %v8181_v62 = vld [vmem:[#allocation136_spill] sm:$0xff] }
 0x685   :  { %2886 = vmatprep.subr.bf16.mxu0 %v8172_v19  ;;  %2927 = vmatprep.subr.bf16.mxu1 %v8173_v3 }
 0x688   :  { %2887 = vmatpush1.bf16.msra.mxu0 %v8174_v63  ;;  %2928 = vmatpush1.bf16.msra.mxu1 %v8175_v56  ;;  %v2578_v63 = vld [vmem:[#allocation3 + $0x10] sm:$0xc0] }
 0x689   :  { %2888 = vmatprep.subr.bf16.mxu0 %v8176_v5  ;;  %2929 = vmatprep.subr.bf16.mxu1 %v8177_v13 }
 0x68c   :  { %2889 = vmatpush1.bf16.msra.mxu0 %v8178_v14  ;;  %2930 = vmatpush1.bf16.msra.mxu1 %v8179_v36 }
 0x68d   :  { %2940 = vmatprep.subr.bf16.mxu0 %v8180_v15  ;;  %2981 = vmatprep.subr.bf16.mxu1 %v8181_v62 }
 0x6e2   :  { %v2626_v39 = vpop.f32.mrb[32].mxu0  ;;  %v2667_v19 = vpop.f32.mrb[32].mxu1 }
 0x6e3   :  { %v2766_v10 = vrot.slane %v2667_v19, 2  ;;  %v2628_v3 = vpop.f32.mrb[33].mxu0  ;;  %v2669_v12 = vpop.f32.mrb[33].mxu1 }
 0x6e4   :  { %v2767_v32 = vrot.slane %v2669_v12, 2  ;;  %v2630_v56 = vpop.f32.mrb[34].mxu0  ;;  %v2671_v23 = vpop.f32.mrb[34].mxu1 }
 0x6e5   :  { %v2782_v5 = vadd.f32 %v2766_v10, %v2578_v63  ;;  %v2631_v13 = vpop.f32.mrb[35].mxu0  ;;  %v2672_v4 = vpop.f32.mrb[35].mxu1  ;;  %v2829_v23 = vrot.slane %v6701_v59, 6  ;;  %v2580_v59 = vld [vmem:[#allocation3 + $0x20] sm:$0xc0] }
 0x6e6   :  { %v2783_v14 = vadd.f32 %v2767_v32, %v2579_v55  ;;  %v2764_v4 = vrot.slane %v2626_v39, 2  ;;  %v2765_v55 = vrot.slane %v2628_v3, 2  ;;  %v2576_v32 = vld [vmem:[#allocation3] sm:$0xc0]  ;;  %v2582_v3 = vld [vmem:[#allocation3 + $0x30] sm:$0xc0] }
 0x6e7   :  { %v4534_v51 = vmul.f32 -1.442695, %v2782_v5 }
 0x6e8   :  { %v4535_v36 = vmul.f32 -1.442695, %v2783_v14  ;;  %v2780_v5 = vadd.f32 %v2764_v4, %v2576_v32 }
 0x6e9   :  { %4738 = vpow2.f32 %v4534_v51  ;;  %v2577_v51 = vld [vmem:[#allocation3 + $0x8] sm:$0xc0] }
 0x6ea   :  { %4740 = vpow2.f32 %v4535_v36  ;;  %v2781_v14 = vadd.f32 %v2765_v55, %v2577_v51  ;;  %v4532_v36 = vmul.f32 -1.442695, %v2780_v5 }
 0x6f3   :  { %v4739_v15 = vpop.eup %4738 }
 0x6f4   :  { %v2806_v62 = vadd.f32 1.0, %v4739_v15  ;;  %v4741_v54 = vpop.eup %4740  ;;  %v4533_v15 = vmul.f32 -1.442695, %v2781_v14  ;;  %v2581_v14 = vld [vmem:[#allocation3 + $0x28] sm:$0xc0] }
 0x6f5   :  { %v2807_v19 = vadd.f32 1.0, %v4741_v54 }
 0x6f6   :  { %4742 = vrcp.f32 %v2806_v62 }
 0x6f7   :  { %4744 = vrcp.f32 %v2807_v19 }
 0x6f8   :  { %4746 = vpow2.f32 %v4532_v36  ;;  %v2583_v36 = vld [vmem:[#allocation3 + $0x38] sm:$0xc0] }
 0x6f9   :  { %4748 = vpow2.f32 %v4533_v15 }
 0x700   :  { %v4743_v12 = vpop.eup %4742 }
 0x701   :  { %v2832_v56 = vmul.f32 %v4743_v12, %v2828_v48  ;;  %v4745_v10 = vpop.eup %4744 }
 0x702   :  { %v2833_v13 = vmul.f32 %v4745_v10, %v2829_v23  ;;  %v4747_v54 = vpop.eup %4746 }
 0x703   :  { %v4749_v62 = vpop.eup %4748  ;;  %v2794_v63 = vadd.f32 1.0, %v4747_v54 }
 0x704   :  { %v2795_v18 = vadd.f32 1.0, %v4749_v62 }
 0x705   :  { %4750 = vrcp.f32 %v2794_v63 }
 0x706   :  { %4752 = vrcp.f32 %v2795_v18 }
 0x722   :  { %v2708_v19 = vpop.f32.mrb[36].mxu0  ;;  %v2749_v24 = vpop.f32.mrb[36].mxu1 }
 0x723   :  { %v2768_v48 = vrot.slane %v2708_v19, 2  ;;  %v2770_v12 = vrot.slane %v2749_v24, 2  ;;  %v2710_v23 = vpop.f32.mrb[37].mxu0  ;;  %v2751_v39 = vpop.f32.mrb[37].mxu1 }
 0x724   :  { %v2769_v10 = vrot.slane %v2710_v23, 2  ;;  %v2771_v4 = vrot.slane %v2751_v39, 2  ;;  %v2712_v32 = vpop.f32.mrb[38].mxu0  ;;  %v2753_v55 = vpop.f32.mrb[38].mxu1 }
 0x725   :  { %v2784_v5 = vadd.f32 %v2768_v48, %v2580_v59  ;;  %v2786_v51 = vadd.f32 %v2770_v12, %v2582_v3  ;;  %v2713_v15 = vpop.f32.mrb[39].mxu0  ;;  %v2754_v54 = vpop.f32.mrb[39].mxu1 }
 0x726   :  { %v2785_v62 = vadd.f32 %v2769_v10, %v2581_v14  ;;  %v2787_v2 = vadd.f32 %v2771_v4, %v2583_v36  ;;  %v4751_v23 = vpop.eup %4750 }
 0x727   :  { %4754 = vtanh.f32 %v2784_v5  ;;  %v4536_v19 = vmul.f32 -1.442695, %v2786_v51  ;;  %v4753_v39 = vpop.eup %4752 }
 0x728   :  { %4756 = vtanh.f32 %v2785_v62  ;;  %v4537_v24 = vmul.f32 -1.442695, %v2787_v2 }
 0x729   :  { %4758 = vpow2.f32 %v4536_v19 }
 0x72a   :  { %4760 = vpow2.f32 %v4537_v24 }
 0x731   :  { %v4755_v32 = vpop.eup %4754 }
 0x732   :  { %v4757_v55 = vpop.eup %4756  ;;  %v2834_v63 = vmul.f32 %v4755_v32, %v4751_v23 }
 0x733   :  { %v4759_v59 = vpop.eup %4758  ;;  %v2835_v48 = vmul.f32 %v4757_v55, %v4753_v39 }
 0x734   :  { %v4761_v12 = vpop.eup %4760  ;;  %v6865_v3 = vadd.f32 %v2834_v63, %v2832_v56  ;;  %v2820_v15 = vadd.f32 1.0, %v4759_v59 }
 0x735   :  { %v6867_v18 = vadd.f32 %v2835_v48, %v2833_v13  ;;  %v2821_v10 = vadd.f32 1.0, %v4761_v12  ;;  %v8186_v48 = vld [vmem:[#allocation177_spill] sm:$0xff]  ;;  %v8187_v12 = vld [vmem:[#allocation178_spill] sm:$0xff] }
 0x736   :  { %4762 = vtanh.f32 %v6865_v3 }
 0x737   :  { %4764 = vrcp.f32 %v2820_v15  ;;  %v8188_v15 = vld [vmem:[#allocation179_spill] sm:$0xff] }
 0x738   :  { %4766 = vtanh.f32 %v6867_v18 }
 0x739   :  { %4768 = vrcp.f32 %v2821_v10  ;;  %v8189_v10 = vld [vmem:[#allocation180_spill] sm:$0xff] }
 0x740   :  { %v4763_v2 = vpop.eup %4762 }
 0x741   :  { %v4765_v4 = vpop.eup %4764 }
 0x742   :  { %v4767_v5 = vpop.eup %4766  ;;  %v2840_v51 = vmul.f32 %v4765_v4, %v4763_v2  ;;  %v8190_v2 = vld [vmem:[#allocation181_spill] sm:$0xff]  ;;  %v8191_v4 = vld [vmem:[#allocation182_spill] sm:$0xff] }
 0x743   :  { %v4769_v14 = vpop.eup %4768 }
 0x744   :  { %v2841_v36 = vmul.f32 %v4769_v14, %v4767_v5  ;;  %v3890_v54 = vrot.slane %v2840_v51, 3  ;;  %v3932_v62 = vrot.slane %v2840_v51, 4  ;;  %v2850_v56 = vpack.c.bf16 %v2840_v51, %v2840_v51  ;;  %v8192_v5 = vld [vmem:[#allocation183_spill] sm:$0xff]  ;;  %v8193_v51 = vld [vmem:[#allocation184_spill] sm:$0xff]  ;;  %v8194_v14 = vld [vmem:[#allocation185_spill] sm:$0xff] }
 0x746   :  { %v2851_v19 = vpack.c.bf16 %v2841_v36, %v2841_v36  ;;  %v3891_v13 = vrot.slane %v2841_v36, 3  ;;  %v3933_v24 = vrot.slane %v2841_v36, 4  ;;  %v6872_v23 = vsel %vm3954_vm2, %v6718_v25, %v3890_v54  ;;  %v8182_v25 = vld [vmem:[#allocation173_spill] sm:$0xff]  ;;  %v8195_v36 = vld [vmem:[#allocation186_spill] sm:$0xff]  ;;  %v8196_v54 = vld [vmem:[#allocation187_spill] sm:$0xff] }
 0x747   :  { %v6875_v39 = vsel %vm3954_vm2, %v6721_v40, %v3932_v62  ;;  %v6883_v59 = vrot.slane %v2850_v56, 3  ;;  %v8183_v40 = vld [vmem:[#allocation174_spill] sm:$0xff]  ;;  %v8197_v62 = vld [vmem:[#allocation188_spill] sm:$0xff]  ;;  %v8198_v56 = vld [vmem:[#allocation189_spill] sm:$0xff] }
 0x748   :  { %v2855_v32 = vrot.slane %v2851_v19, 3  ;;  %v6878_v55 = vsel %vm3954_vm2, %v6724_v28, %v3891_v13  ;;  %v6881_v63 = vsel %vm3954_vm2, %v6727_v61, %v3933_v24  ;;  %v8184_v28 = vld [vmem:[#allocation175_spill] sm:$0xff]  ;;  %v8185_v61 = vld [vmem:[#allocation176_spill] sm:$0xff]  ;;  %v8199_v19 = vld [vmem:[#allocation190_spill] sm:$0xff] }
 0x749   :  { %v8200_v13 = vld [vmem:[#allocation191_spill] sm:$0xff]  ;;  %v8201_v24 = vld [vmem:[#allocation192_spill] sm:$0xff] }
 0x74a   :  { %2890 = vmatprep.mubr.bf16.mxu0 %v2855_v32  ;;  %2931 = vmatprep.mubr.bf16.mxu1 %v2855_v32 }
 0x74b   :  { %2891 = vmatmul.mubr.bf16.vlgmr.msra.gmra.mrb[40].mxu0 %v6883_v59  ;;  %2932 = vmatmul.mubr.bf16.vlgmr.msra.gmra.mrb[40].mxu1 %v6883_v59 }
 0x74c   :  { %2941 = vmatpush1.bf16.msra.mxu0 %v7916_v8  ;;  %2982 = vmatpush1.bf16.msra.mxu1 %v7917_v47 }
 0x74d   :  { %2972 = vmatprep.mubr.bf16.mxu0 %v2855_v32  ;;  %3013 = vmatprep.mubr.bf16.mxu1 %v2855_v32  ;;  %v8202_v32 = vld [vmem:[#allocation193_spill] sm:$0xff] }
 0x74e   :  { %2942 = vmatprep.subr.bf16.mxu0 %v7918_v53  ;;  %2983 = vmatprep.subr.bf16.mxu1 %v7919_v46 }
 0x750   :  { %2943 = vmatpush1.bf16.msra.mxu0 %v7920_v45  ;;  %2984 = vmatpush1.bf16.msra.mxu1 %v7921_v17 }
 0x751   :  { %2944 = vmatprep.subr.bf16.mxu0 %v7922_v31  ;;  %2985 = vmatprep.subr.bf16.mxu1 %v7923_v41 }
 0x754   :  { %2945 = vmatpush1.bf16.msra.mxu0 %v8002_v58  ;;  %2986 = vmatpush1.bf16.msra.mxu1 %v8003_v30 }
 0x755   :  { %2946 = vmatprep.subr.bf16.mxu0 %v8004_v42  ;;  %2987 = vmatprep.subr.bf16.mxu1 %v8005_v57 }
 0x758   :  { %2947 = vmatpush1.bf16.msra.mxu0 %v8006_v43  ;;  %2988 = vmatpush1.bf16.msra.mxu1 %v8007_v0 }
 0x759   :  { %2948 = vmatprep.subr.bf16.mxu0 %v8008_v33  ;;  %2989 = vmatprep.subr.bf16.mxu1 %v8009_v16 }
 0x75c   :  { %2949 = vmatpush1.bf16.msra.mxu0 %v8092_v1  ;;  %2990 = vmatpush1.bf16.msra.mxu1 %v8093_v11 }
 0x75d   :  { %2950 = vmatprep.subr.bf16.mxu0 %v8094_v27  ;;  %2991 = vmatprep.subr.bf16.mxu1 %v8095_v38 }
 0x760   :  { %2951 = vmatpush1.bf16.msra.mxu0 %v8096_v6  ;;  %2992 = vmatpush1.bf16.msra.mxu1 %v8097_v9 }
 0x761   :  { %2952 = vmatprep.subr.bf16.mxu0 %v8098_v20  ;;  %2993 = vmatprep.subr.bf16.mxu1 %v8099_v26 }
 0x764   :  { %2953 = vmatpush1.bf16.msra.mxu0 %v8100_v21  ;;  %2994 = vmatpush1.bf16.msra.mxu1 %v8101_v7 }
 0x765   :  { %2954 = vmatprep.subr.bf16.mxu0 %v8020_v35  ;;  %2995 = vmatprep.subr.bf16.mxu1 %v8021_v34 }
 0x768   :  { %2955 = vmatpush1.bf16.msra.mxu0 %v8022_v44  ;;  %2996 = vmatpush1.bf16.msra.mxu1 %v8102_v22 }
 0x769   :  { %2956 = vmatprep.subr.bf16.mxu0 %v8024_v60  ;;  %2997 = vmatprep.subr.bf16.mxu1 %v8025_v29 }
 0x76c   :  { %2957 = vmatpush1.bf16.msra.mxu0 %v8026_v37  ;;  %2998 = vmatpush1.bf16.msra.mxu1 %v8027_v49 }
 0x76d   :  { %2958 = vmatprep.subr.bf16.mxu0 %v8028_v50  ;;  %2999 = vmatprep.subr.bf16.mxu1 %v8029_v52 }
 0x770   :  { %2959 = vmatpush1.bf16.msra.mxu0 %v8182_v25  ;;  %3000 = vmatpush1.bf16.msra.mxu1 %v8183_v40 }
 0x771   :  { %2960 = vmatprep.subr.bf16.mxu0 %v8184_v28  ;;  %3001 = vmatprep.subr.bf16.mxu1 %v8185_v61  ;;  %v2848_v28 = vld [vmem:[#allocation3 + $0x70] sm:$0x3] }
 0x774   :  { %2961 = vmatpush1.bf16.msra.mxu0 %v8186_v48  ;;  %3002 = vmatpush1.bf16.msra.mxu1 %v8187_v12 }
 0x775   :  { %2962 = vmatprep.subr.bf16.mxu0 %v8188_v15  ;;  %3003 = vmatprep.subr.bf16.mxu1 %v8189_v10 }
 0x778   :  { %2963 = vmatpush1.bf16.msra.mxu0 %v8190_v2  ;;  %3004 = vmatpush1.bf16.msra.mxu1 %v8191_v4 }
 0x779   :  { %2964 = vmatprep.subr.bf16.mxu0 %v8192_v5  ;;  %3005 = vmatprep.subr.bf16.mxu1 %v8193_v51  ;;  %v8203_v5 = vld [vmem:[#allocation194_spill] sm:$0xff]  ;;  %v8204_v51 = vld [vmem:[#allocation195_spill] sm:$0xff] }
 0x77c   :  { %2965 = vmatpush1.bf16.msra.mxu0 %v8194_v14  ;;  %3006 = vmatpush1.bf16.msra.mxu1 %v8195_v36  ;;  %v8205_v14 = vld [vmem:[#allocation196_spill] sm:$0xff]  ;;  %v8206_v36 = vld [vmem:[#allocation197_spill] sm:$0xff] }
 0x77d   :  { %2966 = vmatprep.subr.bf16.mxu0 %v8196_v54  ;;  %3007 = vmatprep.subr.bf16.mxu1 %v8197_v62  ;;  %v8207_v54 = vld [vmem:[#allocation198_spill] sm:$0xff]  ;;  %v8208_v62 = vld [vmem:[#allocation71_spill] sm:$0xff] }
 0x780   :  { %2967 = vmatpush1.bf16.msra.mxu0 %v8198_v56  ;;  %3008 = vmatpush1.bf16.msra.mxu1 %v8199_v19  ;;  %v8209_v56 = vld [vmem:[#allocation72_spill] sm:$0xff] }
 0x781   :  { %2968 = vmatprep.subr.bf16.mxu0 %v8200_v13  ;;  %3009 = vmatprep.subr.bf16.mxu1 %v8201_v24  ;;  %v8210_v24 = vld [vmem:[#allocation73_spill] sm:$0xff]  ;;  %v8219_v13 = vld [vmem:[#allocation82_spill] sm:$0xff] }
 0x784   :  { %2969 = vmatpush1.bf16.msra.mxu0 %v8202_v32  ;;  %3010 = vmatpush1.bf16.msra.mxu1 %v8203_v5  ;;  %v8211_v32 = vld [vmem:[#allocation74_spill] sm:$0xff]  ;;  %v8212_v5 = vld [vmem:[#allocation75_spill] sm:$0xff] }
 0x785   :  { %2970 = vmatprep.subr.bf16.mxu0 %v8204_v51  ;;  %3011 = vmatprep.subr.bf16.mxu1 %v8205_v14  ;;  %v8213_v51 = vld [vmem:[#allocation76_spill] sm:$0xff]  ;;  %v8214_v14 = vld [vmem:[#allocation77_spill] sm:$0xff] }
 0x788   :  { %2971 = vmatpush1.bf16.msra.mxu0 %v8206_v36  ;;  %3012 = vmatpush1.bf16.msra.mxu1 %v8207_v54  ;;  %v8215_v36 = vld [vmem:[#allocation78_spill] sm:$0xff]  ;;  %v8216_v54 = vld [vmem:[#allocation79_spill] sm:$0xff] }
 0x789   :  { %3094 = vmatprep.subr.bf16.mxu0 %v8208_v62  ;;  %3135 = vmatprep.subr.bf16.mxu1 %v8209_v56  ;;  %v8217_v62 = vld [vmem:[#allocation80_spill] sm:$0xff]  ;;  %v8218_v56 = vld [vmem:[#allocation81_spill] sm:$0xff] }
 0x78b   :  { %2973 = vmatmul.mubr.bf16.vlgmr.msra.gmra.mrb[44].mxu0 %v6883_v59  ;;  %3014 = vmatmul.mubr.bf16.vlgmr.msra.gmra.mrb[44].mxu1 %v6883_v59  ;;  %v8220_v59 = vld [vmem:[#allocation83_spill] sm:$0xff] }
 0x78c   :  { %3095 = vmatpush1.bf16.msra.mxu0 %v8210_v24  ;;  %3136 = vmatpush1.bf16.msra.mxu1 %v8211_v32  ;;  %v8221_v24 = vld [vmem:[#allocation84_spill] sm:$0xff]  ;;  %v8222_v32 = vld [vmem:[#allocation85_spill] sm:$0xff] }
 0x78d   :  { %3096 = vmatprep.subr.bf16.mxu0 %v8212_v5  ;;  %3137 = vmatprep.subr.bf16.mxu1 %v8213_v51  ;;  %v8223_v5 = vld [vmem:[#allocation86_spill] sm:$0xff]  ;;  %v8224_v51 = vld [vmem:[#allocation87_spill] sm:$0xff] }
 0x790   :  { %3097 = vmatpush1.bf16.msra.mxu0 %v8214_v14  ;;  %3138 = vmatpush1.bf16.msra.mxu1 %v8215_v36  ;;  %v8225_v14 = vld [vmem:[#allocation88_spill] sm:$0xff]  ;;  %v8226_v36 = vld [vmem:[#allocation89_spill] sm:$0xff] }
 0x791   :  { %3098 = vmatprep.subr.bf16.mxu0 %v8216_v54  ;;  %3139 = vmatprep.subr.bf16.mxu1 %v8217_v62  ;;  %v8227_v54 = vld [vmem:[#allocation90_spill] sm:$0xff]  ;;  %v8228_v62 = vld [vmem:[#allocation91_spill] sm:$0xff] }
 0x794   :  { %3099 = vmatpush1.bf16.msra.mxu0 %v8218_v56  ;;  %3140 = vmatpush1.bf16.msra.mxu1 %v8219_v13  ;;  %v8229_v56 = vld [vmem:[#allocation92_spill] sm:$0xff]  ;;  %v8230_v13 = vld [vmem:[#allocation93_spill] sm:$0xff] }
 0x795   :  { %3100 = vmatprep.subr.bf16.mxu0 %v8220_v59  ;;  %3141 = vmatprep.subr.bf16.mxu1 %v8221_v24  ;;  %v8231_v59 = vld [vmem:[#allocation94_spill] sm:$0xff]  ;;  %v8232_v24 = vld [vmem:[#allocation95_spill] sm:$0xff] }
 0x798   :  { %3101 = vmatpush1.bf16.msra.mxu0 %v8222_v32  ;;  %3142 = vmatpush1.bf16.msra.mxu1 %v8223_v5  ;;  %v8233_v32 = vld [vmem:[#allocation96_spill] sm:$0xff]  ;;  %v8234_v5 = vld [vmem:[#allocation97_spill] sm:$0xff] }
 0x799   :  { %3102 = vmatprep.subr.bf16.mxu0 %v8224_v51  ;;  %3143 = vmatprep.subr.bf16.mxu1 %v8225_v14  ;;  %v8235_v51 = vld [vmem:[#allocation98_spill] sm:$0xff]  ;;  %v8236_v14 = vld [vmem:[#allocation99_spill] sm:$0xff] }
 0x79c   :  { %3103 = vmatpush1.bf16.msra.mxu0 %v8226_v36  ;;  %3144 = vmatpush1.bf16.msra.mxu1 %v8227_v54  ;;  %v8237_v36 = vld [vmem:[#allocation100_spill] sm:$0xff]  ;;  %v8238_v54 = vld [vmem:[#allocation101_spill] sm:$0xff] }
 0x79d   :  { %3104 = vmatprep.subr.bf16.mxu0 %v8228_v62  ;;  %3145 = vmatprep.subr.bf16.mxu1 %v8229_v56  ;;  %v8239_v62 = vld [vmem:[#allocation102_spill] sm:$0xff]  ;;  %v8240_v56 = vld [vmem:[#allocation103_spill] sm:$0xff] }
 0x7a0   :  { %3105 = vmatpush1.bf16.msra.mxu0 %v8230_v13  ;;  %3146 = vmatpush1.bf16.msra.mxu1 %v8231_v59  ;;  %v8241_v13 = vld [vmem:[#allocation104_spill] sm:$0xff]  ;;  %v8242_v59 = vld [vmem:[#allocation105_spill] sm:$0xff] }
 0x7a1   :  { %3106 = vmatprep.subr.bf16.mxu0 %v8232_v24  ;;  %3147 = vmatprep.subr.bf16.mxu1 %v8233_v32  ;;  %v8243_v24 = vld [vmem:[#allocation106_spill] sm:$0xff]  ;;  %v8244_v32 = vld [vmem:[#allocation107_spill] sm:$0xff] }
 0x7a4   :  { %3107 = vmatpush1.bf16.msra.mxu0 %v8234_v5  ;;  %3148 = vmatpush1.bf16.msra.mxu1 %v8235_v51  ;;  %v8245_v5 = vld [vmem:[#allocation108_spill] sm:$0xff]  ;;  %v8246_v51 = vld [vmem:[#allocation109_spill] sm:$0xff] }
 0x7a5   :  { %3108 = vmatprep.subr.bf16.mxu0 %v8236_v14  ;;  %3149 = vmatprep.subr.bf16.mxu1 %v8237_v36  ;;  %v8247_v14 = vld [vmem:[#allocation110_spill] sm:$0xff]  ;;  %v8248_v36 = vld [vmem:[#allocation111_spill] sm:$0xff] }
 0x7a8   :  { %3109 = vmatpush1.bf16.msra.mxu0 %v8238_v54  ;;  %3150 = vmatpush1.bf16.msra.mxu1 %v8239_v62  ;;  %v8249_v54 = vld [vmem:[#allocation112_spill] sm:$0xff]  ;;  %v8250_v62 = vld [vmem:[#allocation113_spill] sm:$0xff] }
 0x7a9   :  { %3110 = vmatprep.subr.bf16.mxu0 %v8240_v56  ;;  %3151 = vmatprep.subr.bf16.mxu1 %v8241_v13  ;;  %v8251_v56 = vld [vmem:[#allocation114_spill] sm:$0xff]  ;;  %v8252_v13 = vld [vmem:[#allocation115_spill] sm:$0xff] }
 0x7ac   :  { %3111 = vmatpush1.bf16.msra.mxu0 %v8242_v59  ;;  %3152 = vmatpush1.bf16.msra.mxu1 %v8243_v24  ;;  %v8253_v59 = vld [vmem:[#allocation116_spill] sm:$0xff]  ;;  %v8254_v24 = vld [vmem:[#allocation117_spill] sm:$0xff] }
 0x7ad   :  { %3112 = vmatprep.subr.bf16.mxu0 %v8244_v32  ;;  %3153 = vmatprep.subr.bf16.mxu1 %v8245_v5  ;;  %v8255_v32 = vld [vmem:[#allocation118_spill] sm:$0xff]  ;;  %v8256_v5 = vld [vmem:[#allocation119_spill] sm:$0xff] }
 0x7b0   :  { %3113 = vmatpush1.bf16.msra.mxu0 %v8246_v51  ;;  %3154 = vmatpush1.bf16.msra.mxu1 %v8247_v14  ;;  %v8257_v51 = vld [vmem:[#allocation120_spill] sm:$0xff]  ;;  %v8258_v14 = vld [vmem:[#allocation121_spill] sm:$0xff] }
 0x7b1   :  { %3114 = vmatprep.subr.bf16.mxu0 %v8248_v36  ;;  %3155 = vmatprep.subr.bf16.mxu1 %v8249_v54  ;;  %v8259_v36 = vld [vmem:[#allocation122_spill] sm:$0xff]  ;;  %v8260_v54 = vld [vmem:[#allocation123_spill] sm:$0xff] }
 0x7b4   :  { %3115 = vmatpush1.bf16.msra.mxu0 %v8250_v62  ;;  %3156 = vmatpush1.bf16.msra.mxu1 %v8251_v56  ;;  %v8261_v62 = vld [vmem:[#allocation124_spill] sm:$0xff]  ;;  %v8262_v56 = vld [vmem:[#allocation125_spill] sm:$0xff] }
 0x7b5   :  { %3116 = vmatprep.subr.bf16.mxu0 %v8252_v13  ;;  %3157 = vmatprep.subr.bf16.mxu1 %v8253_v59  ;;  %v8263_v13 = vld [vmem:[#allocation126_spill] sm:$0xff]  ;;  %v8264_v59 = vld [vmem:[#allocation127_spill] sm:$0xff] }
 0x7b8   :  { %3117 = vmatpush1.bf16.msra.mxu0 %v8254_v24  ;;  %3158 = vmatpush1.bf16.msra.mxu1 %v8255_v32  ;;  %v8265_v24 = vld [vmem:[#allocation128_spill] sm:$0xff]  ;;  %v8266_v32 = vld [vmem:[#allocation129_spill] sm:$0xff] }
 0x7b9   :  { %3118 = vmatprep.subr.bf16.mxu0 %v8256_v5  ;;  %3159 = vmatprep.subr.bf16.mxu1 %v8257_v51  ;;  %v8267_v5 = vld [vmem:[#allocation130_spill] sm:$0xff]  ;;  %v8268_v51 = vld [vmem:[#allocation131_spill] sm:$0xff] }
 0x7bc   :  { %3119 = vmatpush1.bf16.msra.mxu0 %v8258_v14  ;;  %3160 = vmatpush1.bf16.msra.mxu1 %v8259_v36  ;;  %v8269_v14 = vld [vmem:[#allocation132_spill] sm:$0xff]  ;;  %v8270_v36 = vld [vmem:[#allocation133_spill] sm:$0xff] }
 0x7bd   :  { %3120 = vmatprep.subr.bf16.mxu0 %v8260_v54  ;;  %3161 = vmatprep.subr.bf16.mxu1 %v8261_v62  ;;  %v8271_v54 = vld [vmem:[#allocation134_spill] sm:$0xff]  ;;  %v8272_v62 = vld [vmem:[#allocation135_spill] sm:$0xff] }
 0x7c0   :  { %3121 = vmatpush1.bf16.msra.mxu0 %v8262_v56  ;;  %3162 = vmatpush1.bf16.msra.mxu1 %v8263_v13  ;;  %v8273_v56 = vld [vmem:[#allocation136_spill] sm:$0xff] }
 0x7c1   :  { %3122 = vmatprep.subr.bf16.mxu0 %v8264_v59  ;;  %3163 = vmatprep.subr.bf16.mxu1 %v8265_v24  ;;  %v2844_v59 = vld [vmem:[#allocation3 + $0x50] sm:$0x3] }
 0x7c4   :  { %3123 = vmatpush1.bf16.msra.mxu0 %v8266_v32  ;;  %3164 = vmatpush1.bf16.msra.mxu1 %v8267_v5  ;;  %v2845_v32 = vld [vmem:[#allocation3 + $0x58] sm:$0x3] }
 0x7c5   :  { %3124 = vmatprep.subr.bf16.mxu0 %v8268_v51  ;;  %3165 = vmatprep.subr.bf16.mxu1 %v8269_v14 }
 0x7c8   :  { %3125 = vmatpush1.bf16.msra.mxu0 %v8270_v36  ;;  %3166 = vmatpush1.bf16.msra.mxu1 %v8271_v54 }
 0x7c9   :  { %3176 = vmatprep.subr.bf16.mxu0 %v8272_v62  ;;  %3217 = vmatprep.subr.bf16.mxu1 %v8273_v56 }
 0x81e   :  { %v2892_v13 = vpop.f32.mrb[40].mxu0  ;;  %v2933_v19 = vpop.f32.mrb[40].mxu1 }
 0x81f   :  { %v3024_v24 = vadd.f32 %v2933_v19, %v2844_v59  ;;  %v2894_v4 = vpop.f32.mrb[41].mxu0  ;;  %v2935_v2 = vpop.f32.mrb[41].mxu1  ;;  %v3070_v19 = vrot.slane %v6865_v3, 6 }
 0x820   :  { %v3025_v5 = vadd.f32 %v2935_v2, %v2845_v32  ;;  %v2896_v10 = vpop.f32.mrb[42].mxu0  ;;  %v2937_v51 = vpop.f32.mrb[42].mxu1  ;;  %v3071_v2 = vrot.slane %v6867_v18, 6  ;;  %v2846_v32 = vld [vmem:[#allocation3 + $0x60] sm:$0x3] }
 0x821   :  { %v4540_v15 = vmul.f32 -1.442695, %v3024_v24  ;;  %v2897_v14 = vpop.f32.mrb[43].mxu0  ;;  %v2938_v12 = vpop.f32.mrb[43].mxu1  ;;  %v2842_v24 = vld [vmem:[#allocation3 + $0x40] sm:$0x3] }
 0x822   :  { %v4541_v36 = vmul.f32 -1.442695, %v3025_v5  ;;  %v3022_v14 = vadd.f32 %v2892_v13, %v2842_v24  ;;  %v2843_v12 = vld [vmem:[#allocation3 + $0x48] sm:$0x3]  ;;  %v2849_v13 = vld [vmem:[#allocation3 + $0x78] sm:$0x3] }
 0x823   :  { %4770 = vpow2.f32 %v4540_v15  ;;  %v3023_v5 = vadd.f32 %v2894_v4, %v2843_v12 }
 0x824   :  { %4772 = vpow2.f32 %v4541_v36  ;;  %v4538_v15 = vmul.f32 -1.442695, %v3022_v14 }
 0x825   :  { %v4539_v36 = vmul.f32 -1.442695, %v3023_v5 }
 0x82d   :  { %v4771_v54 = vpop.eup %4770 }
 0x82e   :  { %v3048_v62 = vadd.f32 1.0, %v4771_v54  ;;  %v4773_v48 = vpop.eup %4772 }
 0x82f   :  { %v3049_v56 = vadd.f32 1.0, %v4773_v48 }
 0x830   :  { %4774 = vrcp.f32 %v3048_v62 }
 0x831   :  { %4776 = vrcp.f32 %v3049_v56 }
 0x832   :  { %4778 = vpow2.f32 %v4538_v15 }
 0x833   :  { %4780 = vpow2.f32 %v4539_v36 }
 0x83a   :  { %v4775_v59 = vpop.eup %4774 }
 0x83b   :  { %v3074_v61 = vmul.f32 %v4775_v59, %v3070_v19  ;;  %v4777_v10 = vpop.eup %4776 }
 0x83c   :  { %v3075_v51 = vmul.f32 %v4777_v10, %v3071_v2  ;;  %v4779_v54 = vpop.eup %4778  ;;  %v2847_v2 = vld [vmem:[#allocation3 + $0x68] sm:$0x3] }
 0x83d   :  { %v4781_v62 = vpop.eup %4780  ;;  %v3036_v48 = vadd.f32 1.0, %v4779_v54 }
 0x83e   :  { %v3037_v56 = vadd.f32 1.0, %v4781_v62 }
 0x83f   :  { %4782 = vrcp.f32 %v3036_v48 }
 0x840   :  { %4784 = vrcp.f32 %v3037_v56 }
 0x849   :  { %v4783_v48 = vpop.eup %4782 }
 0x85e   :  { %v2974_v3 = vpop.f32.mrb[44].mxu0  ;;  %v3015_v19 = vpop.f32.mrb[44].mxu1 }
 0x85f   :  { %v3026_v18 = vadd.f32 %v2974_v3, %v2846_v32  ;;  %v3028_v59 = vadd.f32 %v3015_v19, %v2848_v28  ;;  %v2976_v10 = vpop.f32.mrb[45].mxu0  ;;  %v3017_v24 = vpop.f32.mrb[45].mxu1 }
 0x860   :  { %v3027_v4 = vadd.f32 %v2976_v10, %v2847_v2  ;;  %v3029_v14 = vadd.f32 %v3017_v24, %v2849_v13  ;;  %v2978_v12 = vpop.f32.mrb[46].mxu0  ;;  %v3019_v5 = vpop.f32.mrb[46].mxu1 }
 0x861   :  { %4786 = vtanh.f32 %v3026_v18  ;;  %v4542_v15 = vmul.f32 -1.442695, %v3028_v59  ;;  %v2979_v36 = vpop.f32.mrb[47].mxu0  ;;  %v3020_v54 = vpop.f32.mrb[47].mxu1 }
 0x862   :  { %4788 = vtanh.f32 %v3027_v4  ;;  %v4543_v62 = vmul.f32 -1.442695, %v3029_v14  ;;  %v4785_v32 = vpop.eup %4784 }
 0x863   :  { %4790 = vpow2.f32 %v4542_v15 }
 0x864   :  { %4792 = vpow2.f32 %v4543_v62 }
 0x86b   :  { %v4787_v28 = vpop.eup %4786 }
 0x86c   :  { %v4789_v3 = vpop.eup %4788  ;;  %v3076_v19 = vmul.f32 %v4787_v28, %v4783_v48  ;;  %v8278_v28 = vld [vmem:[#allocation177_spill] sm:$0xff] }
 0x86d   :  { %v4791_v40 = vpop.eup %4790  ;;  %v3077_v25 = vmul.f32 %v4789_v3, %v4785_v32  ;;  %v8279_v3 = vld [vmem:[#allocation178_spill] sm:$0xff] }
 0x86e   :  { %v4793_v56 = vpop.eup %4792  ;;  %v7019_v2 = vadd.f32 %v3076_v19, %v3074_v61  ;;  %v3062_v10 = vadd.f32 1.0, %v4791_v40  ;;  %v8280_v19 = vld [vmem:[#allocation179_spill] sm:$0xff] }
 0x86f   :  { %v7021_v13 = vadd.f32 %v3077_v25, %v3075_v51  ;;  %v3063_v18 = vadd.f32 1.0, %v4793_v56  ;;  %v8281_v56 = vld [vmem:[#allocation180_spill] sm:$0xff] }
 0x870   :  { %4794 = vtanh.f32 %v7019_v2 }
 0x871   :  { %4796 = vrcp.f32 %v3062_v10  ;;  %v8282_v10 = vld [vmem:[#allocation181_spill] sm:$0xff] }
 0x872   :  { %4798 = vtanh.f32 %v7021_v13 }
 0x873   :  { %4800 = vrcp.f32 %v3063_v18  ;;  %v8283_v18 = vld [vmem:[#allocation182_spill] sm:$0xff] }
 0x87a   :  { %v4795_v59 = vpop.eup %4794 }
 0x87b   :  { %v4797_v24 = vpop.eup %4796 }
 0x87c   :  { %v4799_v4 = vpop.eup %4798  ;;  %v3082_v14 = vmul.f32 %v4797_v24, %v4795_v59  ;;  %v8284_v59 = vld [vmem:[#allocation183_spill] sm:$0xff]  ;;  %v8285_v24 = vld [vmem:[#allocation184_spill] sm:$0xff] }
 0x87d   :  { %v4801_v12 = vpop.eup %4800 }
 0x87e   :  { %v3083_v5 = vmul.f32 %v4801_v12, %v4799_v4  ;;  %v3896_v15 = vrot.slane %v3082_v14, 4  ;;  %v3936_v61 = vrot.slane %v3082_v14, 5  ;;  %v7028_v54 = vpack.c.bf16 %v3082_v14, %v3082_v14  ;;  %v8286_v4 = vld [vmem:[#allocation185_spill] sm:$0xff]  ;;  %v8287_v14 = vld [vmem:[#allocation186_spill] sm:$0xff]  ;;  %v8288_v12 = vld [vmem:[#allocation187_spill] sm:$0xff] }
 0x880   :  { %v3093_v36 = vpack.c.bf16 %v3083_v5, %v3083_v5  ;;  %v3897_v40 = vrot.slane %v3083_v5, 4  ;;  %v3937_v25 = vrot.slane %v3083_v5, 5  ;;  %v7026_v51 = vsel %vm3957_vm3, %v6872_v23, %v3896_v15  ;;  %v8274_v23 = vld [vmem:[#allocation173_spill] sm:$0xff]  ;;  %v8289_v5 = vld [vmem:[#allocation188_spill] sm:$0xff] }
 0x881   :  { %v7031_v62 = vsel %vm3957_vm3, %v6875_v39, %v3936_v61  ;;  %v8275_v39 = vld [vmem:[#allocation174_spill] sm:$0xff]  ;;  %v8290_v15 = vld [vmem:[#allocation189_spill] sm:$0xff] }
 0x882   :  { %3126 = vmatprep.mubr.bf16.mxu0 %v3093_v36  ;;  %3167 = vmatprep.mubr.bf16.mxu1 %v3093_v36  ;;  %v7034_v48 = vsel %vm3957_vm3, %v6878_v55, %v3897_v40  ;;  %v7037_v32 = vsel %vm3957_vm3, %v6881_v63, %v3937_v25  ;;  %v8276_v55 = vld [vmem:[#allocation175_spill] sm:$0xff]  ;;  %v8277_v63 = vld [vmem:[#allocation176_spill] sm:$0xff]  ;;  %v8291_v61 = vld [vmem:[#allocation190_spill] sm:$0xff] }
 0x883   :  { %3127 = vmatmul.mubr.bf16.vlgmr.msra.gmra.mrb[48].mxu0 %v7028_v54  ;;  %3168 = vmatmul.mubr.bf16.vlgmr.msra.gmra.mrb[48].mxu1 %v7028_v54  ;;  %v8293_v40 = vld [vmem:[#allocation192_spill] sm:$0xff]  ;;  %v8294_v25 = vld [vmem:[#allocation193_spill] sm:$0xff] }
 0x884   :  { %3177 = vmatpush1.bf16.msra.mxu0 %v7916_v8  ;;  %3218 = vmatpush1.bf16.msra.mxu1 %v7917_v47 }
 0x885   :  { %3208 = vmatprep.mubr.bf16.mxu0 %v3093_v36  ;;  %3249 = vmatprep.mubr.bf16.mxu1 %v3093_v36  ;;  %v8292_v36 = vld [vmem:[#allocation191_spill] sm:$0xff] }
 0x886   :  { %3178 = vmatprep.subr.bf16.mxu0 %v7918_v53  ;;  %3219 = vmatprep.subr.bf16.mxu1 %v7919_v46 }
 0x888   :  { %3179 = vmatpush1.bf16.msra.mxu0 %v7920_v45  ;;  %3220 = vmatpush1.bf16.msra.mxu1 %v7921_v17 }
 0x889   :  { %3180 = vmatprep.subr.bf16.mxu0 %v7922_v31  ;;  %3221 = vmatprep.subr.bf16.mxu1 %v7923_v41 }
 0x88c   :  { %3181 = vmatpush1.bf16.msra.mxu0 %v8002_v58  ;;  %3222 = vmatpush1.bf16.msra.mxu1 %v8003_v30 }
 0x88d   :  { %3182 = vmatprep.subr.bf16.mxu0 %v8004_v42  ;;  %3223 = vmatprep.subr.bf16.mxu1 %v8005_v57 }
 0x890   :  { %3183 = vmatpush1.bf16.msra.mxu0 %v8006_v43  ;;  %3224 = vmatpush1.bf16.msra.mxu1 %v8007_v0 }
 0x891   :  { %3184 = vmatprep.subr.bf16.mxu0 %v8008_v33  ;;  %3225 = vmatprep.subr.bf16.mxu1 %v8009_v16 }
 0x894   :  { %3185 = vmatpush1.bf16.msra.mxu0 %v8092_v1  ;;  %3226 = vmatpush1.bf16.msra.mxu1 %v8093_v11 }
 0x895   :  { %3186 = vmatprep.subr.bf16.mxu0 %v8094_v27  ;;  %3227 = vmatprep.subr.bf16.mxu1 %v8095_v38 }
 0x898   :  { %3187 = vmatpush1.bf16.msra.mxu0 %v8096_v6  ;;  %3228 = vmatpush1.bf16.msra.mxu1 %v8097_v9 }
 0x899   :  { %3188 = vmatprep.subr.bf16.mxu0 %v8098_v20  ;;  %3229 = vmatprep.subr.bf16.mxu1 %v8099_v26 }
 0x89c   :  { %3189 = vmatpush1.bf16.msra.mxu0 %v8100_v21  ;;  %3230 = vmatpush1.bf16.msra.mxu1 %v8101_v7 }
 0x89d   :  { %3190 = vmatprep.subr.bf16.mxu0 %v8020_v35  ;;  %3231 = vmatprep.subr.bf16.mxu1 %v8021_v34 }
 0x8a0   :  { %3191 = vmatpush1.bf16.msra.mxu0 %v8022_v44  ;;  %3232 = vmatpush1.bf16.msra.mxu1 %v8102_v22 }
 0x8a1   :  { %3192 = vmatprep.subr.bf16.mxu0 %v8024_v60  ;;  %3233 = vmatprep.subr.bf16.mxu1 %v8025_v29 }
 0x8a4   :  { %3193 = vmatpush1.bf16.msra.mxu0 %v8026_v37  ;;  %3234 = vmatpush1.bf16.msra.mxu1 %v8027_v49 }
 0x8a5   :  { %3194 = vmatprep.subr.bf16.mxu0 %v8028_v50  ;;  %3235 = vmatprep.subr.bf16.mxu1 %v8029_v52 }
 0x8a8   :  { %3195 = vmatpush1.bf16.msra.mxu0 %v8274_v23  ;;  %3236 = vmatpush1.bf16.msra.mxu1 %v8275_v39 }
 0x8a9   :  { %3196 = vmatprep.subr.bf16.mxu0 %v8276_v55  ;;  %3237 = vmatprep.subr.bf16.mxu1 %v8277_v63  ;;  %v3330_v55 = vrot.slane %v7019_v2, 6 }
 0x8ac   :  { %3197 = vmatpush1.bf16.msra.mxu0 %v8278_v28  ;;  %3238 = vmatpush1.bf16.msra.mxu1 %v8279_v3 }
 0x8ad   :  { %3198 = vmatprep.subr.bf16.mxu0 %v8280_v19  ;;  %3239 = vmatprep.subr.bf16.mxu1 %v8281_v56  ;;  %v3087_v19 = vld [vmem:[#allocation3 + $0x58] sm:$0xc] }
 0x8b0   :  { %3199 = vmatpush1.bf16.msra.mxu0 %v8282_v10  ;;  %3240 = vmatpush1.bf16.msra.mxu1 %v8283_v18 }
 0x8b1   :  { %3200 = vmatprep.subr.bf16.mxu0 %v8284_v59  ;;  %3241 = vmatprep.subr.bf16.mxu1 %v8285_v24  ;;  %v8295_v59 = vld [vmem:[#allocation194_spill] sm:$0xff]  ;;  %v8296_v24 = vld [vmem:[#allocation195_spill] sm:$0xff] }
 0x8b4   :  { %3201 = vmatpush1.bf16.msra.mxu0 %v8286_v4  ;;  %3242 = vmatpush1.bf16.msra.mxu1 %v8287_v14  ;;  %v8297_v4 = vld [vmem:[#allocation196_spill] sm:$0xff]  ;;  %v8298_v14 = vld [vmem:[#allocation197_spill] sm:$0xff] }
 0x8b5   :  { %3202 = vmatprep.subr.bf16.mxu0 %v8288_v12  ;;  %3243 = vmatprep.subr.bf16.mxu1 %v8289_v5  ;;  %v8299_v12 = vld [vmem:[#allocation198_spill] sm:$0xff]  ;;  %v8300_v5 = vld [vmem:[#allocation71_spill] sm:$0xff] }
 0x8b8   :  { %3203 = vmatpush1.bf16.msra.mxu0 %v8290_v15  ;;  %3244 = vmatpush1.bf16.msra.mxu1 %v8291_v61  ;;  %v8301_v15 = vld [vmem:[#allocation72_spill] sm:$0xff] }
 0x8b9   :  { %3204 = vmatprep.subr.bf16.mxu0 %v8292_v36  ;;  %3245 = vmatprep.subr.bf16.mxu1 %v8293_v40  ;;  %v8302_v40 = vld [vmem:[#allocation73_spill] sm:$0xff]  ;;  %v8311_v36 = vld [vmem:[#allocation82_spill] sm:$0xff] }
 0x8bc   :  { %3205 = vmatpush1.bf16.msra.mxu0 %v8294_v25  ;;  %3246 = vmatpush1.bf16.msra.mxu1 %v8295_v59  ;;  %v8303_v25 = vld [vmem:[#allocation74_spill] sm:$0xff]  ;;  %v8304_v59 = vld [vmem:[#allocation75_spill] sm:$0xff] }
 0x8bd   :  { %3206 = vmatprep.subr.bf16.mxu0 %v8296_v24  ;;  %3247 = vmatprep.subr.bf16.mxu1 %v8297_v4  ;;  %v8305_v24 = vld [vmem:[#allocation76_spill] sm:$0xff]  ;;  %v8306_v4 = vld [vmem:[#allocation77_spill] sm:$0xff] }
 0x8c0   :  { %3207 = vmatpush1.bf16.msra.mxu0 %v8298_v14  ;;  %3248 = vmatpush1.bf16.msra.mxu1 %v8299_v12  ;;  %v8307_v14 = vld [vmem:[#allocation78_spill] sm:$0xff]  ;;  %v8308_v12 = vld [vmem:[#allocation79_spill] sm:$0xff] }
 0x8c1   :  { %3360 = vmatprep.subr.bf16.mxu0 %v8300_v5  ;;  %3401 = vmatprep.subr.bf16.mxu1 %v8301_v15  ;;  %v8309_v5 = vld [vmem:[#allocation80_spill] sm:$0xff]  ;;  %v8310_v15 = vld [vmem:[#allocation81_spill] sm:$0xff] }
 0x8c3   :  { %3209 = vmatmul.mubr.bf16.vlgmr.msra.gmra.mrb[52].mxu0 %v7028_v54  ;;  %3250 = vmatmul.mubr.bf16.vlgmr.msra.gmra.mrb[52].mxu1 %v7028_v54  ;;  %v8312_v54 = vld [vmem:[#allocation83_spill] sm:$0xff] }
 0x8c4   :  { %3361 = vmatpush1.bf16.msra.mxu0 %v8302_v40  ;;  %3402 = vmatpush1.bf16.msra.mxu1 %v8303_v25  ;;  %v8313_v40 = vld [vmem:[#allocation84_spill] sm:$0xff]  ;;  %v8314_v25 = vld [vmem:[#allocation85_spill] sm:$0xff] }
 0x8c5   :  { %3362 = vmatprep.subr.bf16.mxu0 %v8304_v59  ;;  %3403 = vmatprep.subr.bf16.mxu1 %v8305_v24  ;;  %v8315_v59 = vld [vmem:[#allocation86_spill] sm:$0xff]  ;;  %v8316_v24 = vld [vmem:[#allocation87_spill] sm:$0xff] }
 0x8c8   :  { %3363 = vmatpush1.bf16.msra.mxu0 %v8306_v4  ;;  %3404 = vmatpush1.bf16.msra.mxu1 %v8307_v14  ;;  %v8317_v4 = vld [vmem:[#allocation88_spill] sm:$0xff]  ;;  %v8318_v14 = vld [vmem:[#allocation89_spill] sm:$0xff] }
 0x8c9   :  { %3364 = vmatprep.subr.bf16.mxu0 %v8308_v12  ;;  %3405 = vmatprep.subr.bf16.mxu1 %v8309_v5  ;;  %v8319_v12 = vld [vmem:[#allocation90_spill] sm:$0xff]  ;;  %v8320_v5 = vld [vmem:[#allocation91_spill] sm:$0xff] }
 0x8cc   :  { %3365 = vmatpush1.bf16.msra.mxu0 %v8310_v15  ;;  %3406 = vmatpush1.bf16.msra.mxu1 %v8311_v36  ;;  %v8321_v15 = vld [vmem:[#allocation92_spill] sm:$0xff]  ;;  %v8322_v36 = vld [vmem:[#allocation93_spill] sm:$0xff] }
 0x8cd   :  { %3366 = vmatprep.subr.bf16.mxu0 %v8312_v54  ;;  %3407 = vmatprep.subr.bf16.mxu1 %v8313_v40  ;;  %v8323_v54 = vld [vmem:[#allocation94_spill] sm:$0xff]  ;;  %v8324_v40 = vld [vmem:[#allocation95_spill] sm:$0xff] }
 0x8d0   :  { %3367 = vmatpush1.bf16.msra.mxu0 %v8314_v25  ;;  %3408 = vmatpush1.bf16.msra.mxu1 %v8315_v59  ;;  %v8325_v25 = vld [vmem:[#allocation96_spill] sm:$0xff]  ;;  %v8326_v59 = vld [vmem:[#allocation97_spill] sm:$0xff] }
 0x8d1   :  { %3368 = vmatprep.subr.bf16.mxu0 %v8316_v24  ;;  %3409 = vmatprep.subr.bf16.mxu1 %v8317_v4  ;;  %v8327_v24 = vld [vmem:[#allocation98_spill] sm:$0xff]  ;;  %v8328_v4 = vld [vmem:[#allocation99_spill] sm:$0xff] }
 0x8d4   :  { %3369 = vmatpush1.bf16.msra.mxu0 %v8318_v14  ;;  %3410 = vmatpush1.bf16.msra.mxu1 %v8319_v12  ;;  %v8329_v14 = vld [vmem:[#allocation100_spill] sm:$0xff]  ;;  %v8330_v12 = vld [vmem:[#allocation101_spill] sm:$0xff] }
 0x8d5   :  { %3370 = vmatprep.subr.bf16.mxu0 %v8320_v5  ;;  %3411 = vmatprep.subr.bf16.mxu1 %v8321_v15  ;;  %v8331_v5 = vld [vmem:[#allocation102_spill] sm:$0xff]  ;;  %v8332_v15 = vld [vmem:[#allocation103_spill] sm:$0xff] }
 0x8d8   :  { %3371 = vmatpush1.bf16.msra.mxu0 %v8322_v36  ;;  %3412 = vmatpush1.bf16.msra.mxu1 %v8323_v54  ;;  %v8333_v36 = vld [vmem:[#allocation104_spill] sm:$0xff]  ;;  %v8334_v54 = vld [vmem:[#allocation105_spill] sm:$0xff] }
 0x8d9   :  { %3372 = vmatprep.subr.bf16.mxu0 %v8324_v40  ;;  %3413 = vmatprep.subr.bf16.mxu1 %v8325_v25  ;;  %v8335_v40 = vld [vmem:[#allocation106_spill] sm:$0xff]  ;;  %v8336_v25 = vld [vmem:[#allocation107_spill] sm:$0xff] }
 0x8dc   :  { %3373 = vmatpush1.bf16.msra.mxu0 %v8326_v59  ;;  %3414 = vmatpush1.bf16.msra.mxu1 %v8327_v24  ;;  %v8337_v59 = vld [vmem:[#allocation108_spill] sm:$0xff]  ;;  %v8338_v24 = vld [vmem:[#allocation109_spill] sm:$0xff] }
 0x8dd   :  { %3374 = vmatprep.subr.bf16.mxu0 %v8328_v4  ;;  %3415 = vmatprep.subr.bf16.mxu1 %v8329_v14  ;;  %v8339_v4 = vld [vmem:[#allocation110_spill] sm:$0xff]  ;;  %v8340_v14 = vld [vmem:[#allocation111_spill] sm:$0xff] }
 0x8e0   :  { %3375 = vmatpush1.bf16.msra.mxu0 %v8330_v12  ;;  %3416 = vmatpush1.bf16.msra.mxu1 %v8331_v5  ;;  %v8341_v12 = vld [vmem:[#allocation112_spill] sm:$0xff]  ;;  %v8342_v5 = vld [vmem:[#allocation113_spill] sm:$0xff] }
 0x8e1   :  { %3376 = vmatprep.subr.bf16.mxu0 %v8332_v15  ;;  %3417 = vmatprep.subr.bf16.mxu1 %v8333_v36  ;;  %v8343_v15 = vld [vmem:[#allocation114_spill] sm:$0xff]  ;;  %v8344_v36 = vld [vmem:[#allocation115_spill] sm:$0xff] }
 0x8e4   :  { %3377 = vmatpush1.bf16.msra.mxu0 %v8334_v54  ;;  %3418 = vmatpush1.bf16.msra.mxu1 %v8335_v40  ;;  %v8345_v54 = vld [vmem:[#allocation116_spill] sm:$0xff]  ;;  %v8346_v40 = vld [vmem:[#allocation117_spill] sm:$0xff] }
 0x8e5   :  { %3378 = vmatprep.subr.bf16.mxu0 %v8336_v25  ;;  %3419 = vmatprep.subr.bf16.mxu1 %v8337_v59  ;;  %v8347_v25 = vld [vmem:[#allocation118_spill] sm:$0xff]  ;;  %v8348_v59 = vld [vmem:[#allocation119_spill] sm:$0xff] }
 0x8e8   :  { %3379 = vmatpush1.bf16.msra.mxu0 %v8338_v24  ;;  %3420 = vmatpush1.bf16.msra.mxu1 %v8339_v4  ;;  %v8349_v24 = vld [vmem:[#allocation120_spill] sm:$0xff]  ;;  %v8350_v4 = vld [vmem:[#allocation121_spill] sm:$0xff] }
 0x8e9   :  { %3380 = vmatprep.subr.bf16.mxu0 %v8340_v14  ;;  %3421 = vmatprep.subr.bf16.mxu1 %v8341_v12  ;;  %v8351_v14 = vld [vmem:[#allocation122_spill] sm:$0xff]  ;;  %v8352_v12 = vld [vmem:[#allocation123_spill] sm:$0xff] }
 0x8ec   :  { %3381 = vmatpush1.bf16.msra.mxu0 %v8342_v5  ;;  %3422 = vmatpush1.bf16.msra.mxu1 %v8343_v15  ;;  %v8353_v5 = vld [vmem:[#allocation124_spill] sm:$0xff]  ;;  %v8354_v15 = vld [vmem:[#allocation125_spill] sm:$0xff] }
 0x8ed   :  { %3382 = vmatprep.subr.bf16.mxu0 %v8344_v36  ;;  %3423 = vmatprep.subr.bf16.mxu1 %v8345_v54  ;;  %v8355_v36 = vld [vmem:[#allocation126_spill] sm:$0xff]  ;;  %v8356_v54 = vld [vmem:[#allocation127_spill] sm:$0xff] }
 0x8f0   :  { %3383 = vmatpush1.bf16.msra.mxu0 %v8346_v40  ;;  %3424 = vmatpush1.bf16.msra.mxu1 %v8347_v25  ;;  %v8357_v40 = vld [vmem:[#allocation128_spill] sm:$0xff]  ;;  %v8358_v25 = vld [vmem:[#allocation129_spill] sm:$0xff] }
 0x8f1   :  { %3384 = vmatprep.subr.bf16.mxu0 %v8348_v59  ;;  %3425 = vmatprep.subr.bf16.mxu1 %v8349_v24  ;;  %v8359_v59 = vld [vmem:[#allocation130_spill] sm:$0xff]  ;;  %v8360_v24 = vld [vmem:[#allocation131_spill] sm:$0xff] }
 0x8f4   :  { %3385 = vmatpush1.bf16.msra.mxu0 %v8350_v4  ;;  %3426 = vmatpush1.bf16.msra.mxu1 %v8351_v14  ;;  %v8361_v4 = vld [vmem:[#allocation132_spill] sm:$0xff]  ;;  %v8362_v14 = vld [vmem:[#allocation133_spill] sm:$0xff] }
 0x8f5   :  { %3386 = vmatprep.subr.bf16.mxu0 %v8352_v12  ;;  %3427 = vmatprep.subr.bf16.mxu1 %v8353_v5  ;;  %v8363_v12 = vld [vmem:[#allocation134_spill] sm:$0xff]  ;;  %v8364_v5 = vld [vmem:[#allocation135_spill] sm:$0xff] }
 0x8f8   :  { %3387 = vmatpush1.bf16.msra.mxu0 %v8354_v15  ;;  %3428 = vmatpush1.bf16.msra.mxu1 %v8355_v36  ;;  %v8365_v15 = vld [vmem:[#allocation136_spill] sm:$0xff] }
 0x8f9   :  { %3388 = vmatprep.subr.bf16.mxu0 %v8356_v54  ;;  %3429 = vmatprep.subr.bf16.mxu1 %v8357_v40 }
 0x8fc   :  { %3389 = vmatpush1.bf16.msra.mxu0 %v8358_v25  ;;  %3430 = vmatpush1.bf16.msra.mxu1 %v8359_v59  ;;  %v3086_v25 = vld [vmem:[#allocation3 + $0x50] sm:$0xc] }
 0x8fd   :  { %3390 = vmatprep.subr.bf16.mxu0 %v8360_v24  ;;  %3431 = vmatprep.subr.bf16.mxu1 %v8361_v4 }
 0x900   :  { %3391 = vmatpush1.bf16.msra.mxu0 %v8362_v14  ;;  %3432 = vmatpush1.bf16.msra.mxu1 %v8363_v12 }
 0x901   :  { %3442 = vmatprep.subr.bf16.mxu0 %v8364_v5  ;;  %3483 = vmatprep.subr.bf16.mxu1 %v8365_v15 }
 0x956   :  { %v3128_v36 = vpop.f32.mrb[48].mxu0  ;;  %v3169_v54 = vpop.f32.mrb[48].mxu1 }
 0x957   :  { %v3268_v61 = vrot.slane %v3169_v54, 6  ;;  %v3130_v40 = vpop.f32.mrb[49].mxu0  ;;  %v3171_v18 = vpop.f32.mrb[49].mxu1 }
 0x958   :  { %v3269_v10 = vrot.slane %v3171_v18, 6  ;;  %v3132_v59 = vpop.f32.mrb[50].mxu0  ;;  %v3173_v56 = vpop.f32.mrb[50].mxu1 }
 0x959   :  { %v3284_v24 = vadd.f32 %v3268_v61, %v3086_v25  ;;  %v3133_v4 = vpop.f32.mrb[51].mxu0  ;;  %v3174_v3 = vpop.f32.mrb[51].mxu1  ;;  %v3331_v56 = vrot.slane %v7021_v13, 6  ;;  %v3088_v13 = vld [vmem:[#allocation3 + $0x60] sm:$0xc] }
 0x95a   :  { %v3285_v14 = vadd.f32 %v3269_v10, %v3087_v19  ;;  %v3266_v3 = vrot.slane %v3128_v36, 6  ;;  %v3267_v19 = vrot.slane %v3130_v40, 6  ;;  %v3084_v10 = vld [vmem:[#allocation3 + $0x40] sm:$0xc]  ;;  %v3090_v40 = vld [vmem:[#allocation3 + $0x70] sm:$0xc] }
 0x95b   :  { %v4546_v28 = vmul.f32 -1.442695, %v3284_v24 }
 0x95c   :  { %v4547_v12 = vmul.f32 -1.442695, %v3285_v14  ;;  %v3282_v24 = vadd.f32 %v3266_v3, %v3084_v10 }
 0x95d   :  { %4802 = vpow2.f32 %v4546_v28  ;;  %v3085_v28 = vld [vmem:[#allocation3 + $0x48] sm:$0xc] }
 0x95e   :  { %4804 = vpow2.f32 %v4547_v12  ;;  %v3283_v14 = vadd.f32 %v3267_v19, %v3085_v28  ;;  %v4544_v12 = vmul.f32 -1.442695, %v3282_v24 }
 0x967   :  { %v4803_v5 = vpop.eup %4802 }
 0x968   :  { %v3308_v15 = vadd.f32 1.0, %v4803_v5  ;;  %v4805_v63 = vpop.eup %4804  ;;  %v4545_v5 = vmul.f32 -1.442695, %v3283_v14  ;;  %v3089_v14 = vld [vmem:[#allocation3 + $0x68] sm:$0xc] }
 0x969   :  { %v3309_v54 = vadd.f32 1.0, %v4805_v63 }
 0x96a   :  { %4806 = vrcp.f32 %v3308_v15 }
 0x96b   :  { %4808 = vrcp.f32 %v3309_v54 }
 0x96c   :  { %4810 = vpow2.f32 %v4544_v12  ;;  %v3091_v12 = vld [vmem:[#allocation3 + $0x78] sm:$0xc] }
 0x96d   :  { %4812 = vpow2.f32 %v4545_v5 }
 0x974   :  { %v4807_v18 = vpop.eup %4806 }
 0x975   :  { %v3334_v59 = vmul.f32 %v4807_v18, %v3330_v55  ;;  %v4809_v61 = vpop.eup %4808 }
 0x976   :  { %v3335_v4 = vmul.f32 %v4809_v61, %v3331_v56  ;;  %v4811_v63 = vpop.eup %4810 }
 0x977   :  { %v4813_v15 = vpop.eup %4812  ;;  %v3296_v25 = vadd.f32 1.0, %v4811_v63 }
 0x978   :  { %v3297_v2 = vadd.f32 1.0, %v4813_v15 }
 0x979   :  { %4814 = vrcp.f32 %v3296_v25 }
 0x97a   :  { %4816 = vrcp.f32 %v3297_v2 }
 0x996   :  { %v3210_v54 = vpop.f32.mrb[52].mxu0  ;;  %v3251_v39 = vpop.f32.mrb[52].mxu1 }
 0x997   :  { %v3270_v55 = vrot.slane %v3210_v54, 6  ;;  %v3272_v18 = vrot.slane %v3251_v39, 6  ;;  %v3212_v56 = vpop.f32.mrb[53].mxu0  ;;  %v3253_v36 = vpop.f32.mrb[53].mxu1 }
 0x998   :  { %v3271_v61 = vrot.slane %v3212_v56, 6  ;;  %v3273_v3 = vrot.slane %v3253_v36, 6  ;;  %v3214_v10 = vpop.f32.mrb[54].mxu0  ;;  %v3255_v19 = vpop.f32.mrb[54].mxu1 }
 0x999   :  { %v3286_v24 = vadd.f32 %v3270_v55, %v3088_v13  ;;  %v3288_v28 = vadd.f32 %v3272_v18, %v3090_v40  ;;  %v3215_v5 = vpop.f32.mrb[55].mxu0  ;;  %v3256_v63 = vpop.f32.mrb[55].mxu1 }
 0x99a   :  { %v3287_v15 = vadd.f32 %v3271_v61, %v3089_v14  ;;  %v3289_v23 = vadd.f32 %v3273_v3, %v3091_v12  ;;  %v4815_v56 = vpop.eup %4814 }
 0x99b   :  { %4818 = vtanh.f32 %v3286_v24  ;;  %v4548_v54 = vmul.f32 -1.442695, %v3288_v28  ;;  %v4817_v36 = vpop.eup %4816 }
 0x99c   :  { %4820 = vtanh.f32 %v3287_v15  ;;  %v4549_v39 = vmul.f32 -1.442695, %v3289_v23 }
 0x99d   :  { %4822 = vpow2.f32 %v4548_v54 }
 0x99e   :  { %4824 = vpow2.f32 %v4549_v39 }
 0x9a5   :  { %v4819_v10 = vpop.eup %4818 }
 0x9a6   :  { %v4821_v19 = vpop.eup %4820  ;;  %v3336_v25 = vmul.f32 %v4819_v10, %v4815_v56 }
 0x9a7   :  { %v4823_v13 = vpop.eup %4822  ;;  %v3337_v55 = vmul.f32 %v4821_v19, %v4817_v36 }
 0x9a8   :  { %v4825_v18 = vpop.eup %4824  ;;  %v7173_v40 = vadd.f32 %v3336_v25, %v3334_v59  ;;  %v3322_v5 = vadd.f32 1.0, %v4823_v13 }
 0x9a9   :  { %v7175_v2 = vadd.f32 %v3337_v55, %v3335_v4  ;;  %v3323_v61 = vadd.f32 1.0, %v4825_v18  ;;  %v8370_v55 = vld [vmem:[#allocation177_spill] sm:$0xff]  ;;  %v8371_v18 = vld [vmem:[#allocation178_spill] sm:$0xff] }
 0x9aa   :  { %4826 = vtanh.f32 %v7173_v40 }
 0x9ab   :  { %4828 = vrcp.f32 %v3322_v5  ;;  %v8372_v5 = vld [vmem:[#allocation179_spill] sm:$0xff] }
 0x9ac   :  { %4830 = vtanh.f32 %v7175_v2 }
 0x9ad   :  { %4832 = vrcp.f32 %v3323_v61  ;;  %v8373_v61 = vld [vmem:[#allocation180_spill] sm:$0xff] }
 0x9b4   :  { %v4827_v23 = vpop.eup %4826 }
 0x9b5   :  { %v4829_v3 = vpop.eup %4828 }
 0x9b6   :  { %v4831_v24 = vpop.eup %4830  ;;  %v3342_v28 = vmul.f32 %v4829_v3, %v4827_v23  ;;  %v8374_v23 = vld [vmem:[#allocation181_spill] sm:$0xff]  ;;  %v8375_v3 = vld [vmem:[#allocation182_spill] sm:$0xff] }
 0x9b7   :  { %v4833_v14 = vpop.eup %4832 }
 0x9b8   :  { %v3343_v12 = vmul.f32 %v4833_v14, %v4831_v24  ;;  %v3902_v63 = vrot.slane %v3342_v28, 5  ;;  %v3940_v15 = vrot.slane %v3342_v28, 6  ;;  %v3352_v59 = vpack.c.bf16 %v3342_v28, %v3342_v28  ;;  %v8376_v24 = vld [vmem:[#allocation183_spill] sm:$0xff]  ;;  %v8377_v28 = vld [vmem:[#allocation184_spill] sm:$0xff]  ;;  %v8378_v14 = vld [vmem:[#allocation185_spill] sm:$0xff] }
 0x9ba   :  { %v3353_v54 = vpack.c.bf16 %v3343_v12, %v3343_v12  ;;  %v3903_v4 = vrot.slane %v3343_v12, 5  ;;  %v3941_v39 = vrot.slane %v3343_v12, 6  ;;  %v7180_v56 = vsel %vm3960_vm4, %v7026_v51, %v3902_v63  ;;  %v8366_v51 = vld [vmem:[#allocation173_spill] sm:$0xff]  ;;  %v8379_v12 = vld [vmem:[#allocation186_spill] sm:$0xff]  ;;  %v8380_v63 = vld [vmem:[#allocation187_spill] sm:$0xff] }
 0x9bb   :  { %v7183_v36 = vsel %vm3960_vm4, %v7031_v62, %v3940_v15  ;;  %v7191_v13 = vrot.slane %v3352_v59, 1  ;;  %v8367_v62 = vld [vmem:[#allocation174_spill] sm:$0xff]  ;;  %v8381_v15 = vld [vmem:[#allocation188_spill] sm:$0xff]  ;;  %v8382_v59 = vld [vmem:[#allocation189_spill] sm:$0xff] }
 0x9bc   :  { %v3357_v10 = vrot.slane %v3353_v54, 1  ;;  %v7186_v19 = vsel %vm3960_vm4, %v7034_v48, %v3903_v4  ;;  %v7189_v25 = vsel %vm3960_vm4, %v7037_v32, %v3941_v39  ;;  %v8368_v48 = vld [vmem:[#allocation175_spill] sm:$0xff]  ;;  %v8369_v32 = vld [vmem:[#allocation176_spill] sm:$0xff]  ;;  %v8383_v54 = vld [vmem:[#allocation190_spill] sm:$0xff] }
 0x9bd   :  { %v8384_v4 = vld [vmem:[#allocation191_spill] sm:$0xff]  ;;  %v8385_v39 = vld [vmem:[#allocation192_spill] sm:$0xff] }
 0x9be   :  { %3392 = vmatprep.mubr.bf16.mxu0 %v3357_v10  ;;  %3433 = vmatprep.mubr.bf16.mxu1 %v3357_v10 }
 0x9bf   :  { %3393 = vmatmul.mubr.bf16.vlgmr.msra.gmra.mrb[56].mxu0 %v7191_v13  ;;  %3434 = vmatmul.mubr.bf16.vlgmr.msra.gmra.mrb[56].mxu1 %v7191_v13 }
 0x9c0   :  { %3443 = vmatpush1.bf16.msra.mxu0 %v7916_v8  ;;  %3484 = vmatpush1.bf16.msra.mxu1 %v7917_v47 }
 0x9c1   :  { %3474 = vmatprep.mubr.bf16.mxu0 %v3357_v10  ;;  %3515 = vmatprep.mubr.bf16.mxu1 %v3357_v10  ;;  %v8386_v10 = vld [vmem:[#allocation193_spill] sm:$0xff] }
 0x9c2   :  { %3444 = vmatprep.subr.bf16.mxu0 %v7918_v53  ;;  %3485 = vmatprep.subr.bf16.mxu1 %v7919_v46 }
 0x9c4   :  { %3445 = vmatpush1.bf16.msra.mxu0 %v7920_v45  ;;  %3486 = vmatpush1.bf16.msra.mxu1 %v7921_v17 }
 0x9c5   :  { %3446 = vmatprep.subr.bf16.mxu0 %v7922_v31  ;;  %3487 = vmatprep.subr.bf16.mxu1 %v7923_v41 }
 0x9c8   :  { %3447 = vmatpush1.bf16.msra.mxu0 %v8002_v58  ;;  %3488 = vmatpush1.bf16.msra.mxu1 %v8003_v30 }
 0x9c9   :  { %3448 = vmatprep.subr.bf16.mxu0 %v8004_v42  ;;  %3489 = vmatprep.subr.bf16.mxu1 %v8005_v57 }
 0x9cc   :  { %3449 = vmatpush1.bf16.msra.mxu0 %v8006_v43  ;;  %3490 = vmatpush1.bf16.msra.mxu1 %v8007_v0 }
 0x9cd   :  { %3450 = vmatprep.subr.bf16.mxu0 %v8008_v33  ;;  %3491 = vmatprep.subr.bf16.mxu1 %v8009_v16 }
 0x9d0   :  { %3451 = vmatpush1.bf16.msra.mxu0 %v8092_v1  ;;  %3492 = vmatpush1.bf16.msra.mxu1 %v8093_v11 }
 0x9d1   :  { %3452 = vmatprep.subr.bf16.mxu0 %v8094_v27  ;;  %3493 = vmatprep.subr.bf16.mxu1 %v8095_v38 }
 0x9d4   :  { %3453 = vmatpush1.bf16.msra.mxu0 %v8096_v6  ;;  %3494 = vmatpush1.bf16.msra.mxu1 %v8097_v9 }
 0x9d5   :  { %3454 = vmatprep.subr.bf16.mxu0 %v8098_v20  ;;  %3495 = vmatprep.subr.bf16.mxu1 %v8099_v26 }
 0x9d8   :  { %3455 = vmatpush1.bf16.msra.mxu0 %v8100_v21  ;;  %3496 = vmatpush1.bf16.msra.mxu1 %v8101_v7 }
 0x9d9   :  { %3456 = vmatprep.subr.bf16.mxu0 %v8020_v35  ;;  %3497 = vmatprep.subr.bf16.mxu1 %v8021_v34 }
 0x9dc   :  { %3457 = vmatpush1.bf16.msra.mxu0 %v8022_v44  ;;  %3498 = vmatpush1.bf16.msra.mxu1 %v8102_v22 }
 0x9dd   :  { %3458 = vmatprep.subr.bf16.mxu0 %v8024_v60  ;;  %3499 = vmatprep.subr.bf16.mxu1 %v8025_v29 }
 0x9e0   :  { %3459 = vmatpush1.bf16.msra.mxu0 %v8026_v37  ;;  %3500 = vmatpush1.bf16.msra.mxu1 %v8027_v49 }
 0x9e1   :  { %3460 = vmatprep.subr.bf16.mxu0 %v8028_v50  ;;  %3501 = vmatprep.subr.bf16.mxu1 %v8029_v52 }
 0x9e4   :  { %3461 = vmatpush1.bf16.msra.mxu0 %v8366_v51  ;;  %3502 = vmatpush1.bf16.msra.mxu1 %v8367_v62 }
 0x9e5   :  { %3462 = vmatprep.subr.bf16.mxu0 %v8368_v48  ;;  %3503 = vmatprep.subr.bf16.mxu1 %v8369_v32  ;;  %v3596_v48 = vrot.slane %v7173_v40, 6 }
 0x9e8   :  { %3463 = vmatpush1.bf16.msra.mxu0 %v8370_v55  ;;  %3504 = vmatpush1.bf16.msra.mxu1 %v8371_v18 }
 0x9e9   :  { %3464 = vmatprep.subr.bf16.mxu0 %v8372_v5  ;;  %3505 = vmatprep.subr.bf16.mxu1 %v8373_v61  ;;  %v3347_v5 = vld [vmem:[#allocation3 + $0x58] sm:$0x30] }
 0x9ec   :  { %3465 = vmatpush1.bf16.msra.mxu0 %v8374_v23  ;;  %3506 = vmatpush1.bf16.msra.mxu1 %v8375_v3 }
 0x9ed   :  { %3466 = vmatprep.subr.bf16.mxu0 %v8376_v24  ;;  %3507 = vmatprep.subr.bf16.mxu1 %v8377_v28  ;;  %v8387_v24 = vld [vmem:[#allocation194_spill] sm:$0xff]  ;;  %v8388_v28 = vld [vmem:[#allocation195_spill] sm:$0xff] }
 0x9f0   :  { %3467 = vmatpush1.bf16.msra.mxu0 %v8378_v14  ;;  %3508 = vmatpush1.bf16.msra.mxu1 %v8379_v12  ;;  %v8389_v14 = vld [vmem:[#allocation196_spill] sm:$0xff]  ;;  %v8390_v12 = vld [vmem:[#allocation197_spill] sm:$0xff] }
 0x9f1   :  { %3468 = vmatprep.subr.bf16.mxu0 %v8380_v63  ;;  %3509 = vmatprep.subr.bf16.mxu1 %v8381_v15  ;;  %v8391_v63 = vld [vmem:[#allocation198_spill] sm:$0xff]  ;;  %v8392_v15 = vld [vmem:[#allocation71_spill] sm:$0xff] }
 0x9f4   :  { %3469 = vmatpush1.bf16.msra.mxu0 %v8382_v59  ;;  %3510 = vmatpush1.bf16.msra.mxu1 %v8383_v54  ;;  %v8393_v59 = vld [vmem:[#allocation72_spill] sm:$0xff] }
 0x9f5   :  { %3470 = vmatprep.subr.bf16.mxu0 %v8384_v4  ;;  %3511 = vmatprep.subr.bf16.mxu1 %v8385_v39  ;;  %v8394_v39 = vld [vmem:[#allocation73_spill] sm:$0xff]  ;;  %v8403_v4 = vld [vmem:[#allocation82_spill] sm:$0xff] }
 0x9f8   :  { %3471 = vmatpush1.bf16.msra.mxu0 %v8386_v10  ;;  %3512 = vmatpush1.bf16.msra.mxu1 %v8387_v24  ;;  %v8395_v10 = vld [vmem:[#allocation74_spill] sm:$0xff]  ;;  %v8396_v24 = vld [vmem:[#allocation75_spill] sm:$0xff] }
 0x9f9   :  { %3472 = vmatprep.subr.bf16.mxu0 %v8388_v28  ;;  %3513 = vmatprep.subr.bf16.mxu1 %v8389_v14  ;;  %v8397_v28 = vld [vmem:[#allocation76_spill] sm:$0xff]  ;;  %v8398_v14 = vld [vmem:[#allocation77_spill] sm:$0xff] }
 0x9fc   :  { %3473 = vmatpush1.bf16.msra.mxu0 %v8390_v12  ;;  %3514 = vmatpush1.bf16.msra.mxu1 %v8391_v63  ;;  %v8399_v12 = vld [vmem:[#allocation78_spill] sm:$0xff]  ;;  %v8400_v63 = vld [vmem:[#allocation79_spill] sm:$0xff] }
 0x9fd   :  { %3626 = vmatprep.subr.bf16.mxu0 %v8392_v15  ;;  %3667 = vmatprep.subr.bf16.mxu1 %v8393_v59  ;;  %v8401_v15 = vld [vmem:[#allocation80_spill] sm:$0xff]  ;;  %v8402_v59 = vld [vmem:[#allocation81_spill] sm:$0xff] }
 0x9ff   :  { %3475 = vmatmul.mubr.bf16.vlgmr.msra.gmra.mrb[60].mxu0 %v7191_v13  ;;  %3516 = vmatmul.mubr.bf16.vlgmr.msra.gmra.mrb[60].mxu1 %v7191_v13  ;;  %v8404_v13 = vld [vmem:[#allocation83_spill] sm:$0xff] }
 0xa00   :  { %3627 = vmatpush1.bf16.msra.mxu0 %v8394_v39  ;;  %3668 = vmatpush1.bf16.msra.mxu1 %v8395_v10  ;;  %v8405_v39 = vld [vmem:[#allocation84_spill] sm:$0xff]  ;;  %v8406_v10 = vld [vmem:[#allocation85_spill] sm:$0xff] }
 0xa01   :  { %3628 = vmatprep.subr.bf16.mxu0 %v8396_v24  ;;  %3669 = vmatprep.subr.bf16.mxu1 %v8397_v28  ;;  %v8407_v24 = vld [vmem:[#allocation86_spill] sm:$0xff]  ;;  %v8408_v28 = vld [vmem:[#allocation87_spill] sm:$0xff] }
 0xa04   :  { %3629 = vmatpush1.bf16.msra.mxu0 %v8398_v14  ;;  %3670 = vmatpush1.bf16.msra.mxu1 %v8399_v12  ;;  %v8409_v14 = vld [vmem:[#allocation88_spill] sm:$0xff]  ;;  %v8410_v12 = vld [vmem:[#allocation89_spill] sm:$0xff] }
 0xa05   :  { %3630 = vmatprep.subr.bf16.mxu0 %v8400_v63  ;;  %3671 = vmatprep.subr.bf16.mxu1 %v8401_v15  ;;  %v8411_v63 = vld [vmem:[#allocation90_spill] sm:$0xff]  ;;  %v8412_v15 = vld [vmem:[#allocation91_spill] sm:$0xff] }
 0xa08   :  { %3631 = vmatpush1.bf16.msra.mxu0 %v8402_v59  ;;  %3672 = vmatpush1.bf16.msra.mxu1 %v8403_v4  ;;  %v8413_v59 = vld [vmem:[#allocation92_spill] sm:$0xff]  ;;  %v8414_v4 = vld [vmem:[#allocation93_spill] sm:$0xff] }
 0xa09   :  { %3632 = vmatprep.subr.bf16.mxu0 %v8404_v13  ;;  %3673 = vmatprep.subr.bf16.mxu1 %v8405_v39  ;;  %v8415_v13 = vld [vmem:[#allocation94_spill] sm:$0xff]  ;;  %v8416_v39 = vld [vmem:[#allocation95_spill] sm:$0xff] }
 0xa0c   :  { %3633 = vmatpush1.bf16.msra.mxu0 %v8406_v10  ;;  %3674 = vmatpush1.bf16.msra.mxu1 %v8407_v24  ;;  %v8417_v10 = vld [vmem:[#allocation96_spill] sm:$0xff]  ;;  %v8418_v24 = vld [vmem:[#allocation97_spill] sm:$0xff] }
 0xa0d   :  { %3634 = vmatprep.subr.bf16.mxu0 %v8408_v28  ;;  %3675 = vmatprep.subr.bf16.mxu1 %v8409_v14  ;;  %v8419_v28 = vld [vmem:[#allocation98_spill] sm:$0xff]  ;;  %v8420_v14 = vld [vmem:[#allocation99_spill] sm:$0xff] }
 0xa10   :  { %3635 = vmatpush1.bf16.msra.mxu0 %v8410_v12  ;;  %3676 = vmatpush1.bf16.msra.mxu1 %v8411_v63  ;;  %v8421_v12 = vld [vmem:[#allocation100_spill] sm:$0xff]  ;;  %v8422_v63 = vld [vmem:[#allocation101_spill] sm:$0xff] }
 0xa11   :  { %3636 = vmatprep.subr.bf16.mxu0 %v8412_v15  ;;  %3677 = vmatprep.subr.bf16.mxu1 %v8413_v59  ;;  %v8423_v15 = vld [vmem:[#allocation102_spill] sm:$0xff]  ;;  %v8424_v59 = vld [vmem:[#allocation103_spill] sm:$0xff] }
 0xa14   :  { %3637 = vmatpush1.bf16.msra.mxu0 %v8414_v4  ;;  %3678 = vmatpush1.bf16.msra.mxu1 %v8415_v13  ;;  %v8425_v4 = vld [vmem:[#allocation104_spill] sm:$0xff]  ;;  %v8426_v13 = vld [vmem:[#allocation105_spill] sm:$0xff] }
 0xa15   :  { %3638 = vmatprep.subr.bf16.mxu0 %v8416_v39  ;;  %3679 = vmatprep.subr.bf16.mxu1 %v8417_v10  ;;  %v8427_v39 = vld [vmem:[#allocation106_spill] sm:$0xff]  ;;  %v8428_v10 = vld [vmem:[#allocation107_spill] sm:$0xff] }
 0xa18   :  { %3639 = vmatpush1.bf16.msra.mxu0 %v8418_v24  ;;  %3680 = vmatpush1.bf16.msra.mxu1 %v8419_v28  ;;  %v8429_v24 = vld [vmem:[#allocation108_spill] sm:$0xff]  ;;  %v8430_v28 = vld [vmem:[#allocation109_spill] sm:$0xff] }
 0xa19   :  { %3640 = vmatprep.subr.bf16.mxu0 %v8420_v14  ;;  %3681 = vmatprep.subr.bf16.mxu1 %v8421_v12  ;;  %v8431_v14 = vld [vmem:[#allocation110_spill] sm:$0xff]  ;;  %v8432_v12 = vld [vmem:[#allocation111_spill] sm:$0xff] }
 0xa1c   :  { %3641 = vmatpush1.bf16.msra.mxu0 %v8422_v63  ;;  %3682 = vmatpush1.bf16.msra.mxu1 %v8423_v15  ;;  %v8433_v63 = vld [vmem:[#allocation112_spill] sm:$0xff]  ;;  %v8434_v15 = vld [vmem:[#allocation113_spill] sm:$0xff] }
 0xa1d   :  { %3642 = vmatprep.subr.bf16.mxu0 %v8424_v59  ;;  %3683 = vmatprep.subr.bf16.mxu1 %v8425_v4  ;;  %v8435_v59 = vld [vmem:[#allocation114_spill] sm:$0xff]  ;;  %v8436_v4 = vld [vmem:[#allocation115_spill] sm:$0xff] }
 0xa20   :  { %3643 = vmatpush1.bf16.msra.mxu0 %v8426_v13  ;;  %3684 = vmatpush1.bf16.msra.mxu1 %v8427_v39  ;;  %v8437_v13 = vld [vmem:[#allocation116_spill] sm:$0xff]  ;;  %v8438_v39 = vld [vmem:[#allocation117_spill] sm:$0xff] }
 0xa21   :  { %3644 = vmatprep.subr.bf16.mxu0 %v8428_v10  ;;  %3685 = vmatprep.subr.bf16.mxu1 %v8429_v24  ;;  %v8439_v10 = vld [vmem:[#allocation118_spill] sm:$0xff]  ;;  %v8440_v24 = vld [vmem:[#allocation119_spill] sm:$0xff] }
 0xa24   :  { %3645 = vmatpush1.bf16.msra.mxu0 %v8430_v28  ;;  %3686 = vmatpush1.bf16.msra.mxu1 %v8431_v14  ;;  %v8441_v28 = vld [vmem:[#allocation120_spill] sm:$0xff]  ;;  %v8442_v14 = vld [vmem:[#allocation121_spill] sm:$0xff] }
 0xa25   :  { %3646 = vmatprep.subr.bf16.mxu0 %v8432_v12  ;;  %3687 = vmatprep.subr.bf16.mxu1 %v8433_v63  ;;  %v8443_v12 = vld [vmem:[#allocation122_spill] sm:$0xff]  ;;  %v8444_v63 = vld [vmem:[#allocation123_spill] sm:$0xff] }
 0xa28   :  { %3647 = vmatpush1.bf16.msra.mxu0 %v8434_v15  ;;  %3688 = vmatpush1.bf16.msra.mxu1 %v8435_v59  ;;  %v8445_v15 = vld [vmem:[#allocation124_spill] sm:$0xff]  ;;  %v8446_v59 = vld [vmem:[#allocation125_spill] sm:$0xff] }
 0xa29   :  { %3648 = vmatprep.subr.bf16.mxu0 %v8436_v4  ;;  %3689 = vmatprep.subr.bf16.mxu1 %v8437_v13  ;;  %v8447_v4 = vld [vmem:[#allocation126_spill] sm:$0xff]  ;;  %v8448_v13 = vld [vmem:[#allocation127_spill] sm:$0xff] }
 0xa2c   :  { %3649 = vmatpush1.bf16.msra.mxu0 %v8438_v39  ;;  %3690 = vmatpush1.bf16.msra.mxu1 %v8439_v10  ;;  %v8449_v39 = vld [vmem:[#allocation128_spill] sm:$0xff]  ;;  %v8450_v10 = vld [vmem:[#allocation129_spill] sm:$0xff] }
 0xa2d   :  { %3650 = vmatprep.subr.bf16.mxu0 %v8440_v24  ;;  %3691 = vmatprep.subr.bf16.mxu1 %v8441_v28  ;;  %v8451_v24 = vld [vmem:[#allocation130_spill] sm:$0xff]  ;;  %v8452_v28 = vld [vmem:[#allocation131_spill] sm:$0xff] }
 0xa30   :  { %3651 = vmatpush1.bf16.msra.mxu0 %v8442_v14  ;;  %3692 = vmatpush1.bf16.msra.mxu1 %v8443_v12  ;;  %v8453_v14 = vld [vmem:[#allocation132_spill] sm:$0xff]  ;;  %v8454_v12 = vld [vmem:[#allocation133_spill] sm:$0xff] }
 0xa31   :  { %3652 = vmatprep.subr.bf16.mxu0 %v8444_v63  ;;  %3693 = vmatprep.subr.bf16.mxu1 %v8445_v15  ;;  %v8455_v63 = vld [vmem:[#allocation134_spill] sm:$0xff]  ;;  %v8456_v15 = vld [vmem:[#allocation135_spill] sm:$0xff] }
 0xa34   :  { %3653 = vmatpush1.bf16.msra.mxu0 %v8446_v59  ;;  %3694 = vmatpush1.bf16.msra.mxu1 %v8447_v4  ;;  %v8457_v59 = vld [vmem:[#allocation136_spill] sm:$0xff] }
 0xa35   :  { %3654 = vmatprep.subr.bf16.mxu0 %v8448_v13  ;;  %3695 = vmatprep.subr.bf16.mxu1 %v8449_v39 }
 0xa38   :  { %3655 = vmatpush1.bf16.msra.mxu0 %v8450_v10  ;;  %3696 = vmatpush1.bf16.msra.mxu1 %v8451_v24  ;;  %v3346_v10 = vld [vmem:[#allocation3 + $0x50] sm:$0x30] }
 0xa39   :  { %3656 = vmatprep.subr.bf16.mxu0 %v8452_v28  ;;  %3697 = vmatprep.subr.bf16.mxu1 %v8453_v14 }
 0xa3c   :  { %3657 = vmatpush1.bf16.msra.mxu0 %v8454_v12  ;;  %3698 = vmatpush1.bf16.msra.mxu1 %v8455_v63 }
 0xa3d   :  { %3708 = vmatprep.subr.bf16.mxu0 %v8456_v15  ;;  %3749 = vmatprep.subr.bf16.mxu1 %v8457_v59 }
 0xa92   :  { %v3394_v4 = vpop.f32.mrb[56].mxu0  ;;  %v3435_v13 = vpop.f32.mrb[56].mxu1 }
 0xa93   :  { %v3534_v54 = vrot.slane %v3435_v13, 4  ;;  %v3396_v39 = vpop.f32.mrb[57].mxu0  ;;  %v3437_v3 = vpop.f32.mrb[57].mxu1 }
 0xa94   :  { %v3535_v23 = vrot.slane %v3437_v3, 4  ;;  %v3398_v24 = vpop.f32.mrb[58].mxu0  ;;  %v3439_v61 = vpop.f32.mrb[58].mxu1 }
 0xa95   :  { %v3550_v28 = vadd.f32 %v3534_v54, %v3346_v10  ;;  %v3399_v14 = vpop.f32.mrb[59].mxu0  ;;  %v3440_v18 = vpop.f32.mrb[59].mxu1  ;;  %v3597_v61 = vrot.slane %v7175_v2, 6  ;;  %v3348_v2 = vld [vmem:[#allocation3 + $0x60] sm:$0x30] }
 0xa96   :  { %v3551_v12 = vadd.f32 %v3535_v23, %v3347_v5  ;;  %v3532_v18 = vrot.slane %v3394_v4, 4  ;;  %v3533_v5 = vrot.slane %v3396_v39, 4  ;;  %v3344_v23 = vld [vmem:[#allocation3 + $0x40] sm:$0x30]  ;;  %v3350_v39 = vld [vmem:[#allocation3 + $0x70] sm:$0x30] }
 0xa97   :  { %v4552_v55 = vmul.f32 -1.442695, %v3550_v28 }
 0xa98   :  { %v4553_v63 = vmul.f32 -1.442695, %v3551_v12  ;;  %v3548_v28 = vadd.f32 %v3532_v18, %v3344_v23 }
 0xa99   :  { %4834 = vpow2.f32 %v4552_v55  ;;  %v3345_v55 = vld [vmem:[#allocation3 + $0x48] sm:$0x30] }
 0xa9a   :  { %4836 = vpow2.f32 %v4553_v63  ;;  %v3549_v14 = vadd.f32 %v3533_v5, %v3345_v55  ;;  %v4550_v12 = vmul.f32 -1.442695, %v3548_v28 }
 0xa9c   :  { %v4551_v63 = vmul.f32 -1.442695, %v3549_v14  ;;  %v3349_v14 = vld [vmem:[#allocation3 + $0x68] sm:$0x30] }
 0xaa3   :  { %v4835_v15 = vpop.eup %4834 }
 0xaa4   :  { %v3574_v59 = vadd.f32 1.0, %v4835_v15  ;;  %v4837_v32 = vpop.eup %4836 }
 0xaa5   :  { %v3575_v13 = vadd.f32 1.0, %v4837_v32 }
 0xaa6   :  { %4838 = vrcp.f32 %v3574_v59 }
 0xaa7   :  { %4840 = vrcp.f32 %v3575_v13 }
 0xaa8   :  { %4842 = vpow2.f32 %v4550_v12  ;;  %v3351_v12 = vld [vmem:[#allocation3 + $0x78] sm:$0x30] }
 0xaa9   :  { %4844 = vpow2.f32 %v4551_v63 }
 0xab0   :  { %v4839_v3 = vpop.eup %4838 }
 0xab1   :  { %v3600_v54 = vmul.f32 %v4839_v3, %v3596_v48  ;;  %v4841_v10 = vpop.eup %4840 }
 0xab2   :  { %v3601_v24 = vmul.f32 %v4841_v10, %v3597_v61  ;;  %v4843_v32 = vpop.eup %4842 }
 0xab3   :  { %v4845_v15 = vpop.eup %4844  ;;  %v3562_v59 = vadd.f32 1.0, %v4843_v32 }
 0xab4   :  { %v3563_v40 = vadd.f32 1.0, %v4845_v15 }
 0xab5   :  { %4846 = vrcp.f32 %v3562_v59 }
 0xab6   :  { %4848 = vrcp.f32 %v3563_v40 }
 0xad2   :  { %v3476_v13 = vpop.f32.mrb[60].mxu0  ;;  %v3517_v62 = vpop.f32.mrb[60].mxu1 }
 0xad3   :  { %v3536_v48 = vrot.slane %v3476_v13, 4  ;;  %v3538_v3 = vrot.slane %v3517_v62, 4  ;;  %v3478_v61 = vpop.f32.mrb[61].mxu0  ;;  %v3519_v4 = vpop.f32.mrb[61].mxu1 }
 0xad4   :  { %v3537_v10 = vrot.slane %v3478_v61, 4  ;;  %v3539_v18 = vrot.slane %v3519_v4, 4  ;;  %v3480_v23 = vpop.f32.mrb[62].mxu0  ;;  %v3521_v5 = vpop.f32.mrb[62].mxu1 }
 0xad5   :  { %v3552_v28 = vadd.f32 %v3536_v48, %v3348_v2  ;;  %v3554_v55 = vadd.f32 %v3538_v3, %v3350_v39  ;;  %v3481_v63 = vpop.f32.mrb[63].mxu0  ;;  %v3522_v32 = vpop.f32.mrb[63].mxu1 }
 0xad6   :  { %v3553_v15 = vadd.f32 %v3537_v10, %v3349_v14  ;;  %v3555_v51 = vadd.f32 %v3539_v18, %v3351_v12  ;;  %v4847_v61 = vpop.eup %4846 }
 0xad7   :  { %4850 = vtanh.f32 %v3552_v28  ;;  %v4554_v13 = vmul.f32 -1.442695, %v3554_v55  ;;  %v4849_v4 = vpop.eup %4848 }
 0xad8   :  { %4852 = vtanh.f32 %v3553_v15  ;;  %v4555_v62 = vmul.f32 -1.442695, %v3555_v51 }
 0xad9   :  { %4854 = vpow2.f32 %v4554_v13 }
 0xada   :  { %4856 = vpow2.f32 %v4555_v62 }
 0xae1   :  { %v4851_v23 = vpop.eup %4850 }
 0xae2   :  { %v4853_v5 = vpop.eup %4852  ;;  %v3602_v59 = vmul.f32 %v4851_v23, %v4847_v61 }
 0xae3   :  { %v4855_v2 = vpop.eup %4854  ;;  %v3603_v48 = vmul.f32 %v4853_v5, %v4849_v4 }
 0xae4   :  { %v4857_v3 = vpop.eup %4856  ;;  %v7327_v39 = vadd.f32 %v3602_v59, %v3600_v54  ;;  %v3588_v63 = vadd.f32 1.0, %v4855_v2 }
 0xae5   :  { %v7329_v40 = vadd.f32 %v3603_v48, %v3601_v24  ;;  %v3589_v10 = vadd.f32 1.0, %v4857_v3 }
 0xae6   :  { %4858 = vtanh.f32 %v7327_v39 }
 0xae7   :  { %4860 = vrcp.f32 %v3588_v63 }
 0xae8   :  { %4862 = vtanh.f32 %v7329_v40 }
 0xae9   :  { %4864 = vrcp.f32 %v3589_v10 }
 0xaf0   :  { %v4859_v51 = vpop.eup %4858 }
 0xaf1   :  { %v4861_v18 = vpop.eup %4860 }
 0xaf2   :  { %v4863_v28 = vpop.eup %4862  ;;  %v3608_v55 = vmul.f32 %v4861_v18, %v4859_v51 }
 0xaf3   :  { %v4865_v14 = vpop.eup %4864 }
 0xaf4   :  { %v3609_v12 = vmul.f32 %v4865_v14, %v4863_v28  ;;  %v3908_v32 = vrot.slane %v3608_v55, 6  ;;  %v3944_v15 = vrot.slane %v3608_v55, 7  ;;  %v3618_v54 = vpack.c.bf16 %v3608_v55, %v3608_v55 }
 0xaf5   :  { %v3862_v28 = vrot.slane %v7327_v39, 6  ;;  %v3863_v14 = vrot.slane %v7329_v40, 6  ;;  %v3614_v40 = vld [vmem:[#allocation3 + $0x60] sm:$0xc0] }
 0xaf6   :  { %v3619_v13 = vpack.c.bf16 %v3609_v12, %v3609_v12  ;;  %v3909_v24 = vrot.slane %v3609_v12, 6  ;;  %v3945_v62 = vrot.slane %v3609_v12, 7  ;;  %v7334_v61 = vsel %vm3963_vm5, %v7180_v56, %v3908_v32  ;;  %v3613_v56 = vld [vmem:[#allocation3 + $0x58] sm:$0xc0] }
 0xaf7   :  { %v7337_v4 = vsel %vm3963_vm5, %v7183_v36, %v3944_v15  ;;  %v7345_v2 = vrot.slane %v3618_v54, 2 }
 0xaf8   :  { %v3623_v23 = vrot.slane %v3619_v13, 2  ;;  %v7340_v5 = vsel %vm3963_vm5, %v7186_v19, %v3909_v24  ;;  %v7343_v59 = vsel %vm3963_vm5, %v7189_v25, %v3945_v62  ;;  %v3610_v24 = vld [vmem:[#allocation3 + $0x40] sm:$0xc0] }
 0xafa   :  { %3658 = vmatprep.mubr.bf16.mxu0 %v3623_v23  ;;  %3699 = vmatprep.mubr.bf16.mxu1 %v3623_v23 }
 0xafb   :  { %3659 = vmatmul.mubr.bf16.vlgmr.msra.gmra.mrb[64].mxu0 %v7345_v2  ;;  %3700 = vmatmul.mubr.bf16.vlgmr.msra.gmra.mrb[64].mxu1 %v7345_v2 }
 0xafc   :  { %3709 = vmatpush1.bf16.msra.mxu0 %v7916_v8  ;;  %3750 = vmatpush1.bf16.msra.mxu1 %v7917_v47  ;;  %v8458_v8 = vld [vmem:[#allocation173_spill] sm:$0xff]  ;;  %v8459_v47 = vld [vmem:[#allocation174_spill] sm:$0xff] }
 0xafd   :  { %3740 = vmatprep.mubr.bf16.mxu0 %v3623_v23  ;;  %3781 = vmatprep.mubr.bf16.mxu1 %v3623_v23  ;;  %v3611_v23 = vld [vmem:[#allocation3 + $0x48] sm:$0xc0] }
 0xafe   :  { %3710 = vmatprep.subr.bf16.mxu0 %v7918_v53  ;;  %3751 = vmatprep.subr.bf16.mxu1 %v7919_v46  ;;  %v8460_v53 = vld [vmem:[#allocation175_spill] sm:$0xff]  ;;  %v8461_v46 = vld [vmem:[#allocation176_spill] sm:$0xff] }
 0xb00   :  { %3711 = vmatpush1.bf16.msra.mxu0 %v7920_v45  ;;  %3752 = vmatpush1.bf16.msra.mxu1 %v7921_v17  ;;  %v8462_v45 = vld [vmem:[#allocation177_spill] sm:$0xff]  ;;  %v8463_v17 = vld [vmem:[#allocation178_spill] sm:$0xff] }
 0xb01   :  { %3712 = vmatprep.subr.bf16.mxu0 %v7922_v31  ;;  %3753 = vmatprep.subr.bf16.mxu1 %v7923_v41  ;;  %v8464_v31 = vld [vmem:[#allocation179_spill] sm:$0xff]  ;;  %v8465_v41 = vld [vmem:[#allocation180_spill] sm:$0xff] }
 0xb04   :  { %3713 = vmatpush1.bf16.msra.mxu0 %v8002_v58  ;;  %3754 = vmatpush1.bf16.msra.mxu1 %v8003_v30  ;;  %v8466_v58 = vld [vmem:[#allocation181_spill] sm:$0xff]  ;;  %v8467_v30 = vld [vmem:[#allocation182_spill] sm:$0xff] }
 0xb05   :  { %3714 = vmatprep.subr.bf16.mxu0 %v8004_v42  ;;  %3755 = vmatprep.subr.bf16.mxu1 %v8005_v57  ;;  %v8468_v42 = vld [vmem:[#allocation183_spill] sm:$0xff]  ;;  %v8469_v57 = vld [vmem:[#allocation184_spill] sm:$0xff] }
 0xb08   :  { %3715 = vmatpush1.bf16.msra.mxu0 %v8006_v43  ;;  %3756 = vmatpush1.bf16.msra.mxu1 %v8007_v0  ;;  %v8470_v43 = vld [vmem:[#allocation185_spill] sm:$0xff]  ;;  %v8471_v0 = vld [vmem:[#allocation186_spill] sm:$0xff] }
 0xb09   :  { %3716 = vmatprep.subr.bf16.mxu0 %v8008_v33  ;;  %3757 = vmatprep.subr.bf16.mxu1 %v8009_v16  ;;  %v8472_v33 = vld [vmem:[#allocation187_spill] sm:$0xff]  ;;  %v8473_v16 = vld [vmem:[#allocation188_spill] sm:$0xff] }
 0xb0c   :  { %3717 = vmatpush1.bf16.msra.mxu0 %v8092_v1  ;;  %3758 = vmatpush1.bf16.msra.mxu1 %v8093_v11  ;;  %v8483_v1 = vld [vmem:[#allocation198_spill] sm:$0xff] }
 0xb0d   :  { %3718 = vmatprep.subr.bf16.mxu0 %v8094_v27  ;;  %3759 = vmatprep.subr.bf16.mxu1 %v8095_v38 }
 0xb10   :  { %3719 = vmatpush1.bf16.msra.mxu0 %v8096_v6  ;;  %3760 = vmatpush1.bf16.msra.mxu1 %v8097_v9 }
 0xb11   :  { %3720 = vmatprep.subr.bf16.mxu0 %v8098_v20  ;;  %3761 = vmatprep.subr.bf16.mxu1 %v8099_v26  ;;  %v3612_v20 = vld [vmem:[#allocation3 + $0x50] sm:$0xc0] }
 0xb14   :  { %3721 = vmatpush1.bf16.msra.mxu0 %v8100_v21  ;;  %3762 = vmatpush1.bf16.msra.mxu1 %v8101_v7 }
 0xb15   :  { %3722 = vmatprep.subr.bf16.mxu0 %v8020_v35  ;;  %3763 = vmatprep.subr.bf16.mxu1 %v8021_v34  ;;  %v8474_v34 = vld [vmem:[#allocation189_spill] sm:$0xff] }
 0xb16   :  { %v8482_v35 = vld [vmem:[#allocation197_spill] sm:$0xff] }
 0xb18   :  { %3723 = vmatpush1.bf16.msra.mxu0 %v8022_v44  ;;  %3764 = vmatpush1.bf16.msra.mxu1 %v8102_v22  ;;  %v8475_v44 = vld [vmem:[#allocation190_spill] sm:$0xff] }
 0xb19   :  { %3724 = vmatprep.subr.bf16.mxu0 %v8024_v60  ;;  %3765 = vmatprep.subr.bf16.mxu1 %v8025_v29  ;;  %v8476_v60 = vld [vmem:[#allocation191_spill] sm:$0xff]  ;;  %v8477_v29 = vld [vmem:[#allocation192_spill] sm:$0xff] }
 0xb1c   :  { %3725 = vmatpush1.bf16.msra.mxu0 %v8026_v37  ;;  %3766 = vmatpush1.bf16.msra.mxu1 %v8027_v49  ;;  %v8478_v37 = vld [vmem:[#allocation193_spill] sm:$0xff]  ;;  %v8479_v49 = vld [vmem:[#allocation194_spill] sm:$0xff] }
 0xb1d   :  { %3726 = vmatprep.subr.bf16.mxu0 %v8028_v50  ;;  %3767 = vmatprep.subr.bf16.mxu1 %v8029_v52  ;;  %v8480_v50 = vld [vmem:[#allocation195_spill] sm:$0xff]  ;;  %v8481_v52 = vld [vmem:[#allocation196_spill] sm:$0xff] }
 0xb20   :  { %3727 = vmatpush1.bf16.msra.mxu0 %v8458_v8  ;;  %3768 = vmatpush1.bf16.msra.mxu1 %v8459_v47 }
 0xb21   :  { %3728 = vmatprep.subr.bf16.mxu0 %v8460_v53  ;;  %3769 = vmatprep.subr.bf16.mxu1 %v8461_v46 }
 0xb24   :  { %3729 = vmatpush1.bf16.msra.mxu0 %v8462_v45  ;;  %3770 = vmatpush1.bf16.msra.mxu1 %v8463_v17 }
 0xb25   :  { %3730 = vmatprep.subr.bf16.mxu0 %v8464_v31  ;;  %3771 = vmatprep.subr.bf16.mxu1 %v8465_v41 }
 0xb28   :  { %3731 = vmatpush1.bf16.msra.mxu0 %v8466_v58  ;;  %3772 = vmatpush1.bf16.msra.mxu1 %v8467_v30 }
 0xb29   :  { %3732 = vmatprep.subr.bf16.mxu0 %v8468_v42  ;;  %3773 = vmatprep.subr.bf16.mxu1 %v8469_v57  ;;  %v3616_v57 = vld [vmem:[#allocation3 + $0x70] sm:$0xc0] }
 0xb2c   :  { %3733 = vmatpush1.bf16.msra.mxu0 %v8470_v43  ;;  %3774 = vmatpush1.bf16.msra.mxu1 %v8471_v0 }
 0xb2d   :  { %3734 = vmatprep.subr.bf16.mxu0 %v8472_v33  ;;  %3775 = vmatprep.subr.bf16.mxu1 %v8473_v16 }
 0xb30   :  { %3735 = vmatpush1.bf16.msra.mxu0 %v8474_v34  ;;  %3776 = vmatpush1.bf16.msra.mxu1 %v8475_v44 }
 0xb31   :  { %3736 = vmatprep.subr.bf16.mxu0 %v8476_v60  ;;  %3777 = vmatprep.subr.bf16.mxu1 %v8477_v29  ;;  %v3615_v60 = vld [vmem:[#allocation3 + $0x68] sm:$0xc0]  ;;  %v3617_v29 = vld [vmem:[#allocation3 + $0x78] sm:$0xc0] }
 0xb34   :  { %3737 = vmatpush1.bf16.msra.mxu0 %v8478_v37  ;;  %3778 = vmatpush1.bf16.msra.mxu1 %v8479_v49 }
 0xb35   :  { %3738 = vmatprep.subr.bf16.mxu0 %v8480_v50  ;;  %3779 = vmatprep.subr.bf16.mxu1 %v8481_v52 }
 0xb38   :  { %3739 = vmatpush1.bf16.msra.mxu0 %v8482_v35  ;;  %3780 = vmatpush1.bf16.msra.mxu1 %v8483_v1 }
 0xb3b   :  { %3741 = vmatmul.mubr.bf16.vlgmr.msra.gmra.mrb[68].mxu0 %v7345_v2  ;;  %3782 = vmatmul.mubr.bf16.vlgmr.msra.gmra.mrb[68].mxu1 %v7345_v2 }
 0xbce   :  { %v3660_v11 = vpop.f32.mrb[64].mxu0  ;;  %v3701_v27 = vpop.f32.mrb[64].mxu1 }
 0xbcf   :  { %v3800_v38 = vrot.slane %v3701_v27, 2  ;;  %v3662_v6 = vpop.f32.mrb[65].mxu0  ;;  %v3703_v9 = vpop.f32.mrb[65].mxu1  ;;  %v3798_v54 = vrot.slane %v3660_v11, 2  ;;  %v5466_v11 = vmov 1983009808  }
 0xbd0   :  { %v3801_v26 = vrot.slane %v3703_v9, 2  ;;  %v3664_v21 = vpop.f32.mrb[66].mxu0  ;;  %v3705_v7 = vpop.f32.mrb[66].mxu1  ;;  %v3799_v13 = vrot.slane %v3662_v6, 2  ;;  %v3999_v27 = vunpack.c.l.s4 %v5466_v11 }
 0xbd1   :  { %v3816_v22 = vadd.f32 %v3800_v38, %v3612_v20  ;;  %v3665_v36 = vpop.f32.mrb[67].mxu0  ;;  %v3706_v19 = vpop.f32.mrb[67].mxu1  ;;  %v3814_v62 = vadd.f32 %v3798_v54, %v3610_v24 }
 0xbd2   :  { %v3817_v25 = vadd.f32 %v3801_v26, %v3613_v56  ;;  %v3815_v2 = vadd.f32 %v3799_v13, %v3611_v23  ;;  %v4000_v20 = vunpack.c.0.s8 %v3999_v27 }
 0xbd3   :  { %v4558_v48 = vmul.f32 -1.442695, %v3816_v22  ;;  %v4556_v8 = vmul.f32 -1.442695, %v3814_v62 }
 0xbd4   :  { %v4559_v3 = vmul.f32 -1.442695, %v3817_v25  ;;  %v4557_v47 = vmul.f32 -1.442695, %v3815_v2 }
 0xbd5   :  { %4866 = vpow2.f32 %v4558_v48 }
 0xbd6   :  { %4868 = vpow2.f32 %v4559_v3  ;;  %v8484_v3 = vld [vmem:[#allocation199_spill] sm:$0xff] }
 0xbdf   :  { %v4867_v63 = vpop.eup %4866 }
 0xbe0   :  { %v3840_v10 = vadd.f32 1.0, %v4867_v63  ;;  %v4869_v51 = vpop.eup %4868  ;;  %v4003_v63 = vsub.s32 %v4000_v20, %v8484_v3 }
 0xbe1   :  { %v3841_v18 = vadd.f32 1.0, %v4869_v51 }
 0xbe2   :  { %4870 = vrcp.f32 %v3840_v10 }
 0xbe3   :  { %4872 = vrcp.f32 %v3841_v18 }
 0xbe4   :  { %4874 = vpow2.f32 %v4556_v8 }
 0xbe5   :  { %4876 = vpow2.f32 %v4557_v47 }
 0xbec   :  { %v4871_v55 = vpop.eup %4870 }
 0xbed   :  { %v3866_v12 = vmul.f32 %v4871_v55, %v3862_v28  ;;  %v4873_v32 = vpop.eup %4872 }
 0xbee   :  { %v3867_v15 = vmul.f32 %v4873_v32, %v3863_v14  ;;  %v4875_v53 = vpop.eup %4874 }
 0xbef   :  { %v4877_v46 = vpop.eup %4876  ;;  %v3828_v45 = vadd.f32 1.0, %v4875_v53 }
 0xbf0   :  { %v3829_v39 = vadd.f32 1.0, %v4877_v46 }
 0xbf1   :  { %4878 = vrcp.f32 %v3828_v45 }
 0xbf2   :  { %4880 = vrcp.f32 %v3829_v39 }
 0xbfb   :  { %v4879_v38 = vpop.eup %4878 }
 0xbfc   :  { %v4881_v6 = vpop.eup %4880 }
 0xc0e   :  { %v3742_v17 = vpop.f32.mrb[68].mxu0  ;;  %v3783_v31 = vpop.f32.mrb[68].mxu1 }
 0xc0f   :  { %v3802_v41 = vrot.slane %v3742_v17, 2  ;;  %v3804_v58 = vrot.slane %v3783_v31, 2  ;;  %v3744_v30 = vpop.f32.mrb[69].mxu0  ;;  %v3785_v42 = vpop.f32.mrb[69].mxu1 }
 0xc10   :  { %v3803_v43 = vrot.slane %v3744_v30, 2  ;;  %v3805_v0 = vrot.slane %v3785_v42, 2  ;;  %v3746_v33 = vpop.f32.mrb[70].mxu0  ;;  %v3787_v16 = vpop.f32.mrb[70].mxu1 }
 0xc11   :  { %v3818_v34 = vadd.f32 %v3802_v41, %v3614_v40  ;;  %v3820_v44 = vadd.f32 %v3804_v58, %v3616_v57  ;;  %v3747_v37 = vpop.f32.mrb[71].mxu0  ;;  %v3788_v49 = vpop.f32.mrb[71].mxu1 }
 0xc12   :  { %v3819_v50 = vadd.f32 %v3803_v43, %v3615_v60  ;;  %v3821_v52 = vadd.f32 %v3805_v0, %v3617_v29 }
 0xc13   :  { %4882 = vtanh.f32 %v3818_v34  ;;  %v4560_v35 = vmul.f32 -1.442695, %v3820_v44 }
 0xc14   :  { %4884 = vtanh.f32 %v3819_v50  ;;  %v4561_v1 = vmul.f32 -1.442695, %v3821_v52 }
 0xc15   :  { %4886 = vpow2.f32 %v4560_v35 }
 0xc16   :  { %4888 = vpow2.f32 %v4561_v1 }
 0xc1d   :  { %v4883_v9 = vpop.eup %4882 }
 0xc1e   :  { %v4885_v26 = vpop.eup %4884  ;;  %v3868_v21 = vmul.f32 %v4883_v9, %v4879_v38 }
 0xc1f   :  { %v4887_v7 = vpop.eup %4886  ;;  %v3869_v22 = vmul.f32 %v4885_v26, %v4881_v6 }
 0xc20   :  { %v4889_v56 = vpop.eup %4888  ;;  %v3870_v36 = vadd.f32 %v3868_v21, %v3866_v12  ;;  %v3854_v19 = vadd.f32 1.0, %v4887_v7 }
 0xc21   :  { %v3871_v25 = vadd.f32 %v3869_v22, %v3867_v15  ;;  %v3855_v48 = vadd.f32 1.0, %v4889_v56 }
 0xc22   :  { %4890 = vtanh.f32 %v3870_v36 }
 0xc23   :  { %4892 = vrcp.f32 %v3854_v19  ;;  %v4010_v10 = vcombine.high %v3870_v36, %v3871_v25 }
 0xc24   :  { %4894 = vtanh.f32 %v3871_v25 }
 0xc25   :  { %4896 = vrcp.f32 %v3855_v48  ;;  %v4017_v51 = vrot.slane %v4010_v10, %v4003_v63 }
 0xc27   :  { %v4018_v18 = vcombine.high %v4017_v51, %v4017_v51 }
 0xc29   :  { %4020 = vst [vmem:[#allocation15] sm:$0xf] %v4018_v18 }
 0xc2c   :  { %v4891_v28 = vpop.eup %4890 }
 0xc2d   :  { %v4893_v55 = vpop.eup %4892 }
 0xc2e   :  { %v4895_v14 = vpop.eup %4894  ;;  %v3874_v32 = vmul.f32 %v4893_v55, %v4891_v28 }
 0xc2f   :  { %v4897_v54 = vpop.eup %4896 }
 0xc30   :  { %v3875_v12 = vmul.f32 %v4897_v54, %v4895_v14  ;;  %v3914_v13 = vrot.slane %v3874_v32, 7  ;;  %v3981_v15 = vsel %vm3966_vm6, %v7337_v4, %v3874_v32 }
 0xc32   :  { %v3915_v24 = vrot.slane %v3875_v12, 7  ;;  %v3997_v62 = vcombine.high %v3874_v32, %v3875_v12  ;;  %v3967_v23 = vsel %vm3966_vm6, %v7334_v61, %v3914_v13  ;;  %v3982_v2 = vsel %vm3966_vm6, %v7343_v59, %v3875_v12 }
 0xc33   :  { %v4613_v8 = vpack.c.bf16 %v3982_v2, %v3981_v15 }
 0xc34   :  { %v4004_v47 = vrot.slane %v3997_v62, %v4003_v63  ;;  %v3968_v53 = vsel %vm3966_vm6, %v7340_v5, %v3915_v24 }
 0xc35   :  { %v4612_v4 = vpack.c.bf16 %v3968_v53, %v3967_v23  ;;  %3996 = vst [vmem:[#allocation12 + $0x8] sm:$0xff] %v4613_v8 }
 0xc36   :  { %v4005_v46 = vcombine.high %v4004_v47, %v4004_v47 }
 0xc37   :  { %3995 = vst [vmem:[#allocation12] sm:$0xff] %v4612_v4 }
 0xc38   :  { %4007 = vst [vmem:[#allocation13] sm:$0xf] %v4005_v46 }
 0xc39   :  { %5347 = shalt.err (!%p5344_p13)
}
 0xc3a   :  { %s5348_s27 = scalar_lea.hbm %s7481_s7, 256 }
 0xc3b   :  { %p5349_p10 = scmp.ne.s32.totalorder %s7481_s7, %s5348_s27  ;;  %p5352_p12 = scmp.lt.u32.totalorder %s5348_s27, %s7481_s7 }
 0xc3d   :  { %p5354_p11 = pnand %p5352_p12, %p5349_p10 }
 0xc3f   :  { %5357 = shalt.err (!%p5354_p11)
}
 0xc40   :  { %s5470_s29 = smov 128   ;;  %s5471_s11 = smov 8  }
 0xc41   :  { %4032 = dma.vmem_to_hbm [thread:$0]  %s4027_s20, 256, %s7481_s7, [#allocation9], %s5470_s29, %s5470_s29, %s5471_s11  }
 0xc42   :  { %s5358_s25 = scalar_lea.vmem %s7424_s19, 64  ;;  %p5363_p8 = scmp.lt.s32.totalorder %s7424_s19, %s7424_s19 }
 0xc43   :  { %p5359_p0 = scmp.ne.s32.totalorder %s7424_s19, %s5358_s25  ;;  %p5364_p2 = scmp.lt.s32.totalorder %s5358_s25, %s5358_s25 }
 0xc45   :  { %p5365_p3 = por %p5364_p2, %p5363_p8 }
 0xc47   :  { %p5366_p4 = pnand %p5365_p3, %p5359_p0 }
 0xc49   :  { %5369 = shalt.err (!%p5366_p4)
}
 0xc4a   :  { %s5370_s30 = scalar_lea.hbm %s7482_s8, 64 }
 0xc4b   :  { %p5371_p5 = scmp.ne.s32.totalorder %s7482_s8, %s5370_s30  ;;  %p5374_p6 = scmp.lt.u32.totalorder %s5370_s30, %s7482_s8 }
 0xc4d   :  { %p5376_p7 = pnand %p5374_p6, %p5371_p5 }
 0xc4f   :  { %5379 = shalt.err (!%p5376_p7)
}
 0xc50   :  { %4042 = dma.vmem_to_hbm [thread:$0]  %s7424_s19, 64, %s7482_s8, [#allocation14]  }
 0xc51   :  { %s5380_s2 = scalar_lea.vmem %s7426_s3, 64  ;;  %p5385_p1 = scmp.lt.s32.totalorder %s7426_s3, %s7426_s3 }
 0xc52   :  { %p5381_p9 = scmp.ne.s32.totalorder %s7426_s3, %s5380_s2  ;;  %p5386_p13 = scmp.lt.s32.totalorder %s5380_s2, %s5380_s2 }
 0xc54   :  { %p5387_p10 = por %p5386_p13, %p5385_p1 }
 0xc56   :  { %p5388_p12 = pnand %p5387_p10, %p5381_p9 }
 0xc58   :  { %5391 = shalt.err (!%p5388_p12)
}
 0xc59   :  { %s5392_s21 = scalar_lea.hbm %s7483_s9, 64 }
 0xc5a   :  { %p5393_p11 = scmp.ne.s32.totalorder %s7483_s9, %s5392_s21  ;;  %p5396_p0 = scmp.lt.u32.totalorder %s5392_s21, %s7483_s9 }
 0xc5c   :  { %p5398_p8 = pnand %p5396_p0, %p5393_p11 }
 0xc5e   :  { %5401 = shalt.err (!%p5398_p8)
}
 0xc5f   :  { %4052 = dma.vmem_to_hbm [thread:$0]  %s7426_s3, 64, %s7483_s9, [#allocation14]  }
 0xc60   :  { %5440 = dma.done.wait [#allocation9], 256  }
 0xc61   :  { %5441 = vsyncadd [#allocation9], 4294967040 }
 0xc62   :  { %5442 = dma.done.wait [#allocation14], 128  }
 0xc63   :  { %5443 = vsyncadd [#allocation14], 4294967168 }
 0xc64   :  { %4062 = vsyncpa [#allocation8], 1 }
 0xc65   :  { %4063 = vsyncpa [#allocation11], 1 }
 0xc66   :  { %4064 = vsyncpa [#allocation9], 1 }
 0xc67   :  { %4065 = vsyncpa [#allocation14], 1 }
 0xc68   :  { %4066 = vsyncmov [#allocation4] }
 0xc6b   :  { %s4067_s27 = vpop.sfrf %4066 }
 0xc6c   :  { %p4564_p2 = scmp.ne.s32.totalorder %s4067_s27, 0 }
 0xc6e   :  { %4071 = shalt.err (%p4564_p2)  }
 0xc6f   :  { %4073 = vsyncmov [#allocation4 + $0x1] }
 0xc72   :  { %s4074_s28 = vpop.sfrf %4073 }
 0xc73   :  { %p4565_p3 = scmp.ne.s32.totalorder %s4074_s28, 0 }
 0xc75   :  { %4078 = shalt.err (%p4565_p3)  }
 0xc76   :  { %4080 = vsyncmov [#allocation4 + $0x2] }
 0xc79   :  { %s4081_s0 = vpop.sfrf %4080 }
 0xc7a   :  { %p4566_p4 = scmp.ne.s32.totalorder %s4081_s0, 0 }
 0xc7c   :  { %4085 = shalt.err (%p4566_p4)  }
 0xc7d   :  { %4087 = vsyncmov [#allocation4 + $0x3] }
 0xc80   :  { %s4088_s9 = vpop.sfrf %4087 }
 0xc81   :  { %p4567_p5 = scmp.ne.s32.totalorder %s4088_s9, 0 }
 0xc83   :  { %4092 = shalt.err (%p4567_p5)  }
 0xc84   :  { %4094 = vsyncmov [#allocation4 + $0x4] }
 0xc87   :  { %s4095_s3 = vpop.sfrf %4094 }
 0xc88   :  { %p4568_p6 = scmp.ne.s32.totalorder %s4095_s3, 0 }
 0xc8a   :  { %4099 = shalt.err (%p4568_p6)  }
 0xc8b   :  { %4101 = vsyncmov [#allocation4 + $0x5] }
 0xc8e   :  { %s4102_s16 = vpop.sfrf %4101 }
 0xc8f   :  { %p4569_p7 = scmp.ne.s32.totalorder %s4102_s16, 0 }
 0xc91   :  { %4106 = shalt.err (%p4569_p7)  }
 0xc92   :  { %4108 = vsyncmov [#allocation4 + $0x6] }
 0xc95   :  { %s4109_s26 = vpop.sfrf %4108 }
 0xc96   :  { %p4570_p9 = scmp.ne.s32.totalorder %s4109_s26, 0 }
 0xc98   :  { %4113 = shalt.err (%p4570_p9)  }
 0xc99   :  { %4115 = vsyncmov [#allocation4 + $0x7] }
 0xc9c   :  { %s4116_s29 = vpop.sfrf %4115 }
 0xc9d   :  { %p4571_p1 = scmp.ne.s32.totalorder %s4116_s29, 0 }
 0xc9f   :  { %4120 = shalt.err (%p4571_p1)  }
 0xca0   :  { %4122 = vsyncmov [#allocation4 + $0x8] }
 0xca3   :  { %s4123_s11 = vpop.sfrf %4122 }
 0xca4   :  { %p4572_p13 = scmp.ne.s32.totalorder %s4123_s11, 0 }
 0xca6   :  { %4127 = shalt.err (%p4572_p13)  }
 0xca7   :  { %4129 = vsyncmov [#allocation4 + $0x9] }
 0xcaa   :  { %s4130_s13 = vpop.sfrf %4129 }
 0xcab   :  { %p4573_p10 = scmp.ne.s32.totalorder %s4130_s13, 0 }
 0xcad   :  { %4134 = shalt.err (%p4573_p10)  }
 0xcae   :  { %4136 = vsyncmov [#allocation4 + $0xa] }
 0xcb1   :  { %s4137_s15 = vpop.sfrf %4136 }
 0xcb2   :  { %p4574_p12 = scmp.ne.s32.totalorder %s4137_s15, 0 }
 0xcb4   :  { %4141 = shalt.err (%p4574_p12)  }
 0xcb5   :  { %4143 = vsyncmov [#allocation4 + $0xb] }
 0xcb8   :  { %s4144_s25 = vpop.sfrf %4143 }
 0xcb9   :  { %p4575_p11 = scmp.ne.s32.totalorder %s4144_s25, 0 }
 0xcbb   :  { %4148 = shalt.err (%p4575_p11)  }
 0xcbc   :  { %4150 = vsyncmov [#allocation4 + $0xc] }
 0xcbf   :  { %s4151_s18 = vpop.sfrf %4150 }
 0xcc0   :  { %p4576_p0 = scmp.ne.s32.totalorder %s4151_s18, 0 }
 0xcc2   :  { %4155 = shalt.err (%p4576_p0)  }
 0xcc3   :  { %4157 = vsyncmov [#allocation4 + $0xd] }
 0xcc6   :  { %s4158_s12 = vpop.sfrf %4157 }
 0xcc7   :  { %p4577_p8 = scmp.ne.s32.totalorder %s4158_s12, 0 }
 0xcc9   :  { %4162 = shalt.err (%p4577_p8)  }
 0xcca   :  { %4164 = vsyncmov [#allocation4 + $0xe] }
 0xccd   :  { %s4165_s30 = vpop.sfrf %4164 }
 0xcce   :  { %p4578_p2 = scmp.ne.s32.totalorder %s4165_s30, 0 }
 0xcd0   :  { %4169 = shalt.err (%p4578_p2)  }
 0xcd1   :  { %4171 = vsyncmov [#allocation4 + $0xf] }
 0xcd4   :  { %s4172_s1 = vpop.sfrf %4171 }
 0xcd5   :  { %p4579_p3 = scmp.ne.s32.totalorder %s4172_s1, 0 }
 0xcd7   :  { %4176 = shalt.err (%p4579_p3)  }

</bundles_post_ra>
